<compile_context>
chip_gen: v7x
topology: tpu7x:2x2x1
jax: 0.10.0
libtpu: 0.0.40
codegen_flags: <defaults>
</compile_context>

<pallas_src>
import functools

import jax
import jax.numpy as jnp
from jax import lax
from jax.experimental import pallas as pl
from jax.experimental.pallas import tpu as pltpu

NUM_LAYERS = 4
_SELU_ALPHA = 1.6732632423543772
_SELU_SCALE = 1.0507009873554805


def _selu(v):
    return _SELU_SCALE * jnp.where(v > 0, v, _SELU_ALPHA * (jnp.exp(v) - 1.0))


# -----------------------------------------------------------------------------
# The fused kernel: all 4 SRU layers + mean-pool + LayerNorm in one invocation.
#   x_ref      : (L*B, IN)        f32   time-major rows (t*B + b)
#   wX_ref     : (n_in, 2*k*H)    f32 (layer 0) / bf16   columns pre-permuted to
#                                 [dir0: u0|u1|u2|(u3) | dir1: ...], H fastest
#   p_ref      : (4*NL, 2B, H)    f32   per layer rows [v_f, v_r, b_f, b_r],
#                                 each already stacked as [fwd x B ; bwd x B]
#   g_ref,b_ref: (1, 2H)          f32   LayerNorm affine
#   o_ref      : (B, 2H)          f32   pooled + normalized features
#   ha/hb_ref  : (L*B, 2H)        f32   VMEM ping-pong for inter-layer hiddens
# -----------------------------------------------------------------------------
def _fused_sru_kernel(x_ref, w0_ref, w1_ref, w2_ref, w3_ref, p_ref,
                      g_ref, b_ref, o_ref, ha_ref, hb_ref, *, L, B, H):
    w_refs = (w0_ref, w1_ref, w2_ref, w3_ref)
    scratches = (ha_ref, hb_ref)
    B2 = 2 * B
    pool_f = pool_b = None

    for layer in range(NUM_LAYERS):
        last = layer == NUM_LAYERS - 1
        k = 4 if layer == 0 else 3
        kH = k * H

        # ---- layer input & projection U = x @ W (one MXU call per layer) ----
        w_ref = w_refs[layer]
        if layer == 0:
            hin = x_ref[...]                                   # (L*B, IN) f32
        else:
            hin = scratches[(layer - 1) % 2][...]              # (L*B, 2H) f32
        u = jnp.dot(hin.astype(w_ref.dtype), w_ref[...],
                    preferred_element_type=jnp.float32)        # (L*B, 2*k*H) f32

        # ---- recurrence params, [fwd ; bwd] stacked along sublanes ----------
        vf = p_ref[4 * layer + 0]                              # (2B, H)
        vr = p_ref[4 * layer + 1]
        bf = p_ref[4 * layer + 2]
        br = p_ref[4 * layer + 3]

        hout_ref = scratches[layer % 2]
        c = jnp.zeros((B2, H), jnp.float32)
        if last:
            pool_f = jnp.zeros((B, H), jnp.float32)
            pool_b = jnp.zeros((B, H), jnp.float32)

        # ---- time recurrence: fully unrolled, both directions per step ------
        for t in range(L):
            tb = L - 1 - t
            uf = u[t * B:(t + 1) * B, 0:kH]                    # fwd,  time t
            ub = u[tb * B:(tb + 1) * B, kH:2 * kH]             # bwd,  time L-1-t
            us = jnp.concatenate([uf, ub], axis=0)             # (2B, k*H)
            u0 = us[:, 0:H]
            u1 = us[:, H:2 * H]
            u2 = us[:, 2 * H:3 * H]
            if k == 4:
                xp = us[:, 3 * H:4 * H]                        # highway = U3
            else:                                              # highway = input slice
                xp = jnp.concatenate(
                    [hin[t * B:(t + 1) * B, 0:H],
                     hin[tb * B:(tb + 1) * B, H:2 * H]], axis=0)

            f = jax.nn.sigmoid(u1 + c * vf + bf)
            r = jax.nn.sigmoid(u2 + c * vr + br)
            c = f * c + (1.0 - f) * u0
            h_t = r * _selu(c) + (1.0 - r) * xp                # (2B, H)

            if last:
                # fuse avg_pool1d(time) into the last layer's loop
                pool_f = pool_f + h_t[0:B]
                pool_b = pool_b + h_t[B:2 * B]
            else:
                hout_ref[t * B:(t + 1) * B, 0:H] = h_t[0:B]
                hout_ref[tb * B:(tb + 1) * B, H:2 * H] = h_t[B:2 * B]

    # ---- time-mean + LayerNorm(2H) epilogue, lane-dense (B, 2H) store -------
    feat = jnp.concatenate([pool_f, pool_b], axis=1) * (1.0 / L)   # (B, 2H)
    mu = jnp.mean(feat, axis=-1, keepdims=True)
    var = jnp.mean(jnp.square(feat - mu), axis=-1, keepdims=True)
    o_ref[...] = (feat - mu) * lax.rsqrt(var + 1e-5) * g_ref[...] + b_ref[...]


# -----------------------------------------------------------------------------
# Parameter construction (deterministic, synthetic)
# -----------------------------------------------------------------------------
def init_params(key, input_size, hidden_size):
    H = hidden_size
    out_size = 2 * H
    weights, p_layers = [], []
    n_in = input_size
    for layer in range(NUM_LAYERS):
        k = 4 if n_in != out_size else 3
        key, kw, kc = jax.random.split(key, 3)
        s = (3.0 / n_in) ** 0.5
        w_raw = jax.random.uniform(kw, (n_in, 2 * H * k), jnp.float32, -s, s)
        # pre-permute projection columns ONCE: (dir, H, k) -> (dir, k, H) so the
        # kernel's U slices [u0|u1|u2|(u3)] need no runtime transpose.
        w = (w_raw.reshape(n_in, 2, H, k)
                  .transpose(0, 1, 3, 2)
                  .reshape(n_in, 2 * k * H))
        # layer-0 weight stays f32 (K = input_size is tiny); deeper layers bf16
        w = w.astype(jnp.float32 if layer == 0 else jnp.bfloat16)
        weight_c = jax.random.uniform(kc, (4 * H,), jnp.float32, -0.1, 0.1)
        bias = jnp.zeros((4 * H,), jnp.float32)
        wc = weight_c.reshape(2, 2, H)      # [v_f, v_r] x [fwd, bwd] x H
        bb = bias.reshape(2, 2, H)          # [b_f, b_r] x [fwd, bwd] x H
        p_layers.append(jnp.stack(
            [wc[0, 0], wc[1, 0], bb[0, 0], bb[1, 0],     # forward  dir
             wc[0, 1], wc[1, 1], bb[0, 1], bb[1, 1]],    # backward dir
            axis=0))                                      # (8, H)
        weights.append(w)
        n_in = out_size
    return {
        "w": weights,
        "p": jnp.stack(p_layers, axis=0),                 # (NL, 8, H)
        "gamma": jnp.ones((1, out_size), jnp.float32),
        "beta": jnp.zeros((1, out_size), jnp.float32),
        "H": H,
    }


# -----------------------------------------------------------------------------
# Forward wrapper: single pallas_call under jit
# -----------------------------------------------------------------------------
@jax.jit
def feature_generator_sru_forward(x, w0, w1, w2, w3, p, gamma, beta):
    """x: (L, B, input_size) -> (B, 2*H), matching the PyTorch module output."""
    L, B, n_in = x.shape
    H = gamma.shape[-1] // 2
    x2d = x.reshape(L * B, n_in).astype(jnp.float32)

    # Stack per-direction recurrence params along the sublane axis once:
    # row block [0:B] = forward params, [B:2B] = backward params.
    p4 = p.reshape(NUM_LAYERS, 2, 4, H)                        # dir x [vf,vr,bf,br]
    p_stacked = jnp.broadcast_to(p4[:, :, :, None, :],
                                 (NUM_LAYERS, 2, 4, B, H))
    p_stacked = jnp.transpose(p_stacked, (0, 2, 1, 3, 4)).reshape(
        NUM_LAYERS * 4, 2 * B, H).astype(jnp.float32)

    kernel = functools.partial(_fused_sru_kernel, L=L, B=B, H=H)

    def full(shape):
        return pl.BlockSpec(shape, lambda i: (0,) * len(shape))

    return pl.pallas_call(
        kernel,
        out_shape=jax.ShapeDtypeStruct((B, 2 * H), jnp.float32),
        grid=(1,),
        in_specs=[
            full(x2d.shape), full(w0.shape), full(w1.shape), full(w2.shape),
            full(w3.shape), full(p_stacked.shape), full(gamma.shape),
            full(beta.shape),
        ],
        out_specs=full((B, 2 * H)),
        scratch_shapes=[
            pltpu.VMEM((L * B, 2 * H), jnp.float32),
            pltpu.VMEM((L * B, 2 * H), jnp.float32),
        ],
        compiler_params=pltpu.CompilerParams(
            dimension_semantics=("arbitrary",)),
    )(x2d, w0, w1, w2, w3, p_stacked, gamma, beta)


# -----------------------------------------------------------------------------
# Pure-JAX reference (same math / same params) for a numerical self-check
# -----------------------------------------------------------------------------
def _reference_forward(x, params):
    L, B, n_in = x.shape
    H = params["H"]
    hin = x.reshape(L * B, n_in).astype(jnp.float32)
    for layer in range(NUM_LAYERS):
        w = params["w"][layer]
        k = 4 if layer == 0 else 3
        kH = k * H
        u = jnp.dot(hin.astype(w.dtype), w,
                    preferred_element_type=jnp.float32).astype(jnp.float32)
        p = params["p"][layer]
        hout = jnp.zeros((L * B, 2 * H), jnp.float32)
        for d in range(2):                      # 0 = forward, 1 = backward
            vf, vr, bf, br = p[4 * d + 0], p[4 * d + 1], p[4 * d + 2], p[4 * d + 3]
            c = jnp.zeros((B, H), jnp.float32)
            times = range(L) if d == 0 else range(L - 1, -1, -1)
            for t in times:
                ut = u[t * B:(t + 1) * B, d * kH:(d + 1) * kH]
                u0, u1, u2 = ut[:, 0:H], ut[:, H:2 * H], ut[:, 2 * H:3 * H]
                xp = (ut[:, 3 * H:4 * H] if k == 4
                      else hin[t * B:(t + 1) * B, d * H:(d + 1) * H])
                f = jax.nn.sigmoid(u1 + c * vf + bf)
                r = jax.nn.sigmoid(u2 + c * vr + br)
                c = f * c + (1.0 - f) * u0
                h_t = r * _selu(c) + (1.0 - r) * xp
                hout = hout.at[t * B:(t + 1) * B, d * H:(d + 1) * H].set(h_t)
        hin = hout
    feat = jnp.mean(hin.reshape(L, B, 2 * H), axis=0)
    mu = jnp.mean(feat, axis=-1, keepdims=True)
    var = jnp.mean(jnp.square(feat - mu), axis=-1, keepdims=True)
    return (feat - mu) / jnp.sqrt(var + 1e-5) * params["gamma"] + params["beta"]


if __name__ == "__main__":
    # LayerNorm(256) forces hidden=128 (bidirectional => 2*128 features)
    L, B, INPUT_SIZE, HIDDEN = 8, 2, 16, 128

    key = jax.random.PRNGKey(0)
    key, kx, kp = jax.random.split(key, 3)
    x = jax.random.normal(kx, (L, B, INPUT_SIZE), jnp.float32)
    params = init_params(kp, INPUT_SIZE, HIDDEN)

    feats = feature_generator_sru_forward(
        x, params["w"][0], params["w"][1], params["w"][2], params["w"][3],
        params["p"], params["gamma"], params["beta"])
    feats = jax.block_until_ready(feats)

    assert feats.shape == (B, 2 * HIDDEN), feats.shape
    assert bool(jnp.all(jnp.isfinite(feats)))

    ref = _reference_forward(x, params)
    max_err = float(jnp.max(jnp.abs(feats - ref)))
    assert max_err < 5e-2, f"max abs error vs reference: {max_err}"

    print("KERNEL_OK")
</pallas_src>

<mosaic_0001>
module attributes {stable_mosaic.version = 11 : i64} {
  func.func @_fused_sru_kernel(%arg0: i32, %arg1: memref<16x16xf32, #tpu.memory_space<vmem>>, %arg2: memref<16x1024xf32, #tpu.memory_space<vmem>>, %arg3: memref<256x768xbf16, #tpu.memory_space<vmem>>, %arg4: memref<256x768xbf16, #tpu.memory_space<vmem>>, %arg5: memref<256x768xbf16, #tpu.memory_space<vmem>>, %arg6: memref<16x4x128xf32, #tpu.memory_space<vmem>>, %arg7: memref<1x256xf32, #tpu.memory_space<vmem>>, %arg8: memref<1x256xf32, #tpu.memory_space<vmem>>, %arg9: memref<2x256xf32, #tpu.memory_space<vmem>>, %arg10: memref<16x256xf32, #tpu.memory_space<vmem>>, %arg11: memref<16x256xf32, #tpu.memory_space<vmem>>) attributes {dimension_semantics = [#tpu.dimension_semantics<arbitrary>], iteration_bounds = array<i64: 1>, scalar_prefetch = 0 : i64, scratch_operands = 2 : i64, tpu.core_type = #tpu.core_type<tc>, window_params = [{pipeline_mode = #tpu.pipeline_mode<synchronous>, transform_indices = @transform_0, window_bounds = array<i64: 16, 16>}, {pipeline_mode = #tpu.pipeline_mode<synchronous>, transform_indices = @transform_1, window_bounds = array<i64: 16, 1024>}, {pipeline_mode = #tpu.pipeline_mode<synchronous>, transform_indices = @transform_2, window_bounds = array<i64: 256, 768>}, {pipeline_mode = #tpu.pipeline_mode<synchronous>, transform_indices = @transform_3, window_bounds = array<i64: 256, 768>}, {pipeline_mode = #tpu.pipeline_mode<synchronous>, transform_indices = @transform_4, window_bounds = array<i64: 256, 768>}, {pipeline_mode = #tpu.pipeline_mode<synchronous>, transform_indices = @transform_5, window_bounds = array<i64: 16, 4, 128>}, {pipeline_mode = #tpu.pipeline_mode<synchronous>, transform_indices = @transform_6, window_bounds = array<i64: 1, 256>}, {pipeline_mode = #tpu.pipeline_mode<synchronous>, transform_indices = @transform_7, window_bounds = array<i64: 1, 256>}, {pipeline_mode = #tpu.pipeline_mode<synchronous>, transform_indices = @transform_8, window_bounds = array<i64: 2, 256>}]} {
    %c0 = arith.constant 0 : index
    %c0_0 = arith.constant 0 : index
    %0 = vector.load %arg1[%c0, %c0_0] : memref<16x16xf32, #tpu.memory_space<vmem>>, vector<16x16xf32>
    %c0_1 = arith.constant 0 : index
    %c0_2 = arith.constant 0 : index
    %1 = vector.load %arg2[%c0_1, %c0_2] : memref<16x1024xf32, #tpu.memory_space<vmem>>, vector<16x1024xf32>
    %cst = arith.constant dense<0.000000e+00> : vector<16x1024xf32>
    %2 = tpu.matmul %0, %1, %cst {dimension_numbers = #tpu.dot_dimension_numbers<[1], [0], [0], [1], [0, 0, 1, 1], [], []>} : vector<16x16xf32>, vector<16x1024xf32>, vector<16x1024xf32> -> vector<16x1024xf32>
    %c0_3 = arith.constant 0 : index
    %c0_4 = arith.constant 0 : index
    %c0_5 = arith.constant 0 : index
    %3 = vector.load %arg6[%c0_3, %c0_4, %c0_5] : memref<16x4x128xf32, #tpu.memory_space<vmem>>, vector<1x4x128xf32>
    %4 = vector.shape_cast %3 : vector<1x4x128xf32> to vector<4x128xf32>
    %c1 = arith.constant 1 : index
    %c0_6 = arith.constant 0 : index
    %c0_7 = arith.constant 0 : index
    %5 = vector.load %arg6[%c1, %c0_6, %c0_7] : memref<16x4x128xf32, #tpu.memory_space<vmem>>, vector<1x4x128xf32>
    %6 = vector.shape_cast %5 : vector<1x4x128xf32> to vector<4x128xf32>
    %c2 = arith.constant 2 : index
    %c0_8 = arith.constant 0 : index
    %c0_9 = arith.constant 0 : index
    %7 = vector.load %arg6[%c2, %c0_8, %c0_9] : memref<16x4x128xf32, #tpu.memory_space<vmem>>, vector<1x4x128xf32>
    %8 = vector.shape_cast %7 : vector<1x4x128xf32> to vector<4x128xf32>
    %c3 = arith.constant 3 : index
    %c0_10 = arith.constant 0 : index
    %c0_11 = arith.constant 0 : index
    %9 = vector.load %arg6[%c3, %c0_10, %c0_11] : memref<16x4x128xf32, #tpu.memory_space<vmem>>, vector<1x4x128xf32>
    %10 = vector.shape_cast %9 : vector<1x4x128xf32> to vector<4x128xf32>
    %cst_12 = arith.constant 0.000000e+00 : f32
    %11 = vector.broadcast %cst_12 : f32 to vector<4x128xf32>
    %12 = vector.extract_strided_slice %2 {offsets = [0, 0], sizes = [2, 512], strides = [1, 1]} : vector<16x1024xf32> to vector<2x512xf32>
    %13 = vector.extract_strided_slice %2 {offsets = [14, 512], sizes = [2, 512], strides = [1, 1]} : vector<16x1024xf32> to vector<2x512xf32>
    %14 = tpu.concatenate %12, %13 in 0 : vector<2x512xf32>, vector<2x512xf32> -> vector<4x512xf32>
    %15 = vector.extract_strided_slice %14 {offsets = [0, 0], sizes = [4, 128], strides = [1, 1]} : vector<4x512xf32> to vector<4x128xf32>
    %16 = vector.extract_strided_slice %14 {offsets = [0, 128], sizes = [4, 128], strides = [1, 1]} : vector<4x512xf32> to vector<4x128xf32>
    %17 = vector.extract_strided_slice %14 {offsets = [0, 256], sizes = [4, 128], strides = [1, 1]} : vector<4x512xf32> to vector<4x128xf32>
    %18 = vector.extract_strided_slice %14 {offsets = [0, 384], sizes = [4, 128], strides = [1, 1]} : vector<4x512xf32> to vector<4x128xf32>
    %19 = arith.mulf %11, %4 : vector<4x128xf32>
    %20 = arith.addf %16, %19 : vector<4x128xf32>
    %21 = arith.addf %20, %8 : vector<4x128xf32>
    %22 = arith.negf %21 : vector<4x128xf32>
    %23 = math.exp %22 : vector<4x128xf32>
    %cst_13 = arith.constant 1.000000e+00 : f32
    %24 = vector.broadcast %cst_13 : f32 to vector<4x128xf32>
    %25 = arith.addf %24, %23 : vector<4x128xf32>
    %26 = arith.divf %24, %25 : vector<4x128xf32>
    %27 = arith.mulf %11, %6 : vector<4x128xf32>
    %28 = arith.addf %17, %27 : vector<4x128xf32>
    %29 = arith.addf %28, %10 : vector<4x128xf32>
    %30 = arith.negf %29 : vector<4x128xf32>
    %31 = math.exp %30 : vector<4x128xf32>
    %cst_14 = arith.constant 1.000000e+00 : f32
    %32 = vector.broadcast %cst_14 : f32 to vector<4x128xf32>
    %33 = arith.addf %32, %31 : vector<4x128xf32>
    %34 = arith.divf %32, %33 : vector<4x128xf32>
    %35 = arith.mulf %26, %11 : vector<4x128xf32>
    %cst_15 = arith.constant 1.000000e+00 : f32
    %36 = vector.broadcast %cst_15 : f32 to vector<4x128xf32>
    %37 = arith.subf %36, %26 : vector<4x128xf32>
    %38 = arith.mulf %37, %15 : vector<4x128xf32>
    %39 = arith.addf %35, %38 : vector<4x128xf32>
    %cst_16 = arith.constant 0.000000e+00 : f32
    %40 = vector.broadcast %cst_16 : f32 to vector<4x128xf32>
    %41 = arith.cmpf ogt, %39, %40 : vector<4x128xf32>
    %42 = math.exp %39 : vector<4x128xf32>
    %cst_17 = arith.constant 1.000000e+00 : f32
    %43 = vector.broadcast %cst_17 : f32 to vector<4x128xf32>
    %44 = arith.subf %42, %43 : vector<4x128xf32>
    %cst_18 = arith.constant 1.67326319 : f32
    %45 = vector.broadcast %cst_18 : f32 to vector<4x128xf32>
    %46 = arith.mulf %45, %44 : vector<4x128xf32>
    %47 = arith.select %41, %39, %46 : vector<4x128xi1>, vector<4x128xf32>
    %cst_19 = arith.constant 1.05070102 : f32
    %48 = vector.broadcast %cst_19 : f32 to vector<4x128xf32>
    %49 = arith.mulf %48, %47 : vector<4x128xf32>
    %50 = arith.mulf %34, %49 : vector<4x128xf32>
    %cst_20 = arith.constant 1.000000e+00 : f32
    %51 = vector.broadcast %cst_20 : f32 to vector<4x128xf32>
    %52 = arith.subf %51, %34 : vector<4x128xf32>
    %53 = arith.mulf %52, %18 : vector<4x128xf32>
    %54 = arith.addf %50, %53 : vector<4x128xf32>
    %55 = vector.extract_strided_slice %54 {offsets = [0, 0], sizes = [2, 128], strides = [1, 1]} : vector<4x128xf32> to vector<2x128xf32>
    %c0_21 = arith.constant 0 : index
    %c0_22 = arith.constant 0 : index
    %56 = vector.load %arg10[%c0_21, %c0_22] : memref<16x256xf32, #tpu.memory_space<vmem>>, vector<2x128xf32>
    tpu.vector_store %arg10[%c0_21, %c0_22], %55 {strides = array<i32>} : memref<16x256xf32, #tpu.memory_space<vmem>>, vector<2x128xf32>,
    %57 = vector.extract_strided_slice %54 {offsets = [2, 0], sizes = [2, 128], strides = [1, 1]} : vector<4x128xf32> to vector<2x128xf32>
    %c14 = arith.constant 14 : index
    %c128 = arith.constant 128 : index
    %58 = vector.load %arg10[%c14, %c128] : memref<16x256xf32, #tpu.memory_space<vmem>>, vector<2x128xf32>
    tpu.vector_store %arg10[%c14, %c128], %57 {strides = array<i32>} : memref<16x256xf32, #tpu.memory_space<vmem>>, vector<2x128xf32>,
    %59 = vector.extract_strided_slice %2 {offsets = [2, 0], sizes = [2, 512], strides = [1, 1]} : vector<16x1024xf32> to vector<2x512xf32>
    %60 = vector.extract_strided_slice %2 {offsets = [12, 512], sizes = [2, 512], strides = [1, 1]} : vector<16x1024xf32> to vector<2x512xf32>
    %61 = tpu.concatenate %59, %60 in 0 : vector<2x512xf32>, vector<2x512xf32> -> vector<4x512xf32>
    %62 = vector.extract_strided_slice %61 {offsets = [0, 0], sizes = [4, 128], strides = [1, 1]} : vector<4x512xf32> to vector<4x128xf32>
    %63 = vector.extract_strided_slice %61 {offsets = [0, 128], sizes = [4, 128], strides = [1, 1]} : vector<4x512xf32> to vector<4x128xf32>
    %64 = vector.extract_strided_slice %61 {offsets = [0, 256], sizes = [4, 128], strides = [1, 1]} : vector<4x512xf32> to vector<4x128xf32>
    %65 = vector.extract_strided_slice %61 {offsets = [0, 384], sizes = [4, 128], strides = [1, 1]} : vector<4x512xf32> to vector<4x128xf32>
    %66 = arith.mulf %39, %4 : vector<4x128xf32>
    %67 = arith.addf %63, %66 : vector<4x128xf32>
    %68 = arith.addf %67, %8 : vector<4x128xf32>
    %69 = arith.negf %68 : vector<4x128xf32>
    %70 = math.exp %69 : vector<4x128xf32>
    %cst_23 = arith.constant 1.000000e+00 : f32
    %71 = vector.broadcast %cst_23 : f32 to vector<4x128xf32>
    %72 = arith.addf %71, %70 : vector<4x128xf32>
    %73 = arith.divf %71, %72 : vector<4x128xf32>
    %74 = arith.mulf %39, %6 : vector<4x128xf32>
    %75 = arith.addf %64, %74 : vector<4x128xf32>
    %76 = arith.addf %75, %10 : vector<4x128xf32>
    %77 = arith.negf %76 : vector<4x128xf32>
    %78 = math.exp %77 : vector<4x128xf32>
    %cst_24 = arith.constant 1.000000e+00 : f32
    %79 = vector.broadcast %cst_24 : f32 to vector<4x128xf32>
    %80 = arith.addf %79, %78 : vector<4x128xf32>
    %81 = arith.divf %79, %80 : vector<4x128xf32>
    %82 = arith.mulf %73, %39 : vector<4x128xf32>
    %cst_25 = arith.constant 1.000000e+00 : f32
    %83 = vector.broadcast %cst_25 : f32 to vector<4x128xf32>
    %84 = arith.subf %83, %73 : vector<4x128xf32>
    %85 = arith.mulf %84, %62 : vector<4x128xf32>
    %86 = arith.addf %82, %85 : vector<4x128xf32>
    %cst_26 = arith.constant 0.000000e+00 : f32
    %87 = vector.broadcast %cst_26 : f32 to vector<4x128xf32>
    %88 = arith.cmpf ogt, %86, %87 : vector<4x128xf32>
    %89 = math.exp %86 : vector<4x128xf32>
    %cst_27 = arith.constant 1.000000e+00 : f32
    %90 = vector.broadcast %cst_27 : f32 to vector<4x128xf32>
    %91 = arith.subf %89, %90 : vector<4x128xf32>
    %cst_28 = arith.constant 1.67326319 : f32
    %92 = vector.broadcast %cst_28 : f32 to vector<4x128xf32>
    %93 = arith.mulf %92, %91 : vector<4x128xf32>
    %94 = arith.select %88, %86, %93 : vector<4x128xi1>, vector<4x128xf32>
    %cst_29 = arith.constant 1.05070102 : f32
    %95 = vector.broadcast %cst_29 : f32 to vector<4x128xf32>
    %96 = arith.mulf %95, %94 : vector<4x128xf32>
    %97 = arith.mulf %81, %96 : vector<4x128xf32>
    %cst_30 = arith.constant 1.000000e+00 : f32
    %98 = vector.broadcast %cst_30 : f32 to vector<4x128xf32>
    %99 = arith.subf %98, %81 : vector<4x128xf32>
    %100 = arith.mulf %99, %65 : vector<4x128xf32>
    %101 = arith.addf %97, %100 : vector<4x128xf32>
    %102 = vector.extract_strided_slice %101 {offsets = [0, 0], sizes = [2, 128], strides = [1, 1]} : vector<4x128xf32> to vector<2x128xf32>
    %c2_31 = arith.constant 2 : index
    %c0_32 = arith.constant 0 : index
    %103 = vector.load %arg10[%c2_31, %c0_32] : memref<16x256xf32, #tpu.memory_space<vmem>>, vector<2x128xf32>
    tpu.vector_store %arg10[%c2_31, %c0_32], %102 {strides = array<i32>} : memref<16x256xf32, #tpu.memory_space<vmem>>, vector<2x128xf32>,
    %104 = vector.extract_strided_slice %101 {offsets = [2, 0], sizes = [2, 128], strides = [1, 1]} : vector<4x128xf32> to vector<2x128xf32>
    %c12 = arith.constant 12 : index
    %c128_33 = arith.constant 128 : index
    %105 = vector.load %arg10[%c12, %c128_33] : memref<16x256xf32, #tpu.memory_space<vmem>>, vector<2x128xf32>
    tpu.vector_store %arg10[%c12, %c128_33], %104 {strides = array<i32>} : memref<16x256xf32, #tpu.memory_space<vmem>>, vector<2x128xf32>,
    %106 = vector.extract_strided_slice %2 {offsets = [4, 0], sizes = [2, 512], strides = [1, 1]} : vector<16x1024xf32> to vector<2x512xf32>
    %107 = vector.extract_strided_slice %2 {offsets = [10, 512], sizes = [2, 512], strides = [1, 1]} : vector<16x1024xf32> to vector<2x512xf32>
    %108 = tpu.concatenate %106, %107 in 0 : vector<2x512xf32>, vector<2x512xf32> -> vector<4x512xf32>
    %109 = vector.extract_strided_slice %108 {offsets = [0, 0], sizes = [4, 128], strides = [1, 1]} : vector<4x512xf32> to vector<4x128xf32>
    %110 = vector.extract_strided_slice %108 {offsets = [0, 128], sizes = [4, 128], strides = [1, 1]} : vector<4x512xf32> to vector<4x128xf32>
    %111 = vector.extract_strided_slice %108 {offsets = [0, 256], sizes = [4, 128], strides = [1, 1]} : vector<4x512xf32> to vector<4x128xf32>
    %112 = vector.extract_strided_slice %108 {offsets = [0, 384], sizes = [4, 128], strides = [1, 1]} : vector<4x512xf32> to vector<4x128xf32>
    %113 = arith.mulf %86, %4 : vector<4x128xf32>
    %114 = arith.addf %110, %113 : vector<4x128xf32>
    %115 = arith.addf %114, %8 : vector<4x128xf32>
    %116 = arith.negf %115 : vector<4x128xf32>
    %117 = math.exp %116 : vector<4x128xf32>
    %cst_34 = arith.constant 1.000000e+00 : f32
    %118 = vector.broadcast %cst_34 : f32 to vector<4x128xf32>
    %119 = arith.addf %118, %117 : vector<4x128xf32>
    %120 = arith.divf %118, %119 : vector<4x128xf32>
    %121 = arith.mulf %86, %6 : vector<4x128xf32>
    %122 = arith.addf %111, %121 : vector<4x128xf32>
    %123 = arith.addf %122, %10 : vector<4x128xf32>
    %124 = arith.negf %123 : vector<4x128xf32>
    %125 = math.exp %124 : vector<4x128xf32>
    %cst_35 = arith.constant 1.000000e+00 : f32
    %126 = vector.broadcast %cst_35 : f32 to vector<4x128xf32>
    %127 = arith.addf %126, %125 : vector<4x128xf32>
    %128 = arith.divf %126, %127 : vector<4x128xf32>
    %129 = arith.mulf %120, %86 : vector<4x128xf32>
    %cst_36 = arith.constant 1.000000e+00 : f32
    %130 = vector.broadcast %cst_36 : f32 to vector<4x128xf32>
    %131 = arith.subf %130, %120 : vector<4x128xf32>
    %132 = arith.mulf %131, %109 : vector<4x128xf32>
    %133 = arith.addf %129, %132 : vector<4x128xf32>
    %cst_37 = arith.constant 0.000000e+00 : f32
    %134 = vector.broadcast %cst_37 : f32 to vector<4x128xf32>
    %135 = arith.cmpf ogt, %133, %134 : vector<4x128xf32>
    %136 = math.exp %133 : vector<4x128xf32>
    %cst_38 = arith.constant 1.000000e+00 : f32
    %137 = vector.broadcast %cst_38 : f32 to vector<4x128xf32>
    %138 = arith.subf %136, %137 : vector<4x128xf32>
    %cst_39 = arith.constant 1.67326319 : f32
    %139 = vector.broadcast %cst_39 : f32 to vector<4x128xf32>
    %140 = arith.mulf %139, %138 : vector<4x128xf32>
    %141 = arith.select %135, %133, %140 : vector<4x128xi1>, vector<4x128xf32>
    %cst_40 = arith.constant 1.05070102 : f32
    %142 = vector.broadcast %cst_40 : f32 to vector<4x128xf32>
    %143 = arith.mulf %142, %141 : vector<4x128xf32>
    %144 = arith.mulf %128, %143 : vector<4x128xf32>
    %cst_41 = arith.constant 1.000000e+00 : f32
    %145 = vector.broadcast %cst_41 : f32 to vector<4x128xf32>
    %146 = arith.subf %145, %128 : vector<4x128xf32>
    %147 = arith.mulf %146, %112 : vector<4x128xf32>
    %148 = arith.addf %144, %147 : vector<4x128xf32>
    %149 = vector.extract_strided_slice %148 {offsets = [0, 0], sizes = [2, 128], strides = [1, 1]} : vector<4x128xf32> to vector<2x128xf32>
    %c4 = arith.constant 4 : index
    %c0_42 = arith.constant 0 : index
    %150 = vector.load %arg10[%c4, %c0_42] : memref<16x256xf32, #tpu.memory_space<vmem>>, vector<2x128xf32>
    tpu.vector_store %arg10[%c4, %c0_42], %149 {strides = array<i32>} : memref<16x256xf32, #tpu.memory_space<vmem>>, vector<2x128xf32>,
    %151 = vector.extract_strided_slice %148 {offsets = [2, 0], sizes = [2, 128], strides = [1, 1]} : vector<4x128xf32> to vector<2x128xf32>
    %c10 = arith.constant 10 : index
    %c128_43 = arith.constant 128 : index
    %152 = vector.load %arg10[%c10, %c128_43] : memref<16x256xf32, #tpu.memory_space<vmem>>, vector<2x128xf32>
    tpu.vector_store %arg10[%c10, %c128_43], %151 {strides = array<i32>} : memref<16x256xf32, #tpu.memory_space<vmem>>, vector<2x128xf32>,
    %153 = vector.extract_strided_slice %2 {offsets = [6, 0], sizes = [2, 512], strides = [1, 1]} : vector<16x1024xf32> to vector<2x512xf32>
    %154 = vector.extract_strided_slice %2 {offsets = [8, 512], sizes = [2, 512], strides = [1, 1]} : vector<16x1024xf32> to vector<2x512xf32>
    %155 = tpu.concatenate %153, %154 in 0 : vector<2x512xf32>, vector<2x512xf32> -> vector<4x512xf32>
    %156 = vector.extract_strided_slice %155 {offsets = [0, 0], sizes = [4, 128], strides = [1, 1]} : vector<4x512xf32> to vector<4x128xf32>
    %157 = vector.extract_strided_slice %155 {offsets = [0, 128], sizes = [4, 128], strides = [1, 1]} : vector<4x512xf32> to vector<4x128xf32>
    %158 = vector.extract_strided_slice %155 {offsets = [0, 256], sizes = [4, 128], strides = [1, 1]} : vector<4x512xf32> to vector<4x128xf32>
    %159 = vector.extract_strided_slice %155 {offsets = [0, 384], sizes = [4, 128], strides = [1, 1]} : vector<4x512xf32> to vector<4x128xf32>
    %160 = arith.mulf %133, %4 : vector<4x128xf32>
    %161 = arith.addf %157, %160 : vector<4x128xf32>
    %162 = arith.addf %161, %8 : vector<4x128xf32>
    %163 = arith.negf %162 : vector<4x128xf32>
    %164 = math.exp %163 : vector<4x128xf32>
    %cst_44 = arith.constant 1.000000e+00 : f32
    %165 = vector.broadcast %cst_44 : f32 to vector<4x128xf32>
    %166 = arith.addf %165, %164 : vector<4x128xf32>
    %167 = arith.divf %165, %166 : vector<4x128xf32>
    %168 = arith.mulf %133, %6 : vector<4x128xf32>
    %169 = arith.addf %158, %168 : vector<4x128xf32>
    %170 = arith.addf %169, %10 : vector<4x128xf32>
    %171 = arith.negf %170 : vector<4x128xf32>
    %172 = math.exp %171 : vector<4x128xf32>
    %cst_45 = arith.constant 1.000000e+00 : f32
    %173 = vector.broadcast %cst_45 : f32 to vector<4x128xf32>
    %174 = arith.addf %173, %172 : vector<4x128xf32>
    %175 = arith.divf %173, %174 : vector<4x128xf32>
    %176 = arith.mulf %167, %133 : vector<4x128xf32>
    %cst_46 = arith.constant 1.000000e+00 : f32
    %177 = vector.broadcast %cst_46 : f32 to vector<4x128xf32>
    %178 = arith.subf %177, %167 : vector<4x128xf32>
    %179 = arith.mulf %178, %156 : vector<4x128xf32>
    %180 = arith.addf %176, %179 : vector<4x128xf32>
    %cst_47 = arith.constant 0.000000e+00 : f32
    %181 = vector.broadcast %cst_47 : f32 to vector<4x128xf32>
    %182 = arith.cmpf ogt, %180, %181 : vector<4x128xf32>
    %183 = math.exp %180 : vector<4x128xf32>
    %cst_48 = arith.constant 1.000000e+00 : f32
    %184 = vector.broadcast %cst_48 : f32 to vector<4x128xf32>
    %185 = arith.subf %183, %184 : vector<4x128xf32>
    %cst_49 = arith.constant 1.67326319 : f32
    %186 = vector.broadcast %cst_49 : f32 to vector<4x128xf32>
    %187 = arith.mulf %186, %185 : vector<4x128xf32>
    %188 = arith.select %182, %180, %187 : vector<4x128xi1>, vector<4x128xf32>
    %cst_50 = arith.constant 1.05070102 : f32
    %189 = vector.broadcast %cst_50 : f32 to vector<4x128xf32>
    %190 = arith.mulf %189, %188 : vector<4x128xf32>
    %191 = arith.mulf %175, %190 : vector<4x128xf32>
    %cst_51 = arith.constant 1.000000e+00 : f32
    %192 = vector.broadcast %cst_51 : f32 to vector<4x128xf32>
    %193 = arith.subf %192, %175 : vector<4x128xf32>
    %194 = arith.mulf %193, %159 : vector<4x128xf32>
    %195 = arith.addf %191, %194 : vector<4x128xf32>
    %196 = vector.extract_strided_slice %195 {offsets = [0, 0], sizes = [2, 128], strides = [1, 1]} : vector<4x128xf32> to vector<2x128xf32>
    %c6 = arith.constant 6 : index
    %c0_52 = arith.constant 0 : index
    %197 = vector.load %arg10[%c6, %c0_52] : memref<16x256xf32, #tpu.memory_space<vmem>>, vector<2x128xf32>
    tpu.vector_store %arg10[%c6, %c0_52], %196 {strides = array<i32>} : memref<16x256xf32, #tpu.memory_space<vmem>>, vector<2x128xf32>,
    %198 = vector.extract_strided_slice %195 {offsets = [2, 0], sizes = [2, 128], strides = [1, 1]} : vector<4x128xf32> to vector<2x128xf32>
    %c8 = arith.constant 8 : index
    %c128_53 = arith.constant 128 : index
    %199 = vector.load %arg10[%c8, %c128_53] : memref<16x256xf32, #tpu.memory_space<vmem>>, vector<2x128xf32>
    tpu.vector_store %arg10[%c8, %c128_53], %198 {strides = array<i32>} : memref<16x256xf32, #tpu.memory_space<vmem>>, vector<2x128xf32>,
    %200 = vector.extract_strided_slice %2 {offsets = [8, 0], sizes = [2, 512], strides = [1, 1]} : vector<16x1024xf32> to vector<2x512xf32>
    %201 = vector.extract_strided_slice %2 {offsets = [6, 512], sizes = [2, 512], strides = [1, 1]} : vector<16x1024xf32> to vector<2x512xf32>
    %202 = tpu.concatenate %200, %201 in 0 : vector<2x512xf32>, vector<2x512xf32> -> vector<4x512xf32>
    %203 = vector.extract_strided_slice %202 {offsets = [0, 0], sizes = [4, 128], strides = [1, 1]} : vector<4x512xf32> to vector<4x128xf32>
    %204 = vector.extract_strided_slice %202 {offsets = [0, 128], sizes = [4, 128], strides = [1, 1]} : vector<4x512xf32> to vector<4x128xf32>
    %205 = vector.extract_strided_slice %202 {offsets = [0, 256], sizes = [4, 128], strides = [1, 1]} : vector<4x512xf32> to vector<4x128xf32>
    %206 = vector.extract_strided_slice %202 {offsets = [0, 384], sizes = [4, 128], strides = [1, 1]} : vector<4x512xf32> to vector<4x128xf32>
    %207 = arith.mulf %180, %4 : vector<4x128xf32>
    %208 = arith.addf %204, %207 : vector<4x128xf32>
    %209 = arith.addf %208, %8 : vector<4x128xf32>
    %210 = arith.negf %209 : vector<4x128xf32>
    %211 = math.exp %210 : vector<4x128xf32>
    %cst_54 = arith.constant 1.000000e+00 : f32
    %212 = vector.broadcast %cst_54 : f32 to vector<4x128xf32>
    %213 = arith.addf %212, %211 : vector<4x128xf32>
    %214 = arith.divf %212, %213 : vector<4x128xf32>
    %215 = arith.mulf %180, %6 : vector<4x128xf32>
    %216 = arith.addf %205, %215 : vector<4x128xf32>
    %217 = arith.addf %216, %10 : vector<4x128xf32>
    %218 = arith.negf %217 : vector<4x128xf32>
    %219 = math.exp %218 : vector<4x128xf32>
    %cst_55 = arith.constant 1.000000e+00 : f32
    %220 = vector.broadcast %cst_55 : f32 to vector<4x128xf32>
    %221 = arith.addf %220, %219 : vector<4x128xf32>
    %222 = arith.divf %220, %221 : vector<4x128xf32>
    %223 = arith.mulf %214, %180 : vector<4x128xf32>
    %cst_56 = arith.constant 1.000000e+00 : f32
    %224 = vector.broadcast %cst_56 : f32 to vector<4x128xf32>
    %225 = arith.subf %224, %214 : vector<4x128xf32>
    %226 = arith.mulf %225, %203 : vector<4x128xf32>
    %227 = arith.addf %223, %226 : vector<4x128xf32>
    %cst_57 = arith.constant 0.000000e+00 : f32
    %228 = vector.broadcast %cst_57 : f32 to vector<4x128xf32>
    %229 = arith.cmpf ogt, %227, %228 : vector<4x128xf32>
    %230 = math.exp %227 : vector<4x128xf32>
    %cst_58 = arith.constant 1.000000e+00 : f32
    %231 = vector.broadcast %cst_58 : f32 to vector<4x128xf32>
    %232 = arith.subf %230, %231 : vector<4x128xf32>
    %cst_59 = arith.constant 1.67326319 : f32
    %233 = vector.broadcast %cst_59 : f32 to vector<4x128xf32>
    %234 = arith.mulf %233, %232 : vector<4x128xf32>
    %235 = arith.select %229, %227, %234 : vector<4x128xi1>, vector<4x128xf32>
    %cst_60 = arith.constant 1.05070102 : f32
    %236 = vector.broadcast %cst_60 : f32 to vector<4x128xf32>
    %237 = arith.mulf %236, %235 : vector<4x128xf32>
    %238 = arith.mulf %222, %237 : vector<4x128xf32>
    %cst_61 = arith.constant 1.000000e+00 : f32
    %239 = vector.broadcast %cst_61 : f32 to vector<4x128xf32>
    %240 = arith.subf %239, %222 : vector<4x128xf32>
    %241 = arith.mulf %240, %206 : vector<4x128xf32>
    %242 = arith.addf %238, %241 : vector<4x128xf32>
    %243 = vector.extract_strided_slice %242 {offsets = [0, 0], sizes = [2, 128], strides = [1, 1]} : vector<4x128xf32> to vector<2x128xf32>
    %c8_62 = arith.constant 8 : index
    %c0_63 = arith.constant 0 : index
    %244 = vector.load %arg10[%c8_62, %c0_63] : memref<16x256xf32, #tpu.memory_space<vmem>>, vector<2x128xf32>
    tpu.vector_store %arg10[%c8_62, %c0_63], %243 {strides = array<i32>} : memref<16x256xf32, #tpu.memory_space<vmem>>, vector<2x128xf32>,
    %245 = vector.extract_strided_slice %242 {offsets = [2, 0], sizes = [2, 128], strides = [1, 1]} : vector<4x128xf32> to vector<2x128xf32>
    %c6_64 = arith.constant 6 : index
    %c128_65 = arith.constant 128 : index
    %246 = vector.load %arg10[%c6_64, %c128_65] : memref<16x256xf32, #tpu.memory_space<vmem>>, vector<2x128xf32>
    tpu.vector_store %arg10[%c6_64, %c128_65], %245 {strides = array<i32>} : memref<16x256xf32, #tpu.memory_space<vmem>>, vector<2x128xf32>,
    %247 = vector.extract_strided_slice %2 {offsets = [10, 0], sizes = [2, 512], strides = [1, 1]} : vector<16x1024xf32> to vector<2x512xf32>
    %248 = vector.extract_strided_slice %2 {offsets = [4, 512], sizes = [2, 512], strides = [1, 1]} : vector<16x1024xf32> to vector<2x512xf32>
    %249 = tpu.concatenate %247, %248 in 0 : vector<2x512xf32>, vector<2x512xf32> -> vector<4x512xf32>
    %250 = vector.extract_strided_slice %249 {offsets = [0, 0], sizes = [4, 128], strides = [1, 1]} : vector<4x512xf32> to vector<4x128xf32>
    %251 = vector.extract_strided_slice %249 {offsets = [0, 128], sizes = [4, 128], strides = [1, 1]} : vector<4x512xf32> to vector<4x128xf32>
    %252 = vector.extract_strided_slice %249 {offsets = [0, 256], sizes = [4, 128], strides = [1, 1]} : vector<4x512xf32> to vector<4x128xf32>
    %253 = vector.extract_strided_slice %249 {offsets = [0, 384], sizes = [4, 128], strides = [1, 1]} : vector<4x512xf32> to vector<4x128xf32>
    %254 = arith.mulf %227, %4 : vector<4x128xf32>
    %255 = arith.addf %251, %254 : vector<4x128xf32>
    %256 = arith.addf %255, %8 : vector<4x128xf32>
    %257 = arith.negf %256 : vector<4x128xf32>
    %258 = math.exp %257 : vector<4x128xf32>
    %cst_66 = arith.constant 1.000000e+00 : f32
    %259 = vector.broadcast %cst_66 : f32 to vector<4x128xf32>
    %260 = arith.addf %259, %258 : vector<4x128xf32>
    %261 = arith.divf %259, %260 : vector<4x128xf32>
    %262 = arith.mulf %227, %6 : vector<4x128xf32>
    %263 = arith.addf %252, %262 : vector<4x128xf32>
    %264 = arith.addf %263, %10 : vector<4x128xf32>
    %265 = arith.negf %264 : vector<4x128xf32>
    %266 = math.exp %265 : vector<4x128xf32>
    %cst_67 = arith.constant 1.000000e+00 : f32
    %267 = vector.broadcast %cst_67 : f32 to vector<4x128xf32>
    %268 = arith.addf %267, %266 : vector<4x128xf32>
    %269 = arith.divf %267, %268 : vector<4x128xf32>
    %270 = arith.mulf %261, %227 : vector<4x128xf32>
    %cst_68 = arith.constant 1.000000e+00 : f32
    %271 = vector.broadcast %cst_68 : f32 to vector<4x128xf32>
    %272 = arith.subf %271, %261 : vector<4x128xf32>
    %273 = arith.mulf %272, %250 : vector<4x128xf32>
    %274 = arith.addf %270, %273 : vector<4x128xf32>
    %cst_69 = arith.constant 0.000000e+00 : f32
    %275 = vector.broadcast %cst_69 : f32 to vector<4x128xf32>
    %276 = arith.cmpf ogt, %274, %275 : vector<4x128xf32>
    %277 = math.exp %274 : vector<4x128xf32>
    %cst_70 = arith.constant 1.000000e+00 : f32
    %278 = vector.broadcast %cst_70 : f32 to vector<4x128xf32>
    %279 = arith.subf %277, %278 : vector<4x128xf32>
    %cst_71 = arith.constant 1.67326319 : f32
    %280 = vector.broadcast %cst_71 : f32 to vector<4x128xf32>
    %281 = arith.mulf %280, %279 : vector<4x128xf32>
    %282 = arith.select %276, %274, %281 : vector<4x128xi1>, vector<4x128xf32>
    %cst_72 = arith.constant 1.05070102 : f32
    %283 = vector.broadcast %cst_72 : f32 to vector<4x128xf32>
    %284 = arith.mulf %283, %282 : vector<4x128xf32>
    %285 = arith.mulf %269, %284 : vector<4x128xf32>
    %cst_73 = arith.constant 1.000000e+00 : f32
    %286 = vector.broadcast %cst_73 : f32 to vector<4x128xf32>
    %287 = arith.subf %286, %269 : vector<4x128xf32>
    %288 = arith.mulf %287, %253 : vector<4x128xf32>
    %289 = arith.addf %285, %288 : vector<4x128xf32>
    %290 = vector.extract_strided_slice %289 {offsets = [0, 0], sizes = [2, 128], strides = [1, 1]} : vector<4x128xf32> to vector<2x128xf32>
    %c10_74 = arith.constant 10 : index
    %c0_75 = arith.constant 0 : index
    %291 = vector.load %arg10[%c10_74, %c0_75] : memref<16x256xf32, #tpu.memory_space<vmem>>, vector<2x128xf32>
    tpu.vector_store %arg10[%c10_74, %c0_75], %290 {strides = array<i32>} : memref<16x256xf32, #tpu.memory_space<vmem>>, vector<2x128xf32>,
    %292 = vector.extract_strided_slice %289 {offsets = [2, 0], sizes = [2, 128], strides = [1, 1]} : vector<4x128xf32> to vector<2x128xf32>
    %c4_76 = arith.constant 4 : index
    %c128_77 = arith.constant 128 : index
    %293 = vector.load %arg10[%c4_76, %c128_77] : memref<16x256xf32, #tpu.memory_space<vmem>>, vector<2x128xf32>
    tpu.vector_store %arg10[%c4_76, %c128_77], %292 {strides = array<i32>} : memref<16x256xf32, #tpu.memory_space<vmem>>, vector<2x128xf32>,
    %294 = vector.extract_strided_slice %2 {offsets = [12, 0], sizes = [2, 512], strides = [1, 1]} : vector<16x1024xf32> to vector<2x512xf32>
    %295 = vector.extract_strided_slice %2 {offsets = [2, 512], sizes = [2, 512], strides = [1, 1]} : vector<16x1024xf32> to vector<2x512xf32>
    %296 = tpu.concatenate %294, %295 in 0 : vector<2x512xf32>, vector<2x512xf32> -> vector<4x512xf32>
    %297 = vector.extract_strided_slice %296 {offsets = [0, 0], sizes = [4, 128], strides = [1, 1]} : vector<4x512xf32> to vector<4x128xf32>
    %298 = vector.extract_strided_slice %296 {offsets = [0, 128], sizes = [4, 128], strides = [1, 1]} : vector<4x512xf32> to vector<4x128xf32>
    %299 = vector.extract_strided_slice %296 {offsets = [0, 256], sizes = [4, 128], strides = [1, 1]} : vector<4x512xf32> to vector<4x128xf32>
    %300 = vector.extract_strided_slice %296 {offsets = [0, 384], sizes = [4, 128], strides = [1, 1]} : vector<4x512xf32> to vector<4x128xf32>
    %301 = arith.mulf %274, %4 : vector<4x128xf32>
    %302 = arith.addf %298, %301 : vector<4x128xf32>
    %303 = arith.addf %302, %8 : vector<4x128xf32>
    %304 = arith.negf %303 : vector<4x128xf32>
    %305 = math.exp %304 : vector<4x128xf32>
    %cst_78 = arith.constant 1.000000e+00 : f32
    %306 = vector.broadcast %cst_78 : f32 to vector<4x128xf32>
    %307 = arith.addf %306, %305 : vector<4x128xf32>
    %308 = arith.divf %306, %307 : vector<4x128xf32>
    %309 = arith.mulf %274, %6 : vector<4x128xf32>
    %310 = arith.addf %299, %309 : vector<4x128xf32>
    %311 = arith.addf %310, %10 : vector<4x128xf32>
    %312 = arith.negf %311 : vector<4x128xf32>
    %313 = math.exp %312 : vector<4x128xf32>
    %cst_79 = arith.constant 1.000000e+00 : f32
    %314 = vector.broadcast %cst_79 : f32 to vector<4x128xf32>
    %315 = arith.addf %314, %313 : vector<4x128xf32>
    %316 = arith.divf %314, %315 : vector<4x128xf32>
    %317 = arith.mulf %308, %274 : vector<4x128xf32>
    %cst_80 = arith.constant 1.000000e+00 : f32
    %318 = vector.broadcast %cst_80 : f32 to vector<4x128xf32>
    %319 = arith.subf %318, %308 : vector<4x128xf32>
    %320 = arith.mulf %319, %297 : vector<4x128xf32>
    %321 = arith.addf %317, %320 : vector<4x128xf32>
    %cst_81 = arith.constant 0.000000e+00 : f32
    %322 = vector.broadcast %cst_81 : f32 to vector<4x128xf32>
    %323 = arith.cmpf ogt, %321, %322 : vector<4x128xf32>
    %324 = math.exp %321 : vector<4x128xf32>
    %cst_82 = arith.constant 1.000000e+00 : f32
    %325 = vector.broadcast %cst_82 : f32 to vector<4x128xf32>
    %326 = arith.subf %324, %325 : vector<4x128xf32>
    %cst_83 = arith.constant 1.67326319 : f32
    %327 = vector.broadcast %cst_83 : f32 to vector<4x128xf32>
    %328 = arith.mulf %327, %326 : vector<4x128xf32>
    %329 = arith.select %323, %321, %328 : vector<4x128xi1>, vector<4x128xf32>
    %cst_84 = arith.constant 1.05070102 : f32
    %330 = vector.broadcast %cst_84 : f32 to vector<4x128xf32>
    %331 = arith.mulf %330, %329 : vector<4x128xf32>
    %332 = arith.mulf %316, %331 : vector<4x128xf32>
    %cst_85 = arith.constant 1.000000e+00 : f32
    %333 = vector.broadcast %cst_85 : f32 to vector<4x128xf32>
    %334 = arith.subf %333, %316 : vector<4x128xf32>
    %335 = arith.mulf %334, %300 : vector<4x128xf32>
    %336 = arith.addf %332, %335 : vector<4x128xf32>
    %337 = vector.extract_strided_slice %336 {offsets = [0, 0], sizes = [2, 128], strides = [1, 1]} : vector<4x128xf32> to vector<2x128xf32>
    %c12_86 = arith.constant 12 : index
    %c0_87 = arith.constant 0 : index
    %338 = vector.load %arg10[%c12_86, %c0_87] : memref<16x256xf32, #tpu.memory_space<vmem>>, vector<2x128xf32>
    tpu.vector_store %arg10[%c12_86, %c0_87], %337 {strides = array<i32>} : memref<16x256xf32, #tpu.memory_space<vmem>>, vector<2x128xf32>,
    %339 = vector.extract_strided_slice %336 {offsets = [2, 0], sizes = [2, 128], strides = [1, 1]} : vector<4x128xf32> to vector<2x128xf32>
    %c2_88 = arith.constant 2 : index
    %c128_89 = arith.constant 128 : index
    %340 = vector.load %arg10[%c2_88, %c128_89] : memref<16x256xf32, #tpu.memory_space<vmem>>, vector<2x128xf32>
    tpu.vector_store %arg10[%c2_88, %c128_89], %339 {strides = array<i32>} : memref<16x256xf32, #tpu.memory_space<vmem>>, vector<2x128xf32>,
    %341 = vector.extract_strided_slice %2 {offsets = [14, 0], sizes = [2, 512], strides = [1, 1]} : vector<16x1024xf32> to vector<2x512xf32>
    %342 = vector.extract_strided_slice %2 {offsets = [0, 512], sizes = [2, 512], strides = [1, 1]} : vector<16x1024xf32> to vector<2x512xf32>
    %343 = tpu.concatenate %341, %342 in 0 : vector<2x512xf32>, vector<2x512xf32> -> vector<4x512xf32>
    %344 = vector.extract_strided_slice %343 {offsets = [0, 0], sizes = [4, 128], strides = [1, 1]} : vector<4x512xf32> to vector<4x128xf32>
    %345 = vector.extract_strided_slice %343 {offsets = [0, 128], sizes = [4, 128], strides = [1, 1]} : vector<4x512xf32> to vector<4x128xf32>
    %346 = vector.extract_strided_slice %343 {offsets = [0, 256], sizes = [4, 128], strides = [1, 1]} : vector<4x512xf32> to vector<4x128xf32>
    %347 = vector.extract_strided_slice %343 {offsets = [0, 384], sizes = [4, 128], strides = [1, 1]} : vector<4x512xf32> to vector<4x128xf32>
    %348 = arith.mulf %321, %4 : vector<4x128xf32>
    %349 = arith.addf %345, %348 : vector<4x128xf32>
    %350 = arith.addf %349, %8 : vector<4x128xf32>
    %351 = arith.negf %350 : vector<4x128xf32>
    %352 = math.exp %351 : vector<4x128xf32>
    %cst_90 = arith.constant 1.000000e+00 : f32
    %353 = vector.broadcast %cst_90 : f32 to vector<4x128xf32>
    %354 = arith.addf %353, %352 : vector<4x128xf32>
    %355 = arith.divf %353, %354 : vector<4x128xf32>
    %356 = arith.mulf %321, %6 : vector<4x128xf32>
    %357 = arith.addf %346, %356 : vector<4x128xf32>
    %358 = arith.addf %357, %10 : vector<4x128xf32>
    %359 = arith.negf %358 : vector<4x128xf32>
    %360 = math.exp %359 : vector<4x128xf32>
    %cst_91 = arith.constant 1.000000e+00 : f32
    %361 = vector.broadcast %cst_91 : f32 to vector<4x128xf32>
    %362 = arith.addf %361, %360 : vector<4x128xf32>
    %363 = arith.divf %361, %362 : vector<4x128xf32>
    %364 = arith.mulf %355, %321 : vector<4x128xf32>
    %cst_92 = arith.constant 1.000000e+00 : f32
    %365 = vector.broadcast %cst_92 : f32 to vector<4x128xf32>
    %366 = arith.subf %365, %355 : vector<4x128xf32>
    %367 = arith.mulf %366, %344 : vector<4x128xf32>
    %368 = arith.addf %364, %367 : vector<4x128xf32>
    %cst_93 = arith.constant 0.000000e+00 : f32
    %369 = vector.broadcast %cst_93 : f32 to vector<4x128xf32>
    %370 = arith.cmpf ogt, %368, %369 : vector<4x128xf32>
    %371 = math.exp %368 : vector<4x128xf32>
    %cst_94 = arith.constant 1.000000e+00 : f32
    %372 = vector.broadcast %cst_94 : f32 to vector<4x128xf32>
    %373 = arith.subf %371, %372 : vector<4x128xf32>
    %cst_95 = arith.constant 1.67326319 : f32
    %374 = vector.broadcast %cst_95 : f32 to vector<4x128xf32>
    %375 = arith.mulf %374, %373 : vector<4x128xf32>
    %376 = arith.select %370, %368, %375 : vector<4x128xi1>, vector<4x128xf32>
    %cst_96 = arith.constant 1.05070102 : f32
    %377 = vector.broadcast %cst_96 : f32 to vector<4x128xf32>
    %378 = arith.mulf %377, %376 : vector<4x128xf32>
    %379 = arith.mulf %363, %378 : vector<4x128xf32>
    %cst_97 = arith.constant 1.000000e+00 : f32
    %380 = vector.broadcast %cst_97 : f32 to vector<4x128xf32>
    %381 = arith.subf %380, %363 : vector<4x128xf32>
    %382 = arith.mulf %381, %347 : vector<4x128xf32>
    %383 = arith.addf %379, %382 : vector<4x128xf32>
    %384 = vector.extract_strided_slice %383 {offsets = [0, 0], sizes = [2, 128], strides = [1, 1]} : vector<4x128xf32> to vector<2x128xf32>
    %c14_98 = arith.constant 14 : index
    %c0_99 = arith.constant 0 : index
    %385 = vector.load %arg10[%c14_98, %c0_99] : memref<16x256xf32, #tpu.memory_space<vmem>>, vector<2x128xf32>
    tpu.vector_store %arg10[%c14_98, %c0_99], %384 {strides = array<i32>} : memref<16x256xf32, #tpu.memory_space<vmem>>, vector<2x128xf32>,
    %386 = vector.extract_strided_slice %383 {offsets = [2, 0], sizes = [2, 128], strides = [1, 1]} : vector<4x128xf32> to vector<2x128xf32>
    %c0_100 = arith.constant 0 : index
    %c128_101 = arith.constant 128 : index
    %387 = vector.load %arg10[%c0_100, %c128_101] : memref<16x256xf32, #tpu.memory_space<vmem>>, vector<2x128xf32>
    tpu.vector_store %arg10[%c0_100, %c128_101], %386 {strides = array<i32>} : memref<16x256xf32, #tpu.memory_space<vmem>>, vector<2x128xf32>,
    %c0_102 = arith.constant 0 : index
    %c0_103 = arith.constant 0 : index
    %388 = vector.load %arg10[%c0_102, %c0_103] : memref<16x256xf32, #tpu.memory_space<vmem>>, vector<16x256xf32>
    %389 = arith.truncf %388 : vector<16x256xf32> to vector<16x256xbf16>
    %c0_104 = arith.constant 0 : index
    %c0_105 = arith.constant 0 : index
    %390 = vector.load %arg3[%c0_104, %c0_105] : memref<256x768xbf16, #tpu.memory_space<vmem>>, vector<256x768xbf16>
    %cst_106 = arith.constant dense<0.000000e+00> : vector<16x768xf32>
    %391 = tpu.matmul %389, %390, %cst_106 {dimension_numbers = #tpu.dot_dimension_numbers<[1], [0], [0], [1], [0, 0, 1, 1], [], []>} : vector<16x256xbf16>, vector<256x768xbf16>, vector<16x768xf32> -> vector<16x768xf32>
    %c4_107 = arith.constant 4 : index
    %c0_108 = arith.constant 0 : index
    %c0_109 = arith.constant 0 : index
    %392 = vector.load %arg6[%c4_107, %c0_108, %c0_109] : memref<16x4x128xf32, #tpu.memory_space<vmem>>, vector<1x4x128xf32>
    %393 = vector.shape_cast %392 : vector<1x4x128xf32> to vector<4x128xf32>
    %c5 = arith.constant 5 : index
    %c0_110 = arith.constant 0 : index
    %c0_111 = arith.constant 0 : index
    %394 = vector.load %arg6[%c5, %c0_110, %c0_111] : memref<16x4x128xf32, #tpu.memory_space<vmem>>, vector<1x4x128xf32>
    %395 = vector.shape_cast %394 : vector<1x4x128xf32> to vector<4x128xf32>
    %c6_112 = arith.constant 6 : index
    %c0_113 = arith.constant 0 : index
    %c0_114 = arith.constant 0 : index
    %396 = vector.load %arg6[%c6_112, %c0_113, %c0_114] : memref<16x4x128xf32, #tpu.memory_space<vmem>>, vector<1x4x128xf32>
    %397 = vector.shape_cast %396 : vector<1x4x128xf32> to vector<4x128xf32>
    %c7 = arith.constant 7 : index
    %c0_115 = arith.constant 0 : index
    %c0_116 = arith.constant 0 : index
    %398 = vector.load %arg6[%c7, %c0_115, %c0_116] : memref<16x4x128xf32, #tpu.memory_space<vmem>>, vector<1x4x128xf32>
    %399 = vector.shape_cast %398 : vector<1x4x128xf32> to vector<4x128xf32>
    %cst_117 = arith.constant 0.000000e+00 : f32
    %400 = vector.broadcast %cst_117 : f32 to vector<4x128xf32>
    %401 = vector.extract_strided_slice %391 {offsets = [0, 0], sizes = [2, 384], strides = [1, 1]} : vector<16x768xf32> to vector<2x384xf32>
    %402 = vector.extract_strided_slice %391 {offsets = [14, 384], sizes = [2, 384], strides = [1, 1]} : vector<16x768xf32> to vector<2x384xf32>
    %403 = tpu.concatenate %401, %402 in 0 : vector<2x384xf32>, vector<2x384xf32> -> vector<4x384xf32>
    %404 = vector.extract_strided_slice %403 {offsets = [0, 0], sizes = [4, 128], strides = [1, 1]} : vector<4x384xf32> to vector<4x128xf32>
    %405 = vector.extract_strided_slice %403 {offsets = [0, 128], sizes = [4, 128], strides = [1, 1]} : vector<4x384xf32> to vector<4x128xf32>
    %406 = vector.extract_strided_slice %403 {offsets = [0, 256], sizes = [4, 128], strides = [1, 1]} : vector<4x384xf32> to vector<4x128xf32>
    %407 = vector.extract_strided_slice %388 {offsets = [0, 0], sizes = [2, 128], strides = [1, 1]} : vector<16x256xf32> to vector<2x128xf32>
    %408 = vector.extract_strided_slice %388 {offsets = [14, 128], sizes = [2, 128], strides = [1, 1]} : vector<16x256xf32> to vector<2x128xf32>
    %409 = tpu.concatenate %407, %408 in 0 : vector<2x128xf32>, vector<2x128xf32> -> vector<4x128xf32>
    %410 = arith.mulf %400, %393 : vector<4x128xf32>
    %411 = arith.addf %405, %410 : vector<4x128xf32>
    %412 = arith.addf %411, %397 : vector<4x128xf32>
    %413 = arith.negf %412 : vector<4x128xf32>
    %414 = math.exp %413 : vector<4x128xf32>
    %cst_118 = arith.constant 1.000000e+00 : f32
    %415 = vector.broadcast %cst_118 : f32 to vector<4x128xf32>
    %416 = arith.addf %415, %414 : vector<4x128xf32>
    %417 = arith.divf %415, %416 : vector<4x128xf32>
    %418 = arith.mulf %400, %395 : vector<4x128xf32>
    %419 = arith.addf %406, %418 : vector<4x128xf32>
    %420 = arith.addf %419, %399 : vector<4x128xf32>
    %421 = arith.negf %420 : vector<4x128xf32>
    %422 = math.exp %421 : vector<4x128xf32>
    %cst_119 = arith.constant 1.000000e+00 : f32
    %423 = vector.broadcast %cst_119 : f32 to vector<4x128xf32>
    %424 = arith.addf %423, %422 : vector<4x128xf32>
    %425 = arith.divf %423, %424 : vector<4x128xf32>
    %426 = arith.mulf %417, %400 : vector<4x128xf32>
    %cst_120 = arith.constant 1.000000e+00 : f32
    %427 = vector.broadcast %cst_120 : f32 to vector<4x128xf32>
    %428 = arith.subf %427, %417 : vector<4x128xf32>
    %429 = arith.mulf %428, %404 : vector<4x128xf32>
    %430 = arith.addf %426, %429 : vector<4x128xf32>
    %cst_121 = arith.constant 0.000000e+00 : f32
    %431 = vector.broadcast %cst_121 : f32 to vector<4x128xf32>
    %432 = arith.cmpf ogt, %430, %431 : vector<4x128xf32>
    %433 = math.exp %430 : vector<4x128xf32>
    %cst_122 = arith.constant 1.000000e+00 : f32
    %434 = vector.broadcast %cst_122 : f32 to vector<4x128xf32>
    %435 = arith.subf %433, %434 : vector<4x128xf32>
    %cst_123 = arith.constant 1.67326319 : f32
    %436 = vector.broadcast %cst_123 : f32 to vector<4x128xf32>
    %437 = arith.mulf %436, %435 : vector<4x128xf32>
    %438 = arith.select %432, %430, %437 : vector<4x128xi1>, vector<4x128xf32>
    %cst_124 = arith.constant 1.05070102 : f32
    %439 = vector.broadcast %cst_124 : f32 to vector<4x128xf32>
    %440 = arith.mulf %439, %438 : vector<4x128xf32>
    %441 = arith.mulf %425, %440 : vector<4x128xf32>
    %cst_125 = arith.constant 1.000000e+00 : f32
    %442 = vector.broadcast %cst_125 : f32 to vector<4x128xf32>
    %443 = arith.subf %442, %425 : vector<4x128xf32>
    %444 = arith.mulf %443, %409 : vector<4x128xf32>
    %445 = arith.addf %441, %444 : vector<4x128xf32>
    %446 = vector.extract_strided_slice %445 {offsets = [0, 0], sizes = [2, 128], strides = [1, 1]} : vector<4x128xf32> to vector<2x128xf32>
    %c0_126 = arith.constant 0 : index
    %c0_127 = arith.constant 0 : index
    %447 = vector.load %arg11[%c0_126, %c0_127] : memref<16x256xf32, #tpu.memory_space<vmem>>, vector<2x128xf32>
    tpu.vector_store %arg11[%c0_126, %c0_127], %446 {strides = array<i32>} : memref<16x256xf32, #tpu.memory_space<vmem>>, vector<2x128xf32>,
    %448 = vector.extract_strided_slice %445 {offsets = [2, 0], sizes = [2, 128], strides = [1, 1]} : vector<4x128xf32> to vector<2x128xf32>
    %c14_128 = arith.constant 14 : index
    %c128_129 = arith.constant 128 : index
    %449 = vector.load %arg11[%c14_128, %c128_129] : memref<16x256xf32, #tpu.memory_space<vmem>>, vector<2x128xf32>
    tpu.vector_store %arg11[%c14_128, %c128_129], %448 {strides = array<i32>} : memref<16x256xf32, #tpu.memory_space<vmem>>, vector<2x128xf32>,
    %450 = vector.extract_strided_slice %391 {offsets = [2, 0], sizes = [2, 384], strides = [1, 1]} : vector<16x768xf32> to vector<2x384xf32>
    %451 = vector.extract_strided_slice %391 {offsets = [12, 384], sizes = [2, 384], strides = [1, 1]} : vector<16x768xf32> to vector<2x384xf32>
    %452 = tpu.concatenate %450, %451 in 0 : vector<2x384xf32>, vector<2x384xf32> -> vector<4x384xf32>
    %453 = vector.extract_strided_slice %452 {offsets = [0, 0], sizes = [4, 128], strides = [1, 1]} : vector<4x384xf32> to vector<4x128xf32>
    %454 = vector.extract_strided_slice %452 {offsets = [0, 128], sizes = [4, 128], strides = [1, 1]} : vector<4x384xf32> to vector<4x128xf32>
    %455 = vector.extract_strided_slice %452 {offsets = [0, 256], sizes = [4, 128], strides = [1, 1]} : vector<4x384xf32> to vector<4x128xf32>
    %456 = vector.extract_strided_slice %388 {offsets = [2, 0], sizes = [2, 128], strides = [1, 1]} : vector<16x256xf32> to vector<2x128xf32>
    %457 = vector.extract_strided_slice %388 {offsets = [12, 128], sizes = [2, 128], strides = [1, 1]} : vector<16x256xf32> to vector<2x128xf32>
    %458 = tpu.concatenate %456, %457 in 0 : vector<2x128xf32>, vector<2x128xf32> -> vector<4x128xf32>
    %459 = arith.mulf %430, %393 : vector<4x128xf32>
    %460 = arith.addf %454, %459 : vector<4x128xf32>
    %461 = arith.addf %460, %397 : vector<4x128xf32>
    %462 = arith.negf %461 : vector<4x128xf32>
    %463 = math.exp %462 : vector<4x128xf32>
    %cst_130 = arith.constant 1.000000e+00 : f32
    %464 = vector.broadcast %cst_130 : f32 to vector<4x128xf32>
    %465 = arith.addf %464, %463 : vector<4x128xf32>
    %466 = arith.divf %464, %465 : vector<4x128xf32>
    %467 = arith.mulf %430, %395 : vector<4x128xf32>
    %468 = arith.addf %455, %467 : vector<4x128xf32>
    %469 = arith.addf %468, %399 : vector<4x128xf32>
    %470 = arith.negf %469 : vector<4x128xf32>
    %471 = math.exp %470 : vector<4x128xf32>
    %cst_131 = arith.constant 1.000000e+00 : f32
    %472 = vector.broadcast %cst_131 : f32 to vector<4x128xf32>
    %473 = arith.addf %472, %471 : vector<4x128xf32>
    %474 = arith.divf %472, %473 : vector<4x128xf32>
    %475 = arith.mulf %466, %430 : vector<4x128xf32>
    %cst_132 = arith.constant 1.000000e+00 : f32
    %476 = vector.broadcast %cst_132 : f32 to vector<4x128xf32>
    %477 = arith.subf %476, %466 : vector<4x128xf32>
    %478 = arith.mulf %477, %453 : vector<4x128xf32>
    %479 = arith.addf %475, %478 : vector<4x128xf32>
    %cst_133 = arith.constant 0.000000e+00 : f32
    %480 = vector.broadcast %cst_133 : f32 to vector<4x128xf32>
    %481 = arith.cmpf ogt, %479, %480 : vector<4x128xf32>
    %482 = math.exp %479 : vector<4x128xf32>
    %cst_134 = arith.constant 1.000000e+00 : f32
    %483 = vector.broadcast %cst_134 : f32 to vector<4x128xf32>
    %484 = arith.subf %482, %483 : vector<4x128xf32>
    %cst_135 = arith.constant 1.67326319 : f32
    %485 = vector.broadcast %cst_135 : f32 to vector<4x128xf32>
    %486 = arith.mulf %485, %484 : vector<4x128xf32>
    %487 = arith.select %481, %479, %486 : vector<4x128xi1>, vector<4x128xf32>
    %cst_136 = arith.constant 1.05070102 : f32
    %488 = vector.broadcast %cst_136 : f32 to vector<4x128xf32>
    %489 = arith.mulf %488, %487 : vector<4x128xf32>
    %490 = arith.mulf %474, %489 : vector<4x128xf32>
    %cst_137 = arith.constant 1.000000e+00 : f32
    %491 = vector.broadcast %cst_137 : f32 to vector<4x128xf32>
    %492 = arith.subf %491, %474 : vector<4x128xf32>
    %493 = arith.mulf %492, %458 : vector<4x128xf32>
    %494 = arith.addf %490, %493 : vector<4x128xf32>
    %495 = vector.extract_strided_slice %494 {offsets = [0, 0], sizes = [2, 128], strides = [1, 1]} : vector<4x128xf32> to vector<2x128xf32>
    %c2_138 = arith.constant 2 : index
    %c0_139 = arith.constant 0 : index
    %496 = vector.load %arg11[%c2_138, %c0_139] : memref<16x256xf32, #tpu.memory_space<vmem>>, vector<2x128xf32>
    tpu.vector_store %arg11[%c2_138, %c0_139], %495 {strides = array<i32>} : memref<16x256xf32, #tpu.memory_space<vmem>>, vector<2x128xf32>,
    %497 = vector.extract_strided_slice %494 {offsets = [2, 0], sizes = [2, 128], strides = [1, 1]} : vector<4x128xf32> to vector<2x128xf32>
    %c12_140 = arith.constant 12 : index
    %c128_141 = arith.constant 128 : index
    %498 = vector.load %arg11[%c12_140, %c128_141] : memref<16x256xf32, #tpu.memory_space<vmem>>, vector<2x128xf32>
    tpu.vector_store %arg11[%c12_140, %c128_141], %497 {strides = array<i32>} : memref<16x256xf32, #tpu.memory_space<vmem>>, vector<2x128xf32>,
    %499 = vector.extract_strided_slice %391 {offsets = [4, 0], sizes = [2, 384], strides = [1, 1]} : vector<16x768xf32> to vector<2x384xf32>
    %500 = vector.extract_strided_slice %391 {offsets = [10, 384], sizes = [2, 384], strides = [1, 1]} : vector<16x768xf32> to vector<2x384xf32>
    %501 = tpu.concatenate %499, %500 in 0 : vector<2x384xf32>, vector<2x384xf32> -> vector<4x384xf32>
    %502 = vector.extract_strided_slice %501 {offsets = [0, 0], sizes = [4, 128], strides = [1, 1]} : vector<4x384xf32> to vector<4x128xf32>
    %503 = vector.extract_strided_slice %501 {offsets = [0, 128], sizes = [4, 128], strides = [1, 1]} : vector<4x384xf32> to vector<4x128xf32>
    %504 = vector.extract_strided_slice %501 {offsets = [0, 256], sizes = [4, 128], strides = [1, 1]} : vector<4x384xf32> to vector<4x128xf32>
    %505 = vector.extract_strided_slice %388 {offsets = [4, 0], sizes = [2, 128], strides = [1, 1]} : vector<16x256xf32> to vector<2x128xf32>
    %506 = vector.extract_strided_slice %388 {offsets = [10, 128], sizes = [2, 128], strides = [1, 1]} : vector<16x256xf32> to vector<2x128xf32>
    %507 = tpu.concatenate %505, %506 in 0 : vector<2x128xf32>, vector<2x128xf32> -> vector<4x128xf32>
    %508 = arith.mulf %479, %393 : vector<4x128xf32>
    %509 = arith.addf %503, %508 : vector<4x128xf32>
    %510 = arith.addf %509, %397 : vector<4x128xf32>
    %511 = arith.negf %510 : vector<4x128xf32>
    %512 = math.exp %511 : vector<4x128xf32>
    %cst_142 = arith.constant 1.000000e+00 : f32
    %513 = vector.broadcast %cst_142 : f32 to vector<4x128xf32>
    %514 = arith.addf %513, %512 : vector<4x128xf32>
    %515 = arith.divf %513, %514 : vector<4x128xf32>
    %516 = arith.mulf %479, %395 : vector<4x128xf32>
    %517 = arith.addf %504, %516 : vector<4x128xf32>
    %518 = arith.addf %517, %399 : vector<4x128xf32>
    %519 = arith.negf %518 : vector<4x128xf32>
    %520 = math.exp %519 : vector<4x128xf32>
    %cst_143 = arith.constant 1.000000e+00 : f32
    %521 = vector.broadcast %cst_143 : f32 to vector<4x128xf32>
    %522 = arith.addf %521, %520 : vector<4x128xf32>
    %523 = arith.divf %521, %522 : vector<4x128xf32>
    %524 = arith.mulf %515, %479 : vector<4x128xf32>
    %cst_144 = arith.constant 1.000000e+00 : f32
    %525 = vector.broadcast %cst_144 : f32 to vector<4x128xf32>
    %526 = arith.subf %525, %515 : vector<4x128xf32>
    %527 = arith.mulf %526, %502 : vector<4x128xf32>
    %528 = arith.addf %524, %527 : vector<4x128xf32>
    %cst_145 = arith.constant 0.000000e+00 : f32
    %529 = vector.broadcast %cst_145 : f32 to vector<4x128xf32>
    %530 = arith.cmpf ogt, %528, %529 : vector<4x128xf32>
    %531 = math.exp %528 : vector<4x128xf32>
    %cst_146 = arith.constant 1.000000e+00 : f32
    %532 = vector.broadcast %cst_146 : f32 to vector<4x128xf32>
    %533 = arith.subf %531, %532 : vector<4x128xf32>
    %cst_147 = arith.constant 1.67326319 : f32
    %534 = vector.broadcast %cst_147 : f32 to vector<4x128xf32>
    %535 = arith.mulf %534, %533 : vector<4x128xf32>
    %536 = arith.select %530, %528, %535 : vector<4x128xi1>, vector<4x128xf32>
    %cst_148 = arith.constant 1.05070102 : f32
    %537 = vector.broadcast %cst_148 : f32 to vector<4x128xf32>
    %538 = arith.mulf %537, %536 : vector<4x128xf32>
    %539 = arith.mulf %523, %538 : vector<4x128xf32>
    %cst_149 = arith.constant 1.000000e+00 : f32
    %540 = vector.broadcast %cst_149 : f32 to vector<4x128xf32>
    %541 = arith.subf %540, %523 : vector<4x128xf32>
    %542 = arith.mulf %541, %507 : vector<4x128xf32>
    %543 = arith.addf %539, %542 : vector<4x128xf32>
    %544 = vector.extract_strided_slice %543 {offsets = [0, 0], sizes = [2, 128], strides = [1, 1]} : vector<4x128xf32> to vector<2x128xf32>
    %c4_150 = arith.constant 4 : index
    %c0_151 = arith.constant 0 : index
    %545 = vector.load %arg11[%c4_150, %c0_151] : memref<16x256xf32, #tpu.memory_space<vmem>>, vector<2x128xf32>
    tpu.vector_store %arg11[%c4_150, %c0_151], %544 {strides = array<i32>} : memref<16x256xf32, #tpu.memory_space<vmem>>, vector<2x128xf32>,
    %546 = vector.extract_strided_slice %543 {offsets = [2, 0], sizes = [2, 128], strides = [1, 1]} : vector<4x128xf32> to vector<2x128xf32>
    %c10_152 = arith.constant 10 : index
    %c128_153 = arith.constant 128 : index
    %547 = vector.load %arg11[%c10_152, %c128_153] : memref<16x256xf32, #tpu.memory_space<vmem>>, vector<2x128xf32>
    tpu.vector_store %arg11[%c10_152, %c128_153], %546 {strides = array<i32>} : memref<16x256xf32, #tpu.memory_space<vmem>>, vector<2x128xf32>,
    %548 = vector.extract_strided_slice %391 {offsets = [6, 0], sizes = [2, 384], strides = [1, 1]} : vector<16x768xf32> to vector<2x384xf32>
    %549 = vector.extract_strided_slice %391 {offsets = [8, 384], sizes = [2, 384], strides = [1, 1]} : vector<16x768xf32> to vector<2x384xf32>
    %550 = tpu.concatenate %548, %549 in 0 : vector<2x384xf32>, vector<2x384xf32> -> vector<4x384xf32>
    %551 = vector.extract_strided_slice %550 {offsets = [0, 0], sizes = [4, 128], strides = [1, 1]} : vector<4x384xf32> to vector<4x128xf32>
    %552 = vector.extract_strided_slice %550 {offsets = [0, 128], sizes = [4, 128], strides = [1, 1]} : vector<4x384xf32> to vector<4x128xf32>
    %553 = vector.extract_strided_slice %550 {offsets = [0, 256], sizes = [4, 128], strides = [1, 1]} : vector<4x384xf32> to vector<4x128xf32>
    %554 = vector.extract_strided_slice %388 {offsets = [6, 0], sizes = [2, 128], strides = [1, 1]} : vector<16x256xf32> to vector<2x128xf32>
    %555 = vector.extract_strided_slice %388 {offsets = [8, 128], sizes = [2, 128], strides = [1, 1]} : vector<16x256xf32> to vector<2x128xf32>
    %556 = tpu.concatenate %554, %555 in 0 : vector<2x128xf32>, vector<2x128xf32> -> vector<4x128xf32>
    %557 = arith.mulf %528, %393 : vector<4x128xf32>
    %558 = arith.addf %552, %557 : vector<4x128xf32>
    %559 = arith.addf %558, %397 : vector<4x128xf32>
    %560 = arith.negf %559 : vector<4x128xf32>
    %561 = math.exp %560 : vector<4x128xf32>
    %cst_154 = arith.constant 1.000000e+00 : f32
    %562 = vector.broadcast %cst_154 : f32 to vector<4x128xf32>
    %563 = arith.addf %562, %561 : vector<4x128xf32>
    %564 = arith.divf %562, %563 : vector<4x128xf32>
    %565 = arith.mulf %528, %395 : vector<4x128xf32>
    %566 = arith.addf %553, %565 : vector<4x128xf32>
    %567 = arith.addf %566, %399 : vector<4x128xf32>
    %568 = arith.negf %567 : vector<4x128xf32>
    %569 = math.exp %568 : vector<4x128xf32>
    %cst_155 = arith.constant 1.000000e+00 : f32
    %570 = vector.broadcast %cst_155 : f32 to vector<4x128xf32>
    %571 = arith.addf %570, %569 : vector<4x128xf32>
    %572 = arith.divf %570, %571 : vector<4x128xf32>
    %573 = arith.mulf %564, %528 : vector<4x128xf32>
    %cst_156 = arith.constant 1.000000e+00 : f32
    %574 = vector.broadcast %cst_156 : f32 to vector<4x128xf32>
    %575 = arith.subf %574, %564 : vector<4x128xf32>
    %576 = arith.mulf %575, %551 : vector<4x128xf32>
    %577 = arith.addf %573, %576 : vector<4x128xf32>
    %cst_157 = arith.constant 0.000000e+00 : f32
    %578 = vector.broadcast %cst_157 : f32 to vector<4x128xf32>
    %579 = arith.cmpf ogt, %577, %578 : vector<4x128xf32>
    %580 = math.exp %577 : vector<4x128xf32>
    %cst_158 = arith.constant 1.000000e+00 : f32
    %581 = vector.broadcast %cst_158 : f32 to vector<4x128xf32>
    %582 = arith.subf %580, %581 : vector<4x128xf32>
    %cst_159 = arith.constant 1.67326319 : f32
    %583 = vector.broadcast %cst_159 : f32 to vector<4x128xf32>
    %584 = arith.mulf %583, %582 : vector<4x128xf32>
    %585 = arith.select %579, %577, %584 : vector<4x128xi1>, vector<4x128xf32>
    %cst_160 = arith.constant 1.05070102 : f32
    %586 = vector.broadcast %cst_160 : f32 to vector<4x128xf32>
    %587 = arith.mulf %586, %585 : vector<4x128xf32>
    %588 = arith.mulf %572, %587 : vector<4x128xf32>
    %cst_161 = arith.constant 1.000000e+00 : f32
    %589 = vector.broadcast %cst_161 : f32 to vector<4x128xf32>
    %590 = arith.subf %589, %572 : vector<4x128xf32>
    %591 = arith.mulf %590, %556 : vector<4x128xf32>
    %592 = arith.addf %588, %591 : vector<4x128xf32>
    %593 = vector.extract_strided_slice %592 {offsets = [0, 0], sizes = [2, 128], strides = [1, 1]} : vector<4x128xf32> to vector<2x128xf32>
    %c6_162 = arith.constant 6 : index
    %c0_163 = arith.constant 0 : index
    %594 = vector.load %arg11[%c6_162, %c0_163] : memref<16x256xf32, #tpu.memory_space<vmem>>, vector<2x128xf32>
    tpu.vector_store %arg11[%c6_162, %c0_163], %593 {strides = array<i32>} : memref<16x256xf32, #tpu.memory_space<vmem>>, vector<2x128xf32>,
    %595 = vector.extract_strided_slice %592 {offsets = [2, 0], sizes = [2, 128], strides = [1, 1]} : vector<4x128xf32> to vector<2x128xf32>
    %c8_164 = arith.constant 8 : index
    %c128_165 = arith.constant 128 : index
    %596 = vector.load %arg11[%c8_164, %c128_165] : memref<16x256xf32, #tpu.memory_space<vmem>>, vector<2x128xf32>
    tpu.vector_store %arg11[%c8_164, %c128_165], %595 {strides = array<i32>} : memref<16x256xf32, #tpu.memory_space<vmem>>, vector<2x128xf32>,
    %597 = vector.extract_strided_slice %391 {offsets = [8, 0], sizes = [2, 384], strides = [1, 1]} : vector<16x768xf32> to vector<2x384xf32>
    %598 = vector.extract_strided_slice %391 {offsets = [6, 384], sizes = [2, 384], strides = [1, 1]} : vector<16x768xf32> to vector<2x384xf32>
    %599 = tpu.concatenate %597, %598 in 0 : vector<2x384xf32>, vector<2x384xf32> -> vector<4x384xf32>
    %600 = vector.extract_strided_slice %599 {offsets = [0, 0], sizes = [4, 128], strides = [1, 1]} : vector<4x384xf32> to vector<4x128xf32>
    %601 = vector.extract_strided_slice %599 {offsets = [0, 128], sizes = [4, 128], strides = [1, 1]} : vector<4x384xf32> to vector<4x128xf32>
    %602 = vector.extract_strided_slice %599 {offsets = [0, 256], sizes = [4, 128], strides = [1, 1]} : vector<4x384xf32> to vector<4x128xf32>
    %603 = vector.extract_strided_slice %388 {offsets = [8, 0], sizes = [2, 128], strides = [1, 1]} : vector<16x256xf32> to vector<2x128xf32>
    %604 = vector.extract_strided_slice %388 {offsets = [6, 128], sizes = [2, 128], strides = [1, 1]} : vector<16x256xf32> to vector<2x128xf32>
    %605 = tpu.concatenate %603, %604 in 0 : vector<2x128xf32>, vector<2x128xf32> -> vector<4x128xf32>
    %606 = arith.mulf %577, %393 : vector<4x128xf32>
    %607 = arith.addf %601, %606 : vector<4x128xf32>
    %608 = arith.addf %607, %397 : vector<4x128xf32>
    %609 = arith.negf %608 : vector<4x128xf32>
    %610 = math.exp %609 : vector<4x128xf32>
    %cst_166 = arith.constant 1.000000e+00 : f32
    %611 = vector.broadcast %cst_166 : f32 to vector<4x128xf32>
    %612 = arith.addf %611, %610 : vector<4x128xf32>
    %613 = arith.divf %611, %612 : vector<4x128xf32>
    %614 = arith.mulf %577, %395 : vector<4x128xf32>
    %615 = arith.addf %602, %614 : vector<4x128xf32>
    %616 = arith.addf %615, %399 : vector<4x128xf32>
    %617 = arith.negf %616 : vector<4x128xf32>
    %618 = math.exp %617 : vector<4x128xf32>
    %cst_167 = arith.constant 1.000000e+00 : f32
    %619 = vector.broadcast %cst_167 : f32 to vector<4x128xf32>
    %620 = arith.addf %619, %618 : vector<4x128xf32>
    %621 = arith.divf %619, %620 : vector<4x128xf32>
    %622 = arith.mulf %613, %577 : vector<4x128xf32>
    %cst_168 = arith.constant 1.000000e+00 : f32
    %623 = vector.broadcast %cst_168 : f32 to vector<4x128xf32>
    %624 = arith.subf %623, %613 : vector<4x128xf32>
    %625 = arith.mulf %624, %600 : vector<4x128xf32>
    %626 = arith.addf %622, %625 : vector<4x128xf32>
    %cst_169 = arith.constant 0.000000e+00 : f32
    %627 = vector.broadcast %cst_169 : f32 to vector<4x128xf32>
    %628 = arith.cmpf ogt, %626, %627 : vector<4x128xf32>
    %629 = math.exp %626 : vector<4x128xf32>
    %cst_170 = arith.constant 1.000000e+00 : f32
    %630 = vector.broadcast %cst_170 : f32 to vector<4x128xf32>
    %631 = arith.subf %629, %630 : vector<4x128xf32>
    %cst_171 = arith.constant 1.67326319 : f32
    %632 = vector.broadcast %cst_171 : f32 to vector<4x128xf32>
    %633 = arith.mulf %632, %631 : vector<4x128xf32>
    %634 = arith.select %628, %626, %633 : vector<4x128xi1>, vector<4x128xf32>
    %cst_172 = arith.constant 1.05070102 : f32
    %635 = vector.broadcast %cst_172 : f32 to vector<4x128xf32>
    %636 = arith.mulf %635, %634 : vector<4x128xf32>
    %637 = arith.mulf %621, %636 : vector<4x128xf32>
    %cst_173 = arith.constant 1.000000e+00 : f32
    %638 = vector.broadcast %cst_173 : f32 to vector<4x128xf32>
    %639 = arith.subf %638, %621 : vector<4x128xf32>
    %640 = arith.mulf %639, %605 : vector<4x128xf32>
    %641 = arith.addf %637, %640 : vector<4x128xf32>
    %642 = vector.extract_strided_slice %641 {offsets = [0, 0], sizes = [2, 128], strides = [1, 1]} : vector<4x128xf32> to vector<2x128xf32>
    %c8_174 = arith.constant 8 : index
    %c0_175 = arith.constant 0 : index
    %643 = vector.load %arg11[%c8_174, %c0_175] : memref<16x256xf32, #tpu.memory_space<vmem>>, vector<2x128xf32>
    tpu.vector_store %arg11[%c8_174, %c0_175], %642 {strides = array<i32>} : memref<16x256xf32, #tpu.memory_space<vmem>>, vector<2x128xf32>,
    %644 = vector.extract_strided_slice %641 {offsets = [2, 0], sizes = [2, 128], strides = [1, 1]} : vector<4x128xf32> to vector<2x128xf32>
    %c6_176 = arith.constant 6 : index
    %c128_177 = arith.constant 128 : index
    %645 = vector.load %arg11[%c6_176, %c128_177] : memref<16x256xf32, #tpu.memory_space<vmem>>, vector<2x128xf32>
    tpu.vector_store %arg11[%c6_176, %c128_177], %644 {strides = array<i32>} : memref<16x256xf32, #tpu.memory_space<vmem>>, vector<2x128xf32>,
    %646 = vector.extract_strided_slice %391 {offsets = [10, 0], sizes = [2, 384], strides = [1, 1]} : vector<16x768xf32> to vector<2x384xf32>
    %647 = vector.extract_strided_slice %391 {offsets = [4, 384], sizes = [2, 384], strides = [1, 1]} : vector<16x768xf32> to vector<2x384xf32>
    %648 = tpu.concatenate %646, %647 in 0 : vector<2x384xf32>, vector<2x384xf32> -> vector<4x384xf32>
    %649 = vector.extract_strided_slice %648 {offsets = [0, 0], sizes = [4, 128], strides = [1, 1]} : vector<4x384xf32> to vector<4x128xf32>
    %650 = vector.extract_strided_slice %648 {offsets = [0, 128], sizes = [4, 128], strides = [1, 1]} : vector<4x384xf32> to vector<4x128xf32>
    %651 = vector.extract_strided_slice %648 {offsets = [0, 256], sizes = [4, 128], strides = [1, 1]} : vector<4x384xf32> to vector<4x128xf32>
    %652 = vector.extract_strided_slice %388 {offsets = [10, 0], sizes = [2, 128], strides = [1, 1]} : vector<16x256xf32> to vector<2x128xf32>
    %653 = vector.extract_strided_slice %388 {offsets = [4, 128], sizes = [2, 128], strides = [1, 1]} : vector<16x256xf32> to vector<2x128xf32>
    %654 = tpu.concatenate %652, %653 in 0 : vector<2x128xf32>, vector<2x128xf32> -> vector<4x128xf32>
    %655 = arith.mulf %626, %393 : vector<4x128xf32>
    %656 = arith.addf %650, %655 : vector<4x128xf32>
    %657 = arith.addf %656, %397 : vector<4x128xf32>
    %658 = arith.negf %657 : vector<4x128xf32>
    %659 = math.exp %658 : vector<4x128xf32>
    %cst_178 = arith.constant 1.000000e+00 : f32
    %660 = vector.broadcast %cst_178 : f32 to vector<4x128xf32>
    %661 = arith.addf %660, %659 : vector<4x128xf32>
    %662 = arith.divf %660, %661 : vector<4x128xf32>
    %663 = arith.mulf %626, %395 : vector<4x128xf32>
    %664 = arith.addf %651, %663 : vector<4x128xf32>
    %665 = arith.addf %664, %399 : vector<4x128xf32>
    %666 = arith.negf %665 : vector<4x128xf32>
    %667 = math.exp %666 : vector<4x128xf32>
    %cst_179 = arith.constant 1.000000e+00 : f32
    %668 = vector.broadcast %cst_179 : f32 to vector<4x128xf32>
    %669 = arith.addf %668, %667 : vector<4x128xf32>
    %670 = arith.divf %668, %669 : vector<4x128xf32>
    %671 = arith.mulf %662, %626 : vector<4x128xf32>
    %cst_180 = arith.constant 1.000000e+00 : f32
    %672 = vector.broadcast %cst_180 : f32 to vector<4x128xf32>
    %673 = arith.subf %672, %662 : vector<4x128xf32>
    %674 = arith.mulf %673, %649 : vector<4x128xf32>
    %675 = arith.addf %671, %674 : vector<4x128xf32>
    %cst_181 = arith.constant 0.000000e+00 : f32
    %676 = vector.broadcast %cst_181 : f32 to vector<4x128xf32>
    %677 = arith.cmpf ogt, %675, %676 : vector<4x128xf32>
    %678 = math.exp %675 : vector<4x128xf32>
    %cst_182 = arith.constant 1.000000e+00 : f32
    %679 = vector.broadcast %cst_182 : f32 to vector<4x128xf32>
    %680 = arith.subf %678, %679 : vector<4x128xf32>
    %cst_183 = arith.constant 1.67326319 : f32
    %681 = vector.broadcast %cst_183 : f32 to vector<4x128xf32>
    %682 = arith.mulf %681, %680 : vector<4x128xf32>
    %683 = arith.select %677, %675, %682 : vector<4x128xi1>, vector<4x128xf32>
    %cst_184 = arith.constant 1.05070102 : f32
    %684 = vector.broadcast %cst_184 : f32 to vector<4x128xf32>
    %685 = arith.mulf %684, %683 : vector<4x128xf32>
    %686 = arith.mulf %670, %685 : vector<4x128xf32>
    %cst_185 = arith.constant 1.000000e+00 : f32
    %687 = vector.broadcast %cst_185 : f32 to vector<4x128xf32>
    %688 = arith.subf %687, %670 : vector<4x128xf32>
    %689 = arith.mulf %688, %654 : vector<4x128xf32>
    %690 = arith.addf %686, %689 : vector<4x128xf32>
    %691 = vector.extract_strided_slice %690 {offsets = [0, 0], sizes = [2, 128], strides = [1, 1]} : vector<4x128xf32> to vector<2x128xf32>
    %c10_186 = arith.constant 10 : index
    %c0_187 = arith.constant 0 : index
    %692 = vector.load %arg11[%c10_186, %c0_187] : memref<16x256xf32, #tpu.memory_space<vmem>>, vector<2x128xf32>
    tpu.vector_store %arg11[%c10_186, %c0_187], %691 {strides = array<i32>} : memref<16x256xf32, #tpu.memory_space<vmem>>, vector<2x128xf32>,
    %693 = vector.extract_strided_slice %690 {offsets = [2, 0], sizes = [2, 128], strides = [1, 1]} : vector<4x128xf32> to vector<2x128xf32>
    %c4_188 = arith.constant 4 : index
    %c128_189 = arith.constant 128 : index
    %694 = vector.load %arg11[%c4_188, %c128_189] : memref<16x256xf32, #tpu.memory_space<vmem>>, vector<2x128xf32>
    tpu.vector_store %arg11[%c4_188, %c128_189], %693 {strides = array<i32>} : memref<16x256xf32, #tpu.memory_space<vmem>>, vector<2x128xf32>,
    %695 = vector.extract_strided_slice %391 {offsets = [12, 0], sizes = [2, 384], strides = [1, 1]} : vector<16x768xf32> to vector<2x384xf32>
    %696 = vector.extract_strided_slice %391 {offsets = [2, 384], sizes = [2, 384], strides = [1, 1]} : vector<16x768xf32> to vector<2x384xf32>
    %697 = tpu.concatenate %695, %696 in 0 : vector<2x384xf32>, vector<2x384xf32> -> vector<4x384xf32>
    %698 = vector.extract_strided_slice %697 {offsets = [0, 0], sizes = [4, 128], strides = [1, 1]} : vector<4x384xf32> to vector<4x128xf32>
    %699 = vector.extract_strided_slice %697 {offsets = [0, 128], sizes = [4, 128], strides = [1, 1]} : vector<4x384xf32> to vector<4x128xf32>
    %700 = vector.extract_strided_slice %697 {offsets = [0, 256], sizes = [4, 128], strides = [1, 1]} : vector<4x384xf32> to vector<4x128xf32>
    %701 = vector.extract_strided_slice %388 {offsets = [12, 0], sizes = [2, 128], strides = [1, 1]} : vector<16x256xf32> to vector<2x128xf32>
    %702 = vector.extract_strided_slice %388 {offsets = [2, 128], sizes = [2, 128], strides = [1, 1]} : vector<16x256xf32> to vector<2x128xf32>
    %703 = tpu.concatenate %701, %702 in 0 : vector<2x128xf32>, vector<2x128xf32> -> vector<4x128xf32>
    %704 = arith.mulf %675, %393 : vector<4x128xf32>
    %705 = arith.addf %699, %704 : vector<4x128xf32>
    %706 = arith.addf %705, %397 : vector<4x128xf32>
    %707 = arith.negf %706 : vector<4x128xf32>
    %708 = math.exp %707 : vector<4x128xf32>
    %cst_190 = arith.constant 1.000000e+00 : f32
    %709 = vector.broadcast %cst_190 : f32 to vector<4x128xf32>
    %710 = arith.addf %709, %708 : vector<4x128xf32>
    %711 = arith.divf %709, %710 : vector<4x128xf32>
    %712 = arith.mulf %675, %395 : vector<4x128xf32>
    %713 = arith.addf %700, %712 : vector<4x128xf32>
    %714 = arith.addf %713, %399 : vector<4x128xf32>
    %715 = arith.negf %714 : vector<4x128xf32>
    %716 = math.exp %715 : vector<4x128xf32>
    %cst_191 = arith.constant 1.000000e+00 : f32
    %717 = vector.broadcast %cst_191 : f32 to vector<4x128xf32>
    %718 = arith.addf %717, %716 : vector<4x128xf32>
    %719 = arith.divf %717, %718 : vector<4x128xf32>
    %720 = arith.mulf %711, %675 : vector<4x128xf32>
    %cst_192 = arith.constant 1.000000e+00 : f32
    %721 = vector.broadcast %cst_192 : f32 to vector<4x128xf32>
    %722 = arith.subf %721, %711 : vector<4x128xf32>
    %723 = arith.mulf %722, %698 : vector<4x128xf32>
    %724 = arith.addf %720, %723 : vector<4x128xf32>
    %cst_193 = arith.constant 0.000000e+00 : f32
    %725 = vector.broadcast %cst_193 : f32 to vector<4x128xf32>
    %726 = arith.cmpf ogt, %724, %725 : vector<4x128xf32>
    %727 = math.exp %724 : vector<4x128xf32>
    %cst_194 = arith.constant 1.000000e+00 : f32
    %728 = vector.broadcast %cst_194 : f32 to vector<4x128xf32>
    %729 = arith.subf %727, %728 : vector<4x128xf32>
    %cst_195 = arith.constant 1.67326319 : f32
    %730 = vector.broadcast %cst_195 : f32 to vector<4x128xf32>
    %731 = arith.mulf %730, %729 : vector<4x128xf32>
    %732 = arith.select %726, %724, %731 : vector<4x128xi1>, vector<4x128xf32>
    %cst_196 = arith.constant 1.05070102 : f32
    %733 = vector.broadcast %cst_196 : f32 to vector<4x128xf32>
    %734 = arith.mulf %733, %732 : vector<4x128xf32>
    %735 = arith.mulf %719, %734 : vector<4x128xf32>
    %cst_197 = arith.constant 1.000000e+00 : f32
    %736 = vector.broadcast %cst_197 : f32 to vector<4x128xf32>
    %737 = arith.subf %736, %719 : vector<4x128xf32>
    %738 = arith.mulf %737, %703 : vector<4x128xf32>
    %739 = arith.addf %735, %738 : vector<4x128xf32>
    %740 = vector.extract_strided_slice %739 {offsets = [0, 0], sizes = [2, 128], strides = [1, 1]} : vector<4x128xf32> to vector<2x128xf32>
    %c12_198 = arith.constant 12 : index
    %c0_199 = arith.constant 0 : index
    %741 = vector.load %arg11[%c12_198, %c0_199] : memref<16x256xf32, #tpu.memory_space<vmem>>, vector<2x128xf32>
    tpu.vector_store %arg11[%c12_198, %c0_199], %740 {strides = array<i32>} : memref<16x256xf32, #tpu.memory_space<vmem>>, vector<2x128xf32>,
    %742 = vector.extract_strided_slice %739 {offsets = [2, 0], sizes = [2, 128], strides = [1, 1]} : vector<4x128xf32> to vector<2x128xf32>
    %c2_200 = arith.constant 2 : index
    %c128_201 = arith.constant 128 : index
    %743 = vector.load %arg11[%c2_200, %c128_201] : memref<16x256xf32, #tpu.memory_space<vmem>>, vector<2x128xf32>
    tpu.vector_store %arg11[%c2_200, %c128_201], %742 {strides = array<i32>} : memref<16x256xf32, #tpu.memory_space<vmem>>, vector<2x128xf32>,
    %744 = vector.extract_strided_slice %391 {offsets = [14, 0], sizes = [2, 384], strides = [1, 1]} : vector<16x768xf32> to vector<2x384xf32>
    %745 = vector.extract_strided_slice %391 {offsets = [0, 384], sizes = [2, 384], strides = [1, 1]} : vector<16x768xf32> to vector<2x384xf32>
    %746 = tpu.concatenate %744, %745 in 0 : vector<2x384xf32>, vector<2x384xf32> -> vector<4x384xf32>
    %747 = vector.extract_strided_slice %746 {offsets = [0, 0], sizes = [4, 128], strides = [1, 1]} : vector<4x384xf32> to vector<4x128xf32>
    %748 = vector.extract_strided_slice %746 {offsets = [0, 128], sizes = [4, 128], strides = [1, 1]} : vector<4x384xf32> to vector<4x128xf32>
    %749 = vector.extract_strided_slice %746 {offsets = [0, 256], sizes = [4, 128], strides = [1, 1]} : vector<4x384xf32> to vector<4x128xf32>
    %750 = vector.extract_strided_slice %388 {offsets = [14, 0], sizes = [2, 128], strides = [1, 1]} : vector<16x256xf32> to vector<2x128xf32>
    %751 = vector.extract_strided_slice %388 {offsets = [0, 128], sizes = [2, 128], strides = [1, 1]} : vector<16x256xf32> to vector<2x128xf32>
    %752 = tpu.concatenate %750, %751 in 0 : vector<2x128xf32>, vector<2x128xf32> -> vector<4x128xf32>
    %753 = arith.mulf %724, %393 : vector<4x128xf32>
    %754 = arith.addf %748, %753 : vector<4x128xf32>
    %755 = arith.addf %754, %397 : vector<4x128xf32>
    %756 = arith.negf %755 : vector<4x128xf32>
    %757 = math.exp %756 : vector<4x128xf32>
    %cst_202 = arith.constant 1.000000e+00 : f32
    %758 = vector.broadcast %cst_202 : f32 to vector<4x128xf32>
    %759 = arith.addf %758, %757 : vector<4x128xf32>
    %760 = arith.divf %758, %759 : vector<4x128xf32>
    %761 = arith.mulf %724, %395 : vector<4x128xf32>
    %762 = arith.addf %749, %761 : vector<4x128xf32>
    %763 = arith.addf %762, %399 : vector<4x128xf32>
    %764 = arith.negf %763 : vector<4x128xf32>
    %765 = math.exp %764 : vector<4x128xf32>
    %cst_203 = arith.constant 1.000000e+00 : f32
    %766 = vector.broadcast %cst_203 : f32 to vector<4x128xf32>
    %767 = arith.addf %766, %765 : vector<4x128xf32>
    %768 = arith.divf %766, %767 : vector<4x128xf32>
    %769 = arith.mulf %760, %724 : vector<4x128xf32>
    %cst_204 = arith.constant 1.000000e+00 : f32
    %770 = vector.broadcast %cst_204 : f32 to vector<4x128xf32>
    %771 = arith.subf %770, %760 : vector<4x128xf32>
    %772 = arith.mulf %771, %747 : vector<4x128xf32>
    %773 = arith.addf %769, %772 : vector<4x128xf32>
    %cst_205 = arith.constant 0.000000e+00 : f32
    %774 = vector.broadcast %cst_205 : f32 to vector<4x128xf32>
    %775 = arith.cmpf ogt, %773, %774 : vector<4x128xf32>
    %776 = math.exp %773 : vector<4x128xf32>
    %cst_206 = arith.constant 1.000000e+00 : f32
    %777 = vector.broadcast %cst_206 : f32 to vector<4x128xf32>
    %778 = arith.subf %776, %777 : vector<4x128xf32>
    %cst_207 = arith.constant 1.67326319 : f32
    %779 = vector.broadcast %cst_207 : f32 to vector<4x128xf32>
    %780 = arith.mulf %779, %778 : vector<4x128xf32>
    %781 = arith.select %775, %773, %780 : vector<4x128xi1>, vector<4x128xf32>
    %cst_208 = arith.constant 1.05070102 : f32
    %782 = vector.broadcast %cst_208 : f32 to vector<4x128xf32>
    %783 = arith.mulf %782, %781 : vector<4x128xf32>
    %784 = arith.mulf %768, %783 : vector<4x128xf32>
    %cst_209 = arith.constant 1.000000e+00 : f32
    %785 = vector.broadcast %cst_209 : f32 to vector<4x128xf32>
    %786 = arith.subf %785, %768 : vector<4x128xf32>
    %787 = arith.mulf %786, %752 : vector<4x128xf32>
    %788 = arith.addf %784, %787 : vector<4x128xf32>
    %789 = vector.extract_strided_slice %788 {offsets = [0, 0], sizes = [2, 128], strides = [1, 1]} : vector<4x128xf32> to vector<2x128xf32>
    %c14_210 = arith.constant 14 : index
    %c0_211 = arith.constant 0 : index
    %790 = vector.load %arg11[%c14_210, %c0_211] : memref<16x256xf32, #tpu.memory_space<vmem>>, vector<2x128xf32>
    tpu.vector_store %arg11[%c14_210, %c0_211], %789 {strides = array<i32>} : memref<16x256xf32, #tpu.memory_space<vmem>>, vector<2x128xf32>,
    %791 = vector.extract_strided_slice %788 {offsets = [2, 0], sizes = [2, 128], strides = [1, 1]} : vector<4x128xf32> to vector<2x128xf32>
    %c0_212 = arith.constant 0 : index
    %c128_213 = arith.constant 128 : index
    %792 = vector.load %arg11[%c0_212, %c128_213] : memref<16x256xf32, #tpu.memory_space<vmem>>, vector<2x128xf32>
    tpu.vector_store %arg11[%c0_212, %c128_213], %791 {strides = array<i32>} : memref<16x256xf32, #tpu.memory_space<vmem>>, vector<2x128xf32>,
    %c0_214 = arith.constant 0 : index
    %c0_215 = arith.constant 0 : index
    %793 = vector.load %arg11[%c0_214, %c0_215] : memref<16x256xf32, #tpu.memory_space<vmem>>, vector<16x256xf32>
    %794 = arith.truncf %793 : vector<16x256xf32> to vector<16x256xbf16>
    %c0_216 = arith.constant 0 : index
    %c0_217 = arith.constant 0 : index
    %795 = vector.load %arg4[%c0_216, %c0_217] : memref<256x768xbf16, #tpu.memory_space<vmem>>, vector<256x768xbf16>
    %cst_218 = arith.constant dense<0.000000e+00> : vector<16x768xf32>
    %796 = tpu.matmul %794, %795, %cst_218 {dimension_numbers = #tpu.dot_dimension_numbers<[1], [0], [0], [1], [0, 0, 1, 1], [], []>} : vector<16x256xbf16>, vector<256x768xbf16>, vector<16x768xf32> -> vector<16x768xf32>
    %c8_219 = arith.constant 8 : index
    %c0_220 = arith.constant 0 : index
    %c0_221 = arith.constant 0 : index
    %797 = vector.load %arg6[%c8_219, %c0_220, %c0_221] : memref<16x4x128xf32, #tpu.memory_space<vmem>>, vector<1x4x128xf32>
    %798 = vector.shape_cast %797 : vector<1x4x128xf32> to vector<4x128xf32>
    %c9 = arith.constant 9 : index
    %c0_222 = arith.constant 0 : index
    %c0_223 = arith.constant 0 : index
    %799 = vector.load %arg6[%c9, %c0_222, %c0_223] : memref<16x4x128xf32, #tpu.memory_space<vmem>>, vector<1x4x128xf32>
    %800 = vector.shape_cast %799 : vector<1x4x128xf32> to vector<4x128xf32>
    %c10_224 = arith.constant 10 : index
    %c0_225 = arith.constant 0 : index
    %c0_226 = arith.constant 0 : index
    %801 = vector.load %arg6[%c10_224, %c0_225, %c0_226] : memref<16x4x128xf32, #tpu.memory_space<vmem>>, vector<1x4x128xf32>
    %802 = vector.shape_cast %801 : vector<1x4x128xf32> to vector<4x128xf32>
    %c11 = arith.constant 11 : index
    %c0_227 = arith.constant 0 : index
    %c0_228 = arith.constant 0 : index
    %803 = vector.load %arg6[%c11, %c0_227, %c0_228] : memref<16x4x128xf32, #tpu.memory_space<vmem>>, vector<1x4x128xf32>
    %804 = vector.shape_cast %803 : vector<1x4x128xf32> to vector<4x128xf32>
    %cst_229 = arith.constant 0.000000e+00 : f32
    %805 = vector.broadcast %cst_229 : f32 to vector<4x128xf32>
    %806 = vector.extract_strided_slice %796 {offsets = [0, 0], sizes = [2, 384], strides = [1, 1]} : vector<16x768xf32> to vector<2x384xf32>
    %807 = vector.extract_strided_slice %796 {offsets = [14, 384], sizes = [2, 384], strides = [1, 1]} : vector<16x768xf32> to vector<2x384xf32>
    %808 = tpu.concatenate %806, %807 in 0 : vector<2x384xf32>, vector<2x384xf32> -> vector<4x384xf32>
    %809 = vector.extract_strided_slice %808 {offsets = [0, 0], sizes = [4, 128], strides = [1, 1]} : vector<4x384xf32> to vector<4x128xf32>
    %810 = vector.extract_strided_slice %808 {offsets = [0, 128], sizes = [4, 128], strides = [1, 1]} : vector<4x384xf32> to vector<4x128xf32>
    %811 = vector.extract_strided_slice %808 {offsets = [0, 256], sizes = [4, 128], strides = [1, 1]} : vector<4x384xf32> to vector<4x128xf32>
    %812 = vector.extract_strided_slice %793 {offsets = [0, 0], sizes = [2, 128], strides = [1, 1]} : vector<16x256xf32> to vector<2x128xf32>
    %813 = vector.extract_strided_slice %793 {offsets = [14, 128], sizes = [2, 128], strides = [1, 1]} : vector<16x256xf32> to vector<2x128xf32>
    %814 = tpu.concatenate %812, %813 in 0 : vector<2x128xf32>, vector<2x128xf32> -> vector<4x128xf32>
    %815 = arith.mulf %805, %798 : vector<4x128xf32>
    %816 = arith.addf %810, %815 : vector<4x128xf32>
    %817 = arith.addf %816, %802 : vector<4x128xf32>
    %818 = arith.negf %817 : vector<4x128xf32>
    %819 = math.exp %818 : vector<4x128xf32>
    %cst_230 = arith.constant 1.000000e+00 : f32
    %820 = vector.broadcast %cst_230 : f32 to vector<4x128xf32>
    %821 = arith.addf %820, %819 : vector<4x128xf32>
    %822 = arith.divf %820, %821 : vector<4x128xf32>
    %823 = arith.mulf %805, %800 : vector<4x128xf32>
    %824 = arith.addf %811, %823 : vector<4x128xf32>
    %825 = arith.addf %824, %804 : vector<4x128xf32>
    %826 = arith.negf %825 : vector<4x128xf32>
    %827 = math.exp %826 : vector<4x128xf32>
    %cst_231 = arith.constant 1.000000e+00 : f32
    %828 = vector.broadcast %cst_231 : f32 to vector<4x128xf32>
    %829 = arith.addf %828, %827 : vector<4x128xf32>
    %830 = arith.divf %828, %829 : vector<4x128xf32>
    %831 = arith.mulf %822, %805 : vector<4x128xf32>
    %cst_232 = arith.constant 1.000000e+00 : f32
    %832 = vector.broadcast %cst_232 : f32 to vector<4x128xf32>
    %833 = arith.subf %832, %822 : vector<4x128xf32>
    %834 = arith.mulf %833, %809 : vector<4x128xf32>
    %835 = arith.addf %831, %834 : vector<4x128xf32>
    %cst_233 = arith.constant 0.000000e+00 : f32
    %836 = vector.broadcast %cst_233 : f32 to vector<4x128xf32>
    %837 = arith.cmpf ogt, %835, %836 : vector<4x128xf32>
    %838 = math.exp %835 : vector<4x128xf32>
    %cst_234 = arith.constant 1.000000e+00 : f32
    %839 = vector.broadcast %cst_234 : f32 to vector<4x128xf32>
    %840 = arith.subf %838, %839 : vector<4x128xf32>
    %cst_235 = arith.constant 1.67326319 : f32
    %841 = vector.broadcast %cst_235 : f32 to vector<4x128xf32>
    %842 = arith.mulf %841, %840 : vector<4x128xf32>
    %843 = arith.select %837, %835, %842 : vector<4x128xi1>, vector<4x128xf32>
    %cst_236 = arith.constant 1.05070102 : f32
    %844 = vector.broadcast %cst_236 : f32 to vector<4x128xf32>
    %845 = arith.mulf %844, %843 : vector<4x128xf32>
    %846 = arith.mulf %830, %845 : vector<4x128xf32>
    %cst_237 = arith.constant 1.000000e+00 : f32
    %847 = vector.broadcast %cst_237 : f32 to vector<4x128xf32>
    %848 = arith.subf %847, %830 : vector<4x128xf32>
    %849 = arith.mulf %848, %814 : vector<4x128xf32>
    %850 = arith.addf %846, %849 : vector<4x128xf32>
    %851 = vector.extract_strided_slice %850 {offsets = [0, 0], sizes = [2, 128], strides = [1, 1]} : vector<4x128xf32> to vector<2x128xf32>
    %c0_238 = arith.constant 0 : index
    %c0_239 = arith.constant 0 : index
    %852 = vector.load %arg10[%c0_238, %c0_239] : memref<16x256xf32, #tpu.memory_space<vmem>>, vector<2x128xf32>
    tpu.vector_store %arg10[%c0_238, %c0_239], %851 {strides = array<i32>} : memref<16x256xf32, #tpu.memory_space<vmem>>, vector<2x128xf32>,
    %853 = vector.extract_strided_slice %850 {offsets = [2, 0], sizes = [2, 128], strides = [1, 1]} : vector<4x128xf32> to vector<2x128xf32>
    %c14_240 = arith.constant 14 : index
    %c128_241 = arith.constant 128 : index
    %854 = vector.load %arg10[%c14_240, %c128_241] : memref<16x256xf32, #tpu.memory_space<vmem>>, vector<2x128xf32>
    tpu.vector_store %arg10[%c14_240, %c128_241], %853 {strides = array<i32>} : memref<16x256xf32, #tpu.memory_space<vmem>>, vector<2x128xf32>,
    %855 = vector.extract_strided_slice %796 {offsets = [2, 0], sizes = [2, 384], strides = [1, 1]} : vector<16x768xf32> to vector<2x384xf32>
    %856 = vector.extract_strided_slice %796 {offsets = [12, 384], sizes = [2, 384], strides = [1, 1]} : vector<16x768xf32> to vector<2x384xf32>
    %857 = tpu.concatenate %855, %856 in 0 : vector<2x384xf32>, vector<2x384xf32> -> vector<4x384xf32>
    %858 = vector.extract_strided_slice %857 {offsets = [0, 0], sizes = [4, 128], strides = [1, 1]} : vector<4x384xf32> to vector<4x128xf32>
    %859 = vector.extract_strided_slice %857 {offsets = [0, 128], sizes = [4, 128], strides = [1, 1]} : vector<4x384xf32> to vector<4x128xf32>
    %860 = vector.extract_strided_slice %857 {offsets = [0, 256], sizes = [4, 128], strides = [1, 1]} : vector<4x384xf32> to vector<4x128xf32>
    %861 = vector.extract_strided_slice %793 {offsets = [2, 0], sizes = [2, 128], strides = [1, 1]} : vector<16x256xf32> to vector<2x128xf32>
    %862 = vector.extract_strided_slice %793 {offsets = [12, 128], sizes = [2, 128], strides = [1, 1]} : vector<16x256xf32> to vector<2x128xf32>
    %863 = tpu.concatenate %861, %862 in 0 : vector<2x128xf32>, vector<2x128xf32> -> vector<4x128xf32>
    %864 = arith.mulf %835, %798 : vector<4x128xf32>
    %865 = arith.addf %859, %864 : vector<4x128xf32>
    %866 = arith.addf %865, %802 : vector<4x128xf32>
    %867 = arith.negf %866 : vector<4x128xf32>
    %868 = math.exp %867 : vector<4x128xf32>
    %cst_242 = arith.constant 1.000000e+00 : f32
    %869 = vector.broadcast %cst_242 : f32 to vector<4x128xf32>
    %870 = arith.addf %869, %868 : vector<4x128xf32>
    %871 = arith.divf %869, %870 : vector<4x128xf32>
    %872 = arith.mulf %835, %800 : vector<4x128xf32>
    %873 = arith.addf %860, %872 : vector<4x128xf32>
    %874 = arith.addf %873, %804 : vector<4x128xf32>
    %875 = arith.negf %874 : vector<4x128xf32>
    %876 = math.exp %875 : vector<4x128xf32>
    %cst_243 = arith.constant 1.000000e+00 : f32
    %877 = vector.broadcast %cst_243 : f32 to vector<4x128xf32>
    %878 = arith.addf %877, %876 : vector<4x128xf32>
    %879 = arith.divf %877, %878 : vector<4x128xf32>
    %880 = arith.mulf %871, %835 : vector<4x128xf32>
    %cst_244 = arith.constant 1.000000e+00 : f32
    %881 = vector.broadcast %cst_244 : f32 to vector<4x128xf32>
    %882 = arith.subf %881, %871 : vector<4x128xf32>
    %883 = arith.mulf %882, %858 : vector<4x128xf32>
    %884 = arith.addf %880, %883 : vector<4x128xf32>
    %cst_245 = arith.constant 0.000000e+00 : f32
    %885 = vector.broadcast %cst_245 : f32 to vector<4x128xf32>
    %886 = arith.cmpf ogt, %884, %885 : vector<4x128xf32>
    %887 = math.exp %884 : vector<4x128xf32>
    %cst_246 = arith.constant 1.000000e+00 : f32
    %888 = vector.broadcast %cst_246 : f32 to vector<4x128xf32>
    %889 = arith.subf %887, %888 : vector<4x128xf32>
    %cst_247 = arith.constant 1.67326319 : f32
    %890 = vector.broadcast %cst_247 : f32 to vector<4x128xf32>
    %891 = arith.mulf %890, %889 : vector<4x128xf32>
    %892 = arith.select %886, %884, %891 : vector<4x128xi1>, vector<4x128xf32>
    %cst_248 = arith.constant 1.05070102 : f32
    %893 = vector.broadcast %cst_248 : f32 to vector<4x128xf32>
    %894 = arith.mulf %893, %892 : vector<4x128xf32>
    %895 = arith.mulf %879, %894 : vector<4x128xf32>
    %cst_249 = arith.constant 1.000000e+00 : f32
    %896 = vector.broadcast %cst_249 : f32 to vector<4x128xf32>
    %897 = arith.subf %896, %879 : vector<4x128xf32>
    %898 = arith.mulf %897, %863 : vector<4x128xf32>
    %899 = arith.addf %895, %898 : vector<4x128xf32>
    %900 = vector.extract_strided_slice %899 {offsets = [0, 0], sizes = [2, 128], strides = [1, 1]} : vector<4x128xf32> to vector<2x128xf32>
    %c2_250 = arith.constant 2 : index
    %c0_251 = arith.constant 0 : index
    %901 = vector.load %arg10[%c2_250, %c0_251] : memref<16x256xf32, #tpu.memory_space<vmem>>, vector<2x128xf32>
    tpu.vector_store %arg10[%c2_250, %c0_251], %900 {strides = array<i32>} : memref<16x256xf32, #tpu.memory_space<vmem>>, vector<2x128xf32>,
    %902 = vector.extract_strided_slice %899 {offsets = [2, 0], sizes = [2, 128], strides = [1, 1]} : vector<4x128xf32> to vector<2x128xf32>
    %c12_252 = arith.constant 12 : index
    %c128_253 = arith.constant 128 : index
    %903 = vector.load %arg10[%c12_252, %c128_253] : memref<16x256xf32, #tpu.memory_space<vmem>>, vector<2x128xf32>
    tpu.vector_store %arg10[%c12_252, %c128_253], %902 {strides = array<i32>} : memref<16x256xf32, #tpu.memory_space<vmem>>, vector<2x128xf32>,
    %904 = vector.extract_strided_slice %796 {offsets = [4, 0], sizes = [2, 384], strides = [1, 1]} : vector<16x768xf32> to vector<2x384xf32>
    %905 = vector.extract_strided_slice %796 {offsets = [10, 384], sizes = [2, 384], strides = [1, 1]} : vector<16x768xf32> to vector<2x384xf32>
    %906 = tpu.concatenate %904, %905 in 0 : vector<2x384xf32>, vector<2x384xf32> -> vector<4x384xf32>
    %907 = vector.extract_strided_slice %906 {offsets = [0, 0], sizes = [4, 128], strides = [1, 1]} : vector<4x384xf32> to vector<4x128xf32>
    %908 = vector.extract_strided_slice %906 {offsets = [0, 128], sizes = [4, 128], strides = [1, 1]} : vector<4x384xf32> to vector<4x128xf32>
    %909 = vector.extract_strided_slice %906 {offsets = [0, 256], sizes = [4, 128], strides = [1, 1]} : vector<4x384xf32> to vector<4x128xf32>
    %910 = vector.extract_strided_slice %793 {offsets = [4, 0], sizes = [2, 128], strides = [1, 1]} : vector<16x256xf32> to vector<2x128xf32>
    %911 = vector.extract_strided_slice %793 {offsets = [10, 128], sizes = [2, 128], strides = [1, 1]} : vector<16x256xf32> to vector<2x128xf32>
    %912 = tpu.concatenate %910, %911 in 0 : vector<2x128xf32>, vector<2x128xf32> -> vector<4x128xf32>
    %913 = arith.mulf %884, %798 : vector<4x128xf32>
    %914 = arith.addf %908, %913 : vector<4x128xf32>
    %915 = arith.addf %914, %802 : vector<4x128xf32>
    %916 = arith.negf %915 : vector<4x128xf32>
    %917 = math.exp %916 : vector<4x128xf32>
    %cst_254 = arith.constant 1.000000e+00 : f32
    %918 = vector.broadcast %cst_254 : f32 to vector<4x128xf32>
    %919 = arith.addf %918, %917 : vector<4x128xf32>
    %920 = arith.divf %918, %919 : vector<4x128xf32>
    %921 = arith.mulf %884, %800 : vector<4x128xf32>
    %922 = arith.addf %909, %921 : vector<4x128xf32>
    %923 = arith.addf %922, %804 : vector<4x128xf32>
    %924 = arith.negf %923 : vector<4x128xf32>
    %925 = math.exp %924 : vector<4x128xf32>
    %cst_255 = arith.constant 1.000000e+00 : f32
    %926 = vector.broadcast %cst_255 : f32 to vector<4x128xf32>
    %927 = arith.addf %926, %925 : vector<4x128xf32>
    %928 = arith.divf %926, %927 : vector<4x128xf32>
    %929 = arith.mulf %920, %884 : vector<4x128xf32>
    %cst_256 = arith.constant 1.000000e+00 : f32
    %930 = vector.broadcast %cst_256 : f32 to vector<4x128xf32>
    %931 = arith.subf %930, %920 : vector<4x128xf32>
    %932 = arith.mulf %931, %907 : vector<4x128xf32>
    %933 = arith.addf %929, %932 : vector<4x128xf32>
    %cst_257 = arith.constant 0.000000e+00 : f32
    %934 = vector.broadcast %cst_257 : f32 to vector<4x128xf32>
    %935 = arith.cmpf ogt, %933, %934 : vector<4x128xf32>
    %936 = math.exp %933 : vector<4x128xf32>
    %cst_258 = arith.constant 1.000000e+00 : f32
    %937 = vector.broadcast %cst_258 : f32 to vector<4x128xf32>
    %938 = arith.subf %936, %937 : vector<4x128xf32>
    %cst_259 = arith.constant 1.67326319 : f32
    %939 = vector.broadcast %cst_259 : f32 to vector<4x128xf32>
    %940 = arith.mulf %939, %938 : vector<4x128xf32>
    %941 = arith.select %935, %933, %940 : vector<4x128xi1>, vector<4x128xf32>
    %cst_260 = arith.constant 1.05070102 : f32
    %942 = vector.broadcast %cst_260 : f32 to vector<4x128xf32>
    %943 = arith.mulf %942, %941 : vector<4x128xf32>
    %944 = arith.mulf %928, %943 : vector<4x128xf32>
    %cst_261 = arith.constant 1.000000e+00 : f32
    %945 = vector.broadcast %cst_261 : f32 to vector<4x128xf32>
    %946 = arith.subf %945, %928 : vector<4x128xf32>
    %947 = arith.mulf %946, %912 : vector<4x128xf32>
    %948 = arith.addf %944, %947 : vector<4x128xf32>
    %949 = vector.extract_strided_slice %948 {offsets = [0, 0], sizes = [2, 128], strides = [1, 1]} : vector<4x128xf32> to vector<2x128xf32>
    %c4_262 = arith.constant 4 : index
    %c0_263 = arith.constant 0 : index
    %950 = vector.load %arg10[%c4_262, %c0_263] : memref<16x256xf32, #tpu.memory_space<vmem>>, vector<2x128xf32>
    tpu.vector_store %arg10[%c4_262, %c0_263], %949 {strides = array<i32>} : memref<16x256xf32, #tpu.memory_space<vmem>>, vector<2x128xf32>,
    %951 = vector.extract_strided_slice %948 {offsets = [2, 0], sizes = [2, 128], strides = [1, 1]} : vector<4x128xf32> to vector<2x128xf32>
    %c10_264 = arith.constant 10 : index
    %c128_265 = arith.constant 128 : index
    %952 = vector.load %arg10[%c10_264, %c128_265] : memref<16x256xf32, #tpu.memory_space<vmem>>, vector<2x128xf32>
    tpu.vector_store %arg10[%c10_264, %c128_265], %951 {strides = array<i32>} : memref<16x256xf32, #tpu.memory_space<vmem>>, vector<2x128xf32>,
    %953 = vector.extract_strided_slice %796 {offsets = [6, 0], sizes = [2, 384], strides = [1, 1]} : vector<16x768xf32> to vector<2x384xf32>
    %954 = vector.extract_strided_slice %796 {offsets = [8, 384], sizes = [2, 384], strides = [1, 1]} : vector<16x768xf32> to vector<2x384xf32>
    %955 = tpu.concatenate %953, %954 in 0 : vector<2x384xf32>, vector<2x384xf32> -> vector<4x384xf32>
    %956 = vector.extract_strided_slice %955 {offsets = [0, 0], sizes = [4, 128], strides = [1, 1]} : vector<4x384xf32> to vector<4x128xf32>
    %957 = vector.extract_strided_slice %955 {offsets = [0, 128], sizes = [4, 128], strides = [1, 1]} : vector<4x384xf32> to vector<4x128xf32>
    %958 = vector.extract_strided_slice %955 {offsets = [0, 256], sizes = [4, 128], strides = [1, 1]} : vector<4x384xf32> to vector<4x128xf32>
    %959 = vector.extract_strided_slice %793 {offsets = [6, 0], sizes = [2, 128], strides = [1, 1]} : vector<16x256xf32> to vector<2x128xf32>
    %960 = vector.extract_strided_slice %793 {offsets = [8, 128], sizes = [2, 128], strides = [1, 1]} : vector<16x256xf32> to vector<2x128xf32>
    %961 = tpu.concatenate %959, %960 in 0 : vector<2x128xf32>, vector<2x128xf32> -> vector<4x128xf32>
    %962 = arith.mulf %933, %798 : vector<4x128xf32>
    %963 = arith.addf %957, %962 : vector<4x128xf32>
    %964 = arith.addf %963, %802 : vector<4x128xf32>
    %965 = arith.negf %964 : vector<4x128xf32>
    %966 = math.exp %965 : vector<4x128xf32>
    %cst_266 = arith.constant 1.000000e+00 : f32
    %967 = vector.broadcast %cst_266 : f32 to vector<4x128xf32>
    %968 = arith.addf %967, %966 : vector<4x128xf32>
    %969 = arith.divf %967, %968 : vector<4x128xf32>
    %970 = arith.mulf %933, %800 : vector<4x128xf32>
    %971 = arith.addf %958, %970 : vector<4x128xf32>
    %972 = arith.addf %971, %804 : vector<4x128xf32>
    %973 = arith.negf %972 : vector<4x128xf32>
    %974 = math.exp %973 : vector<4x128xf32>
    %cst_267 = arith.constant 1.000000e+00 : f32
    %975 = vector.broadcast %cst_267 : f32 to vector<4x128xf32>
    %976 = arith.addf %975, %974 : vector<4x128xf32>
    %977 = arith.divf %975, %976 : vector<4x128xf32>
    %978 = arith.mulf %969, %933 : vector<4x128xf32>
    %cst_268 = arith.constant 1.000000e+00 : f32
    %979 = vector.broadcast %cst_268 : f32 to vector<4x128xf32>
    %980 = arith.subf %979, %969 : vector<4x128xf32>
    %981 = arith.mulf %980, %956 : vector<4x128xf32>
    %982 = arith.addf %978, %981 : vector<4x128xf32>
    %cst_269 = arith.constant 0.000000e+00 : f32
    %983 = vector.broadcast %cst_269 : f32 to vector<4x128xf32>
    %984 = arith.cmpf ogt, %982, %983 : vector<4x128xf32>
    %985 = math.exp %982 : vector<4x128xf32>
    %cst_270 = arith.constant 1.000000e+00 : f32
    %986 = vector.broadcast %cst_270 : f32 to vector<4x128xf32>
    %987 = arith.subf %985, %986 : vector<4x128xf32>
    %cst_271 = arith.constant 1.67326319 : f32
    %988 = vector.broadcast %cst_271 : f32 to vector<4x128xf32>
    %989 = arith.mulf %988, %987 : vector<4x128xf32>
    %990 = arith.select %984, %982, %989 : vector<4x128xi1>, vector<4x128xf32>
    %cst_272 = arith.constant 1.05070102 : f32
    %991 = vector.broadcast %cst_272 : f32 to vector<4x128xf32>
    %992 = arith.mulf %991, %990 : vector<4x128xf32>
    %993 = arith.mulf %977, %992 : vector<4x128xf32>
    %cst_273 = arith.constant 1.000000e+00 : f32
    %994 = vector.broadcast %cst_273 : f32 to vector<4x128xf32>
    %995 = arith.subf %994, %977 : vector<4x128xf32>
    %996 = arith.mulf %995, %961 : vector<4x128xf32>
    %997 = arith.addf %993, %996 : vector<4x128xf32>
    %998 = vector.extract_strided_slice %997 {offsets = [0, 0], sizes = [2, 128], strides = [1, 1]} : vector<4x128xf32> to vector<2x128xf32>
    %c6_274 = arith.constant 6 : index
    %c0_275 = arith.constant 0 : index
    %999 = vector.load %arg10[%c6_274, %c0_275] : memref<16x256xf32, #tpu.memory_space<vmem>>, vector<2x128xf32>
    tpu.vector_store %arg10[%c6_274, %c0_275], %998 {strides = array<i32>} : memref<16x256xf32, #tpu.memory_space<vmem>>, vector<2x128xf32>,
    %1000 = vector.extract_strided_slice %997 {offsets = [2, 0], sizes = [2, 128], strides = [1, 1]} : vector<4x128xf32> to vector<2x128xf32>
    %c8_276 = arith.constant 8 : index
    %c128_277 = arith.constant 128 : index
    %1001 = vector.load %arg10[%c8_276, %c128_277] : memref<16x256xf32, #tpu.memory_space<vmem>>, vector<2x128xf32>
    tpu.vector_store %arg10[%c8_276, %c128_277], %1000 {strides = array<i32>} : memref<16x256xf32, #tpu.memory_space<vmem>>, vector<2x128xf32>,
    %1002 = vector.extract_strided_slice %796 {offsets = [8, 0], sizes = [2, 384], strides = [1, 1]} : vector<16x768xf32> to vector<2x384xf32>
    %1003 = vector.extract_strided_slice %796 {offsets = [6, 384], sizes = [2, 384], strides = [1, 1]} : vector<16x768xf32> to vector<2x384xf32>
    %1004 = tpu.concatenate %1002, %1003 in 0 : vector<2x384xf32>, vector<2x384xf32> -> vector<4x384xf32>
    %1005 = vector.extract_strided_slice %1004 {offsets = [0, 0], sizes = [4, 128], strides = [1, 1]} : vector<4x384xf32> to vector<4x128xf32>
    %1006 = vector.extract_strided_slice %1004 {offsets = [0, 128], sizes = [4, 128], strides = [1, 1]} : vector<4x384xf32> to vector<4x128xf32>
    %1007 = vector.extract_strided_slice %1004 {offsets = [0, 256], sizes = [4, 128], strides = [1, 1]} : vector<4x384xf32> to vector<4x128xf32>
    %1008 = vector.extract_strided_slice %793 {offsets = [8, 0], sizes = [2, 128], strides = [1, 1]} : vector<16x256xf32> to vector<2x128xf32>
    %1009 = vector.extract_strided_slice %793 {offsets = [6, 128], sizes = [2, 128], strides = [1, 1]} : vector<16x256xf32> to vector<2x128xf32>
    %1010 = tpu.concatenate %1008, %1009 in 0 : vector<2x128xf32>, vector<2x128xf32> -> vector<4x128xf32>
    %1011 = arith.mulf %982, %798 : vector<4x128xf32>
    %1012 = arith.addf %1006, %1011 : vector<4x128xf32>
    %1013 = arith.addf %1012, %802 : vector<4x128xf32>
    %1014 = arith.negf %1013 : vector<4x128xf32>
    %1015 = math.exp %1014 : vector<4x128xf32>
    %cst_278 = arith.constant 1.000000e+00 : f32
    %1016 = vector.broadcast %cst_278 : f32 to vector<4x128xf32>
    %1017 = arith.addf %1016, %1015 : vector<4x128xf32>
    %1018 = arith.divf %1016, %1017 : vector<4x128xf32>
    %1019 = arith.mulf %982, %800 : vector<4x128xf32>
    %1020 = arith.addf %1007, %1019 : vector<4x128xf32>
    %1021 = arith.addf %1020, %804 : vector<4x128xf32>
    %1022 = arith.negf %1021 : vector<4x128xf32>
    %1023 = math.exp %1022 : vector<4x128xf32>
    %cst_279 = arith.constant 1.000000e+00 : f32
    %1024 = vector.broadcast %cst_279 : f32 to vector<4x128xf32>
    %1025 = arith.addf %1024, %1023 : vector<4x128xf32>
    %1026 = arith.divf %1024, %1025 : vector<4x128xf32>
    %1027 = arith.mulf %1018, %982 : vector<4x128xf32>
    %cst_280 = arith.constant 1.000000e+00 : f32
    %1028 = vector.broadcast %cst_280 : f32 to vector<4x128xf32>
    %1029 = arith.subf %1028, %1018 : vector<4x128xf32>
    %1030 = arith.mulf %1029, %1005 : vector<4x128xf32>
    %1031 = arith.addf %1027, %1030 : vector<4x128xf32>
    %cst_281 = arith.constant 0.000000e+00 : f32
    %1032 = vector.broadcast %cst_281 : f32 to vector<4x128xf32>
    %1033 = arith.cmpf ogt, %1031, %1032 : vector<4x128xf32>
    %1034 = math.exp %1031 : vector<4x128xf32>
    %cst_282 = arith.constant 1.000000e+00 : f32
    %1035 = vector.broadcast %cst_282 : f32 to vector<4x128xf32>
    %1036 = arith.subf %1034, %1035 : vector<4x128xf32>
    %cst_283 = arith.constant 1.67326319 : f32
    %1037 = vector.broadcast %cst_283 : f32 to vector<4x128xf32>
    %1038 = arith.mulf %1037, %1036 : vector<4x128xf32>
    %1039 = arith.select %1033, %1031, %1038 : vector<4x128xi1>, vector<4x128xf32>
    %cst_284 = arith.constant 1.05070102 : f32
    %1040 = vector.broadcast %cst_284 : f32 to vector<4x128xf32>
    %1041 = arith.mulf %1040, %1039 : vector<4x128xf32>
    %1042 = arith.mulf %1026, %1041 : vector<4x128xf32>
    %cst_285 = arith.constant 1.000000e+00 : f32
    %1043 = vector.broadcast %cst_285 : f32 to vector<4x128xf32>
    %1044 = arith.subf %1043, %1026 : vector<4x128xf32>
    %1045 = arith.mulf %1044, %1010 : vector<4x128xf32>
    %1046 = arith.addf %1042, %1045 : vector<4x128xf32>
    %1047 = vector.extract_strided_slice %1046 {offsets = [0, 0], sizes = [2, 128], strides = [1, 1]} : vector<4x128xf32> to vector<2x128xf32>
    %c8_286 = arith.constant 8 : index
    %c0_287 = arith.constant 0 : index
    %1048 = vector.load %arg10[%c8_286, %c0_287] : memref<16x256xf32, #tpu.memory_space<vmem>>, vector<2x128xf32>
    tpu.vector_store %arg10[%c8_286, %c0_287], %1047 {strides = array<i32>} : memref<16x256xf32, #tpu.memory_space<vmem>>, vector<2x128xf32>,
    %1049 = vector.extract_strided_slice %1046 {offsets = [2, 0], sizes = [2, 128], strides = [1, 1]} : vector<4x128xf32> to vector<2x128xf32>
    %c6_288 = arith.constant 6 : index
    %c128_289 = arith.constant 128 : index
    %1050 = vector.load %arg10[%c6_288, %c128_289] : memref<16x256xf32, #tpu.memory_space<vmem>>, vector<2x128xf32>
    tpu.vector_store %arg10[%c6_288, %c128_289], %1049 {strides = array<i32>} : memref<16x256xf32, #tpu.memory_space<vmem>>, vector<2x128xf32>,
    %1051 = vector.extract_strided_slice %796 {offsets = [10, 0], sizes = [2, 384], strides = [1, 1]} : vector<16x768xf32> to vector<2x384xf32>
    %1052 = vector.extract_strided_slice %796 {offsets = [4, 384], sizes = [2, 384], strides = [1, 1]} : vector<16x768xf32> to vector<2x384xf32>
    %1053 = tpu.concatenate %1051, %1052 in 0 : vector<2x384xf32>, vector<2x384xf32> -> vector<4x384xf32>
    %1054 = vector.extract_strided_slice %1053 {offsets = [0, 0], sizes = [4, 128], strides = [1, 1]} : vector<4x384xf32> to vector<4x128xf32>
    %1055 = vector.extract_strided_slice %1053 {offsets = [0, 128], sizes = [4, 128], strides = [1, 1]} : vector<4x384xf32> to vector<4x128xf32>
    %1056 = vector.extract_strided_slice %1053 {offsets = [0, 256], sizes = [4, 128], strides = [1, 1]} : vector<4x384xf32> to vector<4x128xf32>
    %1057 = vector.extract_strided_slice %793 {offsets = [10, 0], sizes = [2, 128], strides = [1, 1]} : vector<16x256xf32> to vector<2x128xf32>
    %1058 = vector.extract_strided_slice %793 {offsets = [4, 128], sizes = [2, 128], strides = [1, 1]} : vector<16x256xf32> to vector<2x128xf32>
    %1059 = tpu.concatenate %1057, %1058 in 0 : vector<2x128xf32>, vector<2x128xf32> -> vector<4x128xf32>
    %1060 = arith.mulf %1031, %798 : vector<4x128xf32>
    %1061 = arith.addf %1055, %1060 : vector<4x128xf32>
    %1062 = arith.addf %1061, %802 : vector<4x128xf32>
    %1063 = arith.negf %1062 : vector<4x128xf32>
    %1064 = math.exp %1063 : vector<4x128xf32>
    %cst_290 = arith.constant 1.000000e+00 : f32
    %1065 = vector.broadcast %cst_290 : f32 to vector<4x128xf32>
    %1066 = arith.addf %1065, %1064 : vector<4x128xf32>
    %1067 = arith.divf %1065, %1066 : vector<4x128xf32>
    %1068 = arith.mulf %1031, %800 : vector<4x128xf32>
    %1069 = arith.addf %1056, %1068 : vector<4x128xf32>
    %1070 = arith.addf %1069, %804 : vector<4x128xf32>
    %1071 = arith.negf %1070 : vector<4x128xf32>
    %1072 = math.exp %1071 : vector<4x128xf32>
    %cst_291 = arith.constant 1.000000e+00 : f32
    %1073 = vector.broadcast %cst_291 : f32 to vector<4x128xf32>
    %1074 = arith.addf %1073, %1072 : vector<4x128xf32>
    %1075 = arith.divf %1073, %1074 : vector<4x128xf32>
    %1076 = arith.mulf %1067, %1031 : vector<4x128xf32>
    %cst_292 = arith.constant 1.000000e+00 : f32
    %1077 = vector.broadcast %cst_292 : f32 to vector<4x128xf32>
    %1078 = arith.subf %1077, %1067 : vector<4x128xf32>
    %1079 = arith.mulf %1078, %1054 : vector<4x128xf32>
    %1080 = arith.addf %1076, %1079 : vector<4x128xf32>
    %cst_293 = arith.constant 0.000000e+00 : f32
    %1081 = vector.broadcast %cst_293 : f32 to vector<4x128xf32>
    %1082 = arith.cmpf ogt, %1080, %1081 : vector<4x128xf32>
    %1083 = math.exp %1080 : vector<4x128xf32>
    %cst_294 = arith.constant 1.000000e+00 : f32
    %1084 = vector.broadcast %cst_294 : f32 to vector<4x128xf32>
    %1085 = arith.subf %1083, %1084 : vector<4x128xf32>
    %cst_295 = arith.constant 1.67326319 : f32
    %1086 = vector.broadcast %cst_295 : f32 to vector<4x128xf32>
    %1087 = arith.mulf %1086, %1085 : vector<4x128xf32>
    %1088 = arith.select %1082, %1080, %1087 : vector<4x128xi1>, vector<4x128xf32>
    %cst_296 = arith.constant 1.05070102 : f32
    %1089 = vector.broadcast %cst_296 : f32 to vector<4x128xf32>
    %1090 = arith.mulf %1089, %1088 : vector<4x128xf32>
    %1091 = arith.mulf %1075, %1090 : vector<4x128xf32>
    %cst_297 = arith.constant 1.000000e+00 : f32
    %1092 = vector.broadcast %cst_297 : f32 to vector<4x128xf32>
    %1093 = arith.subf %1092, %1075 : vector<4x128xf32>
    %1094 = arith.mulf %1093, %1059 : vector<4x128xf32>
    %1095 = arith.addf %1091, %1094 : vector<4x128xf32>
    %1096 = vector.extract_strided_slice %1095 {offsets = [0, 0], sizes = [2, 128], strides = [1, 1]} : vector<4x128xf32> to vector<2x128xf32>
    %c10_298 = arith.constant 10 : index
    %c0_299 = arith.constant 0 : index
    %1097 = vector.load %arg10[%c10_298, %c0_299] : memref<16x256xf32, #tpu.memory_space<vmem>>, vector<2x128xf32>
    tpu.vector_store %arg10[%c10_298, %c0_299], %1096 {strides = array<i32>} : memref<16x256xf32, #tpu.memory_space<vmem>>, vector<2x128xf32>,
    %1098 = vector.extract_strided_slice %1095 {offsets = [2, 0], sizes = [2, 128], strides = [1, 1]} : vector<4x128xf32> to vector<2x128xf32>
    %c4_300 = arith.constant 4 : index
    %c128_301 = arith.constant 128 : index
    %1099 = vector.load %arg10[%c4_300, %c128_301] : memref<16x256xf32, #tpu.memory_space<vmem>>, vector<2x128xf32>
    tpu.vector_store %arg10[%c4_300, %c128_301], %1098 {strides = array<i32>} : memref<16x256xf32, #tpu.memory_space<vmem>>, vector<2x128xf32>,
    %1100 = vector.extract_strided_slice %796 {offsets = [12, 0], sizes = [2, 384], strides = [1, 1]} : vector<16x768xf32> to vector<2x384xf32>
    %1101 = vector.extract_strided_slice %796 {offsets = [2, 384], sizes = [2, 384], strides = [1, 1]} : vector<16x768xf32> to vector<2x384xf32>
    %1102 = tpu.concatenate %1100, %1101 in 0 : vector<2x384xf32>, vector<2x384xf32> -> vector<4x384xf32>
    %1103 = vector.extract_strided_slice %1102 {offsets = [0, 0], sizes = [4, 128], strides = [1, 1]} : vector<4x384xf32> to vector<4x128xf32>
    %1104 = vector.extract_strided_slice %1102 {offsets = [0, 128], sizes = [4, 128], strides = [1, 1]} : vector<4x384xf32> to vector<4x128xf32>
    %1105 = vector.extract_strided_slice %1102 {offsets = [0, 256], sizes = [4, 128], strides = [1, 1]} : vector<4x384xf32> to vector<4x128xf32>
    %1106 = vector.extract_strided_slice %793 {offsets = [12, 0], sizes = [2, 128], strides = [1, 1]} : vector<16x256xf32> to vector<2x128xf32>
    %1107 = vector.extract_strided_slice %793 {offsets = [2, 128], sizes = [2, 128], strides = [1, 1]} : vector<16x256xf32> to vector<2x128xf32>
    %1108 = tpu.concatenate %1106, %1107 in 0 : vector<2x128xf32>, vector<2x128xf32> -> vector<4x128xf32>
    %1109 = arith.mulf %1080, %798 : vector<4x128xf32>
    %1110 = arith.addf %1104, %1109 : vector<4x128xf32>
    %1111 = arith.addf %1110, %802 : vector<4x128xf32>
    %1112 = arith.negf %1111 : vector<4x128xf32>
    %1113 = math.exp %1112 : vector<4x128xf32>
    %cst_302 = arith.constant 1.000000e+00 : f32
    %1114 = vector.broadcast %cst_302 : f32 to vector<4x128xf32>
    %1115 = arith.addf %1114, %1113 : vector<4x128xf32>
    %1116 = arith.divf %1114, %1115 : vector<4x128xf32>
    %1117 = arith.mulf %1080, %800 : vector<4x128xf32>
    %1118 = arith.addf %1105, %1117 : vector<4x128xf32>
    %1119 = arith.addf %1118, %804 : vector<4x128xf32>
    %1120 = arith.negf %1119 : vector<4x128xf32>
    %1121 = math.exp %1120 : vector<4x128xf32>
    %cst_303 = arith.constant 1.000000e+00 : f32
    %1122 = vector.broadcast %cst_303 : f32 to vector<4x128xf32>
    %1123 = arith.addf %1122, %1121 : vector<4x128xf32>
    %1124 = arith.divf %1122, %1123 : vector<4x128xf32>
    %1125 = arith.mulf %1116, %1080 : vector<4x128xf32>
    %cst_304 = arith.constant 1.000000e+00 : f32
    %1126 = vector.broadcast %cst_304 : f32 to vector<4x128xf32>
    %1127 = arith.subf %1126, %1116 : vector<4x128xf32>
    %1128 = arith.mulf %1127, %1103 : vector<4x128xf32>
    %1129 = arith.addf %1125, %1128 : vector<4x128xf32>
    %cst_305 = arith.constant 0.000000e+00 : f32
    %1130 = vector.broadcast %cst_305 : f32 to vector<4x128xf32>
    %1131 = arith.cmpf ogt, %1129, %1130 : vector<4x128xf32>
    %1132 = math.exp %1129 : vector<4x128xf32>
    %cst_306 = arith.constant 1.000000e+00 : f32
    %1133 = vector.broadcast %cst_306 : f32 to vector<4x128xf32>
    %1134 = arith.subf %1132, %1133 : vector<4x128xf32>
    %cst_307 = arith.constant 1.67326319 : f32
    %1135 = vector.broadcast %cst_307 : f32 to vector<4x128xf32>
    %1136 = arith.mulf %1135, %1134 : vector<4x128xf32>
    %1137 = arith.select %1131, %1129, %1136 : vector<4x128xi1>, vector<4x128xf32>
    %cst_308 = arith.constant 1.05070102 : f32
    %1138 = vector.broadcast %cst_308 : f32 to vector<4x128xf32>
    %1139 = arith.mulf %1138, %1137 : vector<4x128xf32>
    %1140 = arith.mulf %1124, %1139 : vector<4x128xf32>
    %cst_309 = arith.constant 1.000000e+00 : f32
    %1141 = vector.broadcast %cst_309 : f32 to vector<4x128xf32>
    %1142 = arith.subf %1141, %1124 : vector<4x128xf32>
    %1143 = arith.mulf %1142, %1108 : vector<4x128xf32>
    %1144 = arith.addf %1140, %1143 : vector<4x128xf32>
    %1145 = vector.extract_strided_slice %1144 {offsets = [0, 0], sizes = [2, 128], strides = [1, 1]} : vector<4x128xf32> to vector<2x128xf32>
    %c12_310 = arith.constant 12 : index
    %c0_311 = arith.constant 0 : index
    %1146 = vector.load %arg10[%c12_310, %c0_311] : memref<16x256xf32, #tpu.memory_space<vmem>>, vector<2x128xf32>
    tpu.vector_store %arg10[%c12_310, %c0_311], %1145 {strides = array<i32>} : memref<16x256xf32, #tpu.memory_space<vmem>>, vector<2x128xf32>,
    %1147 = vector.extract_strided_slice %1144 {offsets = [2, 0], sizes = [2, 128], strides = [1, 1]} : vector<4x128xf32> to vector<2x128xf32>
    %c2_312 = arith.constant 2 : index
    %c128_313 = arith.constant 128 : index
    %1148 = vector.load %arg10[%c2_312, %c128_313] : memref<16x256xf32, #tpu.memory_space<vmem>>, vector<2x128xf32>
    tpu.vector_store %arg10[%c2_312, %c128_313], %1147 {strides = array<i32>} : memref<16x256xf32, #tpu.memory_space<vmem>>, vector<2x128xf32>,
    %1149 = vector.extract_strided_slice %796 {offsets = [14, 0], sizes = [2, 384], strides = [1, 1]} : vector<16x768xf32> to vector<2x384xf32>
    %1150 = vector.extract_strided_slice %796 {offsets = [0, 384], sizes = [2, 384], strides = [1, 1]} : vector<16x768xf32> to vector<2x384xf32>
    %1151 = tpu.concatenate %1149, %1150 in 0 : vector<2x384xf32>, vector<2x384xf32> -> vector<4x384xf32>
    %1152 = vector.extract_strided_slice %1151 {offsets = [0, 0], sizes = [4, 128], strides = [1, 1]} : vector<4x384xf32> to vector<4x128xf32>
    %1153 = vector.extract_strided_slice %1151 {offsets = [0, 128], sizes = [4, 128], strides = [1, 1]} : vector<4x384xf32> to vector<4x128xf32>
    %1154 = vector.extract_strided_slice %1151 {offsets = [0, 256], sizes = [4, 128], strides = [1, 1]} : vector<4x384xf32> to vector<4x128xf32>
    %1155 = vector.extract_strided_slice %793 {offsets = [14, 0], sizes = [2, 128], strides = [1, 1]} : vector<16x256xf32> to vector<2x128xf32>
    %1156 = vector.extract_strided_slice %793 {offsets = [0, 128], sizes = [2, 128], strides = [1, 1]} : vector<16x256xf32> to vector<2x128xf32>
    %1157 = tpu.concatenate %1155, %1156 in 0 : vector<2x128xf32>, vector<2x128xf32> -> vector<4x128xf32>
    %1158 = arith.mulf %1129, %798 : vector<4x128xf32>
    %1159 = arith.addf %1153, %1158 : vector<4x128xf32>
    %1160 = arith.addf %1159, %802 : vector<4x128xf32>
    %1161 = arith.negf %1160 : vector<4x128xf32>
    %1162 = math.exp %1161 : vector<4x128xf32>
    %cst_314 = arith.constant 1.000000e+00 : f32
    %1163 = vector.broadcast %cst_314 : f32 to vector<4x128xf32>
    %1164 = arith.addf %1163, %1162 : vector<4x128xf32>
    %1165 = arith.divf %1163, %1164 : vector<4x128xf32>
    %1166 = arith.mulf %1129, %800 : vector<4x128xf32>
    %1167 = arith.addf %1154, %1166 : vector<4x128xf32>
    %1168 = arith.addf %1167, %804 : vector<4x128xf32>
    %1169 = arith.negf %1168 : vector<4x128xf32>
    %1170 = math.exp %1169 : vector<4x128xf32>
    %cst_315 = arith.constant 1.000000e+00 : f32
    %1171 = vector.broadcast %cst_315 : f32 to vector<4x128xf32>
    %1172 = arith.addf %1171, %1170 : vector<4x128xf32>
    %1173 = arith.divf %1171, %1172 : vector<4x128xf32>
    %1174 = arith.mulf %1165, %1129 : vector<4x128xf32>
    %cst_316 = arith.constant 1.000000e+00 : f32
    %1175 = vector.broadcast %cst_316 : f32 to vector<4x128xf32>
    %1176 = arith.subf %1175, %1165 : vector<4x128xf32>
    %1177 = arith.mulf %1176, %1152 : vector<4x128xf32>
    %1178 = arith.addf %1174, %1177 : vector<4x128xf32>
    %cst_317 = arith.constant 0.000000e+00 : f32
    %1179 = vector.broadcast %cst_317 : f32 to vector<4x128xf32>
    %1180 = arith.cmpf ogt, %1178, %1179 : vector<4x128xf32>
    %1181 = math.exp %1178 : vector<4x128xf32>
    %cst_318 = arith.constant 1.000000e+00 : f32
    %1182 = vector.broadcast %cst_318 : f32 to vector<4x128xf32>
    %1183 = arith.subf %1181, %1182 : vector<4x128xf32>
    %cst_319 = arith.constant 1.67326319 : f32
    %1184 = vector.broadcast %cst_319 : f32 to vector<4x128xf32>
    %1185 = arith.mulf %1184, %1183 : vector<4x128xf32>
    %1186 = arith.select %1180, %1178, %1185 : vector<4x128xi1>, vector<4x128xf32>
    %cst_320 = arith.constant 1.05070102 : f32
    %1187 = vector.broadcast %cst_320 : f32 to vector<4x128xf32>
    %1188 = arith.mulf %1187, %1186 : vector<4x128xf32>
    %1189 = arith.mulf %1173, %1188 : vector<4x128xf32>
    %cst_321 = arith.constant 1.000000e+00 : f32
    %1190 = vector.broadcast %cst_321 : f32 to vector<4x128xf32>
    %1191 = arith.subf %1190, %1173 : vector<4x128xf32>
    %1192 = arith.mulf %1191, %1157 : vector<4x128xf32>
    %1193 = arith.addf %1189, %1192 : vector<4x128xf32>
    %1194 = vector.extract_strided_slice %1193 {offsets = [0, 0], sizes = [2, 128], strides = [1, 1]} : vector<4x128xf32> to vector<2x128xf32>
    %c14_322 = arith.constant 14 : index
    %c0_323 = arith.constant 0 : index
    %1195 = vector.load %arg10[%c14_322, %c0_323] : memref<16x256xf32, #tpu.memory_space<vmem>>, vector<2x128xf32>
    tpu.vector_store %arg10[%c14_322, %c0_323], %1194 {strides = array<i32>} : memref<16x256xf32, #tpu.memory_space<vmem>>, vector<2x128xf32>,
    %1196 = vector.extract_strided_slice %1193 {offsets = [2, 0], sizes = [2, 128], strides = [1, 1]} : vector<4x128xf32> to vector<2x128xf32>
    %c0_324 = arith.constant 0 : index
    %c128_325 = arith.constant 128 : index
    %1197 = vector.load %arg10[%c0_324, %c128_325] : memref<16x256xf32, #tpu.memory_space<vmem>>, vector<2x128xf32>
    tpu.vector_store %arg10[%c0_324, %c128_325], %1196 {strides = array<i32>} : memref<16x256xf32, #tpu.memory_space<vmem>>, vector<2x128xf32>,
    %c0_326 = arith.constant 0 : index
    %c0_327 = arith.constant 0 : index
    %1198 = vector.load %arg10[%c0_326, %c0_327] : memref<16x256xf32, #tpu.memory_space<vmem>>, vector<16x256xf32>
    %1199 = arith.truncf %1198 : vector<16x256xf32> to vector<16x256xbf16>
    %c0_328 = arith.constant 0 : index
    %c0_329 = arith.constant 0 : index
    %1200 = vector.load %arg5[%c0_328, %c0_329] : memref<256x768xbf16, #tpu.memory_space<vmem>>, vector<256x768xbf16>
    %cst_330 = arith.constant dense<0.000000e+00> : vector<16x768xf32>
    %1201 = tpu.matmul %1199, %1200, %cst_330 {dimension_numbers = #tpu.dot_dimension_numbers<[1], [0], [0], [1], [0, 0, 1, 1], [], []>} : vector<16x256xbf16>, vector<256x768xbf16>, vector<16x768xf32> -> vector<16x768xf32>
    %c12_331 = arith.constant 12 : index
    %c0_332 = arith.constant 0 : index
    %c0_333 = arith.constant 0 : index
    %1202 = vector.load %arg6[%c12_331, %c0_332, %c0_333] : memref<16x4x128xf32, #tpu.memory_space<vmem>>, vector<1x4x128xf32>
    %1203 = vector.shape_cast %1202 : vector<1x4x128xf32> to vector<4x128xf32>
    %c13 = arith.constant 13 : index
    %c0_334 = arith.constant 0 : index
    %c0_335 = arith.constant 0 : index
    %1204 = vector.load %arg6[%c13, %c0_334, %c0_335] : memref<16x4x128xf32, #tpu.memory_space<vmem>>, vector<1x4x128xf32>
    %1205 = vector.shape_cast %1204 : vector<1x4x128xf32> to vector<4x128xf32>
    %c14_336 = arith.constant 14 : index
    %c0_337 = arith.constant 0 : index
    %c0_338 = arith.constant 0 : index
    %1206 = vector.load %arg6[%c14_336, %c0_337, %c0_338] : memref<16x4x128xf32, #tpu.memory_space<vmem>>, vector<1x4x128xf32>
    %1207 = vector.shape_cast %1206 : vector<1x4x128xf32> to vector<4x128xf32>
    %c15 = arith.constant 15 : index
    %c0_339 = arith.constant 0 : index
    %c0_340 = arith.constant 0 : index
    %1208 = vector.load %arg6[%c15, %c0_339, %c0_340] : memref<16x4x128xf32, #tpu.memory_space<vmem>>, vector<1x4x128xf32>
    %1209 = vector.shape_cast %1208 : vector<1x4x128xf32> to vector<4x128xf32>
    %cst_341 = arith.constant 0.000000e+00 : f32
    %1210 = vector.broadcast %cst_341 : f32 to vector<4x128xf32>
    %cst_342 = arith.constant 0.000000e+00 : f32
    %1211 = vector.broadcast %cst_342 : f32 to vector<2x128xf32>
    %cst_343 = arith.constant 0.000000e+00 : f32
    %1212 = vector.broadcast %cst_343 : f32 to vector<2x128xf32>
    %1213 = vector.extract_strided_slice %1201 {offsets = [0, 0], sizes = [2, 384], strides = [1, 1]} : vector<16x768xf32> to vector<2x384xf32>
    %1214 = vector.extract_strided_slice %1201 {offsets = [14, 384], sizes = [2, 384], strides = [1, 1]} : vector<16x768xf32> to vector<2x384xf32>
    %1215 = tpu.concatenate %1213, %1214 in 0 : vector<2x384xf32>, vector<2x384xf32> -> vector<4x384xf32>
    %1216 = vector.extract_strided_slice %1215 {offsets = [0, 0], sizes = [4, 128], strides = [1, 1]} : vector<4x384xf32> to vector<4x128xf32>
    %1217 = vector.extract_strided_slice %1215 {offsets = [0, 128], sizes = [4, 128], strides = [1, 1]} : vector<4x384xf32> to vector<4x128xf32>
    %1218 = vector.extract_strided_slice %1215 {offsets = [0, 256], sizes = [4, 128], strides = [1, 1]} : vector<4x384xf32> to vector<4x128xf32>
    %1219 = vector.extract_strided_slice %1198 {offsets = [0, 0], sizes = [2, 128], strides = [1, 1]} : vector<16x256xf32> to vector<2x128xf32>
    %1220 = vector.extract_strided_slice %1198 {offsets = [14, 128], sizes = [2, 128], strides = [1, 1]} : vector<16x256xf32> to vector<2x128xf32>
    %1221 = tpu.concatenate %1219, %1220 in 0 : vector<2x128xf32>, vector<2x128xf32> -> vector<4x128xf32>
    %1222 = arith.mulf %1210, %1203 : vector<4x128xf32>
    %1223 = arith.addf %1217, %1222 : vector<4x128xf32>
    %1224 = arith.addf %1223, %1207 : vector<4x128xf32>
    %1225 = arith.negf %1224 : vector<4x128xf32>
    %1226 = math.exp %1225 : vector<4x128xf32>
    %cst_344 = arith.constant 1.000000e+00 : f32
    %1227 = vector.broadcast %cst_344 : f32 to vector<4x128xf32>
    %1228 = arith.addf %1227, %1226 : vector<4x128xf32>
    %1229 = arith.divf %1227, %1228 : vector<4x128xf32>
    %1230 = arith.mulf %1210, %1205 : vector<4x128xf32>
    %1231 = arith.addf %1218, %1230 : vector<4x128xf32>
    %1232 = arith.addf %1231, %1209 : vector<4x128xf32>
    %1233 = arith.negf %1232 : vector<4x128xf32>
    %1234 = math.exp %1233 : vector<4x128xf32>
    %cst_345 = arith.constant 1.000000e+00 : f32
    %1235 = vector.broadcast %cst_345 : f32 to vector<4x128xf32>
    %1236 = arith.addf %1235, %1234 : vector<4x128xf32>
    %1237 = arith.divf %1235, %1236 : vector<4x128xf32>
    %1238 = arith.mulf %1229, %1210 : vector<4x128xf32>
    %cst_346 = arith.constant 1.000000e+00 : f32
    %1239 = vector.broadcast %cst_346 : f32 to vector<4x128xf32>
    %1240 = arith.subf %1239, %1229 : vector<4x128xf32>
    %1241 = arith.mulf %1240, %1216 : vector<4x128xf32>
    %1242 = arith.addf %1238, %1241 : vector<4x128xf32>
    %cst_347 = arith.constant 0.000000e+00 : f32
    %1243 = vector.broadcast %cst_347 : f32 to vector<4x128xf32>
    %1244 = arith.cmpf ogt, %1242, %1243 : vector<4x128xf32>
    %1245 = math.exp %1242 : vector<4x128xf32>
    %cst_348 = arith.constant 1.000000e+00 : f32
    %1246 = vector.broadcast %cst_348 : f32 to vector<4x128xf32>
    %1247 = arith.subf %1245, %1246 : vector<4x128xf32>
    %cst_349 = arith.constant 1.67326319 : f32
    %1248 = vector.broadcast %cst_349 : f32 to vector<4x128xf32>
    %1249 = arith.mulf %1248, %1247 : vector<4x128xf32>
    %1250 = arith.select %1244, %1242, %1249 : vector<4x128xi1>, vector<4x128xf32>
    %cst_350 = arith.constant 1.05070102 : f32
    %1251 = vector.broadcast %cst_350 : f32 to vector<4x128xf32>
    %1252 = arith.mulf %1251, %1250 : vector<4x128xf32>
    %1253 = arith.mulf %1237, %1252 : vector<4x128xf32>
    %cst_351 = arith.constant 1.000000e+00 : f32
    %1254 = vector.broadcast %cst_351 : f32 to vector<4x128xf32>
    %1255 = arith.subf %1254, %1237 : vector<4x128xf32>
    %1256 = arith.mulf %1255, %1221 : vector<4x128xf32>
    %1257 = arith.addf %1253, %1256 : vector<4x128xf32>
    %1258 = vector.extract_strided_slice %1257 {offsets = [0, 0], sizes = [2, 128], strides = [1, 1]} : vector<4x128xf32> to vector<2x128xf32>
    %1259 = arith.addf %1211, %1258 : vector<2x128xf32>
    %1260 = vector.extract_strided_slice %1257 {offsets = [2, 0], sizes = [2, 128], strides = [1, 1]} : vector<4x128xf32> to vector<2x128xf32>
    %1261 = arith.addf %1212, %1260 : vector<2x128xf32>
    %1262 = vector.extract_strided_slice %1201 {offsets = [2, 0], sizes = [2, 384], strides = [1, 1]} : vector<16x768xf32> to vector<2x384xf32>
    %1263 = vector.extract_strided_slice %1201 {offsets = [12, 384], sizes = [2, 384], strides = [1, 1]} : vector<16x768xf32> to vector<2x384xf32>
    %1264 = tpu.concatenate %1262, %1263 in 0 : vector<2x384xf32>, vector<2x384xf32> -> vector<4x384xf32>
    %1265 = vector.extract_strided_slice %1264 {offsets = [0, 0], sizes = [4, 128], strides = [1, 1]} : vector<4x384xf32> to vector<4x128xf32>
    %1266 = vector.extract_strided_slice %1264 {offsets = [0, 128], sizes = [4, 128], strides = [1, 1]} : vector<4x384xf32> to vector<4x128xf32>
    %1267 = vector.extract_strided_slice %1264 {offsets = [0, 256], sizes = [4, 128], strides = [1, 1]} : vector<4x384xf32> to vector<4x128xf32>
    %1268 = vector.extract_strided_slice %1198 {offsets = [2, 0], sizes = [2, 128], strides = [1, 1]} : vector<16x256xf32> to vector<2x128xf32>
    %1269 = vector.extract_strided_slice %1198 {offsets = [12, 128], sizes = [2, 128], strides = [1, 1]} : vector<16x256xf32> to vector<2x128xf32>
    %1270 = tpu.concatenate %1268, %1269 in 0 : vector<2x128xf32>, vector<2x128xf32> -> vector<4x128xf32>
    %1271 = arith.mulf %1242, %1203 : vector<4x128xf32>
    %1272 = arith.addf %1266, %1271 : vector<4x128xf32>
    %1273 = arith.addf %1272, %1207 : vector<4x128xf32>
    %1274 = arith.negf %1273 : vector<4x128xf32>
    %1275 = math.exp %1274 : vector<4x128xf32>
    %cst_352 = arith.constant 1.000000e+00 : f32
    %1276 = vector.broadcast %cst_352 : f32 to vector<4x128xf32>
    %1277 = arith.addf %1276, %1275 : vector<4x128xf32>
    %1278 = arith.divf %1276, %1277 : vector<4x128xf32>
    %1279 = arith.mulf %1242, %1205 : vector<4x128xf32>
    %1280 = arith.addf %1267, %1279 : vector<4x128xf32>
    %1281 = arith.addf %1280, %1209 : vector<4x128xf32>
    %1282 = arith.negf %1281 : vector<4x128xf32>
    %1283 = math.exp %1282 : vector<4x128xf32>
    %cst_353 = arith.constant 1.000000e+00 : f32
    %1284 = vector.broadcast %cst_353 : f32 to vector<4x128xf32>
    %1285 = arith.addf %1284, %1283 : vector<4x128xf32>
    %1286 = arith.divf %1284, %1285 : vector<4x128xf32>
    %1287 = arith.mulf %1278, %1242 : vector<4x128xf32>
    %cst_354 = arith.constant 1.000000e+00 : f32
    %1288 = vector.broadcast %cst_354 : f32 to vector<4x128xf32>
    %1289 = arith.subf %1288, %1278 : vector<4x128xf32>
    %1290 = arith.mulf %1289, %1265 : vector<4x128xf32>
    %1291 = arith.addf %1287, %1290 : vector<4x128xf32>
    %cst_355 = arith.constant 0.000000e+00 : f32
    %1292 = vector.broadcast %cst_355 : f32 to vector<4x128xf32>
    %1293 = arith.cmpf ogt, %1291, %1292 : vector<4x128xf32>
    %1294 = math.exp %1291 : vector<4x128xf32>
    %cst_356 = arith.constant 1.000000e+00 : f32
    %1295 = vector.broadcast %cst_356 : f32 to vector<4x128xf32>
    %1296 = arith.subf %1294, %1295 : vector<4x128xf32>
    %cst_357 = arith.constant 1.67326319 : f32
    %1297 = vector.broadcast %cst_357 : f32 to vector<4x128xf32>
    %1298 = arith.mulf %1297, %1296 : vector<4x128xf32>
    %1299 = arith.select %1293, %1291, %1298 : vector<4x128xi1>, vector<4x128xf32>
    %cst_358 = arith.constant 1.05070102 : f32
    %1300 = vector.broadcast %cst_358 : f32 to vector<4x128xf32>
    %1301 = arith.mulf %1300, %1299 : vector<4x128xf32>
    %1302 = arith.mulf %1286, %1301 : vector<4x128xf32>
    %cst_359 = arith.constant 1.000000e+00 : f32
    %1303 = vector.broadcast %cst_359 : f32 to vector<4x128xf32>
    %1304 = arith.subf %1303, %1286 : vector<4x128xf32>
    %1305 = arith.mulf %1304, %1270 : vector<4x128xf32>
    %1306 = arith.addf %1302, %1305 : vector<4x128xf32>
    %1307 = vector.extract_strided_slice %1306 {offsets = [0, 0], sizes = [2, 128], strides = [1, 1]} : vector<4x128xf32> to vector<2x128xf32>
    %1308 = arith.addf %1259, %1307 : vector<2x128xf32>
    %1309 = vector.extract_strided_slice %1306 {offsets = [2, 0], sizes = [2, 128], strides = [1, 1]} : vector<4x128xf32> to vector<2x128xf32>
    %1310 = arith.addf %1261, %1309 : vector<2x128xf32>
    %1311 = vector.extract_strided_slice %1201 {offsets = [4, 0], sizes = [2, 384], strides = [1, 1]} : vector<16x768xf32> to vector<2x384xf32>
    %1312 = vector.extract_strided_slice %1201 {offsets = [10, 384], sizes = [2, 384], strides = [1, 1]} : vector<16x768xf32> to vector<2x384xf32>
    %1313 = tpu.concatenate %1311, %1312 in 0 : vector<2x384xf32>, vector<2x384xf32> -> vector<4x384xf32>
    %1314 = vector.extract_strided_slice %1313 {offsets = [0, 0], sizes = [4, 128], strides = [1, 1]} : vector<4x384xf32> to vector<4x128xf32>
    %1315 = vector.extract_strided_slice %1313 {offsets = [0, 128], sizes = [4, 128], strides = [1, 1]} : vector<4x384xf32> to vector<4x128xf32>
    %1316 = vector.extract_strided_slice %1313 {offsets = [0, 256], sizes = [4, 128], strides = [1, 1]} : vector<4x384xf32> to vector<4x128xf32>
    %1317 = vector.extract_strided_slice %1198 {offsets = [4, 0], sizes = [2, 128], strides = [1, 1]} : vector<16x256xf32> to vector<2x128xf32>
    %1318 = vector.extract_strided_slice %1198 {offsets = [10, 128], sizes = [2, 128], strides = [1, 1]} : vector<16x256xf32> to vector<2x128xf32>
    %1319 = tpu.concatenate %1317, %1318 in 0 : vector<2x128xf32>, vector<2x128xf32> -> vector<4x128xf32>
    %1320 = arith.mulf %1291, %1203 : vector<4x128xf32>
    %1321 = arith.addf %1315, %1320 : vector<4x128xf32>
    %1322 = arith.addf %1321, %1207 : vector<4x128xf32>
    %1323 = arith.negf %1322 : vector<4x128xf32>
    %1324 = math.exp %1323 : vector<4x128xf32>
    %cst_360 = arith.constant 1.000000e+00 : f32
    %1325 = vector.broadcast %cst_360 : f32 to vector<4x128xf32>
    %1326 = arith.addf %1325, %1324 : vector<4x128xf32>
    %1327 = arith.divf %1325, %1326 : vector<4x128xf32>
    %1328 = arith.mulf %1291, %1205 : vector<4x128xf32>
    %1329 = arith.addf %1316, %1328 : vector<4x128xf32>
    %1330 = arith.addf %1329, %1209 : vector<4x128xf32>
    %1331 = arith.negf %1330 : vector<4x128xf32>
    %1332 = math.exp %1331 : vector<4x128xf32>
    %cst_361 = arith.constant 1.000000e+00 : f32
    %1333 = vector.broadcast %cst_361 : f32 to vector<4x128xf32>
    %1334 = arith.addf %1333, %1332 : vector<4x128xf32>
    %1335 = arith.divf %1333, %1334 : vector<4x128xf32>
    %1336 = arith.mulf %1327, %1291 : vector<4x128xf32>
    %cst_362 = arith.constant 1.000000e+00 : f32
    %1337 = vector.broadcast %cst_362 : f32 to vector<4x128xf32>
    %1338 = arith.subf %1337, %1327 : vector<4x128xf32>
    %1339 = arith.mulf %1338, %1314 : vector<4x128xf32>
    %1340 = arith.addf %1336, %1339 : vector<4x128xf32>
    %cst_363 = arith.constant 0.000000e+00 : f32
    %1341 = vector.broadcast %cst_363 : f32 to vector<4x128xf32>
    %1342 = arith.cmpf ogt, %1340, %1341 : vector<4x128xf32>
    %1343 = math.exp %1340 : vector<4x128xf32>
    %cst_364 = arith.constant 1.000000e+00 : f32
    %1344 = vector.broadcast %cst_364 : f32 to vector<4x128xf32>
    %1345 = arith.subf %1343, %1344 : vector<4x128xf32>
    %cst_365 = arith.constant 1.67326319 : f32
    %1346 = vector.broadcast %cst_365 : f32 to vector<4x128xf32>
    %1347 = arith.mulf %1346, %1345 : vector<4x128xf32>
    %1348 = arith.select %1342, %1340, %1347 : vector<4x128xi1>, vector<4x128xf32>
    %cst_366 = arith.constant 1.05070102 : f32
    %1349 = vector.broadcast %cst_366 : f32 to vector<4x128xf32>
    %1350 = arith.mulf %1349, %1348 : vector<4x128xf32>
    %1351 = arith.mulf %1335, %1350 : vector<4x128xf32>
    %cst_367 = arith.constant 1.000000e+00 : f32
    %1352 = vector.broadcast %cst_367 : f32 to vector<4x128xf32>
    %1353 = arith.subf %1352, %1335 : vector<4x128xf32>
    %1354 = arith.mulf %1353, %1319 : vector<4x128xf32>
    %1355 = arith.addf %1351, %1354 : vector<4x128xf32>
    %1356 = vector.extract_strided_slice %1355 {offsets = [0, 0], sizes = [2, 128], strides = [1, 1]} : vector<4x128xf32> to vector<2x128xf32>
    %1357 = arith.addf %1308, %1356 : vector<2x128xf32>
    %1358 = vector.extract_strided_slice %1355 {offsets = [2, 0], sizes = [2, 128], strides = [1, 1]} : vector<4x128xf32> to vector<2x128xf32>
    %1359 = arith.addf %1310, %1358 : vector<2x128xf32>
    %1360 = vector.extract_strided_slice %1201 {offsets = [6, 0], sizes = [2, 384], strides = [1, 1]} : vector<16x768xf32> to vector<2x384xf32>
    %1361 = vector.extract_strided_slice %1201 {offsets = [8, 384], sizes = [2, 384], strides = [1, 1]} : vector<16x768xf32> to vector<2x384xf32>
    %1362 = tpu.concatenate %1360, %1361 in 0 : vector<2x384xf32>, vector<2x384xf32> -> vector<4x384xf32>
    %1363 = vector.extract_strided_slice %1362 {offsets = [0, 0], sizes = [4, 128], strides = [1, 1]} : vector<4x384xf32> to vector<4x128xf32>
    %1364 = vector.extract_strided_slice %1362 {offsets = [0, 128], sizes = [4, 128], strides = [1, 1]} : vector<4x384xf32> to vector<4x128xf32>
    %1365 = vector.extract_strided_slice %1362 {offsets = [0, 256], sizes = [4, 128], strides = [1, 1]} : vector<4x384xf32> to vector<4x128xf32>
    %1366 = vector.extract_strided_slice %1198 {offsets = [6, 0], sizes = [2, 128], strides = [1, 1]} : vector<16x256xf32> to vector<2x128xf32>
    %1367 = vector.extract_strided_slice %1198 {offsets = [8, 128], sizes = [2, 128], strides = [1, 1]} : vector<16x256xf32> to vector<2x128xf32>
    %1368 = tpu.concatenate %1366, %1367 in 0 : vector<2x128xf32>, vector<2x128xf32> -> vector<4x128xf32>
    %1369 = arith.mulf %1340, %1203 : vector<4x128xf32>
    %1370 = arith.addf %1364, %1369 : vector<4x128xf32>
    %1371 = arith.addf %1370, %1207 : vector<4x128xf32>
    %1372 = arith.negf %1371 : vector<4x128xf32>
    %1373 = math.exp %1372 : vector<4x128xf32>
    %cst_368 = arith.constant 1.000000e+00 : f32
    %1374 = vector.broadcast %cst_368 : f32 to vector<4x128xf32>
    %1375 = arith.addf %1374, %1373 : vector<4x128xf32>
    %1376 = arith.divf %1374, %1375 : vector<4x128xf32>
    %1377 = arith.mulf %1340, %1205 : vector<4x128xf32>
    %1378 = arith.addf %1365, %1377 : vector<4x128xf32>
    %1379 = arith.addf %1378, %1209 : vector<4x128xf32>
    %1380 = arith.negf %1379 : vector<4x128xf32>
    %1381 = math.exp %1380 : vector<4x128xf32>
    %cst_369 = arith.constant 1.000000e+00 : f32
    %1382 = vector.broadcast %cst_369 : f32 to vector<4x128xf32>
    %1383 = arith.addf %1382, %1381 : vector<4x128xf32>
    %1384 = arith.divf %1382, %1383 : vector<4x128xf32>
    %1385 = arith.mulf %1376, %1340 : vector<4x128xf32>
    %cst_370 = arith.constant 1.000000e+00 : f32
    %1386 = vector.broadcast %cst_370 : f32 to vector<4x128xf32>
    %1387 = arith.subf %1386, %1376 : vector<4x128xf32>
    %1388 = arith.mulf %1387, %1363 : vector<4x128xf32>
    %1389 = arith.addf %1385, %1388 : vector<4x128xf32>
    %cst_371 = arith.constant 0.000000e+00 : f32
    %1390 = vector.broadcast %cst_371 : f32 to vector<4x128xf32>
    %1391 = arith.cmpf ogt, %1389, %1390 : vector<4x128xf32>
    %1392 = math.exp %1389 : vector<4x128xf32>
    %cst_372 = arith.constant 1.000000e+00 : f32
    %1393 = vector.broadcast %cst_372 : f32 to vector<4x128xf32>
    %1394 = arith.subf %1392, %1393 : vector<4x128xf32>
    %cst_373 = arith.constant 1.67326319 : f32
    %1395 = vector.broadcast %cst_373 : f32 to vector<4x128xf32>
    %1396 = arith.mulf %1395, %1394 : vector<4x128xf32>
    %1397 = arith.select %1391, %1389, %1396 : vector<4x128xi1>, vector<4x128xf32>
    %cst_374 = arith.constant 1.05070102 : f32
    %1398 = vector.broadcast %cst_374 : f32 to vector<4x128xf32>
    %1399 = arith.mulf %1398, %1397 : vector<4x128xf32>
    %1400 = arith.mulf %1384, %1399 : vector<4x128xf32>
    %cst_375 = arith.constant 1.000000e+00 : f32
    %1401 = vector.broadcast %cst_375 : f32 to vector<4x128xf32>
    %1402 = arith.subf %1401, %1384 : vector<4x128xf32>
    %1403 = arith.mulf %1402, %1368 : vector<4x128xf32>
    %1404 = arith.addf %1400, %1403 : vector<4x128xf32>
    %1405 = vector.extract_strided_slice %1404 {offsets = [0, 0], sizes = [2, 128], strides = [1, 1]} : vector<4x128xf32> to vector<2x128xf32>
    %1406 = arith.addf %1357, %1405 : vector<2x128xf32>
    %1407 = vector.extract_strided_slice %1404 {offsets = [2, 0], sizes = [2, 128], strides = [1, 1]} : vector<4x128xf32> to vector<2x128xf32>
    %1408 = arith.addf %1359, %1407 : vector<2x128xf32>
    %1409 = vector.extract_strided_slice %1201 {offsets = [8, 0], sizes = [2, 384], strides = [1, 1]} : vector<16x768xf32> to vector<2x384xf32>
    %1410 = vector.extract_strided_slice %1201 {offsets = [6, 384], sizes = [2, 384], strides = [1, 1]} : vector<16x768xf32> to vector<2x384xf32>
    %1411 = tpu.concatenate %1409, %1410 in 0 : vector<2x384xf32>, vector<2x384xf32> -> vector<4x384xf32>
    %1412 = vector.extract_strided_slice %1411 {offsets = [0, 0], sizes = [4, 128], strides = [1, 1]} : vector<4x384xf32> to vector<4x128xf32>
    %1413 = vector.extract_strided_slice %1411 {offsets = [0, 128], sizes = [4, 128], strides = [1, 1]} : vector<4x384xf32> to vector<4x128xf32>
    %1414 = vector.extract_strided_slice %1411 {offsets = [0, 256], sizes = [4, 128], strides = [1, 1]} : vector<4x384xf32> to vector<4x128xf32>
    %1415 = vector.extract_strided_slice %1198 {offsets = [8, 0], sizes = [2, 128], strides = [1, 1]} : vector<16x256xf32> to vector<2x128xf32>
    %1416 = vector.extract_strided_slice %1198 {offsets = [6, 128], sizes = [2, 128], strides = [1, 1]} : vector<16x256xf32> to vector<2x128xf32>
    %1417 = tpu.concatenate %1415, %1416 in 0 : vector<2x128xf32>, vector<2x128xf32> -> vector<4x128xf32>
    %1418 = arith.mulf %1389, %1203 : vector<4x128xf32>
    %1419 = arith.addf %1413, %1418 : vector<4x128xf32>
    %1420 = arith.addf %1419, %1207 : vector<4x128xf32>
    %1421 = arith.negf %1420 : vector<4x128xf32>
    %1422 = math.exp %1421 : vector<4x128xf32>
    %cst_376 = arith.constant 1.000000e+00 : f32
    %1423 = vector.broadcast %cst_376 : f32 to vector<4x128xf32>
    %1424 = arith.addf %1423, %1422 : vector<4x128xf32>
    %1425 = arith.divf %1423, %1424 : vector<4x128xf32>
    %1426 = arith.mulf %1389, %1205 : vector<4x128xf32>
    %1427 = arith.addf %1414, %1426 : vector<4x128xf32>
    %1428 = arith.addf %1427, %1209 : vector<4x128xf32>
    %1429 = arith.negf %1428 : vector<4x128xf32>
    %1430 = math.exp %1429 : vector<4x128xf32>
    %cst_377 = arith.constant 1.000000e+00 : f32
    %1431 = vector.broadcast %cst_377 : f32 to vector<4x128xf32>
    %1432 = arith.addf %1431, %1430 : vector<4x128xf32>
    %1433 = arith.divf %1431, %1432 : vector<4x128xf32>
    %1434 = arith.mulf %1425, %1389 : vector<4x128xf32>
    %cst_378 = arith.constant 1.000000e+00 : f32
    %1435 = vector.broadcast %cst_378 : f32 to vector<4x128xf32>
    %1436 = arith.subf %1435, %1425 : vector<4x128xf32>
    %1437 = arith.mulf %1436, %1412 : vector<4x128xf32>
    %1438 = arith.addf %1434, %1437 : vector<4x128xf32>
    %cst_379 = arith.constant 0.000000e+00 : f32
    %1439 = vector.broadcast %cst_379 : f32 to vector<4x128xf32>
    %1440 = arith.cmpf ogt, %1438, %1439 : vector<4x128xf32>
    %1441 = math.exp %1438 : vector<4x128xf32>
    %cst_380 = arith.constant 1.000000e+00 : f32
    %1442 = vector.broadcast %cst_380 : f32 to vector<4x128xf32>
    %1443 = arith.subf %1441, %1442 : vector<4x128xf32>
    %cst_381 = arith.constant 1.67326319 : f32
    %1444 = vector.broadcast %cst_381 : f32 to vector<4x128xf32>
    %1445 = arith.mulf %1444, %1443 : vector<4x128xf32>
    %1446 = arith.select %1440, %1438, %1445 : vector<4x128xi1>, vector<4x128xf32>
    %cst_382 = arith.constant 1.05070102 : f32
    %1447 = vector.broadcast %cst_382 : f32 to vector<4x128xf32>
    %1448 = arith.mulf %1447, %1446 : vector<4x128xf32>
    %1449 = arith.mulf %1433, %1448 : vector<4x128xf32>
    %cst_383 = arith.constant 1.000000e+00 : f32
    %1450 = vector.broadcast %cst_383 : f32 to vector<4x128xf32>
    %1451 = arith.subf %1450, %1433 : vector<4x128xf32>
    %1452 = arith.mulf %1451, %1417 : vector<4x128xf32>
    %1453 = arith.addf %1449, %1452 : vector<4x128xf32>
    %1454 = vector.extract_strided_slice %1453 {offsets = [0, 0], sizes = [2, 128], strides = [1, 1]} : vector<4x128xf32> to vector<2x128xf32>
    %1455 = arith.addf %1406, %1454 : vector<2x128xf32>
    %1456 = vector.extract_strided_slice %1453 {offsets = [2, 0], sizes = [2, 128], strides = [1, 1]} : vector<4x128xf32> to vector<2x128xf32>
    %1457 = arith.addf %1408, %1456 : vector<2x128xf32>
    %1458 = vector.extract_strided_slice %1201 {offsets = [10, 0], sizes = [2, 384], strides = [1, 1]} : vector<16x768xf32> to vector<2x384xf32>
    %1459 = vector.extract_strided_slice %1201 {offsets = [4, 384], sizes = [2, 384], strides = [1, 1]} : vector<16x768xf32> to vector<2x384xf32>
    %1460 = tpu.concatenate %1458, %1459 in 0 : vector<2x384xf32>, vector<2x384xf32> -> vector<4x384xf32>
    %1461 = vector.extract_strided_slice %1460 {offsets = [0, 0], sizes = [4, 128], strides = [1, 1]} : vector<4x384xf32> to vector<4x128xf32>
    %1462 = vector.extract_strided_slice %1460 {offsets = [0, 128], sizes = [4, 128], strides = [1, 1]} : vector<4x384xf32> to vector<4x128xf32>
    %1463 = vector.extract_strided_slice %1460 {offsets = [0, 256], sizes = [4, 128], strides = [1, 1]} : vector<4x384xf32> to vector<4x128xf32>
    %1464 = vector.extract_strided_slice %1198 {offsets = [10, 0], sizes = [2, 128], strides = [1, 1]} : vector<16x256xf32> to vector<2x128xf32>
    %1465 = vector.extract_strided_slice %1198 {offsets = [4, 128], sizes = [2, 128], strides = [1, 1]} : vector<16x256xf32> to vector<2x128xf32>
    %1466 = tpu.concatenate %1464, %1465 in 0 : vector<2x128xf32>, vector<2x128xf32> -> vector<4x128xf32>
    %1467 = arith.mulf %1438, %1203 : vector<4x128xf32>
    %1468 = arith.addf %1462, %1467 : vector<4x128xf32>
    %1469 = arith.addf %1468, %1207 : vector<4x128xf32>
    %1470 = arith.negf %1469 : vector<4x128xf32>
    %1471 = math.exp %1470 : vector<4x128xf32>
    %cst_384 = arith.constant 1.000000e+00 : f32
    %1472 = vector.broadcast %cst_384 : f32 to vector<4x128xf32>
    %1473 = arith.addf %1472, %1471 : vector<4x128xf32>
    %1474 = arith.divf %1472, %1473 : vector<4x128xf32>
    %1475 = arith.mulf %1438, %1205 : vector<4x128xf32>
    %1476 = arith.addf %1463, %1475 : vector<4x128xf32>
    %1477 = arith.addf %1476, %1209 : vector<4x128xf32>
    %1478 = arith.negf %1477 : vector<4x128xf32>
    %1479 = math.exp %1478 : vector<4x128xf32>
    %cst_385 = arith.constant 1.000000e+00 : f32
    %1480 = vector.broadcast %cst_385 : f32 to vector<4x128xf32>
    %1481 = arith.addf %1480, %1479 : vector<4x128xf32>
    %1482 = arith.divf %1480, %1481 : vector<4x128xf32>
    %1483 = arith.mulf %1474, %1438 : vector<4x128xf32>
    %cst_386 = arith.constant 1.000000e+00 : f32
    %1484 = vector.broadcast %cst_386 : f32 to vector<4x128xf32>
    %1485 = arith.subf %1484, %1474 : vector<4x128xf32>
    %1486 = arith.mulf %1485, %1461 : vector<4x128xf32>
    %1487 = arith.addf %1483, %1486 : vector<4x128xf32>
    %cst_387 = arith.constant 0.000000e+00 : f32
    %1488 = vector.broadcast %cst_387 : f32 to vector<4x128xf32>
    %1489 = arith.cmpf ogt, %1487, %1488 : vector<4x128xf32>
    %1490 = math.exp %1487 : vector<4x128xf32>
    %cst_388 = arith.constant 1.000000e+00 : f32
    %1491 = vector.broadcast %cst_388 : f32 to vector<4x128xf32>
    %1492 = arith.subf %1490, %1491 : vector<4x128xf32>
    %cst_389 = arith.constant 1.67326319 : f32
    %1493 = vector.broadcast %cst_389 : f32 to vector<4x128xf32>
    %1494 = arith.mulf %1493, %1492 : vector<4x128xf32>
    %1495 = arith.select %1489, %1487, %1494 : vector<4x128xi1>, vector<4x128xf32>
    %cst_390 = arith.constant 1.05070102 : f32
    %1496 = vector.broadcast %cst_390 : f32 to vector<4x128xf32>
    %1497 = arith.mulf %1496, %1495 : vector<4x128xf32>
    %1498 = arith.mulf %1482, %1497 : vector<4x128xf32>
    %cst_391 = arith.constant 1.000000e+00 : f32
    %1499 = vector.broadcast %cst_391 : f32 to vector<4x128xf32>
    %1500 = arith.subf %1499, %1482 : vector<4x128xf32>
    %1501 = arith.mulf %1500, %1466 : vector<4x128xf32>
    %1502 = arith.addf %1498, %1501 : vector<4x128xf32>
    %1503 = vector.extract_strided_slice %1502 {offsets = [0, 0], sizes = [2, 128], strides = [1, 1]} : vector<4x128xf32> to vector<2x128xf32>
    %1504 = arith.addf %1455, %1503 : vector<2x128xf32>
    %1505 = vector.extract_strided_slice %1502 {offsets = [2, 0], sizes = [2, 128], strides = [1, 1]} : vector<4x128xf32> to vector<2x128xf32>
    %1506 = arith.addf %1457, %1505 : vector<2x128xf32>
    %1507 = vector.extract_strided_slice %1201 {offsets = [12, 0], sizes = [2, 384], strides = [1, 1]} : vector<16x768xf32> to vector<2x384xf32>
    %1508 = vector.extract_strided_slice %1201 {offsets = [2, 384], sizes = [2, 384], strides = [1, 1]} : vector<16x768xf32> to vector<2x384xf32>
    %1509 = tpu.concatenate %1507, %1508 in 0 : vector<2x384xf32>, vector<2x384xf32> -> vector<4x384xf32>
    %1510 = vector.extract_strided_slice %1509 {offsets = [0, 0], sizes = [4, 128], strides = [1, 1]} : vector<4x384xf32> to vector<4x128xf32>
    %1511 = vector.extract_strided_slice %1509 {offsets = [0, 128], sizes = [4, 128], strides = [1, 1]} : vector<4x384xf32> to vector<4x128xf32>
    %1512 = vector.extract_strided_slice %1509 {offsets = [0, 256], sizes = [4, 128], strides = [1, 1]} : vector<4x384xf32> to vector<4x128xf32>
    %1513 = vector.extract_strided_slice %1198 {offsets = [12, 0], sizes = [2, 128], strides = [1, 1]} : vector<16x256xf32> to vector<2x128xf32>
    %1514 = vector.extract_strided_slice %1198 {offsets = [2, 128], sizes = [2, 128], strides = [1, 1]} : vector<16x256xf32> to vector<2x128xf32>
    %1515 = tpu.concatenate %1513, %1514 in 0 : vector<2x128xf32>, vector<2x128xf32> -> vector<4x128xf32>
    %1516 = arith.mulf %1487, %1203 : vector<4x128xf32>
    %1517 = arith.addf %1511, %1516 : vector<4x128xf32>
    %1518 = arith.addf %1517, %1207 : vector<4x128xf32>
    %1519 = arith.negf %1518 : vector<4x128xf32>
    %1520 = math.exp %1519 : vector<4x128xf32>
    %cst_392 = arith.constant 1.000000e+00 : f32
    %1521 = vector.broadcast %cst_392 : f32 to vector<4x128xf32>
    %1522 = arith.addf %1521, %1520 : vector<4x128xf32>
    %1523 = arith.divf %1521, %1522 : vector<4x128xf32>
    %1524 = arith.mulf %1487, %1205 : vector<4x128xf32>
    %1525 = arith.addf %1512, %1524 : vector<4x128xf32>
    %1526 = arith.addf %1525, %1209 : vector<4x128xf32>
    %1527 = arith.negf %1526 : vector<4x128xf32>
    %1528 = math.exp %1527 : vector<4x128xf32>
    %cst_393 = arith.constant 1.000000e+00 : f32
    %1529 = vector.broadcast %cst_393 : f32 to vector<4x128xf32>
    %1530 = arith.addf %1529, %1528 : vector<4x128xf32>
    %1531 = arith.divf %1529, %1530 : vector<4x128xf32>
    %1532 = arith.mulf %1523, %1487 : vector<4x128xf32>
    %cst_394 = arith.constant 1.000000e+00 : f32
    %1533 = vector.broadcast %cst_394 : f32 to vector<4x128xf32>
    %1534 = arith.subf %1533, %1523 : vector<4x128xf32>
    %1535 = arith.mulf %1534, %1510 : vector<4x128xf32>
    %1536 = arith.addf %1532, %1535 : vector<4x128xf32>
    %cst_395 = arith.constant 0.000000e+00 : f32
    %1537 = vector.broadcast %cst_395 : f32 to vector<4x128xf32>
    %1538 = arith.cmpf ogt, %1536, %1537 : vector<4x128xf32>
    %1539 = math.exp %1536 : vector<4x128xf32>
    %cst_396 = arith.constant 1.000000e+00 : f32
    %1540 = vector.broadcast %cst_396 : f32 to vector<4x128xf32>
    %1541 = arith.subf %1539, %1540 : vector<4x128xf32>
    %cst_397 = arith.constant 1.67326319 : f32
    %1542 = vector.broadcast %cst_397 : f32 to vector<4x128xf32>
    %1543 = arith.mulf %1542, %1541 : vector<4x128xf32>
    %1544 = arith.select %1538, %1536, %1543 : vector<4x128xi1>, vector<4x128xf32>
    %cst_398 = arith.constant 1.05070102 : f32
    %1545 = vector.broadcast %cst_398 : f32 to vector<4x128xf32>
    %1546 = arith.mulf %1545, %1544 : vector<4x128xf32>
    %1547 = arith.mulf %1531, %1546 : vector<4x128xf32>
    %cst_399 = arith.constant 1.000000e+00 : f32
    %1548 = vector.broadcast %cst_399 : f32 to vector<4x128xf32>
    %1549 = arith.subf %1548, %1531 : vector<4x128xf32>
    %1550 = arith.mulf %1549, %1515 : vector<4x128xf32>
    %1551 = arith.addf %1547, %1550 : vector<4x128xf32>
    %1552 = vector.extract_strided_slice %1551 {offsets = [0, 0], sizes = [2, 128], strides = [1, 1]} : vector<4x128xf32> to vector<2x128xf32>
    %1553 = arith.addf %1504, %1552 : vector<2x128xf32>
    %1554 = vector.extract_strided_slice %1551 {offsets = [2, 0], sizes = [2, 128], strides = [1, 1]} : vector<4x128xf32> to vector<2x128xf32>
    %1555 = arith.addf %1506, %1554 : vector<2x128xf32>
    %1556 = vector.extract_strided_slice %1201 {offsets = [14, 0], sizes = [2, 384], strides = [1, 1]} : vector<16x768xf32> to vector<2x384xf32>
    %1557 = vector.extract_strided_slice %1201 {offsets = [0, 384], sizes = [2, 384], strides = [1, 1]} : vector<16x768xf32> to vector<2x384xf32>
    %1558 = tpu.concatenate %1556, %1557 in 0 : vector<2x384xf32>, vector<2x384xf32> -> vector<4x384xf32>
    %1559 = vector.extract_strided_slice %1558 {offsets = [0, 0], sizes = [4, 128], strides = [1, 1]} : vector<4x384xf32> to vector<4x128xf32>
    %1560 = vector.extract_strided_slice %1558 {offsets = [0, 128], sizes = [4, 128], strides = [1, 1]} : vector<4x384xf32> to vector<4x128xf32>
    %1561 = vector.extract_strided_slice %1558 {offsets = [0, 256], sizes = [4, 128], strides = [1, 1]} : vector<4x384xf32> to vector<4x128xf32>
    %1562 = vector.extract_strided_slice %1198 {offsets = [14, 0], sizes = [2, 128], strides = [1, 1]} : vector<16x256xf32> to vector<2x128xf32>
    %1563 = vector.extract_strided_slice %1198 {offsets = [0, 128], sizes = [2, 128], strides = [1, 1]} : vector<16x256xf32> to vector<2x128xf32>
    %1564 = tpu.concatenate %1562, %1563 in 0 : vector<2x128xf32>, vector<2x128xf32> -> vector<4x128xf32>
    %1565 = arith.mulf %1536, %1203 : vector<4x128xf32>
    %1566 = arith.addf %1560, %1565 : vector<4x128xf32>
    %1567 = arith.addf %1566, %1207 : vector<4x128xf32>
    %1568 = arith.negf %1567 : vector<4x128xf32>
    %1569 = math.exp %1568 : vector<4x128xf32>
    %cst_400 = arith.constant 1.000000e+00 : f32
    %1570 = vector.broadcast %cst_400 : f32 to vector<4x128xf32>
    %1571 = arith.addf %1570, %1569 : vector<4x128xf32>
    %1572 = arith.divf %1570, %1571 : vector<4x128xf32>
    %1573 = arith.mulf %1536, %1205 : vector<4x128xf32>
    %1574 = arith.addf %1561, %1573 : vector<4x128xf32>
    %1575 = arith.addf %1574, %1209 : vector<4x128xf32>
    %1576 = arith.negf %1575 : vector<4x128xf32>
    %1577 = math.exp %1576 : vector<4x128xf32>
    %cst_401 = arith.constant 1.000000e+00 : f32
    %1578 = vector.broadcast %cst_401 : f32 to vector<4x128xf32>
    %1579 = arith.addf %1578, %1577 : vector<4x128xf32>
    %1580 = arith.divf %1578, %1579 : vector<4x128xf32>
    %1581 = arith.mulf %1572, %1536 : vector<4x128xf32>
    %cst_402 = arith.constant 1.000000e+00 : f32
    %1582 = vector.broadcast %cst_402 : f32 to vector<4x128xf32>
    %1583 = arith.subf %1582, %1572 : vector<4x128xf32>
    %1584 = arith.mulf %1583, %1559 : vector<4x128xf32>
    %1585 = arith.addf %1581, %1584 : vector<4x128xf32>
    %cst_403 = arith.constant 0.000000e+00 : f32
    %1586 = vector.broadcast %cst_403 : f32 to vector<4x128xf32>
    %1587 = arith.cmpf ogt, %1585, %1586 : vector<4x128xf32>
    %1588 = math.exp %1585 : vector<4x128xf32>
    %cst_404 = arith.constant 1.000000e+00 : f32
    %1589 = vector.broadcast %cst_404 : f32 to vector<4x128xf32>
    %1590 = arith.subf %1588, %1589 : vector<4x128xf32>
    %cst_405 = arith.constant 1.67326319 : f32
    %1591 = vector.broadcast %cst_405 : f32 to vector<4x128xf32>
    %1592 = arith.mulf %1591, %1590 : vector<4x128xf32>
    %1593 = arith.select %1587, %1585, %1592 : vector<4x128xi1>, vector<4x128xf32>
    %cst_406 = arith.constant 1.05070102 : f32
    %1594 = vector.broadcast %cst_406 : f32 to vector<4x128xf32>
    %1595 = arith.mulf %1594, %1593 : vector<4x128xf32>
    %1596 = arith.mulf %1580, %1595 : vector<4x128xf32>
    %cst_407 = arith.constant 1.000000e+00 : f32
    %1597 = vector.broadcast %cst_407 : f32 to vector<4x128xf32>
    %1598 = arith.subf %1597, %1580 : vector<4x128xf32>
    %1599 = arith.mulf %1598, %1564 : vector<4x128xf32>
    %1600 = arith.addf %1596, %1599 : vector<4x128xf32>
    %1601 = vector.extract_strided_slice %1600 {offsets = [0, 0], sizes = [2, 128], strides = [1, 1]} : vector<4x128xf32> to vector<2x128xf32>
    %1602 = arith.addf %1553, %1601 : vector<2x128xf32>
    %1603 = vector.extract_strided_slice %1600 {offsets = [2, 0], sizes = [2, 128], strides = [1, 1]} : vector<4x128xf32> to vector<2x128xf32>
    %1604 = arith.addf %1555, %1603 : vector<2x128xf32>
    %1605 = tpu.concatenate %1602, %1604 in 1 : vector<2x128xf32>, vector<2x128xf32> -> vector<2x256xf32>
    %cst_408 = arith.constant 1.250000e-01 : f32
    %1606 = vector.broadcast %cst_408 : f32 to vector<2x256xf32>
    %1607 = arith.mulf %1605, %1606 : vector<2x256xf32>
    %cst_409 = arith.constant dense<0.000000e+00> : vector<2xf32>
    %1608 = vector.multi_reduction <add>, %1607, %cst_409 [1] : vector<2x256xf32> to vector<2xf32>
    %1609 = vector.shape_cast %1608 : vector<2xf32> to vector<2x1xf32>
    %cst_410 = arith.constant 2.560000e+02 : f32
    %1610 = vector.broadcast %cst_410 : f32 to vector<2x1xf32>
    %1611 = arith.divf %1609, %1610 : vector<2x1xf32>
    %1612 = vector.broadcast %1611 : vector<2x1xf32> to vector<2x256xf32>
    %1613 = arith.subf %1607, %1612 : vector<2x256xf32>
    %1614 = arith.mulf %1613, %1613 : vector<2x256xf32>
    %cst_411 = arith.constant dense<0.000000e+00> : vector<2xf32>
    %1615 = vector.multi_reduction <add>, %1614, %cst_411 [1] : vector<2x256xf32> to vector<2xf32>
    %1616 = vector.shape_cast %1615 : vector<2xf32> to vector<2x1xf32>
    %cst_412 = arith.constant 2.560000e+02 : f32
    %1617 = vector.broadcast %cst_412 : f32 to vector<2x1xf32>
    %1618 = arith.divf %1616, %1617 : vector<2x1xf32>
    %1619 = vector.broadcast %1611 : vector<2x1xf32> to vector<2x256xf32>
    %1620 = arith.subf %1607, %1619 : vector<2x256xf32>
    %cst_413 = arith.constant 9.99999974E-6 : f32
    %1621 = vector.broadcast %cst_413 : f32 to vector<2x1xf32>
    %1622 = arith.addf %1618, %1621 : vector<2x1xf32>
    %1623 = math.rsqrt %1622 : vector<2x1xf32>
    %1624 = vector.broadcast %1623 : vector<2x1xf32> to vector<2x256xf32>
    %1625 = arith.mulf %1620, %1624 : vector<2x256xf32>
    %c0_414 = arith.constant 0 : index
    %c0_415 = arith.constant 0 : index
    %1626 = vector.load %arg7[%c0_414, %c0_415] : memref<1x256xf32, #tpu.memory_space<vmem>>, vector<1x256xf32>
    %1627 = vector.broadcast %1626 : vector<1x256xf32> to vector<2x256xf32>
    %1628 = arith.mulf %1625, %1627 : vector<2x256xf32>
    %c0_416 = arith.constant 0 : index
    %c0_417 = arith.constant 0 : index
    %1629 = vector.load %arg8[%c0_416, %c0_417] : memref<1x256xf32, #tpu.memory_space<vmem>>, vector<1x256xf32>
    %1630 = vector.broadcast %1629 : vector<1x256xf32> to vector<2x256xf32>
    %1631 = arith.addf %1628, %1630 : vector<2x256xf32>
    %c0_418 = arith.constant 0 : index
    %c0_419 = arith.constant 0 : index
    %1632 = vector.load %arg9[%c0_418, %c0_419] : memref<2x256xf32, #tpu.memory_space<vmem>>, vector<2x256xf32>
    tpu.vector_store %arg9[%c0_418, %c0_419], %1631 {strides = array<i32>} : memref<2x256xf32, #tpu.memory_space<vmem>>, vector<2x256xf32>,
    return
  }
  func.func @transform_0(%arg0: i32) -> (i32, i32) {
    %c0_i32 = arith.constant 0 : i32
    %c0_i32_0 = arith.constant 0 : i32
    %c0_i32_1 = arith.constant 0 : i32
    return %c0_i32, %c0_i32_0 : i32, i32
  }
  func.func @transform_1(%arg0: i32) -> (i32, i32) {
    %c0_i32 = arith.constant 0 : i32
    %c0_i32_0 = arith.constant 0 : i32
    %c0_i32_1 = arith.constant 0 : i32
    return %c0_i32, %c0_i32_0 : i32, i32
  }
  func.func @transform_2(%arg0: i32) -> (i32, i32) {
    %c0_i32 = arith.constant 0 : i32
    %c0_i32_0 = arith.constant 0 : i32
    %c0_i32_1 = arith.constant 0 : i32
    return %c0_i32, %c0_i32_0 : i32, i32
  }
  func.func @transform_3(%arg0: i32) -> (i32, i32) {
    %c0_i32 = arith.constant 0 : i32
    %c0_i32_0 = arith.constant 0 : i32
    %c0_i32_1 = arith.constant 0 : i32
    return %c0_i32, %c0_i32_0 : i32, i32
  }
  func.func @transform_4(%arg0: i32) -> (i32, i32) {
    %c0_i32 = arith.constant 0 : i32
    %c0_i32_0 = arith.constant 0 : i32
    %c0_i32_1 = arith.constant 0 : i32
    return %c0_i32, %c0_i32_0 : i32, i32
  }
  func.func @transform_5(%arg0: i32) -> (i32, i32, i32) {
    %c0_i32 = arith.constant 0 : i32
    %c0_i32_0 = arith.constant 0 : i32
    %c0_i32_1 = arith.constant 0 : i32
    %c0_i32_2 = arith.constant 0 : i32
    return %c0_i32, %c0_i32_0, %c0_i32_1 : i32, i32, i32
  }
  func.func @transform_6(%arg0: i32) -> (i32, i32) {
    %c0_i32 = arith.constant 0 : i32
    %c0_i32_0 = arith.constant 0 : i32
    %c0_i32_1 = arith.constant 0 : i32
    return %c0_i32, %c0_i32_0 : i32, i32
  }
  func.func @transform_7(%arg0: i32) -> (i32, i32) {
    %c0_i32 = arith.constant 0 : i32
    %c0_i32_0 = arith.constant 0 : i32
    %c0_i32_1 = arith.constant 0 : i32
    return %c0_i32, %c0_i32_0 : i32, i32
  }
  func.func @transform_8(%arg0: i32) -> (i32, i32) {
    %c0_i32 = arith.constant 0 : i32
    %c0_i32_0 = arith.constant 0 : i32
    %c0_i32_1 = arith.constant 0 : i32
    return %c0_i32, %c0_i32_0 : i32, i32
  }
}

</mosaic_0001>

<bundles_post_ra>
// kernel: feature_generator_sru_forward.1
= control target key start
LH: loop header
LB: loop body
LE: loop exit
PB: predicated region body
PF: predicated region fallthrough
CT: control target
= control target key end

     0   :  { %13 = vsyncpa [#allocation5], 0  ;;  %s6714_s0 = inlined_call_operand.vmem [shape: f32[16,16], index: 0, kind: input, shape index: {}]   ;;  %s6715_s1 = inlined_call_operand.vmem [shape: f32[16,1024], index: 1, kind: input, shape index: {}]   ;;  %s6716_s2 = inlined_call_operand.hbm [shape: bf16[256,768], index: 2, kind: input, shape index: {}]   ;;  %s6717_s3 = inlined_call_operand.hbm [shape: bf16[256,768], index: 3, kind: input, shape index: {}]   ;;  %s6718_s4 = inlined_call_operand.hbm [shape: bf16[256,768], index: 4, kind: input, shape index: {}]   ;;  %s6719_s5 = inlined_call_operand.vmem [shape: f32[16,4,128], index: 5, kind: input, shape index: {}]   ;;  %s6720_s6 = inlined_call_operand.vmem [shape: f32[1,256], index: 6, kind: input, shape index: {}]   ;;  %s6721_s7 = inlined_call_operand.vmem [shape: f32[1,256], index: 7, kind: input, shape index: {}]   ;;  %s6722_s8 = inlined_call_operand.hbm [shape: f32[2,256], index: 8, kind: output, shape index: {}]  }
   0x1   :  { %14 = vsyncpa [#allocation8], 0 }
   0x2   :  { %15 = vsyncpa [#allocation6], 0  ;;  %s5692_s27 = smov [#allocation7]   ;;  %s5693_s29 = smov [#allocation4]  }
   0x3   :  { %s37_s28 = sshll.u32 %s5692_s27, 4  ;;  %s25_s30 = sshll.u32 %s5693_s29, 4  ;;  %s38_s28 = int_to_ptr.vmem [resolvable:$true] %s37_s28  ;;  %s5744_s30 = int_to_ptr.vmem [resolvable:$true] %s25_s30 }
   0x4   :  { %s5598_s11 = scalar_lea.hbm %s6717_s3, 12288 }
   0x5   :  { %p5599_p0 = scmp.ne.s32.totalorder %s6717_s3, %s5598_s11  ;;  %p5602_p1 = scmp.lt.u32.totalorder %s5598_s11, %s6717_s3 }
   0x7   :  { %p5604_p2 = pnand %p5602_p1, %p5599_p0 }
   0x9   :  { %5607 = shalt.err (!%p5604_p2)
}
   0xa   :  { %s5608_s16 = scalar_lea.vmem %s38_s28, 12288  ;;  %p5613_p4 = scmp.lt.s32.totalorder %s38_s28, %s38_s28 }
   0xb   :  { %p5609_p3 = scmp.ne.s32.totalorder %s38_s28, %s5608_s16  ;;  %p5614_p5 = scmp.lt.s32.totalorder %s5608_s16, %s5608_s16 }
   0xd   :  { %p5615_p6 = por %p5614_p5, %p5613_p4 }
   0xf   :  { %p5616_p7 = pnand %p5615_p6, %p5609_p3 }
  0x11   :  { %5619 = shalt.err (!%p5616_p7)
}
  0x12   :  { %s5694_s17 = smov 384   ;;  %s5695_s18 = smov 24  }
  0x13   :  { %43 = dma.hbm_to_vmem [thread:$0]  %s6717_s3, 12288, %s38_s28, [#allocation8], %s5694_s17, %s5694_s17, %s5695_s18  }
  0x14   :  { %s5620_s23 = scalar_lea.hbm %s6716_s2, 12288 }
  0x15   :  { %p5621_p8 = scmp.ne.s32.totalorder %s6716_s2, %s5620_s23  ;;  %p5624_p9 = scmp.lt.u32.totalorder %s5620_s23, %s6716_s2 }
  0x17   :  { %p5626_p10 = pnand %p5624_p9, %p5621_p8 }
  0x19   :  { %5629 = shalt.err (!%p5626_p10)
}
  0x1a   :  { %s5630_s29 = scalar_lea.vmem %s5744_s30, 12288  ;;  %p5635_p12 = scmp.lt.s32.totalorder %s5744_s30, %s5744_s30 }
  0x1b   :  { %p5631_p11 = scmp.ne.s32.totalorder %s5744_s30, %s5630_s29  ;;  %p5636_p13 = scmp.lt.s32.totalorder %s5630_s29, %s5630_s29 }
  0x1d   :  { %p5637_p0 = por %p5636_p13, %p5635_p12 }
  0x1f   :  { %p5638_p1 = pnand %p5637_p0, %p5631_p11 }
  0x21   :  { %5641 = shalt.err (!%p5638_p1)
}
  0x22   :  { %31 = dma.hbm_to_vmem [thread:$0]  %s6716_s2, 12288, %s5744_s30, [#allocation5], %s5694_s17, %s5694_s17, %s5695_s18  }
  0x23   :  { %s5696_s9 = smov [#allocation9]   ;;  %s5642_s13 = scalar_lea.hbm %s6718_s4, 12288 }
  0x24   :  { %s49_s10 = sshll.u32 %s5696_s9, 4  ;;  %p5643_p2 = scmp.ne.s32.totalorder %s6718_s4, %s5642_s13  ;;  %s50_s10 = int_to_ptr.vmem [resolvable:$true] %s49_s10 }
  0x25   :  { %p5646_p3 = scmp.lt.u32.totalorder %s5642_s13, %s6718_s4 }
  0x27   :  { %p5648_p4 = pnand %p5646_p3, %p5643_p2 }
  0x29   :  { %5651 = shalt.err (!%p5648_p4)
}
  0x2a   :  { %s5652_s20 = scalar_lea.vmem %s50_s10, 12288  ;;  %p5657_p6 = scmp.lt.s32.totalorder %s50_s10, %s50_s10 }
  0x2b   :  { %p5653_p5 = scmp.ne.s32.totalorder %s50_s10, %s5652_s20  ;;  %p5658_p7 = scmp.lt.s32.totalorder %s5652_s20, %s5652_s20 }
  0x2d   :  { %p5659_p8 = por %p5658_p7, %p5657_p6 }
  0x2f   :  { %p5660_p9 = pnand %p5659_p8, %p5653_p5 }
  0x31   :  { %5663 = shalt.err (!%p5660_p9)
}
  0x32   :  { %55 = dma.hbm_to_vmem [thread:$0]  %s6718_s4, 12288, %s50_s10, [#allocation8], %s5694_s17, %s5694_s17, %s5695_s18  }
  0x33   :  { %5686 = dma.done.wait [#allocation5], 12288  }
  0x34   :  { %5687 = vsyncadd [#allocation5], 4294955008 }
  0x35   :  { %5688 = dma.done.wait [#allocation8], 24576  }
  0x36   :  { %5689 = vsyncadd [#allocation8], 4294942720  ;;  %v5697_v0 = vmov 0.0   ;;  %v74_v1 = vld [vmem:[%s6715_s1 + $0x8] sm:$0xff]  ;;  %v73_v3 = vld [vmem:[%s6715_s1] sm:$0xff]  ;;  %vm89_vm0 = vcmask 130048  }
  0x37   :  { %160 = vmatprep.mubr.f32.mxu1 %v5697_v0  ;;  %v82_v2 = vld [vmem:[%s6715_s1 + $0x48] sm:$0xff]  ;;  %v81_v5 = vld [vmem:[%s6715_s1 + $0x40] sm:$0xff]  ;;  %v76_v6 = vld [vmem:[%s6715_s1 + $0x18] sm:$0xff]  ;;  %vm423_vm1 = vcmask 1041408   ;;  %s5698_s13 = smov [#allocation10]  }
  0x38   :  { %v4819_v4 = vpack.c.bf16 %v82_v2, %v74_v1  ;;  %v4821_v7 = vpack.c.bf16 %v81_v5, %v73_v3  ;;  %v84_v8 = vld [vmem:[%s6715_s1 + $0x58] sm:$0xff]  ;;  %v75_v9 = vld [vmem:[%s6715_s1 + $0x10] sm:$0xff]  ;;  %v78_v12 = vld [vmem:[%s6715_s1 + $0x28] sm:$0xff]  ;;  %s4401_s14 = sshll.u32 %s5698_s13, 4  ;;  %s4402_s14 = int_to_ptr.vmem [resolvable:$true] %s4401_s14 }
  0x39   :  { %v83_v10 = vld [vmem:[%s6715_s1 + $0x50] sm:$0xff]  ;;  %v4823_v11 = vpack.c.bf16 %v84_v8, %v76_v6  ;;  %v86_v13 = vld [vmem:[%s6715_s1 + $0x68] sm:$0xff]  ;;  %v71_v14 = vld [vmem:[%s6714_s0] sm:$0xff]  ;;  %p5669_p11 = scmp.lt.s32.totalorder %s4402_s14, %s4402_s14 }
  0x3a   :  { %4820 = vmatprep.subr.bf16.mxu1 %v4819_v4  ;;  %v4825_v15 = vpack.c.bf16 %v83_v10, %v75_v9  ;;  %v4827_v16 = vpack.c.bf16 %v86_v13, %v78_v12  ;;  %v72_v17 = vld [vmem:[%s6714_s0 + $0x8] sm:$0xff]  ;;  %v77_v18 = vld [vmem:[%s6715_s1 + $0x20] sm:$0xff]  ;;  %v80_v20 = vld [vmem:[%s6715_s1 + $0x38] sm:$0xff] }
  0x3b   :  { %4822 = vmatpush1.bf16.msra.mxu1 %v4821_v7  ;;  %v85_v19 = vld [vmem:[%s6715_s1 + $0x60] sm:$0xff]  ;;  %v88_v21 = vld [vmem:[%s6715_s1 + $0x78] sm:$0xff]  ;;  %v79_v24 = vld [vmem:[%s6715_s1 + $0x30] sm:$0xff] }
  0x3c   :  { %4824 = vmatprep.subr.bf16.mxu1 %v4823_v11  ;;  %v4829_v22 = vpack.c.bf16 %v85_v19, %v77_v18  ;;  %v4831_v23 = vpack.c.bf16 %v88_v21, %v80_v20  ;;  %v87_v25 = vld [vmem:[%s6715_s1 + $0x70] sm:$0xff]  ;;  %v5869_v33 = vld [vmem:[%s6719_s5] sm:$0xf]  ;;  %v5874_v34 = vld [vmem:[%s6719_s5 + $0x4] sm:$0xf] }
  0x3d   :  { %v4833_v26 = vpack.c.bf16 %v87_v25, %v79_v24  ;;  %v428_v38 = vmul.f32 0.0, %v5869_v33  ;;  %v5882_v39 = vmul.f32 0.0, %v5874_v34 }
  0x3e   :  { %4411 = vmatmul.mubr.msk.f32.vlgmr.msra.gmra.mrb[0].mxu1 %vm89_vm0, %v71_v14 }
  0x3f   :  { %4826 = vmatpush1.bf16.msra.mxu1 %v4825_v15  ;;  %166 = vmatprep.mubr.f32.mxu1 %v5697_v0 }
  0x40   :  { %4828 = vmatprep.subr.bf16.mxu1 %v4827_v16 }
  0x42   :  { %4412 = vmatmul.mubr.msk.f32.gmra.mrb[2].mxu1 %vm89_vm0, %v72_v17 }
  0x43   :  { %237 = vmatprep.mubr.f32.mxu1 %v5697_v0 }
  0x46   :  { %4413 = vmatmul.mubr.msk.f32.vlgmr.msra.gmra.mrb[4].mxu1 %vm89_vm0, %v71_v14 }
  0x47   :  { %4830 = vmatpush1.bf16.msra.mxu1 %v4829_v22  ;;  %243 = vmatprep.mubr.f32.mxu1 %v5697_v0 }
  0x48   :  { %4832 = vmatprep.subr.bf16.mxu1 %v4831_v23 }
  0x4a   :  { %4414 = vmatmul.mubr.msk.f32.gmra.mrb[6].mxu1 %vm89_vm0, %v72_v17 }
  0x4b   :  { %314 = vmatprep.mubr.f32.mxu1 %v5697_v0 }
  0x4e   :  { %4415 = vmatmul.mubr.msk.f32.vlgmr.msra.gmra.mrb[8].mxu1 %vm89_vm0, %v71_v14 }
  0x4f   :  { %320 = vmatprep.mubr.f32.mxu1 %v5697_v0  ;;  %4834 = vmatpush1.bf16.msra.mxu1 %v4833_v26  ;;  %v5941_v26 = vld [vmem:[%s6719_s5 + $0x8] sm:$0xf] }
  0x52   :  { %4416 = vmatmul.mubr.msk.f32.gmra.mrb[10].mxu1 %vm89_vm0, %v72_v17 }
  0x53   :  { %391 = vmatprep.mubr.f32.mxu1 %v5697_v0 }
  0x56   :  { %4417 = vmatmul.mubr.msk.f32.vlgmr.msra.gmra.mrb[12].mxu1 %vm89_vm0, %v71_v14 }
  0x57   :  { %397 = vmatprep.mubr.f32.mxu1 %v5697_v0 }
  0x5a   :  { %4418 = vmatmul.mubr.msk.f32.gmra.mrb[14].mxu1 %vm89_vm0, %v72_v17 }
 0x111   :  { %v5858_v27 = vpop.f32.mrb[0].mxu1 }
 0x112   :  { %v5860_v28 = vpop.f32.mrb[1].mxu1  ;;  %v470_v35 = vrot.slane %v5858_v27, 2  ;;  %v528_v36 = vrot.slane %v5858_v27, 4  ;;  %v578_v40 = vrot.slane %v5858_v27, 6 }
 0x113   :  { %v471_v41 = vrot.slane %v5860_v28, 2  ;;  %v529_v42 = vrot.slane %v5860_v28, 4  ;;  %v579_v43 = vrot.slane %v5860_v28, 6 }
 0x115   :  { %v168_v29 = vpop.f32.mrb[2].mxu1 }
 0x116   :  { %v170_v30 = vpop.f32.mrb[3].mxu1  ;;  %v694_v45 = vrot.slane %v168_v29, 2  ;;  %v752_v46 = vrot.slane %v168_v29, 4  ;;  %v802_v47 = vrot.slane %v168_v29, 6 }
 0x117   :  { %v695_v48 = vrot.slane %v170_v30, 2  ;;  %v753_v49 = vrot.slane %v170_v30, 4  ;;  %v803_v50 = vrot.slane %v170_v30, 6 }
 0x119   :  { %v5862_v31 = vpop.f32.mrb[4].mxu1 }
 0x11a   :  { %v5864_v32 = vpop.f32.mrb[5].mxu1  ;;  %v472_v51 = vrot.slane %v5862_v31, 2  ;;  %v530_v52 = vrot.slane %v5862_v31, 4  ;;  %v580_v53 = vrot.slane %v5862_v31, 6 }
 0x11b   :  { %v473_v54 = vrot.slane %v5864_v32, 2 }
 0x11d   :  { %v5878_v37 = vpop.f32.mrb[6].mxu1 }
 0x11e   :  { %v5888_v44 = vpop.f32.mrb[7].mxu1  ;;  %v696_v55 = vrot.slane %v5878_v37, 2  ;;  %v754_v56 = vrot.slane %v5878_v37, 4  ;;  %v804_v3 = vrot.slane %v5878_v37, 6 }
 0x11f   :  { %v697_v7 = vrot.slane %v5888_v44, 2  ;;  %v755_v21 = vrot.slane %v5888_v44, 4  ;;  %v805_v25 = vrot.slane %v5888_v44, 6 }
 0x121   :  { %v316_v57 = vpop.f32.mrb[8].mxu1 }
 0x122   :  { %v640_v58 = vrot.slane %v316_v57, 4  ;;  %v702_v59 = vrot.slane %v316_v57, 2  ;;  %v5897_v60 = vsel %vm423_vm1, %v752_v46, %v316_v57  ;;  %v810_v61 = vrot.slane %v316_v57, 6  ;;  %v318_v62 = vpop.f32.mrb[9].mxu1 }
 0x123   :  { %v641_v63 = vrot.slane %v318_v62, 4  ;;  %v703_v0 = vrot.slane %v318_v62, 2  ;;  %v5900_v1 = vsel %vm423_vm1, %v753_v49, %v318_v62  ;;  %v811_v2 = vrot.slane %v318_v62, 6 }
 0x124   :  { %v5904_v4 = vsel %vm423_vm1, %v168_v29, %v640_v58  ;;  %v5907_v5 = vsel %vm423_vm1, %v694_v45, %v702_v59  ;;  %v5910_v6 = vsel %vm423_vm1, %v802_v47, %v810_v61 }
 0x125   :  { %v5914_v8 = vsel %vm423_vm1, %v170_v30, %v641_v63  ;;  %v5917_v9 = vsel %vm423_vm1, %v695_v48, %v703_v0  ;;  %v5920_v10 = vsel %vm423_vm1, %v803_v50, %v811_v2  ;;  %v322_v11 = vpop.f32.mrb[10].mxu1 }
 0x126   :  { %v415_v12 = vrot.slane %v322_v11, 4  ;;  %v478_v13 = vrot.slane %v322_v11, 2  ;;  %v5923_v14 = vsel %vm423_vm1, %v528_v36, %v322_v11  ;;  %v586_v15 = vrot.slane %v322_v11, 6  ;;  %v324_v16 = vpop.f32.mrb[11].mxu1 }
 0x127   :  { %v416_v17 = vrot.slane %v324_v16, 4  ;;  %v479_v18 = vrot.slane %v324_v16, 2  ;;  %v5926_v19 = vsel %vm423_vm1, %v529_v42, %v324_v16  ;;  %v587_v20 = vrot.slane %v324_v16, 6 }
 0x128   :  { %v424_v22 = vsel %vm423_vm1, %v5858_v27, %v415_v12  ;;  %v5932_v23 = vsel %vm423_vm1, %v470_v35, %v478_v13  ;;  %v5935_v24 = vsel %vm423_vm1, %v578_v40, %v586_v15 }
 0x129   :  { %v425_v29 = vsel %vm423_vm1, %v5860_v28, %v416_v17  ;;  %v487_v30 = vsel %vm423_vm1, %v471_v41, %v479_v18  ;;  %v5947_v27 = vsel %vm423_vm1, %v579_v43, %v587_v20  ;;  %v393_v35 = vpop.f32.mrb[12].mxu1  ;;  %v581_v20 = vrot.slane %v5864_v32, 6 }
 0x12a   :  { %v429_v36 = vadd.f32 %v428_v38, %v425_v29  ;;  %v642_v42 = vrot.slane %v393_v35, 4  ;;  %v704_v40 = vrot.slane %v393_v35, 2  ;;  %v5950_v45 = vsel %vm423_vm1, %v754_v56, %v393_v35  ;;  %v395_v46 = vpop.f32.mrb[13].mxu1 }
 0x12b   :  { %v812_v47 = vrot.slane %v393_v35, 6  ;;  %v643_v48 = vrot.slane %v395_v46, 4  ;;  %v705_v49 = vrot.slane %v395_v46, 2  ;;  %v5953_v50 = vsel %vm423_vm1, %v755_v21, %v395_v46 }
 0x12c   :  { %v430_v28 = vadd.f32 %v5941_v26, %v429_v36  ;;  %v5958_v41 = vsel %vm423_vm1, %v5878_v37, %v642_v42  ;;  %v5961_v38 = vsel %vm423_vm1, %v696_v55, %v704_v40  ;;  %v813_v43 = vrot.slane %v395_v46, 6 }
 0x12d   :  { %v531_v56 = vrot.slane %v5864_v32, 4  ;;  %v5965_v57 = vsel %vm423_vm1, %v804_v3, %v812_v47  ;;  %v5969_v58 = vsel %vm423_vm1, %v5888_v44, %v643_v48  ;;  %v5972_v59 = vsel %vm423_vm1, %v697_v7, %v705_v49  ;;  %v399_v61 = vpop.f32.mrb[14].mxu1  ;;  %v5985_v7 = vld [vmem:[%s6719_s5 + $0xc] sm:$0xf] }
 0x12e   :  { %v4422_v62 = vmul.f32 -1.442695, %v430_v28  ;;  %v5975_v37 = vsel %vm423_vm1, %v805_v25, %v813_v43  ;;  %v417_v55 = vrot.slane %v399_v61, 4  ;;  %v480_v63 = vrot.slane %v399_v61, 2  ;;  %v401_v0 = vpop.f32.mrb[15].mxu1 }
 0x12f   :  { %v5980_v2 = vsel %vm423_vm1, %v530_v52, %v399_v61  ;;  %v588_v3 = vrot.slane %v399_v61, 6  ;;  %v418_v11 = vrot.slane %v401_v0, 4  ;;  %v481_v44 = vrot.slane %v401_v0, 2 }
 0x130   :  { %5274 = vpow2.f32 %v4422_v62  ;;  %v426_v12 = vsel %vm423_vm1, %v5862_v31, %v417_v55  ;;  %v488_v13 = vsel %vm423_vm1, %v472_v51, %v480_v63  ;;  %v5993_v15 = vsel %vm423_vm1, %v531_v56, %v401_v0 }
 0x131   :  { %v438_v52 = vadd.f32 %v5882_v39, %v426_v12  ;;  %v5999_v16 = vsel %vm423_vm1, %v580_v53, %v588_v3  ;;  %v427_v17 = vsel %vm423_vm1, %v5864_v32, %v418_v11  ;;  %v489_v18 = vsel %vm423_vm1, %v473_v54, %v481_v44 }
 0x132   :  { %v589_v51 = vrot.slane %v401_v0, 6 }
 0x133   :  { %v439_v21 = vadd.f32 %v5985_v7, %v438_v52 }
 0x134   :  { %v6009_v25 = vsel %vm423_vm1, %v581_v20, %v589_v51 }
 0x135   :  { %v4423_v39 = vmul.f32 -1.442695, %v439_v21 }
 0x137   :  { %5276 = vpow2.f32 %v4423_v39 }
 0x13a   :  { %v5275_v31 = vpop.eup %5274 }
 0x13b   :  { %v434_v53 = vadd.f32 1.0, %v5275_v31 }
 0x13d   :  { %5278 = vrcp.f32 %v434_v53 }
 0x141   :  { %v5277_v29 = vpop.eup %5276 }
 0x142   :  { %v443_v35 = vadd.f32 1.0, %v5277_v29 }
 0x144   :  { %5280 = vrcp.f32 %v443_v35 }
 0x147   :  { %v5279_v36 = vpop.eup %5278 }
 0x148   :  { %v447_v42 = vsub.f32 1.0, %v5279_v36  ;;  %v446_v40 = vmul.f32 0.0, %v5279_v36 }
 0x14a   :  { %v448_v54 = vmul.f32 %v447_v42, %v424_v22 }
 0x14c   :  { %v449_v46 = vadd.f32 %v448_v54, %v446_v40 }
 0x14e   :  { %v5281_v32 = vpop.eup %5280  ;;  %v490_v47 = vmul.f32 %v449_v46, %v5869_v33  ;;  %v499_v48 = vmul.f32 %v5874_v34, %v449_v46  ;;  %v451_v49 = vmul.f32 1.442695, %v449_v46  ;;  %vm450_vm2 = vcmp.gt.f32.partialorder %v449_v46, 0.0 }
 0x14f   :  { %v458_v28 = vsub.f32 1.0, %v5281_v32 }
 0x150   :  { %v491_v43 = vadd.f32 %v490_v47, %v487_v30  ;;  %v500_v56 = vadd.f32 %v499_v48, %v488_v13  ;;  %5282 = vpow2.f32 %v451_v49 }
 0x151   :  { %v459_v61 = vmul.f32 %v458_v28, %v427_v17 }
 0x152   :  { %v492_v62 = vadd.f32 %v5941_v26, %v491_v43  ;;  %v501_v55 = vadd.f32 %v5985_v7, %v500_v56 }
 0x154   :  { %v4425_v63 = vmul.f32 -1.442695, %v492_v62  ;;  %v4426_v0 = vmul.f32 -1.442695, %v501_v55 }
 0x156   :  { %5284 = vpow2.f32 %v4425_v63 }
 0x157   :  { %5286 = vpow2.f32 %v4426_v0 }
 0x15a   :  { %v5283_v22 = vpop.eup %5282 }
 0x15b   :  { %v4424_v3 = vadd.f32 -1.0, %v5283_v22 }
 0x15d   :  { %v454_v11 = vmul.f32 1.6732632, %v4424_v3 }
 0x15f   :  { %v455_v44 = vsel %vm450_vm2, %v449_v46, %v454_v11 }
 0x160   :  { %v5285_v12 = vpop.eup %5284  ;;  %v456_v52 = vmul.f32 1.050701, %v455_v44 }
 0x161   :  { %v5287_v20 = vpop.eup %5286  ;;  %v496_v30 = vadd.f32 1.0, %v5285_v12 }
 0x162   :  { %v505_v13 = vadd.f32 1.0, %v5287_v20  ;;  %v457_v51 = vmul.f32 %v5281_v32, %v456_v52 }
 0x163   :  { %5288 = vrcp.f32 %v496_v30 }
 0x164   :  { %5290 = vrcp.f32 %v505_v13  ;;  %v460_v17 = vadd.f32 %v459_v61, %v457_v51 }
 0x166   :  { %461 = vst [vmem:[#allocation2] sm:$0x3] %v460_v17  ;;  %v463_v21 = vrot.slane %v460_v17, 4 }
 0x168   :  { %465 = vst [vmem:[#allocation2 + $0x18] sm:$0xc0] %v463_v21 }
 0x16d   :  { %v5289_v39 = vpop.eup %5288 }
 0x16e   :  { %v5291_v31 = vpop.eup %5290  ;;  %v508_v53 = vmul.f32 %v5289_v39, %v449_v46  ;;  %v509_v29 = vsub.f32 1.0, %v5289_v39 }
 0x16f   :  { %v520_v35 = vsub.f32 1.0, %v5291_v31 }
 0x170   :  { %v510_v36 = vmul.f32 %v509_v29, %v5932_v23 }
 0x171   :  { %v521_v42 = vmul.f32 %v520_v35, %v489_v18 }
 0x172   :  { %v511_v40 = vadd.f32 %v510_v36, %v508_v53 }
 0x174   :  { %v540_v54 = vmul.f32 %v511_v40, %v5869_v33  ;;  %v549_v47 = vmul.f32 %v5874_v34, %v511_v40  ;;  %v513_v32 = vmul.f32 1.442695, %v511_v40  ;;  %vm512_vm3 = vcmp.gt.f32.partialorder %v511_v40, 0.0 }
 0x176   :  { %v541_v48 = vadd.f32 %v540_v54, %v5926_v19  ;;  %v550_v49 = vadd.f32 %v549_v47, %v5980_v2  ;;  %5292 = vpow2.f32 %v513_v32 }
 0x178   :  { %v542_v28 = vadd.f32 %v5941_v26, %v541_v48  ;;  %v551_v46 = vadd.f32 %v5985_v7, %v550_v49 }
 0x17a   :  { %v4428_v43 = vmul.f32 -1.442695, %v542_v28  ;;  %v4429_v56 = vmul.f32 -1.442695, %v551_v46 }
 0x17c   :  { %5294 = vpow2.f32 %v4428_v43 }
 0x17d   :  { %5296 = vpow2.f32 %v4429_v56 }
 0x180   :  { %v5293_v23 = vpop.eup %5292 }
 0x181   :  { %v4427_v18 = vadd.f32 -1.0, %v5293_v23 }
 0x183   :  { %v516_v61 = vmul.f32 1.6732632, %v4427_v18 }
 0x185   :  { %v517_v62 = vsel %vm512_vm3, %v511_v40, %v516_v61 }
 0x186   :  { %v5295_v55 = vpop.eup %5294  ;;  %v518_v63 = vmul.f32 1.050701, %v517_v62 }
 0x187   :  { %v5297_v0 = vpop.eup %5296  ;;  %v546_v19 = vadd.f32 1.0, %v5295_v55 }
 0x188   :  { %v555_v22 = vadd.f32 1.0, %v5297_v0  ;;  %v519_v2 = vmul.f32 %v5291_v31, %v518_v63  ;;  %v4842_v0 = vld [vmem:[#allocation4 + $0x4] ss:$24 sps:$4 sm:$0xff]  }
 0x189   :  { %5298 = vrcp.f32 %v546_v19  ;;  %1442 = vmatprep.subr.bf16.mxu0 %v4842_v0  ;;  %v4878_v0 = vld [vmem:[#allocation4 + $0x124] ss:$24 sps:$4 sm:$0xff]  }
 0x18a   :  { %5300 = vrcp.f32 %v555_v22  ;;  %v522_v3 = vadd.f32 %v521_v42, %v519_v2  ;;  %v4844_v22 = vld [vmem:[#allocation4] ss:$24 sps:$4 sm:$0xff]   ;;  %v4847_v2 = vld [vmem:[#allocation4 + $0xc] ss:$24 sps:$4 sm:$0xff]  }
 0x18b   :  { %1443 = vmatpush1.bf16.msra.mxu0 %v4844_v22  ;;  %1485 = vmatprep.subr.bf16.mxu1 %v4847_v2  ;;  %v4880_v2 = vld [vmem:[#allocation4 + $0x120] ss:$24 sps:$4 sm:$0xff]  }
 0x18c   :  { %v524_v11 = vrot.slane %v522_v3, 6  ;;  %v4845_v3 = vld [vmem:[#allocation4 + $0x8] ss:$24 sps:$4 sm:$0xff]  }
 0x18d   :  { %1486 = vmatpush1.bf16.msra.mxu1 %v4845_v3  ;;  %v4883_v3 = vld [vmem:[#allocation4 + $0x12c] ss:$24 sps:$4 sm:$0xff]  }
 0x18e   :  { %526 = vst [vmem:[#allocation2] ss:$28 sps:$4 sm:$0x3c] %v524_v11  }
 0x193   :  { %v5299_v44 = vpop.eup %5298 }
 0x194   :  { %v5301_v12 = vpop.eup %5300  ;;  %v558_v52 = vmul.f32 %v5299_v44, %v511_v40  ;;  %v559_v20 = vsub.f32 1.0, %v5299_v44 }
 0x195   :  { %v570_v30 = vsub.f32 1.0, %v5301_v12 }
 0x196   :  { %v560_v13 = vmul.f32 %v559_v20, %v5923_v14  ;;  %v4850_v20 = vld [vmem:[#allocation4 + $0x30] ss:$24 sps:$4 sm:$0xff]  }
 0x197   :  { %v571_v51 = vmul.f32 %v570_v30, %v5993_v15  ;;  %v4853_v30 = vld [vmem:[#allocation4 + $0x3c] ss:$24 sps:$4 sm:$0xff]  }
 0x198   :  { %v561_v17 = vadd.f32 %v560_v13, %v558_v52  ;;  %v4851_v13 = vld [vmem:[#allocation4 + $0x38] ss:$24 sps:$4 sm:$0xff]   ;;  %1487 = vmatprep.subr.bf16.mxu1 %v4853_v30 }
 0x199   :  { %1488 = vmatpush1.bf16.msra.mxu1 %v4851_v13  ;;  %v4893_v13 = vld [vmem:[#allocation4 + $0x188] ss:$24 sps:$4 sm:$0xff]  }
 0x19a   :  { %v598_v21 = vmul.f32 %v561_v17, %v5869_v33  ;;  %v607_v39 = vmul.f32 %v5874_v34, %v561_v17  ;;  %v563_v31 = vmul.f32 1.442695, %v561_v17  ;;  %vm562_vm4 = vcmp.gt.f32.partialorder %v561_v17, 0.0 }
 0x19c   :  { %v599_v53 = vadd.f32 %v598_v21, %v5947_v27  ;;  %v608_v29 = vadd.f32 %v607_v39, %v5999_v16  ;;  %5302 = vpow2.f32 %v563_v31  ;;  %v4854_v21 = vld [vmem:[#allocation4 + $0x64] ss:$24 sps:$4 sm:$0xff]  }
 0x19e   :  { %v600_v35 = vadd.f32 %v5941_v26, %v599_v53  ;;  %v609_v36 = vadd.f32 %v5985_v7, %v608_v29  ;;  %v4856_v53 = vld [vmem:[#allocation4 + $0x60] ss:$24 sps:$4 sm:$0xff]   ;;  %v4859_v29 = vld [vmem:[#allocation4 + $0x6c] ss:$24 sps:$4 sm:$0xff]  }
 0x19f   :  { %1489 = vmatprep.subr.bf16.mxu1 %v4859_v29  ;;  %v4901_v29 = vld [vmem:[#allocation4 + $0x1bc] ss:$24 sps:$4 sm:$0xff]  }
 0x1a0   :  { %v4431_v42 = vmul.f32 -1.442695, %v600_v35  ;;  %v4432_v40 = vmul.f32 -1.442695, %v609_v36  ;;  %v4862_v35 = vld [vmem:[#allocation4 + $0x90] ss:$24 sps:$4 sm:$0xff]  }
 0x1a1   :  { %v4865_v36 = vld [vmem:[#allocation4 + $0x9c] ss:$24 sps:$4 sm:$0xff]  }
 0x1a2   :  { %5304 = vpow2.f32 %v4431_v42  ;;  %v4863_v42 = vld [vmem:[#allocation4 + $0x98] ss:$24 sps:$4 sm:$0xff]  }
 0x1a3   :  { %5306 = vpow2.f32 %v4432_v40 }
 0x1a6   :  { %v5303_v14 = vpop.eup %5302 }
 0x1a7   :  { %v4430_v15 = vadd.f32 -1.0, %v5303_v14 }
 0x1a9   :  { %v566_v54 = vmul.f32 1.6732632, %v4430_v15  ;;  %v4866_v15 = vld [vmem:[#allocation4 + $0xc4] ss:$24 sps:$4 sm:$0xff]  }
 0x1ab   :  { %v567_v47 = vsel %vm562_vm4, %v561_v17, %v566_v54  ;;  %v4868_v54 = vld [vmem:[#allocation4 + $0xc0] ss:$24 sps:$4 sm:$0xff]  }
 0x1ac   :  { %v5305_v32 = vpop.eup %5304  ;;  %v568_v48 = vmul.f32 1.050701, %v567_v47  ;;  %v4871_v47 = vld [vmem:[#allocation4 + $0xcc] ss:$24 sps:$4 sm:$0xff]  }
 0x1ad   :  { %v5307_v49 = vpop.eup %5306  ;;  %v604_v27 = vadd.f32 1.0, %v5305_v32 }
 0x1ae   :  { %v613_v28 = vadd.f32 1.0, %v5307_v49  ;;  %v569_v16 = vmul.f32 %v5301_v12, %v568_v48  ;;  %v4869_v48 = vld [vmem:[#allocation4 + $0xc8] ss:$24 sps:$4 sm:$0xff]  }
 0x1af   :  { %5308 = vrcp.f32 %v604_v27  ;;  %v4872_v27 = vld [vmem:[#allocation4 + $0xf4] ss:$24 sps:$4 sm:$0xff]  }
 0x1b0   :  { %5310 = vrcp.f32 %v613_v28  ;;  %v572_v46 = vadd.f32 %v571_v51, %v569_v16 }
 0x1b2   :  { %v574_v43 = vrot.slane %v572_v46, 4  ;;  %577 = vst [vmem:[#allocation2 + $0x18] sm:$0xc] %v572_v46  ;;  %v4874_v46 = vld [vmem:[#allocation4 + $0xf0] ss:$24 sps:$4 sm:$0xff]  }
 0x1b4   :  { %576 = vst [vmem:[#allocation2] sm:$0x30] %v574_v43  ;;  %v4877_v43 = vld [vmem:[#allocation4 + $0xfc] ss:$24 sps:$4 sm:$0xff]  }
 0x1b9   :  { %v5309_v56 = vpop.eup %5308 }
 0x1ba   :  { %v6030_v23 = vpop.eup %5310  ;;  %v616_v18 = vmul.f32 %v5309_v56, %v561_v17  ;;  %v617_v61 = vsub.f32 1.0, %v5309_v56 }
 0x1bb   :  { %v628_v62 = vsub.f32 1.0, %v6030_v23 }
 0x1bc   :  { %v618_v55 = vmul.f32 %v617_v61, %v5935_v24  ;;  %v4848_v24 = vld [vmem:[#allocation4 + $0x34] ss:$24 sps:$4 sm:$0xff]   ;;  %v4875_v61 = vld [vmem:[#allocation4 + $0xf8] ss:$24 sps:$4 sm:$0xff]  }
 0x1bd   :  { %v6035_v63 = vmul.f32 %v628_v62, %v6009_v25  ;;  %1444 = vmatprep.subr.bf16.mxu0 %v4848_v24  ;;  %v4886_v24 = vld [vmem:[#allocation4 + $0x150] ss:$24 sps:$4 sm:$0xff]  }
 0x1be   :  { %v6037_v19 = vadd.f32 %v618_v55, %v616_v18  ;;  %1445 = vmatpush1.bf16.msra.mxu0 %v4850_v20  ;;  %v4895_v20 = vld [vmem:[#allocation4 + $0x18c] ss:$24 sps:$4 sm:$0xff]  }
 0x1bf   :  { %1446 = vmatprep.subr.bf16.mxu0 %v4854_v21 }
 0x1c0   :  { %v652_v11 = vmul.f32 %v6037_v19, %v5869_v33  ;;  %v661_v44 = vmul.f32 %v5874_v34, %v6037_v19  ;;  %v621_v12 = vmul.f32 1.442695, %v6037_v19  ;;  %vm620_vm5 = vcmp.gt.f32.partialorder %v6037_v19, 0.0 }
 0x1c2   :  { %v653_v25 = vadd.f32 %v652_v11, %v5914_v8  ;;  %v662_v52 = vadd.f32 %v661_v44, %v5958_v41  ;;  %5312 = vpow2.f32 %v621_v12  ;;  %v4857_v8 = vld [vmem:[#allocation4 + $0x68] ss:$24 sps:$4 sm:$0xff]   ;;  %1447 = vmatpush1.bf16.msra.mxu0 %v4856_v53  ;;  %v4860_v41 = vld [vmem:[#allocation4 + $0x94] ss:$24 sps:$4 sm:$0xff]  }
 0x1c3   :  { %1490 = vmatpush1.bf16.msra.mxu1 %v4857_v8  ;;  %1448 = vmatprep.subr.bf16.mxu0 %v4860_v41  ;;  %v4881_v11 = vld [vmem:[#allocation4 + $0x128] ss:$24 sps:$4 sm:$0xff]   ;;  %v4884_v12 = vld [vmem:[#allocation4 + $0x154] ss:$24 sps:$4 sm:$0xff]  }
 0x1c4   :  { %v654_v51 = vadd.f32 %v5941_v26, %v653_v25  ;;  %v663_v17 = vadd.f32 %v5985_v7, %v662_v52  ;;  %1491 = vmatprep.subr.bf16.mxu1 %v4865_v36  ;;  %v4887_v25 = vld [vmem:[#allocation4 + $0x158] ss:$24 sps:$4 sm:$0xff]   ;;  %v4890_v52 = vld [vmem:[#allocation4 + $0x184] ss:$24 sps:$4 sm:$0xff]  }
 0x1c5   :  { %v4898_v8 = vld [vmem:[#allocation4 + $0x1b0] ss:$24 sps:$4 sm:$0xff]  }
 0x1c6   :  { %v4434_v39 = vmul.f32 -1.442695, %v654_v51  ;;  %v4435_v31 = vmul.f32 -1.442695, %v663_v17  ;;  %1449 = vmatpush1.bf16.msra.mxu0 %v4862_v35  ;;  %v4899_v35 = vld [vmem:[#allocation4 + $0x1b8] ss:$24 sps:$4 sm:$0xff]  }
 0x1c7   :  { %1492 = vmatpush1.bf16.msra.mxu1 %v4863_v42  ;;  %1450 = vmatprep.subr.bf16.mxu0 %v4866_v15  ;;  %v4907_v15 = vld [vmem:[#allocation4 + $0x1ec] ss:$24 sps:$4 sm:$0xff]  }
 0x1c8   :  { %5314 = vpow2.f32 %v4434_v39  ;;  %1493 = vmatprep.subr.bf16.mxu1 %v4871_v47 }
 0x1c9   :  { %5316 = vpow2.f32 %v4435_v31  ;;  %v4896_v31 = vld [vmem:[#allocation4 + $0x1b4] ss:$24 sps:$4 sm:$0xff]  }
 0x1ca   :  { %1451 = vmatpush1.bf16.msra.mxu0 %v4868_v54 }
 0x1cb   :  { %1494 = vmatpush1.bf16.msra.mxu1 %v4869_v48  ;;  %1452 = vmatprep.subr.bf16.mxu0 %v4872_v27  ;;  %v4910_v27 = vld [vmem:[#allocation4 + $0x210] ss:$24 sps:$4 sm:$0xff]  }
 0x1cc   :  { %v5313_v40 = vpop.eup %5312  ;;  %1495 = vmatprep.subr.bf16.mxu1 %v4877_v43 }
 0x1cd   :  { %v4433_v14 = vadd.f32 -1.0, %v5313_v40 }
 0x1ce   :  { %1453 = vmatpush1.bf16.msra.mxu0 %v4874_v46 }
 0x1cf   :  { %v624_v32 = vmul.f32 1.6732632, %v4433_v14  ;;  %1496 = vmatpush1.bf16.msra.mxu1 %v4875_v61  ;;  %1454 = vmatprep.subr.bf16.mxu0 %v4878_v0  ;;  %v4904_v14 = vld [vmem:[#allocation4 + $0x1e0] ss:$24 sps:$4 sm:$0xff]   ;;  %v4920_v61 = vld [vmem:[#allocation4 + $0x274] ss:$24 sps:$4 sm:$0xff]  }
 0x1d0   :  { %1497 = vmatprep.subr.bf16.mxu1 %v4883_v3  ;;  %v4925_v0 = vld [vmem:[#allocation4 + $0x27c] ss:$24 sps:$4 sm:$0xff]  }
 0x1d1   :  { %v625_v49 = vsel %vm620_vm5, %v6037_v19, %v624_v32  ;;  %v4908_v32 = vld [vmem:[#allocation4 + $0x214] ss:$24 sps:$4 sm:$0xff]   ;;  %v4926_v3 = vld [vmem:[#allocation4 + $0x2a4] ss:$24 sps:$4 sm:$0xff]  }
 0x1d2   :  { %v5315_v28 = vpop.eup %5314  ;;  %v626_v16 = vmul.f32 1.050701, %v625_v49  ;;  %1455 = vmatpush1.bf16.msra.mxu0 %v4880_v2  ;;  %v4923_v2 = vld [vmem:[#allocation4 + $0x278] ss:$24 sps:$4 sm:$0xff]  }
 0x1d3   :  { %v5317_v56 = vpop.eup %5316  ;;  %v658_v18 = vadd.f32 1.0, %v5315_v28  ;;  %1498 = vmatpush1.bf16.msra.mxu1 %v4881_v11  ;;  %1456 = vmatprep.subr.bf16.mxu0 %v4884_v12  ;;  %v4913_v28 = vld [vmem:[#allocation4 + $0x21c] ss:$24 sps:$4 sm:$0xff]   ;;  %v4928_v11 = vld [vmem:[#allocation4 + $0x2a0] ss:$24 sps:$4 sm:$0xff]  }
 0x1d4   :  { %v667_v62 = vadd.f32 1.0, %v5317_v56  ;;  %v627_v55 = vmul.f32 %v6030_v23, %v626_v16  ;;  %v4889_v23 = vld [vmem:[#allocation4 + $0x15c] ss:$24 sps:$4 sm:$0xff]   ;;  %v4911_v16 = vld [vmem:[#allocation4 + $0x218] ss:$24 sps:$4 sm:$0xff]  }
 0x1d5   :  { %5318 = vrcp.f32 %v658_v18  ;;  %1499 = vmatprep.subr.bf16.mxu1 %v4889_v23  ;;  %v4919_v56 = vld [vmem:[#allocation4 + $0x24c] ss:$24 sps:$4 sm:$0xff]   ;;  %v4917_v18 = vld [vmem:[#allocation4 + $0x248] ss:$24 sps:$4 sm:$0xff]  }
 0x1d6   :  { %5320 = vrcp.f32 %v667_v62  ;;  %v630_v22 = vadd.f32 %v6035_v63, %v627_v55  ;;  %1457 = vmatpush1.bf16.msra.mxu0 %v4886_v24  ;;  %v4892_v63 = vld [vmem:[#allocation4 + $0x180] ss:$24 sps:$4 sm:$0xff]   ;;  %v4922_v55 = vld [vmem:[#allocation4 + $0x270] ss:$24 sps:$4 sm:$0xff]   ;;  %v4932_v24 = vld [vmem:[#allocation4 + $0x2d4] ss:$24 sps:$4 sm:$0xff]  }
 0x1d7   :  { %1500 = vmatpush1.bf16.msra.mxu1 %v4887_v25  ;;  %1458 = vmatprep.subr.bf16.mxu0 %v4890_v52  ;;  %v4929_v23 = vld [vmem:[#allocation4 + $0x2a8] ss:$24 sps:$4 sm:$0xff]   ;;  %v4937_v52 = vld [vmem:[#allocation4 + $0x2dc] ss:$24 sps:$4 sm:$0xff]  }
 0x1d8   :  { %v632_v44 = vrot.slane %v630_v22, 2  ;;  %1501 = vmatprep.subr.bf16.mxu1 %v4895_v20 }
 0x1da   :  { %634 = vst [vmem:[#allocation2 + $0x18] ss:$-20 sps:$4 sm:$0xc3] %v632_v44   ;;  %1459 = vmatpush1.bf16.msra.mxu0 %v4892_v63  ;;  %v4931_v44 = vld [vmem:[#allocation4 + $0x2ac] ss:$24 sps:$4 sm:$0xff]  }
 0x1db   :  { %1502 = vmatpush1.bf16.msra.mxu1 %v4893_v13  ;;  %1460 = vmatprep.subr.bf16.mxu0 %v4896_v31  ;;  %v4935_v31 = vld [vmem:[#allocation4 + $0x2d8] ss:$24 sps:$4 sm:$0xff]  }
 0x1dc   :  { %1503 = vmatprep.subr.bf16.mxu1 %v4901_v29 }
 0x1de   :  { %1461 = vmatpush1.bf16.msra.mxu0 %v4898_v8  ;;  %v4940_v8 = vld [vmem:[#allocation4 + $0x14] ss:$24 sps:$4 sm:$0xff]  }
 0x1df   :  { %v5319_v30 = vpop.eup %5318  ;;  %1504 = vmatpush1.bf16.msra.mxu1 %v4899_v35 }
 0x1e0   :  { %v6052_v51 = vpop.eup %5320  ;;  %v670_v17 = vmul.f32 %v5319_v30, %v6037_v19  ;;  %v671_v21 = vsub.f32 1.0, %v5319_v30  ;;  %v4902_v19 = vld [vmem:[#allocation4 + $0x1e4] ss:$24 sps:$4 sm:$0xff]   ;;  %1505 = vmatprep.subr.bf16.mxu1 %v4907_v15  ;;  %v4934_v30 = vld [vmem:[#allocation4 + $0x2d0] ss:$24 sps:$4 sm:$0xff]  }
 0x1e1   :  { %v682_v39 = vsub.f32 1.0, %v6052_v51  ;;  %1462 = vmatprep.subr.bf16.mxu0 %v4902_v19 }
 0x1e2   :  { %v672_v53 = vmul.f32 %v671_v21, %v5904_v4  ;;  %1463 = vmatpush1.bf16.msra.mxu0 %v4904_v14 }
 0x1e3   :  { %v6058_v41 = vmul.f32 %v682_v39, %v5969_v58  ;;  %v4905_v58 = vld [vmem:[#allocation4 + $0x1e8] ss:$24 sps:$4 sm:$0xff]   ;;  %1464 = vmatprep.subr.bf16.mxu0 %v4908_v32 }
 0x1e4   :  { %v6060_v36 = vadd.f32 %v672_v53, %v670_v17  ;;  %1506 = vmatpush1.bf16.msra.mxu1 %v4905_v58 }
 0x1e5   :  { %1507 = vmatprep.subr.bf16.mxu1 %v4913_v28 }
 0x1e6   :  { %v714_v42 = vmul.f32 %v6060_v36, %v5869_v33  ;;  %v723_v40 = vmul.f32 %v5874_v34, %v6060_v36  ;;  %v675_v4 = vmul.f32 1.442695, %v6060_v36  ;;  %1465 = vmatpush1.bf16.msra.mxu0 %v4910_v27  ;;  %vm674_vm6 = vcmp.gt.f32.partialorder %v6060_v36, 0.0 }
 0x1e8   :  { %v715_v54 = vadd.f32 %v714_v42, %v5917_v9  ;;  %v724_v47 = vadd.f32 %v723_v40, %v5961_v38  ;;  %5322 = vpow2.f32 %v675_v4  ;;  %v4914_v9 = vld [vmem:[#allocation4 + $0x244] ss:$24 sps:$4 sm:$0xff]   ;;  %1508 = vmatpush1.bf16.msra.mxu1 %v4911_v16  ;;  %v4916_v38 = vld [vmem:[#allocation4 + $0x240] ss:$24 sps:$4 sm:$0xff]  }
 0x1e9   :  { %1466 = vmatprep.subr.bf16.mxu0 %v4914_v9  ;;  %1509 = vmatprep.subr.bf16.mxu1 %v4919_v56 }
 0x1ea   :  { %v716_v48 = vadd.f32 %v5941_v26, %v715_v54  ;;  %v725_v49 = vadd.f32 %v5985_v7, %v724_v47  ;;  %1467 = vmatpush1.bf16.msra.mxu0 %v4916_v38 }
 0x1eb   :  { %1468 = vmatprep.subr.bf16.mxu0 %v4920_v61 }
 0x1ec   :  { %v4437_v46 = vmul.f32 -1.442695, %v716_v48  ;;  %v4438_v43 = vmul.f32 -1.442695, %v725_v49  ;;  %1510 = vmatpush1.bf16.msra.mxu1 %v4917_v18 }
 0x1ed   :  { %1511 = vmatprep.subr.bf16.mxu1 %v4925_v0 }
 0x1ee   :  { %5324 = vpow2.f32 %v4437_v46  ;;  %1469 = vmatpush1.bf16.msra.mxu0 %v4922_v55 }
 0x1ef   :  { %5326 = vpow2.f32 %v4438_v43  ;;  %1470 = vmatprep.subr.bf16.mxu0 %v4926_v3 }
 0x1f0   :  { %1512 = vmatpush1.bf16.msra.mxu1 %v4923_v2 }
 0x1f1   :  { %1513 = vmatprep.subr.bf16.mxu1 %v4931_v44 }
 0x1f2   :  { %v5323_v62 = vpop.eup %5322  ;;  %1471 = vmatpush1.bf16.msra.mxu0 %v4928_v11 }
 0x1f3   :  { %v4436_v22 = vadd.f32 -1.0, %v5323_v62  ;;  %1472 = vmatprep.subr.bf16.mxu0 %v4932_v24 }
 0x1f4   :  { %1514 = vmatpush1.bf16.msra.mxu1 %v4929_v23 }
 0x1f5   :  { %v678_v12 = vmul.f32 1.6732632, %v4436_v22  ;;  %1515 = vmatprep.subr.bf16.mxu1 %v4937_v52 }
 0x1f6   :  { %1473 = vmatpush1.bf16.msra.mxu0 %v4934_v30 }
 0x1f7   :  { %v679_v25 = vsel %vm674_vm6, %v6060_v36, %v678_v12  ;;  %1528 = vmatprep.subr.bf16.mxu0 %v4940_v8 }
 0x1f8   :  { %v5325_v63 = vpop.eup %5324  ;;  %v680_v20 = vmul.f32 1.050701, %v679_v25  ;;  %1516 = vmatpush1.bf16.msra.mxu1 %v4935_v31 }
 0x1f9   :  { %v5327_v13 = vpop.eup %5326  ;;  %v720_v17 = vadd.f32 1.0, %v5325_v63 }
 0x1fa   :  { %v729_v21 = vadd.f32 1.0, %v5327_v13  ;;  %v681_v39 = vmul.f32 %v6052_v51, %v680_v20 }
 0x1fb   :  { %5328 = vrcp.f32 %v720_v17 }
 0x1fc   :  { %5330 = vrcp.f32 %v729_v21  ;;  %v684_v53 = vadd.f32 %v6058_v41, %v681_v39 }
 0x1fe   :  { %685 = vst [vmem:[#allocation2 + $0x10] sm:$0x3] %v684_v53  ;;  %v687_v29 = vrot.slane %v684_v53, 4 }
 0x200   :  { %689 = vst [vmem:[#allocation2 + $0x8] sm:$0xc0] %v687_v29 }
 0x205   :  { %v5329_v35 = vpop.eup %5328 }
 0x206   :  { %v5331_v19 = vpop.eup %5330  ;;  %v732_v42 = vmul.f32 %v5329_v35, %v6060_v36  ;;  %v733_v40 = vsub.f32 1.0, %v5329_v35 }
 0x207   :  { %v744_v51 = vsub.f32 1.0, %v5331_v19 }
 0x208   :  { %v734_v4 = vmul.f32 %v733_v40, %v5907_v5 }
 0x209   :  { %v745_v14 = vmul.f32 %v744_v51, %v5972_v59 }
 0x20a   :  { %v735_v58 = vadd.f32 %v734_v4, %v732_v42 }
 0x20c   :  { %v764_v41 = vmul.f32 %v735_v58, %v5869_v33  ;;  %v773_v15 = vmul.f32 %v5874_v34, %v735_v58  ;;  %v737_v54 = vmul.f32 1.442695, %v735_v58  ;;  %vm736_vm7 = vcmp.gt.f32.partialorder %v735_v58, 0.0 }
 0x20e   :  { %v765_v47 = vadd.f32 %v764_v41, %v5900_v1  ;;  %v774_v32 = vadd.f32 %v773_v15, %v5950_v45  ;;  %5332 = vpow2.f32 %v737_v54 }
 0x210   :  { %v766_v48 = vadd.f32 %v5941_v26, %v765_v47  ;;  %v775_v36 = vadd.f32 %v5985_v7, %v774_v32 }
 0x212   :  { %v4440_v49 = vmul.f32 -1.442695, %v766_v48  ;;  %v4441_v27 = vmul.f32 -1.442695, %v775_v36  ;;  %v6096_v36 = vld [vmem:[#allocation2 + $0x18] sm:$0xff] }
 0x214   :  { %5334 = vpow2.f32 %v4440_v49  ;;  %v4938_v49 = vld [vmem:[#allocation4 + $0x10] ss:$24 sps:$4 sm:$0xff]  }
 0x215   :  { %5336 = vpow2.f32 %v4441_v27  ;;  %v6102_v27 = vld [vmem:[#allocation2] sm:$0xff] }
 0x218   :  { %v5333_v5 = vpop.eup %5332 }
 0x219   :  { %v4439_v59 = vadd.f32 -1.0, %v5333_v5 }
 0x21b   :  { %v740_v28 = vmul.f32 1.6732632, %v4439_v59  ;;  %v4943_v59 = vld [vmem:[#allocation4 + $0x44] ss:$24 sps:$4 sm:$0xff]  }
 0x21d   :  { %v741_v16 = vsel %vm736_vm7, %v735_v58, %v740_v28  ;;  %v4941_v28 = vld [vmem:[#allocation4 + $0x40] ss:$24 sps:$4 sm:$0xff]  }
 0x21e   :  { %v5335_v46 = vpop.eup %5334  ;;  %v742_v43 = vmul.f32 1.050701, %v741_v16  ;;  %v4946_v16 = vld [vmem:[#allocation4 + $0x74] ss:$24 sps:$4 sm:$0xff]  }
 0x21f   :  { %v5337_v9 = vpop.eup %5336  ;;  %v770_v1 = vadd.f32 1.0, %v5335_v46  ;;  %v4944_v46 = vld [vmem:[#allocation4 + $0x70] ss:$24 sps:$4 sm:$0xff]  }
 0x220   :  { %v779_v38 = vadd.f32 1.0, %v5337_v9  ;;  %v743_v45 = vmul.f32 %v5331_v19, %v742_v43  ;;  %v4949_v43 = vld [vmem:[#allocation4 + $0xa4] ss:$24 sps:$4 sm:$0xff]   ;;  %v4947_v9 = vld [vmem:[#allocation4 + $0xa0] ss:$24 sps:$4 sm:$0xff]  }
 0x221   :  { %5338 = vrcp.f32 %v770_v1  ;;  %v4952_v1 = vld [vmem:[#allocation4 + $0xd4] ss:$24 sps:$4 sm:$0xff]  }
 0x222   :  { %5340 = vrcp.f32 %v779_v38  ;;  %v746_v56 = vadd.f32 %v745_v14, %v743_v45  ;;  %v4950_v38 = vld [vmem:[#allocation4 + $0xd0] ss:$24 sps:$4 sm:$0xff]   ;;  %v4955_v45 = vld [vmem:[#allocation4 + $0x104] ss:$24 sps:$4 sm:$0xff]  }
 0x224   :  { %v748_v18 = vrot.slane %v746_v56, 6  ;;  %v4953_v56 = vld [vmem:[#allocation4 + $0x100] ss:$24 sps:$4 sm:$0xff]  }
 0x226   :  { %750 = vst [vmem:[#allocation2 + $0x10] ss:$-4 sps:$4 sm:$0x3c] %v748_v18   ;;  %v4958_v18 = vld [vmem:[#allocation4 + $0x134] ss:$24 sps:$4 sm:$0xff]  }
 0x22b   :  { %v5339_v61 = vpop.eup %5338 }
 0x22c   :  { %v5341_v62 = vpop.eup %5340  ;;  %v782_v55 = vmul.f32 %v5339_v61, %v735_v58  ;;  %v783_v0 = vsub.f32 1.0, %v5339_v61  ;;  %v4956_v61 = vld [vmem:[#allocation4 + $0x130] ss:$24 sps:$4 sm:$0xff]  }
 0x22d   :  { %v794_v22 = vsub.f32 1.0, %v5341_v62 }
 0x22e   :  { %v784_v2 = vmul.f32 %v783_v0, %v5897_v60  ;;  %v4964_v0 = vld [vmem:[#allocation4 + $0x194] ss:$24 sps:$4 sm:$0xff]  }
 0x22f   :  { %v795_v3 = vmul.f32 %v794_v22, %v5953_v50  ;;  %v4962_v22 = vld [vmem:[#allocation4 + $0x190] ss:$24 sps:$4 sm:$0xff]  }
 0x230   :  { %v785_v11 = vadd.f32 %v784_v2, %v782_v55  ;;  %v4959_v55 = vld [vmem:[#allocation4 + $0x160] ss:$24 sps:$4 sm:$0xff]   ;;  %v4967_v2 = vld [vmem:[#allocation4 + $0x1c4] ss:$24 sps:$4 sm:$0xff]  }
 0x232   :  { %v831_v44 = vmul.f32 %v5874_v34, %v785_v11  ;;  %v787_v12 = vmul.f32 1.442695, %v785_v11  ;;  %v822_v24 = vmul.f32 %v785_v11, %v5869_v33  ;;  %vm786_vm8 = vcmp.gt.f32.partialorder %v785_v11, 0.0 }
 0x234   :  { %v832_v23 = vadd.f32 %v831_v44, %v5965_v57  ;;  %5342 = vpow2.f32 %v787_v12  ;;  %v823_v25 = vadd.f32 %v822_v24, %v5920_v10  ;;  %v4968_v44 = vld [vmem:[#allocation4 + $0x1f0] ss:$24 sps:$4 sm:$0xff]   ;;  %v4973_v12 = vld [vmem:[#allocation4 + $0x224] ss:$24 sps:$4 sm:$0xff]   ;;  %v4971_v24 = vld [vmem:[#allocation4 + $0x220] ss:$24 sps:$4 sm:$0xff]  }
 0x236   :  { %v833_v52 = vadd.f32 %v5985_v7, %v832_v23  ;;  %v824_v63 = vadd.f32 %v5941_v26, %v823_v25  ;;  %v4976_v23 = vld [vmem:[#allocation4 + $0x254] ss:$24 sps:$4 sm:$0xff]   ;;  %v4974_v25 = vld [vmem:[#allocation4 + $0x250] ss:$24 sps:$4 sm:$0xff]  }
 0x238   :  { %v4444_v20 = vmul.f32 -1.442695, %v833_v52  ;;  %v4443_v30 = vmul.f32 -1.442695, %v824_v63  ;;  %v4979_v52 = vld [vmem:[#allocation4 + $0x284] ss:$24 sps:$4 sm:$0xff]  }
 0x239   :  { %v4977_v63 = vld [vmem:[#allocation4 + $0x280] ss:$24 sps:$4 sm:$0xff]  }
 0x23a   :  { %5344 = vpow2.f32 %v4444_v20  ;;  %v4982_v20 = vld [vmem:[#allocation4 + $0x2b4] ss:$24 sps:$4 sm:$0xff]  }
 0x23b   :  { %5346 = vpow2.f32 %v4443_v30  ;;  %v4980_v30 = vld [vmem:[#allocation4 + $0x2b0] ss:$24 sps:$4 sm:$0xff]  }
 0x23e   :  { %v5343_v60 = vpop.eup %5342 }
 0x23f   :  { %v4442_v50 = vadd.f32 -1.0, %v5343_v60  ;;  %v4985_v60 = vld [vmem:[#allocation4 + $0x2e4] ss:$24 sps:$4 sm:$0xff]  }
 0x241   :  { %v790_v13 = vmul.f32 1.6732632, %v4442_v50  ;;  %v4983_v50 = vld [vmem:[#allocation4 + $0x2e0] ss:$24 sps:$4 sm:$0xff]  }
 0x243   :  { %v791_v34 = vsel %vm786_vm8, %v785_v11, %v790_v13 }
 0x244   :  { %v5345_v17 = vpop.eup %5344  ;;  %v792_v33 = vmul.f32 1.050701, %v791_v34 }
 0x245   :  { %v5347_v21 = vpop.eup %5346  ;;  %v837_v57 = vadd.f32 1.0, %v5345_v17 }
 0x246   :  { %v793_v39 = vmul.f32 %v5341_v62, %v792_v33  ;;  %v828_v31 = vadd.f32 1.0, %v5347_v21  ;;  %v4961_v62 = vld [vmem:[#allocation4 + $0x164] ss:$24 sps:$4 sm:$0xff]  }
 0x247   :  { %5348 = vrcp.f32 %v837_v57 }
 0x248   :  { %v796_v10 = vadd.f32 %v795_v3, %v793_v39  ;;  %5350 = vrcp.f32 %v828_v31  ;;  %v4965_v3 = vld [vmem:[#allocation4 + $0x1c0] ss:$24 sps:$4 sm:$0xff]  }
 0x24a   :  { %v798_v7 = vrot.slane %v796_v10, 4  ;;  %801 = vst [vmem:[#allocation2 + $0x8] sm:$0xc] %v796_v10 }
 0x24c   :  { %800 = vst [vmem:[#allocation2 + $0x10] sm:$0x30] %v798_v7 }
 0x251   :  { %v5349_v26 = vpop.eup %5348 }
 0x252   :  { %v5351_v53 = vpop.eup %5350  ;;  %v852_v8 = vsub.f32 1.0, %v5349_v26 }
 0x253   :  { %v840_v29 = vmul.f32 %v5351_v53, %v785_v11  ;;  %v841_v35 = vsub.f32 1.0, %v5351_v53  ;;  %v4970_v11 = vld [vmem:[#allocation4 + $0x1f4] ss:$24 sps:$4 sm:$0xff]  }
 0x254   :  { %v853_v19 = vmul.f32 %v852_v8, %v5975_v37 }
 0x255   :  { %v842_v42 = vmul.f32 %v841_v35, %v5910_v6 }
 0x257   :  { %v843_v40 = vadd.f32 %v842_v42, %v840_v29 }
 0x259   :  { %v845_v51 = vmul.f32 1.442695, %v843_v40  ;;  %vm844_vm9 = vcmp.gt.f32.partialorder %v843_v40, 0.0 }
 0x25b   :  { %5352 = vpow2.f32 %v845_v51 }
 0x265   :  { %v5353_v4 = vpop.eup %5352 }
 0x266   :  { %v4445_v14 = vadd.f32 -1.0, %v5353_v4 }
 0x268   :  { %v848_v58 = vmul.f32 1.6732632, %v4445_v14 }
 0x26a   :  { %v849_v41 = vsel %vm844_vm9, %v843_v40, %v848_v58 }
 0x26b   :  { %v850_v15 = vmul.f32 1.050701, %v849_v41 }
 0x26d   :  { %v851_v54 = vmul.f32 %v5349_v26, %v850_v15 }
 0x26f   :  { %v854_v47 = vadd.f32 %v853_v19, %v851_v54 }
 0x271   :  { %v856_v32 = vrot.slane %v854_v47, 2 }
 0x273   :  { %858 = vst [vmem:[#allocation2 + $0x8] ss:$12 sps:$4 sm:$0xc3] %v856_v32  }
 0x27a   :  { %v6094_v48 = vld [vmem:[#allocation2 + $0x8] sm:$0xff]  ;;  %v6098_v37 = vld [vmem:[#allocation2 + $0x10] sm:$0xff] }
 0x27b   :  { %v865_v6 = vpack.c.bf16 %v6096_v36, %v6094_v48  ;;  %v6106_v5 = vpack.c.bf16 %v6098_v37, %v6102_v27 }
 0x27d   :  { %1474 = vmatprep.mubr.bf16.mxu0 %v865_v6  ;;  %1517 = vmatprep.mubr.bf16.mxu1 %v865_v6 }
 0x27e   :  { %1475 = vmatmul.mubr.bf16.vlgmr.msra.gmra.mrb[0].mxu0 %v6106_v5  ;;  %1518 = vmatmul.mubr.bf16.vlgmr.msra.gmra.mrb[16].mxu1 %v6106_v5 }
 0x27f   :  { %1529 = vmatpush1.bf16.msra.mxu0 %v4938_v49  ;;  %1560 = vmatprep.mubr.bf16.mxu0 %v865_v6  ;;  %v6142_v49 = vld [vmem:[%s6719_s5 + $0x10] sm:$0xf] }
 0x280   :  { %1530 = vmatprep.subr.bf16.mxu0 %v4943_v59 }
 0x283   :  { %1531 = vmatpush1.bf16.msra.mxu0 %v4941_v28 }
 0x284   :  { %1532 = vmatprep.subr.bf16.mxu0 %v4946_v16  ;;  %v1595_v16 = vmul.f32 0.0, %v6142_v49 }
 0x287   :  { %1533 = vmatpush1.bf16.msra.mxu0 %v4944_v46 }
 0x288   :  { %1534 = vmatprep.subr.bf16.mxu0 %v4949_v43 }
 0x28b   :  { %1535 = vmatpush1.bf16.msra.mxu0 %v4947_v9 }
 0x28c   :  { %1536 = vmatprep.subr.bf16.mxu0 %v4952_v1 }
 0x28f   :  { %1537 = vmatpush1.bf16.msra.mxu0 %v4950_v38 }
 0x290   :  { %1538 = vmatprep.subr.bf16.mxu0 %v4955_v45 }
 0x293   :  { %1539 = vmatpush1.bf16.msra.mxu0 %v4953_v56 }
 0x294   :  { %1540 = vmatprep.subr.bf16.mxu0 %v4958_v18 }
 0x297   :  { %1541 = vmatpush1.bf16.msra.mxu0 %v4956_v61 }
 0x298   :  { %1542 = vmatprep.subr.bf16.mxu0 %v4961_v62 }
 0x29b   :  { %1543 = vmatpush1.bf16.msra.mxu0 %v4959_v55 }
 0x29c   :  { %1544 = vmatprep.subr.bf16.mxu0 %v4964_v0 }
 0x29f   :  { %1545 = vmatpush1.bf16.msra.mxu0 %v4962_v22 }
 0x2a0   :  { %1546 = vmatprep.subr.bf16.mxu0 %v4967_v2 }
 0x2a3   :  { %1547 = vmatpush1.bf16.msra.mxu0 %v4965_v3 }
 0x2a4   :  { %1548 = vmatprep.subr.bf16.mxu0 %v4970_v11 }
 0x2a7   :  { %1549 = vmatpush1.bf16.msra.mxu0 %v4968_v44 }
 0x2a8   :  { %1550 = vmatprep.subr.bf16.mxu0 %v4973_v12 }
 0x2ab   :  { %1551 = vmatpush1.bf16.msra.mxu0 %v4971_v24 }
 0x2ac   :  { %1552 = vmatprep.subr.bf16.mxu0 %v4976_v23 }
 0x2af   :  { %1553 = vmatpush1.bf16.msra.mxu0 %v4974_v25 }
 0x2b0   :  { %1554 = vmatprep.subr.bf16.mxu0 %v4979_v52 }
 0x2b3   :  { %1555 = vmatpush1.bf16.msra.mxu0 %v4977_v63 }
 0x2b4   :  { %1556 = vmatprep.subr.bf16.mxu0 %v4982_v20 }
 0x2b7   :  { %1557 = vmatpush1.bf16.msra.mxu0 %v4980_v30 }
 0x2b8   :  { %1558 = vmatprep.subr.bf16.mxu0 %v4985_v60 }
 0x2bb   :  { %1559 = vmatpush1.bf16.msra.mxu0 %v4983_v50 }
 0x2be   :  { %1561 = vmatmul.mubr.bf16.vlgmr.msra.gmra.mrb[4].mxu0 %v6106_v5 }
 0x351   :  { %v1476_v13 = vpop.f32.mrb[0].mxu0  ;;  %v6111_v34 = vpop.f32.mrb[16].mxu1 }
 0x352   :  { %v6113_v17 = vpop.f32.mrb[1].mxu0  ;;  %v1521_v33 = vpop.f32.mrb[17].mxu1  ;;  %v1695_v39 = vrot.slane %v1476_v13, 4  ;;  %v1636_v4 = vrot.slane %v1476_v13, 2  ;;  %v1745_v15 = vrot.slane %v1476_v13, 6  ;;  %v1638_v5 = vrot.slane %v6111_v34, 2 }
 0x353   :  { %v1480_v21 = vpop.f32.mrb[2].mxu0  ;;  %v1523_v57 = vpop.f32.mrb[18].mxu1  ;;  %v1806_v31 = vrot.slane %v1521_v33, 4  ;;  %v1866_v10 = vrot.slane %v1521_v33, 2  ;;  %v1975_v7 = vrot.slane %v1521_v33, 6  ;;  %v1697_v59 = vrot.slane %v6111_v34, 4 }
 0x354   :  { %v1482_v26 = vpop.f32.mrb[3].mxu0  ;;  %v1525_v53 = vpop.f32.mrb[19].mxu1  ;;  %v1860_v8 = vrot.slane %v1480_v21, 2  ;;  %v1919_v29 = vrot.slane %v1480_v21, 4  ;;  %v1969_v35 = vrot.slane %v1480_v21, 6  ;;  %v1637_v28 = vrot.slane %v6113_v17, 2 }
 0x355   :  { %v6116_v19 = vsel %vm423_vm1, %v1480_v21, %v1806_v31  ;;  %v1582_v14 = vrot.slane %v1525_v53, 4  ;;  %v1642_v58 = vrot.slane %v1525_v53, 2  ;;  %v6128_v41 = vsel %vm423_vm1, %v1695_v39, %v1525_v53 }
 0x356   :  { %v6119_v42 = vsel %vm423_vm1, %v1860_v8, %v1866_v10  ;;  %v6122_v40 = vsel %vm423_vm1, %v1919_v29, %v1521_v33  ;;  %v6125_v51 = vsel %vm423_vm1, %v1969_v35, %v1975_v7  ;;  %v1751_v54 = vrot.slane %v1525_v53, 6  ;;  %v6177_v33 = vld [vmem:[%s6719_s5 + $0x18] sm:$0xf] }
 0x357   :  { %v6131_v47 = vsel %vm423_vm1, %v1476_v13, %v1582_v14  ;;  %v6134_v32 = vsel %vm423_vm1, %v1636_v4, %v1642_v58  ;;  %v1696_v46 = vrot.slane %v6113_v17, 4  ;;  %v1746_v43 = vrot.slane %v6113_v17, 6  ;;  %v6199_v58 = vld [vmem:[%s6719_s5 + $0x14] sm:$0xf] }
 0x358   :  { %v6137_v6 = vsel %vm423_vm1, %v1745_v15, %v1751_v54  ;;  %v1862_v9 = vrot.slane %v1523_v57, 2  ;;  %v1920_v1 = vrot.slane %v1482_v26, 4  ;;  %v1921_v38 = vrot.slane %v1523_v57, 4 }
 0x359   :  { %v1971_v45 = vrot.slane %v1523_v57, 6  ;;  %v1861_v56 = vrot.slane %v1482_v26, 2  ;;  %v1970_v18 = vrot.slane %v1482_v26, 6  ;;  %v1747_v8 = vrot.slane %v6111_v34, 6 }
 0x391   :  { %v1562_v61 = vpop.f32.mrb[4].mxu0 }
 0x392   :  { %v1807_v62 = vrot.slane %v1562_v61, 4  ;;  %v1867_v55 = vrot.slane %v1562_v61, 2  ;;  %v6151_v0 = vsel %vm423_vm1, %v1920_v1, %v1562_v61  ;;  %v1976_v22 = vrot.slane %v1562_v61, 6  ;;  %v1564_v2 = vpop.f32.mrb[5].mxu0 }
 0x393   :  { %v1808_v3 = vrot.slane %v1564_v2, 4  ;;  %v1868_v11 = vrot.slane %v1564_v2, 2  ;;  %v6154_v44 = vsel %vm423_vm1, %v1921_v38, %v1564_v2  ;;  %v1977_v12 = vrot.slane %v1564_v2, 6  ;;  %v1566_v24 = vpop.f32.mrb[6].mxu0 }
 0x394   :  { %v6157_v23 = vsel %vm423_vm1, %v1482_v26, %v1807_v62  ;;  %v6160_v25 = vsel %vm423_vm1, %v1861_v56, %v1867_v55  ;;  %v6163_v52 = vsel %vm423_vm1, %v1970_v18, %v1976_v22  ;;  %v1583_v63 = vrot.slane %v1566_v24, 4  ;;  %v1568_v20 = vpop.f32.mrb[7].mxu0 }
 0x395   :  { %v6166_v30 = vsel %vm423_vm1, %v1523_v57, %v1808_v3  ;;  %v6169_v60 = vsel %vm423_vm1, %v1862_v9, %v1868_v11  ;;  %v6172_v50 = vsel %vm423_vm1, %v1971_v45, %v1977_v12  ;;  %v1643_v13 = vrot.slane %v1566_v24, 2 }
 0x396   :  { %v1589_v21 = vsel %vm423_vm1, %v6113_v17, %v1583_v63  ;;  %v6182_v39 = vsel %vm423_vm1, %v1696_v46, %v1566_v24  ;;  %v1752_v57 = vrot.slane %v1566_v24, 6  ;;  %v1584_v31 = vrot.slane %v1568_v20, 4 }
 0x397   :  { %v1596_v10 = vadd.f32 %v1595_v16, %v1589_v21  ;;  %v1649_v7 = vsel %vm423_vm1, %v1637_v28, %v1643_v13  ;;  %v1644_v26 = vrot.slane %v1568_v20, 2  ;;  %v6186_v53 = vsel %vm423_vm1, %v1697_v59, %v1568_v20 }
 0x398   :  { %v6190_v29 = vsel %vm423_vm1, %v1746_v43, %v1752_v57  ;;  %v1590_v17 = vsel %vm423_vm1, %v6111_v34, %v1584_v31  ;;  %v1753_v35 = vrot.slane %v1568_v20, 6  ;;  %v1604_v59 = vmul.f32 0.0, %v6199_v58  ;;  %v6208_v34 = vld [vmem:[%s6719_s5 + $0x1c] sm:$0xf] }
 0x399   :  { %v1597_v4 = vadd.f32 %v6177_v33, %v1596_v10  ;;  %v1650_v14 = vsel %vm423_vm1, %v1638_v5, %v1644_v26 }
 0x39a   :  { %v6202_v15 = vsel %vm423_vm1, %v1747_v8, %v1753_v35  ;;  %v1605_v28 = vadd.f32 %v1604_v59, %v1590_v17 }
 0x39b   :  { %v4546_v54 = vmul.f32 -1.442695, %v1597_v4 }
 0x39c   :  { %v1606_v5 = vadd.f32 %v6208_v34, %v1605_v28 }
 0x39d   :  { %5354 = vpow2.f32 %v4546_v54 }
 0x39e   :  { %v4547_v43 = vmul.f32 -1.442695, %v1606_v5 }
 0x3a7   :  { %v5355_v16 = vpop.eup %5354 }
 0x3a8   :  { %v1601_v46 = vadd.f32 1.0, %v5355_v16 }
 0x3aa   :  { %5356 = vrcp.f32 %v1601_v46 }
 0x3ab   :  { %5358 = vpow2.f32 %v4547_v43 }
 0x3b4   :  { %v5357_v9 = vpop.eup %5356 }
 0x3b5   :  { %v1614_v1 = vsub.f32 1.0, %v5357_v9  ;;  %v5359_v38 = vpop.eup %5358  ;;  %v1613_v45 = vmul.f32 0.0, %v5357_v9 }
 0x3b6   :  { %v1610_v61 = vadd.f32 1.0, %v5359_v38 }
 0x3b7   :  { %v1615_v56 = vmul.f32 %v1614_v1, %v6131_v47  ;;  %v1592_v47 = vrot.slane %v6096_v36, 4 }
 0x3b9   :  { %v1616_v18 = vadd.f32 %v1615_v56, %v1613_v45  ;;  %v1594_v8 = vsel %vm423_vm1, %v6102_v27, %v1592_v47 }
 0x3bb   :  { %v1657_v62 = vmul.f32 %v6142_v49, %v1616_v18  ;;  %v1618_v55 = vmul.f32 1.442695, %v1616_v18  ;;  %v1666_v22 = vmul.f32 %v6199_v58, %v1616_v18  ;;  %vm1617_vm10 = vcmp.gt.f32.partialorder %v1616_v18, 0.0 }
 0x3bd   :  { %v1658_v2 = vadd.f32 %v1657_v62, %v1649_v7  ;;  %5360 = vpow2.f32 %v1618_v55  ;;  %v1667_v3 = vadd.f32 %v1666_v22, %v1650_v14 }
 0x3be   :  { %5362 = vrcp.f32 %v1610_v61 }
 0x3bf   :  { %v1659_v11 = vadd.f32 %v6177_v33, %v1658_v2  ;;  %v1668_v57 = vadd.f32 %v6208_v34, %v1667_v3  ;;  %v1652_v2 = vrot.slane %v6102_v27, 2  ;;  %v1654_v3 = vrot.slane %v6096_v36, 2 }
 0x3c1   :  { %v4549_v12 = vmul.f32 -1.442695, %v1659_v11  ;;  %v4550_v4 = vmul.f32 -1.442695, %v1668_v57  ;;  %v1656_v47 = vsel %vm423_vm1, %v1652_v2, %v1654_v3 }
 0x3c3   :  { %5364 = vpow2.f32 %v4549_v12 }
 0x3c7   :  { %v5361_v24 = vpop.eup %5360 }
 0x3c8   :  { %v5363_v63 = vpop.eup %5362  ;;  %v4548_v20 = vadd.f32 -1.0, %v5361_v24 }
 0x3c9   :  { %v1625_v21 = vsub.f32 1.0, %v5363_v63 }
 0x3ca   :  { %v1621_v13 = vmul.f32 1.6732632, %v4548_v20 }
 0x3cb   :  { %v1626_v35 = vmul.f32 %v1625_v21, %v1594_v8 }
 0x3cc   :  { %v1622_v31 = vsel %vm1617_vm10, %v1616_v18, %v1621_v13 }
 0x3cd   :  { %v5365_v10 = vpop.eup %5364  ;;  %v1623_v7 = vmul.f32 1.050701, %v1622_v31 }
 0x3ce   :  { %v1663_v26 = vadd.f32 1.0, %v5365_v10 }
 0x3cf   :  { %v1624_v17 = vmul.f32 %v5363_v63, %v1623_v7 }
 0x3d0   :  { %5366 = vrcp.f32 %v1663_v26 }
 0x3d1   :  { %v1627_v14 = vadd.f32 %v1626_v35, %v1624_v17  ;;  %5368 = vpow2.f32 %v4550_v4 }
 0x3d3   :  { %1628 = vst [vmem:[#allocation3] sm:$0x3] %v1627_v14  ;;  %v1630_v54 = vrot.slane %v1627_v14, 4 }
 0x3d5   :  { %1632 = vst [vmem:[#allocation3 + $0x18] sm:$0xc0] %v1630_v54 }
 0x3da   :  { %v5367_v59 = vpop.eup %5366 }
 0x3db   :  { %v1675_v28 = vmul.f32 %v5367_v59, %v1616_v18  ;;  %v1676_v5 = vsub.f32 1.0, %v5367_v59  ;;  %v5369_v16 = vpop.eup %5368 }
 0x3dc   :  { %v1672_v9 = vadd.f32 1.0, %v5369_v16 }
 0x3dd   :  { %v1677_v46 = vmul.f32 %v1676_v5, %v6134_v32 }
 0x3df   :  { %v1678_v43 = vadd.f32 %v1677_v46, %v1675_v28 }
 0x3e1   :  { %v1707_v1 = vmul.f32 %v6142_v49, %v1678_v43  ;;  %v1680_v38 = vmul.f32 1.442695, %v1678_v43  ;;  %v1716_v45 = vmul.f32 %v6199_v58, %v1678_v43  ;;  %vm1679_vm11 = vcmp.gt.f32.partialorder %v1678_v43, 0.0 }
 0x3e3   :  { %v1708_v56 = vadd.f32 %v1707_v1, %v6182_v39  ;;  %5370 = vpow2.f32 %v1680_v38  ;;  %v1717_v61 = vadd.f32 %v1716_v45, %v6186_v53  ;;  %v1704_v38 = vrot.slane %v6102_v27, 4 }
 0x3e4   :  { %5372 = vrcp.f32 %v1672_v9 }
 0x3e5   :  { %v1709_v62 = vadd.f32 %v6177_v33, %v1708_v56  ;;  %v1718_v39 = vadd.f32 %v6208_v34, %v1717_v61 }
 0x3e7   :  { %v4552_v18 = vmul.f32 -1.442695, %v1709_v62  ;;  %v4553_v57 = vmul.f32 -1.442695, %v1718_v39 }
 0x3e9   :  { %5374 = vpow2.f32 %v4552_v18 }
 0x3ed   :  { %v5371_v55 = vpop.eup %5370 }
 0x3ee   :  { %v5373_v22 = vpop.eup %5372  ;;  %v4551_v32 = vadd.f32 -1.0, %v5371_v55 }
 0x3ef   :  { %v1687_v12 = vsub.f32 1.0, %v5373_v22 }
 0x3f0   :  { %v1683_v11 = vmul.f32 1.6732632, %v4551_v32 }
 0x3f1   :  { %v1688_v21 = vmul.f32 %v1687_v12, %v1656_v47 }
 0x3f2   :  { %v1684_v24 = vsel %vm1679_vm11, %v1678_v43, %v1683_v11 }
 0x3f3   :  { %v5375_v63 = vpop.eup %5374  ;;  %v1685_v53 = vmul.f32 1.050701, %v1684_v24 }
 0x3f4   :  { %v1713_v20 = vadd.f32 1.0, %v5375_v63 }
 0x3f5   :  { %v1686_v13 = vmul.f32 %v5373_v22, %v1685_v53 }
 0x3f6   :  { %5376 = vrcp.f32 %v1713_v20  ;;  %v4988_v20 = vld [vmem:[#allocation7 + $0x4] ss:$24 sps:$4 sm:$0xff]  }
 0x3f7   :  { %v1689_v31 = vadd.f32 %v1688_v21, %v1686_v13  ;;  %5378 = vpow2.f32 %v4553_v57  ;;  %v4986_v13 = vld [vmem:[#allocation7] ss:$24 sps:$4 sm:$0xff]   ;;  %v4991_v21 = vld [vmem:[#allocation7 + $0xc] ss:$24 sps:$4 sm:$0xff]   ;;  %2609 = vmatprep.subr.bf16.mxu1 %v4988_v20 }
 0x3f8   :  { %2610 = vmatpush1.bf16.msra.mxu1 %v4986_v13  ;;  %2652 = vmatprep.subr.bf16.mxu0 %v4991_v21  ;;  %v5022_v13 = vld [vmem:[#allocation7 + $0x120] ss:$24 sps:$4 sm:$0xff]   ;;  %v5024_v21 = vld [vmem:[#allocation7 + $0x124] ss:$24 sps:$4 sm:$0xff]  }
 0x3f9   :  { %v1691_v10 = vrot.slane %v1689_v31, 6  ;;  %v4989_v31 = vld [vmem:[#allocation7 + $0x8] ss:$24 sps:$4 sm:$0xff]  }
 0x3fa   :  { %2653 = vmatpush1.bf16.msra.mxu0 %v4989_v31  ;;  %v5030_v31 = vld [vmem:[#allocation7 + $0x154] ss:$24 sps:$4 sm:$0xff]  }
 0x3fb   :  { %1693 = vst [vmem:[#allocation3] ss:$28 sps:$4 sm:$0x3c] %v1691_v10  }
 0x400   :  { %v5377_v7 = vpop.eup %5376 }
 0x401   :  { %v1725_v26 = vmul.f32 %v5377_v7, %v1678_v43  ;;  %v1726_v8 = vsub.f32 1.0, %v5377_v7  ;;  %v5379_v17 = vpop.eup %5378 }
 0x402   :  { %v1722_v14 = vadd.f32 1.0, %v5379_v17 }
 0x403   :  { %v1727_v35 = vmul.f32 %v1726_v8, %v6128_v41 }
 0x405   :  { %v1728_v4 = vadd.f32 %v1727_v35, %v1725_v26  ;;  %v4992_v35 = vld [vmem:[#allocation7 + $0x30] ss:$24 sps:$4 sm:$0xff]  }
 0x407   :  { %v1765_v54 = vmul.f32 %v6142_v49, %v1728_v4  ;;  %v1730_v59 = vmul.f32 1.442695, %v1728_v4  ;;  %v1774_v28 = vmul.f32 %v6199_v58, %v1728_v4  ;;  %vm1729_vm12 = vcmp.gt.f32.partialorder %v1728_v4, 0.0 }
 0x409   :  { %v1766_v5 = vadd.f32 %v1765_v54, %v6190_v29  ;;  %5380 = vpow2.f32 %v1730_v59  ;;  %v1775_v16 = vadd.f32 %v1774_v28, %v6202_v15  ;;  %v1706_v15 = vsel %vm423_vm1, %v1704_v38, %v6096_v36  ;;  %v5000_v59 = vld [vmem:[#allocation7 + $0x64] ss:$24 sps:$4 sm:$0xff]  }
 0x40a   :  { %5382 = vrcp.f32 %v1722_v14  ;;  %v4995_v14 = vld [vmem:[#allocation7 + $0x38] ss:$24 sps:$4 sm:$0xff]  }
 0x40b   :  { %v1767_v46 = vadd.f32 %v6177_v33, %v1766_v5  ;;  %v1776_v61 = vadd.f32 %v6208_v34, %v1775_v16  ;;  %v4998_v5 = vld [vmem:[#allocation7 + $0x60] ss:$24 sps:$4 sm:$0xff]  }
 0x40c   :  { %v5001_v16 = vld [vmem:[#allocation7 + $0x68] ss:$24 sps:$4 sm:$0xff]  }
 0x40d   :  { %v4555_v43 = vmul.f32 -1.442695, %v1767_v46  ;;  %v4556_v2 = vmul.f32 -1.442695, %v1776_v61  ;;  %v5003_v46 = vld [vmem:[#allocation7 + $0x6c] ss:$24 sps:$4 sm:$0xff]  }
 0x40e   :  { %v5015_v61 = vld [vmem:[#allocation7 + $0xcc] ss:$24 sps:$4 sm:$0xff]  }
 0x40f   :  { %5384 = vpow2.f32 %v4555_v43  ;;  %v5009_v43 = vld [vmem:[#allocation7 + $0x9c] ss:$24 sps:$4 sm:$0xff]  }
 0x413   :  { %v5381_v9 = vpop.eup %5380 }
 0x414   :  { %v5383_v1 = vpop.eup %5382  ;;  %v4554_v41 = vadd.f32 -1.0, %v5381_v9  ;;  %v5007_v9 = vld [vmem:[#allocation7 + $0x98] ss:$24 sps:$4 sm:$0xff]  }
 0x415   :  { %v1737_v56 = vsub.f32 1.0, %v5383_v1 }
 0x416   :  { %v1733_v45 = vmul.f32 1.6732632, %v4554_v41 }
 0x417   :  { %v1738_v32 = vmul.f32 %v1737_v56, %v1706_v15  ;;  %v5010_v56 = vld [vmem:[#allocation7 + $0xc0] ss:$24 sps:$4 sm:$0xff]  }
 0x418   :  { %v1734_v62 = vsel %vm1729_vm12, %v1728_v4, %v1733_v45  ;;  %v5012_v45 = vld [vmem:[#allocation7 + $0xc4] ss:$24 sps:$4 sm:$0xff]  }
 0x419   :  { %v5385_v29 = vpop.eup %5384  ;;  %v1735_v18 = vmul.f32 1.050701, %v1734_v62  ;;  %v1760_v62 = vrot.slane %v6102_v27, 6  ;;  %v5019_v27 = vld [vmem:[#allocation7 + $0xf8] ss:$24 sps:$4 sm:$0xff]  }
 0x41a   :  { %v1771_v55 = vadd.f32 1.0, %v5385_v29  ;;  %v1762_v29 = vrot.slane %v6096_v36, 6 }
 0x41b   :  { %v1736_v22 = vmul.f32 %v5383_v1, %v1735_v18 }
 0x41c   :  { %5386 = vrcp.f32 %v1771_v55  ;;  %v5013_v55 = vld [vmem:[#allocation7 + $0xc8] ss:$24 sps:$4 sm:$0xff]   ;;  %v1764_v36 = vsel %vm423_vm1, %v1760_v62, %v1762_v29 }
 0x41d   :  { %v1739_v3 = vadd.f32 %v1738_v32, %v1736_v22  ;;  %5388 = vpow2.f32 %v4556_v2  ;;  %v5018_v2 = vld [vmem:[#allocation7 + $0xf4] ss:$24 sps:$4 sm:$0xff]   ;;  %v5049_v29 = vld [vmem:[#allocation7 + $0x1e8] ss:$24 sps:$4 sm:$0xff]  }
 0x41f   :  { %v1741_v11 = vrot.slane %v1739_v3, 4  ;;  %1744 = vst [vmem:[#allocation3 + $0x18] sm:$0xc] %v1739_v3 }
 0x421   :  { %1743 = vst [vmem:[#allocation3] sm:$0x30] %v1741_v11 }
 0x426   :  { %v5387_v12 = vpop.eup %5386 }
 0x427   :  { %v1783_v39 = vmul.f32 %v5387_v12, %v1728_v4  ;;  %v1784_v24 = vsub.f32 1.0, %v5387_v12  ;;  %v5389_v63 = vpop.eup %5388  ;;  %v4997_v4 = vld [vmem:[#allocation7 + $0x3c] ss:$24 sps:$4 sm:$0xff]   ;;  %v5016_v12 = vld [vmem:[#allocation7 + $0xf0] ss:$24 sps:$4 sm:$0xff]  }
 0x428   :  { %v1780_v57 = vadd.f32 1.0, %v5389_v63  ;;  %2654 = vmatprep.subr.bf16.mxu0 %v4997_v4  ;;  %v5039_v4 = vld [vmem:[#allocation7 + $0x18c] ss:$24 sps:$4 sm:$0xff]  }
 0x429   :  { %v1785_v53 = vmul.f32 %v1784_v24, %v6137_v6  ;;  %v4994_v6 = vld [vmem:[#allocation7 + $0x34] ss:$24 sps:$4 sm:$0xff]   ;;  %2655 = vmatpush1.bf16.msra.mxu0 %v4995_v14  ;;  %v5034_v14 = vld [vmem:[#allocation7 + $0x180] ss:$24 sps:$4 sm:$0xff]  }
 0x42a   :  { %2611 = vmatprep.subr.bf16.mxu1 %v4994_v6  ;;  %2656 = vmatprep.subr.bf16.mxu0 %v5003_v46  ;;  %v5021_v24 = vld [vmem:[#allocation7 + $0xfc] ss:$24 sps:$4 sm:$0xff]  }
 0x42b   :  { %v6240_v47 = vadd.f32 %v1785_v53, %v1783_v39  ;;  %2612 = vmatpush1.bf16.msra.mxu1 %v4992_v35  ;;  %v5031_v35 = vld [vmem:[#allocation7 + $0x158] ss:$24 sps:$4 sm:$0xff]  }
 0x42c   :  { %2613 = vmatprep.subr.bf16.mxu1 %v5000_v59  ;;  %v5037_v59 = vld [vmem:[#allocation7 + $0x188] ss:$24 sps:$4 sm:$0xff]  }
 0x42d   :  { %v1819_v10 = vmul.f32 %v6142_v49, %v6240_v47  ;;  %v1788_v7 = vmul.f32 1.442695, %v6240_v47  ;;  %v1828_v26 = vmul.f32 %v6199_v58, %v6240_v47  ;;  %2657 = vmatpush1.bf16.msra.mxu0 %v5001_v16  ;;  %vm1787_vm13 = vcmp.gt.f32.partialorder %v6240_v47, 0.0 }
 0x42e   :  { %2658 = vmatprep.subr.bf16.mxu0 %v5009_v43 }
 0x42f   :  { %v1820_v8 = vadd.f32 %v1819_v10, %v6157_v23  ;;  %5390 = vpow2.f32 %v1788_v7  ;;  %v1829_v17 = vadd.f32 %v1828_v26, %v6166_v30  ;;  %2614 = vmatpush1.bf16.msra.mxu1 %v4998_v5  ;;  %v5006_v23 = vld [vmem:[#allocation7 + $0x94] ss:$24 sps:$4 sm:$0xff]   ;;  %v5004_v30 = vld [vmem:[#allocation7 + $0x90] ss:$24 sps:$4 sm:$0xff]  }
 0x430   :  { %5392 = vrcp.f32 %v1780_v57  ;;  %2615 = vmatprep.subr.bf16.mxu1 %v5006_v23  ;;  %v5027_v57 = vld [vmem:[#allocation7 + $0x12c] ss:$24 sps:$4 sm:$0xff]   ;;  %v5025_v7 = vld [vmem:[#allocation7 + $0x128] ss:$24 sps:$4 sm:$0xff]   ;;  %v5033_v26 = vld [vmem:[#allocation7 + $0x15c] ss:$24 sps:$4 sm:$0xff]  }
 0x431   :  { %v1821_v54 = vadd.f32 %v6177_v33, %v1820_v8  ;;  %2659 = vmatpush1.bf16.msra.mxu0 %v5007_v9  ;;  %v1830_v22 = vadd.f32 %v6208_v34, %v1829_v17  ;;  %v5028_v8 = vld [vmem:[#allocation7 + $0x150] ss:$24 sps:$4 sm:$0xff]   ;;  %v5036_v17 = vld [vmem:[#allocation7 + $0x184] ss:$24 sps:$4 sm:$0xff]  }
 0x432   :  { %2660 = vmatprep.subr.bf16.mxu0 %v5015_v61  ;;  %v5045_v5 = vld [vmem:[#allocation7 + $0x1bc] ss:$24 sps:$4 sm:$0xff]   ;;  %v5040_v23 = vld [vmem:[#allocation7 + $0x1b0] ss:$24 sps:$4 sm:$0xff]  }
 0x433   :  { %v4558_v28 = vmul.f32 -1.442695, %v1821_v54  ;;  %2616 = vmatpush1.bf16.msra.mxu1 %v5004_v30  ;;  %v4559_v20 = vmul.f32 -1.442695, %v1830_v22  ;;  %v5042_v54 = vld [vmem:[#allocation7 + $0x1b4] ss:$24 sps:$4 sm:$0xff]  }
 0x434   :  { %2617 = vmatprep.subr.bf16.mxu1 %v5012_v45  ;;  %v5048_v30 = vld [vmem:[#allocation7 + $0x1e4] ss:$24 sps:$4 sm:$0xff]   ;;  %v5046_v45 = vld [vmem:[#allocation7 + $0x1e0] ss:$24 sps:$4 sm:$0xff]   ;;  %v5054_v61 = vld [vmem:[#allocation7 + $0x214] ss:$24 sps:$4 sm:$0xff]  }
 0x435   :  { %5394 = vpow2.f32 %v4558_v28  ;;  %2661 = vmatpush1.bf16.msra.mxu0 %v5013_v55  ;;  %v5052_v22 = vld [vmem:[#allocation7 + $0x210] ss:$24 sps:$4 sm:$0xff]  }
 0x436   :  { %2662 = vmatprep.subr.bf16.mxu0 %v5021_v24  ;;  %v5072_v24 = vld [vmem:[#allocation7 + $0x2a4] ss:$24 sps:$4 sm:$0xff]  }
 0x437   :  { %2618 = vmatpush1.bf16.msra.mxu1 %v5010_v56 }
 0x438   :  { %2619 = vmatprep.subr.bf16.mxu1 %v5018_v2 }
 0x439   :  { %v5391_v1 = vpop.eup %5390  ;;  %2663 = vmatpush1.bf16.msra.mxu0 %v5019_v27  ;;  %v5058_v27 = vld [vmem:[#allocation7 + $0x240] ss:$24 sps:$4 sm:$0xff]  }
 0x43a   :  { %v5393_v41 = vpop.eup %5392  ;;  %v4557_v38 = vadd.f32 -1.0, %v5391_v1  ;;  %2664 = vmatprep.subr.bf16.mxu0 %v5027_v57  ;;  %v5043_v1 = vld [vmem:[#allocation7 + $0x1b8] ss:$24 sps:$4 sm:$0xff]  }
 0x43b   :  { %v1795_v15 = vsub.f32 1.0, %v5393_v41  ;;  %2620 = vmatpush1.bf16.msra.mxu1 %v5016_v12  ;;  %v5070_v57 = vld [vmem:[#allocation7 + $0x2a0] ss:$24 sps:$4 sm:$0xff]  }
 0x43c   :  { %v1791_v18 = vmul.f32 1.6732632, %v4557_v38  ;;  %2621 = vmatprep.subr.bf16.mxu1 %v5024_v21 }
 0x43d   :  { %v1796_v53 = vmul.f32 %v1795_v15, %v1764_v36  ;;  %2665 = vmatpush1.bf16.msra.mxu0 %v5025_v7  ;;  %v5064_v36 = vld [vmem:[#allocation7 + $0x270] ss:$24 sps:$4 sm:$0xff]  }
 0x43e   :  { %v1792_v32 = vsel %vm1787_vm13, %v6240_v47, %v1791_v18  ;;  %2666 = vmatprep.subr.bf16.mxu0 %v5033_v26  ;;  %v5057_v18 = vld [vmem:[#allocation7 + $0x21c] ss:$24 sps:$4 sm:$0xff]  }
 0x43f   :  { %v5395_v3 = vpop.eup %5394  ;;  %v1793_v11 = vmul.f32 1.050701, %v1792_v32  ;;  %2622 = vmatpush1.bf16.msra.mxu1 %v5022_v13  ;;  %v5060_v32 = vld [vmem:[#allocation7 + $0x244] ss:$24 sps:$4 sm:$0xff]  }
 0x440   :  { %v1825_v39 = vadd.f32 1.0, %v5395_v3  ;;  %2623 = vmatprep.subr.bf16.mxu1 %v5030_v31  ;;  %v5055_v3 = vld [vmem:[#allocation7 + $0x218] ss:$24 sps:$4 sm:$0xff]   ;;  %v5075_v13 = vld [vmem:[#allocation7 + $0x2ac] ss:$24 sps:$4 sm:$0xff]   ;;  %v1816_v31 = vrot.slane %v6094_v48, 4 }
 0x441   :  { %v1794_v63 = vmul.f32 %v5393_v41, %v1793_v11  ;;  %2667 = vmatpush1.bf16.msra.mxu0 %v5031_v35  ;;  %v5051_v41 = vld [vmem:[#allocation7 + $0x1ec] ss:$24 sps:$4 sm:$0xff]  }
 0x442   :  { %5396 = vrcp.f32 %v1825_v39  ;;  %2668 = vmatprep.subr.bf16.mxu0 %v5039_v4  ;;  %v5063_v11 = vld [vmem:[#allocation7 + $0x24c] ss:$24 sps:$4 sm:$0xff]  }
 0x443   :  { %v1797_v10 = vadd.f32 %v1796_v53, %v1794_v63  ;;  %5398 = vpow2.f32 %v4559_v20  ;;  %2624 = vmatpush1.bf16.msra.mxu1 %v5028_v8  ;;  %v5066_v39 = vld [vmem:[#allocation7 + $0x274] ss:$24 sps:$4 sm:$0xff]   ;;  %v5067_v53 = vld [vmem:[#allocation7 + $0x278] ss:$24 sps:$4 sm:$0xff]  }
 0x444   :  { %2625 = vmatprep.subr.bf16.mxu1 %v5036_v17  ;;  %v5081_v17 = vld [vmem:[#allocation7 + $0x2dc] ss:$24 sps:$4 sm:$0xff]  }
 0x445   :  { %v1799_v6 = vrot.slane %v1797_v10, 2  ;;  %2669 = vmatpush1.bf16.msra.mxu0 %v5037_v59  ;;  %v5078_v10 = vld [vmem:[#allocation7 + $0x2d4] ss:$24 sps:$4 sm:$0xff]   ;;  %v1818_v59 = vsel %vm423_vm1, %v6098_v37, %v1816_v31 }
 0x446   :  { %2670 = vmatprep.subr.bf16.mxu0 %v5045_v5 }
 0x447   :  { %1801 = vst [vmem:[#allocation3 + $0x18] ss:$-20 sps:$4 sm:$0xc3] %v1799_v6   ;;  %2626 = vmatpush1.bf16.msra.mxu1 %v5034_v14  ;;  %v5073_v6 = vld [vmem:[#allocation7 + $0x2a8] ss:$24 sps:$4 sm:$0xff]  }
 0x448   :  { %2627 = vmatprep.subr.bf16.mxu1 %v5042_v54  ;;  %v5076_v14 = vld [vmem:[#allocation7 + $0x2d0] ss:$24 sps:$4 sm:$0xff]  }
 0x449   :  { %2671 = vmatpush1.bf16.msra.mxu0 %v5043_v1 }
 0x44a   :  { %2672 = vmatprep.subr.bf16.mxu0 %v5051_v41 }
 0x44b   :  { %2628 = vmatpush1.bf16.msra.mxu1 %v5040_v23 }
 0x44c   :  { %v5397_v28 = vpop.eup %5396  ;;  %2629 = vmatprep.subr.bf16.mxu1 %v5048_v30 }
 0x44d   :  { %v1837_v16 = vmul.f32 %v5397_v28, %v6240_v47  ;;  %v1838_v46 = vsub.f32 1.0, %v5397_v28  ;;  %v5399_v43 = vpop.eup %5398  ;;  %2673 = vmatpush1.bf16.msra.mxu0 %v5049_v29 }
 0x44e   :  { %v1834_v56 = vadd.f32 1.0, %v5399_v43  ;;  %2674 = vmatprep.subr.bf16.mxu0 %v5057_v18  ;;  %v5084_v43 = vld [vmem:[#allocation7 + $0x14] ss:$24 sps:$4 sm:$0xff]  }
 0x44f   :  { %v1839_v9 = vmul.f32 %v1838_v46, %v6116_v19  ;;  %2630 = vmatpush1.bf16.msra.mxu1 %v5046_v45 }
 0x450   :  { %2631 = vmatprep.subr.bf16.mxu1 %v5054_v61 }
 0x451   :  { %v6258_v38 = vadd.f32 %v1839_v9, %v1837_v16  ;;  %2675 = vmatpush1.bf16.msra.mxu0 %v5055_v3  ;;  %v5079_v16 = vld [vmem:[#allocation7 + $0x2d8] ss:$24 sps:$4 sm:$0xff]   ;;  %v1878_v3 = vrot.slane %v6094_v48, 2 }
 0x452   :  { %2676 = vmatprep.subr.bf16.mxu0 %v5063_v11  ;;  %v1876_v11 = vrot.slane %v6098_v37, 2 }
 0x453   :  { %v1881_v47 = vmul.f32 %v6142_v49, %v6258_v38  ;;  %v1890_v62 = vmul.f32 %v6199_v58, %v6258_v38  ;;  %v1842_v19 = vmul.f32 1.442695, %v6258_v38  ;;  %2632 = vmatpush1.bf16.msra.mxu1 %v5052_v22  ;;  %vm1841_vm14 = vcmp.gt.f32.partialorder %v6258_v38, 0.0 }
 0x454   :  { %2633 = vmatprep.subr.bf16.mxu1 %v5060_v32 }
 0x455   :  { %v1882_v55 = vadd.f32 %v1881_v47, %v6160_v25  ;;  %v1891_v15 = vadd.f32 %v1890_v62, %v6169_v60  ;;  %5400 = vpow2.f32 %v1842_v19  ;;  %v5061_v25 = vld [vmem:[#allocation7 + $0x248] ss:$24 sps:$4 sm:$0xff]   ;;  %v5069_v60 = vld [vmem:[#allocation7 + $0x27c] ss:$24 sps:$4 sm:$0xff]  }
 0x456   :  { %5402 = vrcp.f32 %v1834_v56  ;;  %2677 = vmatpush1.bf16.msra.mxu0 %v5061_v25 }
 0x457   :  { %v1883_v2 = vadd.f32 %v6177_v33, %v1882_v55  ;;  %2634 = vmatpush1.bf16.msra.mxu1 %v5058_v27  ;;  %2678 = vmatprep.subr.bf16.mxu0 %v5069_v60  ;;  %v1892_v26 = vadd.f32 %v6208_v34, %v1891_v15 }
 0x458   :  { %2635 = vmatprep.subr.bf16.mxu1 %v5066_v39 }
 0x459   :  { %v4561_v12 = vmul.f32 -1.442695, %v1883_v2  ;;  %v4562_v5 = vmul.f32 -1.442695, %v1892_v26 }
 0x45a   :  { %2679 = vmatpush1.bf16.msra.mxu0 %v5067_v53 }
 0x45b   :  { %5404 = vpow2.f32 %v4561_v12  ;;  %2636 = vmatpush1.bf16.msra.mxu1 %v5064_v36  ;;  %2680 = vmatprep.subr.bf16.mxu0 %v5075_v13  ;;  %v1880_v36 = vsel %vm423_vm1, %v1876_v11, %v1878_v3 }
 0x45c   :  { %2637 = vmatprep.subr.bf16.mxu1 %v5072_v24 }
 0x45e   :  { %2681 = vmatpush1.bf16.msra.mxu0 %v5073_v6 }
 0x45f   :  { %v5401_v63 = vpop.eup %5400  ;;  %2638 = vmatpush1.bf16.msra.mxu1 %v5070_v57  ;;  %2682 = vmatprep.subr.bf16.mxu0 %v5081_v17 }
 0x460   :  { %v5403_v20 = vpop.eup %5402  ;;  %v4560_v21 = vadd.f32 -1.0, %v5401_v63  ;;  %2639 = vmatprep.subr.bf16.mxu1 %v5078_v10 }
 0x461   :  { %v1849_v8 = vsub.f32 1.0, %v5403_v20 }
 0x462   :  { %v1845_v7 = vmul.f32 1.6732632, %v4560_v21  ;;  %2683 = vmatpush1.bf16.msra.mxu0 %v5079_v16 }
 0x463   :  { %v1850_v23 = vmul.f32 %v1849_v8, %v1818_v59  ;;  %2640 = vmatpush1.bf16.msra.mxu1 %v5076_v14 }
 0x464   :  { %v1846_v35 = vsel %vm1841_vm14, %v6258_v38, %v1845_v7  ;;  %2695 = vmatprep.subr.bf16.mxu1 %v5084_v43 }
 0x465   :  { %v5405_v4 = vpop.eup %5404  ;;  %v1847_v54 = vmul.f32 1.050701, %v1846_v35 }
 0x466   :  { %v1887_v28 = vadd.f32 1.0, %v5405_v4 }
 0x467   :  { %v1848_v46 = vmul.f32 %v5403_v20, %v1847_v54 }
 0x468   :  { %5406 = vrcp.f32 %v1887_v28  ;;  %v5596_v28 = vld [vmem:[#allocation2 + $0x10] sm:$0xff] }
 0x469   :  { %v1851_v30 = vadd.f32 %v1850_v23, %v1848_v46  ;;  %5408 = vpow2.f32 %v4562_v5  ;;  %v1928_v5 = vrot.slane %v5596_v28, 4 }
 0x46b   :  { %v1854_v9 = vrot.slane %v1851_v30, 4  ;;  %1852 = vst [vmem:[#allocation3 + $0x10] sm:$0x3] %v1851_v30  ;;  %v5597_v30 = vld [vmem:[#allocation2 + $0x8] sm:$0xff] }
 0x46c   :  { %v1930_v43 = vsel %vm423_vm1, %v1928_v5, %v5597_v30  ;;  %v5102_v5 = vld [vmem:[#allocation7 + $0x134] ss:$24 sps:$4 sm:$0xff]  }
 0x46d   :  { %1856 = vst [vmem:[#allocation3 + $0x8] sm:$0xc0] %v1854_v9 }
 0x472   :  { %v5407_v1 = vpop.eup %5406 }
 0x473   :  { %v1899_v41 = vmul.f32 %v5407_v1, %v6258_v38  ;;  %v1900_v45 = vsub.f32 1.0, %v5407_v1  ;;  %v5409_v56 = vpop.eup %5408 }
 0x474   :  { %v1896_v62 = vadd.f32 1.0, %v5409_v56 }
 0x475   :  { %v1901_v61 = vmul.f32 %v1900_v45, %v6119_v42 }
 0x477   :  { %v1902_v47 = vadd.f32 %v1901_v61, %v1899_v41 }
 0x479   :  { %v1931_v29 = vmul.f32 %v6142_v49, %v1902_v47  ;;  %v1940_v19 = vmul.f32 %v6199_v58, %v1902_v47  ;;  %v1904_v18 = vmul.f32 1.442695, %v1902_v47  ;;  %vm1903_vm15 = vcmp.gt.f32.partialorder %v1902_v47, 0.0 }
 0x47b   :  { %v1932_v55 = vadd.f32 %v1931_v29, %v6151_v0  ;;  %v1941_v15 = vadd.f32 %v1940_v19, %v6154_v44  ;;  %5410 = vpow2.f32 %v1904_v18 }
 0x47c   :  { %5412 = vrcp.f32 %v1896_v62 }
 0x47d   :  { %v1933_v22 = vadd.f32 %v6177_v33, %v1932_v55  ;;  %v1942_v27 = vadd.f32 %v6208_v34, %v1941_v15 }
 0x47f   :  { %v4564_v38 = vmul.f32 -1.442695, %v1933_v22  ;;  %v4565_v24 = vmul.f32 -1.442695, %v1942_v27 }
 0x481   :  { %5414 = vpow2.f32 %v4564_v38  ;;  %v1986_v38 = vrot.slane %v5597_v30, 6  ;;  %v5114_v30 = vld [vmem:[#allocation7 + $0x1f4] ss:$24 sps:$4 sm:$0xff]  }
 0x485   :  { %v5411_v32 = vpop.eup %5410 }
 0x486   :  { %v5413_v2 = vpop.eup %5412  ;;  %v4563_v42 = vadd.f32 -1.0, %v5411_v32  ;;  %v1984_v32 = vrot.slane %v5596_v28, 6  ;;  %v5097_v28 = vld [vmem:[#allocation7 + $0x100] ss:$24 sps:$4 sm:$0xff]  }
 0x487   :  { %v1911_v0 = vsub.f32 1.0, %v5413_v2 }
 0x488   :  { %v1907_v12 = vmul.f32 1.6732632, %v4563_v42 }
 0x489   :  { %v1912_v53 = vmul.f32 %v1911_v0, %v1880_v36 }
 0x48a   :  { %v1908_v39 = vsel %vm1903_vm15, %v1902_v47, %v1907_v12  ;;  %v1988_v12 = vsel %vm423_vm1, %v1984_v32, %v1986_v38 }
 0x48b   :  { %v5415_v44 = vpop.eup %5414  ;;  %v1909_v25 = vmul.f32 1.050701, %v1908_v39 }
 0x48c   :  { %v1937_v60 = vadd.f32 1.0, %v5415_v44 }
 0x48d   :  { %v1910_v63 = vmul.f32 %v5413_v2, %v1909_v25  ;;  %v6295_v25 = vld [vmem:[#allocation3 + $0x18] sm:$0xff] }
 0x48e   :  { %5416 = vrcp.f32 %v1937_v60 }
 0x48f   :  { %v1913_v20 = vadd.f32 %v1912_v53, %v1910_v63  ;;  %5418 = vpow2.f32 %v4565_v24 }
 0x491   :  { %v1915_v48 = vrot.slane %v1913_v20, 6  ;;  %v5082_v20 = vld [vmem:[#allocation7 + $0x10] ss:$24 sps:$4 sm:$0xff]  }
 0x493   :  { %1918 = vst [vmem:[#allocation3 + $0x10] ss:$-4 sps:$4 sm:$0x3c] %v1915_v48   ;;  %v6298_v48 = vld [vmem:[#allocation3] sm:$0xff] }
 0x498   :  { %v5417_v37 = vpop.eup %5416 }
 0x499   :  { %v1949_v13 = vmul.f32 %v5417_v37, %v1902_v47  ;;  %v1950_v21 = vsub.f32 1.0, %v5417_v37  ;;  %v5419_v57 = vpop.eup %5418 }
 0x49a   :  { %v1946_v7 = vadd.f32 1.0, %v5419_v57 }
 0x49b   :  { %v1951_v31 = vmul.f32 %v1950_v21, %v6122_v40 }
 0x49d   :  { %v1952_v10 = vadd.f32 %v1951_v31, %v1949_v13  ;;  %v5087_v31 = vld [vmem:[#allocation7 + $0x44] ss:$24 sps:$4 sm:$0xff]  }
 0x49f   :  { %v1989_v26 = vmul.f32 %v6142_v49, %v1952_v10  ;;  %v1998_v6 = vmul.f32 %v6199_v58, %v1952_v10  ;;  %v1954_v8 = vmul.f32 1.442695, %v1952_v10  ;;  %vm1953_vm0 = vcmp.gt.f32.partialorder %v1952_v10, 0.0 }
 0x4a1   :  { %v1990_v17 = vadd.f32 %v1989_v26, %v6163_v52  ;;  %v1999_v35 = vadd.f32 %v1998_v6, %v6172_v50  ;;  %5420 = vpow2.f32 %v1954_v8  ;;  %v5085_v8 = vld [vmem:[#allocation7 + $0x40] ss:$24 sps:$4 sm:$0xff]  }
 0x4a2   :  { %5422 = vrcp.f32 %v1946_v7 }
 0x4a3   :  { %v1991_v4 = vadd.f32 %v6177_v33, %v1990_v17  ;;  %v2000_v49 = vadd.f32 %v6208_v34, %v1999_v35  ;;  %v5090_v17 = vld [vmem:[#allocation7 + $0x74] ss:$24 sps:$4 sm:$0xff]   ;;  %v5088_v35 = vld [vmem:[#allocation7 + $0x70] ss:$24 sps:$4 sm:$0xff]  }
 0x4a5   :  { %v4567_v14 = vmul.f32 -1.442695, %v1991_v4  ;;  %v4568_v33 = vmul.f32 -1.442695, %v2000_v49  ;;  %v5093_v4 = vld [vmem:[#allocation7 + $0xa4] ss:$24 sps:$4 sm:$0xff]  }
 0x4a6   :  { %v5105_v49 = vld [vmem:[#allocation7 + $0x164] ss:$24 sps:$4 sm:$0xff]  }
 0x4a7   :  { %5424 = vpow2.f32 %v4567_v14  ;;  %v5091_v14 = vld [vmem:[#allocation7 + $0xa0] ss:$24 sps:$4 sm:$0xff]  }
 0x4ab   :  { %v5421_v54 = vpop.eup %5420 }
 0x4ac   :  { %v5423_v59 = vpop.eup %5422  ;;  %v4566_v40 = vadd.f32 -1.0, %v5421_v54  ;;  %v5096_v54 = vld [vmem:[#allocation7 + $0xd4] ss:$24 sps:$4 sm:$0xff]  }
 0x4ad   :  { %v1961_v58 = vsub.f32 1.0, %v5423_v59 }
 0x4ae   :  { %v1957_v16 = vmul.f32 1.6732632, %v4566_v40  ;;  %v5099_v40 = vld [vmem:[#allocation7 + $0x104] ss:$24 sps:$4 sm:$0xff]  }
 0x4af   :  { %v1962_v1 = vmul.f32 %v1961_v58, %v1930_v43  ;;  %v5103_v58 = vld [vmem:[#allocation7 + $0x160] ss:$24 sps:$4 sm:$0xff]   ;;  %v5112_v43 = vld [vmem:[#allocation7 + $0x1f0] ss:$24 sps:$4 sm:$0xff]  }
 0x4b0   :  { %v1958_v46 = vsel %vm1953_vm0, %v1952_v10, %v1957_v16  ;;  %v5100_v16 = vld [vmem:[#allocation7 + $0x130] ss:$24 sps:$4 sm:$0xff]  }
 0x4b1   :  { %v5425_v52 = vpop.eup %5424  ;;  %v1959_v23 = vmul.f32 1.050701, %v1958_v46  ;;  %v5108_v46 = vld [vmem:[#allocation7 + $0x194] ss:$24 sps:$4 sm:$0xff]  }
 0x4b2   :  { %v1995_v50 = vadd.f32 1.0, %v5425_v52  ;;  %v5106_v52 = vld [vmem:[#allocation7 + $0x190] ss:$24 sps:$4 sm:$0xff]  }
 0x4b3   :  { %v1960_v9 = vmul.f32 %v5423_v59, %v1959_v23  ;;  %v5094_v59 = vld [vmem:[#allocation7 + $0xd0] ss:$24 sps:$4 sm:$0xff]   ;;  %v5111_v23 = vld [vmem:[#allocation7 + $0x1c4] ss:$24 sps:$4 sm:$0xff]  }
 0x4b4   :  { %5426 = vrcp.f32 %v1995_v50  ;;  %v5109_v50 = vld [vmem:[#allocation7 + $0x1c0] ss:$24 sps:$4 sm:$0xff]  }
 0x4b5   :  { %v1963_v41 = vadd.f32 %v1962_v1, %v1960_v9  ;;  %5428 = vpow2.f32 %v4568_v33  ;;  %v5117_v33 = vld [vmem:[#allocation7 + $0x224] ss:$24 sps:$4 sm:$0xff]   ;;  %v5115_v9 = vld [vmem:[#allocation7 + $0x220] ss:$24 sps:$4 sm:$0xff]   ;;  %v5120_v1 = vld [vmem:[#allocation7 + $0x254] ss:$24 sps:$4 sm:$0xff]  }
 0x4b7   :  { %v1965_v45 = vrot.slane %v1963_v41, 4  ;;  %1968 = vst [vmem:[#allocation3 + $0x8] sm:$0xc] %v1963_v41  ;;  %v5118_v41 = vld [vmem:[#allocation7 + $0x250] ss:$24 sps:$4 sm:$0xff]  }
 0x4b9   :  { %1967 = vst [vmem:[#allocation3 + $0x10] sm:$0x30] %v1965_v45  ;;  %v5123_v45 = vld [vmem:[#allocation7 + $0x284] ss:$24 sps:$4 sm:$0xff]  }
 0x4be   :  { %v5427_v56 = vpop.eup %5426 }
 0x4bf   :  { %v2008_v34 = vsub.f32 1.0, %v5427_v56  ;;  %v2007_v61 = vmul.f32 %v5427_v56, %v1952_v10  ;;  %v5429_v47 = vpop.eup %5428  ;;  %v5121_v56 = vld [vmem:[#allocation7 + $0x280] ss:$24 sps:$4 sm:$0xff]  }
 0x4c0   :  { %v2004_v19 = vadd.f32 1.0, %v5429_v47  ;;  %v5129_v47 = vld [vmem:[#allocation7 + $0x2e4] ss:$24 sps:$4 sm:$0xff]  }
 0x4c1   :  { %v2009_v62 = vmul.f32 %v2008_v34, %v6125_v51  ;;  %v5126_v34 = vld [vmem:[#allocation7 + $0x2b4] ss:$24 sps:$4 sm:$0xff]  }
 0x4c3   :  { %v2010_v29 = vadd.f32 %v2009_v62, %v2007_v61  ;;  %v5124_v61 = vld [vmem:[#allocation7 + $0x2b0] ss:$24 sps:$4 sm:$0xff]   ;;  %v5127_v62 = vld [vmem:[#allocation7 + $0x2e0] ss:$24 sps:$4 sm:$0xff]  }
 0x4c5   :  { %v2012_v18 = vmul.f32 1.442695, %v2010_v29  ;;  %vm2011_vm2 = vcmp.gt.f32.partialorder %v2010_v29, 0.0 }
 0x4c7   :  { %5430 = vpow2.f32 %v2012_v18 }
 0x4c8   :  { %5432 = vrcp.f32 %v2004_v19 }
 0x4d1   :  { %v5431_v55 = vpop.eup %5430 }
 0x4d2   :  { %v5433_v15 = vpop.eup %5432  ;;  %v4569_v22 = vadd.f32 -1.0, %v5431_v55 }
 0x4d3   :  { %v2019_v42 = vsub.f32 1.0, %v5433_v15 }
 0x4d4   :  { %v2015_v2 = vmul.f32 1.6732632, %v4569_v22 }
 0x4d5   :  { %v2020_v0 = vmul.f32 %v2019_v42, %v1988_v12 }
 0x4d6   :  { %v2016_v3 = vsel %vm2011_vm2, %v2010_v29, %v2015_v2 }
 0x4d7   :  { %v2017_v11 = vmul.f32 1.050701, %v2016_v3 }
 0x4d9   :  { %v2018_v27 = vmul.f32 %v5433_v15, %v2017_v11 }
 0x4db   :  { %v2021_v51 = vadd.f32 %v2020_v0, %v2018_v27 }
 0x4dd   :  { %v2023_v39 = vrot.slane %v2021_v51, 2 }
 0x4df   :  { %2026 = vst [vmem:[#allocation3 + $0x8] ss:$12 sps:$4 sm:$0xc3] %v2023_v39  }
 0x4e6   :  { %v2028_v44 = vld [vmem:[#allocation3 + $0x8] sm:$0xff]  ;;  %v2029_v60 = vld [vmem:[#allocation3 + $0x10] sm:$0xff] }
 0x4e7   :  { %v2032_v36 = vpack.c.bf16 %v6295_v25, %v2028_v44  ;;  %v2983_v24 = vrot.slane %v2028_v44, 4  ;;  %v3045_v63 = vrot.slane %v2028_v44, 2  ;;  %v3153_v53 = vrot.slane %v2028_v44, 6 }
 0x4e8   :  { %v6301_v37 = vpack.c.bf16 %v2029_v60, %v6298_v48  ;;  %v3043_v13 = vrot.slane %v2029_v60, 2  ;;  %v3095_v21 = vrot.slane %v2029_v60, 4  ;;  %v3151_v57 = vrot.slane %v2029_v60, 6 }
 0x4e9   :  { %2641 = vmatprep.mubr.bf16.mxu1 %v2032_v36  ;;  %2684 = vmatprep.mubr.bf16.mxu0 %v2032_v36  ;;  %v6304_v10 = vsel %vm423_vm1, %v2029_v60, %v2983_v24 }
 0x4ea   :  { %2642 = vmatmul.mubr.bf16.vlgmr.msra.gmra.mrb[20].mxu1 %v6301_v37  ;;  %v6308_v7 = vsel %vm423_vm1, %v3043_v13, %v3045_v63  ;;  %v6311_v26 = vsel %vm423_vm1, %v3095_v21, %v2028_v44  ;;  %v6314_v6 = vsel %vm423_vm1, %v3151_v57, %v3153_v53  ;;  %2685 = vmatmul.mubr.bf16.vlgmr.msra.gmra.mrb[8].mxu0 %v6301_v37 }
 0x4eb   :  { %2696 = vmatpush1.bf16.msra.mxu1 %v5082_v20  ;;  %2727 = vmatprep.mubr.bf16.mxu1 %v2032_v36 }
 0x4ec   :  { %2697 = vmatprep.subr.bf16.mxu1 %v5087_v31  ;;  %v6349_v31 = vld [vmem:[%s6719_s5 + $0x20] sm:$0xf] }
 0x4ef   :  { %2698 = vmatpush1.bf16.msra.mxu1 %v5085_v8 }
 0x4f0   :  { %2699 = vmatprep.subr.bf16.mxu1 %v5090_v17 }
 0x4f3   :  { %2700 = vmatpush1.bf16.msra.mxu1 %v5088_v35 }
 0x4f4   :  { %2701 = vmatprep.subr.bf16.mxu1 %v5093_v4  ;;  %v2762_v4 = vmul.f32 0.0, %v6349_v31 }
 0x4f7   :  { %2702 = vmatpush1.bf16.msra.mxu1 %v5091_v14 }
 0x4f8   :  { %2703 = vmatprep.subr.bf16.mxu1 %v5096_v54 }
 0x4fb   :  { %2704 = vmatpush1.bf16.msra.mxu1 %v5094_v59 }
 0x4fc   :  { %2705 = vmatprep.subr.bf16.mxu1 %v5099_v40 }
 0x4ff   :  { %2706 = vmatpush1.bf16.msra.mxu1 %v5097_v28 }
 0x500   :  { %2707 = vmatprep.subr.bf16.mxu1 %v5102_v5 }
 0x503   :  { %2708 = vmatpush1.bf16.msra.mxu1 %v5100_v16 }
 0x504   :  { %2709 = vmatprep.subr.bf16.mxu1 %v5105_v49 }
 0x507   :  { %2710 = vmatpush1.bf16.msra.mxu1 %v5103_v58 }
 0x508   :  { %2711 = vmatprep.subr.bf16.mxu1 %v5108_v46 }
 0x50b   :  { %2712 = vmatpush1.bf16.msra.mxu1 %v5106_v52 }
 0x50c   :  { %2713 = vmatprep.subr.bf16.mxu1 %v5111_v23 }
 0x50f   :  { %2714 = vmatpush1.bf16.msra.mxu1 %v5109_v50 }
 0x510   :  { %2715 = vmatprep.subr.bf16.mxu1 %v5114_v30 }
 0x513   :  { %2716 = vmatpush1.bf16.msra.mxu1 %v5112_v43 }
 0x514   :  { %2717 = vmatprep.subr.bf16.mxu1 %v5117_v33 }
 0x517   :  { %2718 = vmatpush1.bf16.msra.mxu1 %v5115_v9 }
 0x518   :  { %2719 = vmatprep.subr.bf16.mxu1 %v5120_v1 }
 0x51b   :  { %2720 = vmatpush1.bf16.msra.mxu1 %v5118_v41 }
 0x51c   :  { %2721 = vmatprep.subr.bf16.mxu1 %v5123_v45 }
 0x51f   :  { %2722 = vmatpush1.bf16.msra.mxu1 %v5121_v56 }
 0x520   :  { %2723 = vmatprep.subr.bf16.mxu1 %v5126_v34 }
 0x523   :  { %2724 = vmatpush1.bf16.msra.mxu1 %v5124_v61 }
 0x524   :  { %2725 = vmatprep.subr.bf16.mxu1 %v5129_v47 }
 0x527   :  { %2726 = vmatpush1.bf16.msra.mxu1 %v5127_v62 }
 0x52a   :  { %2728 = vmatmul.mubr.bf16.vlgmr.msra.gmra.mrb[24].mxu1 %v6301_v37 }
 0x5bd   :  { %v2643_v29 = vpop.f32.mrb[20].mxu1  ;;  %v6318_v19 = vpop.f32.mrb[8].mxu0 }
 0x5be   :  { %v6320_v18 = vpop.f32.mrb[21].mxu1  ;;  %v2688_v55 = vpop.f32.mrb[9].mxu0  ;;  %v2862_v38 = vrot.slane %v2643_v29, 4  ;;  %v2803_v36 = vrot.slane %v2643_v29, 2  ;;  %v2912_v20 = vrot.slane %v2643_v29, 6  ;;  %v2805_v8 = vrot.slane %v6318_v19, 2 }
 0x5bf   :  { %v2647_v15 = vpop.f32.mrb[22].mxu1  ;;  %v2690_v22 = vpop.f32.mrb[10].mxu0  ;;  %v2973_v32 = vrot.slane %v2688_v55, 4  ;;  %v3033_v2 = vrot.slane %v2688_v55, 2  ;;  %v3142_v42 = vrot.slane %v2688_v55, 6  ;;  %v2864_v17 = vrot.slane %v6318_v19, 4 }
 0x5c0   :  { %v2649_v3 = vpop.f32.mrb[23].mxu1  ;;  %v2692_v11 = vpop.f32.mrb[11].mxu0  ;;  %v3027_v12 = vrot.slane %v2647_v15, 2  ;;  %v3086_v27 = vrot.slane %v2647_v15, 4  ;;  %v3136_v0 = vrot.slane %v2647_v15, 6  ;;  %v2804_v35 = vrot.slane %v6320_v18, 2 }
 0x5c1   :  { %v6323_v51 = vsel %vm423_vm1, %v2647_v15, %v2973_v32  ;;  %v2749_v24 = vrot.slane %v2692_v11, 4  ;;  %v2809_v63 = vrot.slane %v2692_v11, 2  ;;  %v6335_v53 = vsel %vm423_vm1, %v2862_v38, %v2692_v11  ;;  %v6384_v38 = vld [vmem:[%s6719_s5 + $0x28] sm:$0xf] }
 0x5c2   :  { %v6326_v39 = vsel %vm423_vm1, %v3027_v12, %v3033_v2  ;;  %v6329_v44 = vsel %vm423_vm1, %v3086_v27, %v2688_v55  ;;  %v6332_v60 = vsel %vm423_vm1, %v3136_v0, %v3142_v42  ;;  %v2918_v37 = vrot.slane %v2692_v11, 6 }
 0x5c3   :  { %v6338_v13 = vsel %vm423_vm1, %v2643_v29, %v2749_v24  ;;  %v6341_v21 = vsel %vm423_vm1, %v2803_v36, %v2809_v63  ;;  %v2863_v14 = vrot.slane %v6320_v18, 4  ;;  %v2913_v54 = vrot.slane %v6320_v18, 6 }
 0x5c4   :  { %v6344_v57 = vsel %vm423_vm1, %v2912_v20, %v2918_v37  ;;  %v3029_v59 = vrot.slane %v2690_v22, 2  ;;  %v3087_v40 = vrot.slane %v2649_v3, 4  ;;  %v3088_v28 = vrot.slane %v2690_v22, 4  ;;  %v6406_v37 = vld [vmem:[%s6719_s5 + $0x24] sm:$0xf] }
 0x5c5   :  { %v3138_v5 = vrot.slane %v2690_v22, 6  ;;  %v3028_v16 = vrot.slane %v2649_v3, 2  ;;  %v3137_v49 = vrot.slane %v2649_v3, 6  ;;  %v2914_v0 = vrot.slane %v6318_v19, 6 }
 0x5fd   :  { %v2729_v58 = vpop.f32.mrb[24].mxu1 }
 0x5fe   :  { %v2974_v46 = vrot.slane %v2729_v58, 4  ;;  %v3034_v52 = vrot.slane %v2729_v58, 2  ;;  %v6358_v23 = vsel %vm423_vm1, %v3087_v40, %v2729_v58  ;;  %v3143_v50 = vrot.slane %v2729_v58, 6  ;;  %v2731_v30 = vpop.f32.mrb[25].mxu1 }
 0x5ff   :  { %v2975_v43 = vrot.slane %v2731_v30, 4  ;;  %v3035_v33 = vrot.slane %v2731_v30, 2  ;;  %v6361_v9 = vsel %vm423_vm1, %v3088_v28, %v2731_v30  ;;  %v3144_v1 = vrot.slane %v2731_v30, 6  ;;  %v2733_v41 = vpop.f32.mrb[26].mxu1 }
 0x600   :  { %v6364_v45 = vsel %vm423_vm1, %v2649_v3, %v2974_v46  ;;  %v6367_v56 = vsel %vm423_vm1, %v3028_v16, %v3034_v52  ;;  %v6370_v34 = vsel %vm423_vm1, %v3137_v49, %v3143_v50  ;;  %v2750_v61 = vrot.slane %v2733_v41, 4  ;;  %v2735_v47 = vpop.f32.mrb[27].mxu1 }
 0x601   :  { %v6373_v62 = vsel %vm423_vm1, %v2690_v22, %v2975_v43  ;;  %v6376_v29 = vsel %vm423_vm1, %v3029_v59, %v3035_v33  ;;  %v6379_v55 = vsel %vm423_vm1, %v3138_v5, %v3144_v1  ;;  %v2810_v15 = vrot.slane %v2733_v41, 2 }
 0x602   :  { %v2756_v32 = vsel %vm423_vm1, %v6320_v18, %v2750_v61  ;;  %v6389_v2 = vsel %vm423_vm1, %v2863_v14, %v2733_v41  ;;  %v2919_v22 = vrot.slane %v2733_v41, 6  ;;  %v2751_v42 = vrot.slane %v2735_v47, 4 }
 0x603   :  { %v2763_v3 = vadd.f32 %v2762_v4, %v2756_v32  ;;  %v2816_v11 = vsel %vm423_vm1, %v2804_v35, %v2810_v15  ;;  %v2811_v12 = vrot.slane %v2735_v47, 2  ;;  %v6393_v27 = vsel %vm423_vm1, %v2864_v17, %v2735_v47 }
 0x604   :  { %v6397_v36 = vsel %vm423_vm1, %v2913_v54, %v2919_v22  ;;  %v2757_v18 = vsel %vm423_vm1, %v6318_v19, %v2751_v42  ;;  %v2920_v24 = vrot.slane %v2735_v47, 6  ;;  %v2771_v4 = vmul.f32 0.0, %v6406_v37  ;;  %v6415_v19 = vld [vmem:[%s6719_s5 + $0x2c] sm:$0xf] }
 0x605   :  { %v2764_v63 = vadd.f32 %v6384_v38, %v2763_v3  ;;  %v2817_v20 = vsel %vm423_vm1, %v2805_v8, %v2811_v12 }
 0x606   :  { %v6409_v17 = vsel %vm423_vm1, %v2914_v0, %v2920_v24  ;;  %v2772_v14 = vadd.f32 %v2771_v4, %v2757_v18 }
 0x607   :  { %v4670_v35 = vmul.f32 -1.442695, %v2764_v63 }
 0x608   :  { %v2773_v8 = vadd.f32 %v6415_v19, %v2772_v14 }
 0x609   :  { %5434 = vpow2.f32 %v4670_v35 }
 0x60a   :  { %v4671_v40 = vmul.f32 -1.442695, %v2773_v8 }
 0x613   :  { %v5435_v54 = vpop.eup %5434 }
 0x614   :  { %v2768_v59 = vadd.f32 1.0, %v5435_v54 }
 0x616   :  { %5436 = vrcp.f32 %v2768_v59 }
 0x617   :  { %5438 = vpow2.f32 %v4671_v40 }
 0x620   :  { %v5437_v28 = vpop.eup %5436 }
 0x621   :  { %v2781_v5 = vsub.f32 1.0, %v5437_v28  ;;  %v5439_v16 = vpop.eup %5438  ;;  %v2780_v49 = vmul.f32 0.0, %v5437_v28 }
 0x622   :  { %v2777_v52 = vadd.f32 1.0, %v5439_v16 }
 0x623   :  { %v2782_v58 = vmul.f32 %v2781_v5, %v6338_v13  ;;  %v2759_v13 = vrot.slane %v6295_v25, 4 }
 0x625   :  { %v2783_v46 = vadd.f32 %v2782_v58, %v2780_v49  ;;  %v2761_v18 = vsel %vm423_vm1, %v6298_v48, %v2759_v13 }
 0x627   :  { %v2824_v50 = vmul.f32 %v6349_v31, %v2783_v46  ;;  %v2785_v30 = vmul.f32 1.442695, %v2783_v46  ;;  %v2833_v43 = vmul.f32 %v6406_v37, %v2783_v46  ;;  %vm2784_vm3 = vcmp.gt.f32.partialorder %v2783_v46, 0.0 }
 0x629   :  { %v2825_v33 = vadd.f32 %v2824_v50, %v2816_v11  ;;  %5440 = vpow2.f32 %v2785_v30  ;;  %v2834_v1 = vadd.f32 %v2833_v43, %v2817_v20 }
 0x62a   :  { %5442 = vrcp.f32 %v2777_v52 }
 0x62b   :  { %v2826_v41 = vadd.f32 %v6384_v38, %v2825_v33  ;;  %v2835_v3 = vadd.f32 %v6415_v19, %v2834_v1 }
 0x62d   :  { %v4673_v61 = vmul.f32 -1.442695, %v2826_v41  ;;  %v4674_v35 = vmul.f32 -1.442695, %v2835_v3  ;;  %v2821_v41 = vrot.slane %v6295_v25, 2 }
 0x62f   :  { %5444 = vpow2.f32 %v4673_v61  ;;  %v2819_v61 = vrot.slane %v6298_v48, 2 }
 0x633   :  { %v5441_v47 = vpop.eup %5440 }
 0x634   :  { %v5443_v15 = vpop.eup %5442  ;;  %v4672_v32 = vadd.f32 -1.0, %v5441_v47 }
 0x635   :  { %v2792_v42 = vsub.f32 1.0, %v5443_v15 }
 0x636   :  { %v2788_v22 = vmul.f32 1.6732632, %v4672_v32 }
 0x637   :  { %v2793_v20 = vmul.f32 %v2792_v42, %v2761_v18 }
 0x638   :  { %v2789_v12 = vsel %vm2784_vm3, %v2783_v46, %v2788_v22  ;;  %v2823_v22 = vsel %vm423_vm1, %v2819_v61, %v2821_v41 }
 0x639   :  { %v5445_v0 = vpop.eup %5444  ;;  %v2790_v11 = vmul.f32 1.050701, %v2789_v12 }
 0x63a   :  { %v2830_v24 = vadd.f32 1.0, %v5445_v0 }
 0x63b   :  { %v2791_v63 = vmul.f32 %v5443_v15, %v2790_v11 }
 0x63c   :  { %5446 = vrcp.f32 %v2830_v24 }
 0x63d   :  { %v2794_v4 = vadd.f32 %v2793_v20, %v2791_v63  ;;  %5448 = vpow2.f32 %v4674_v35 }
 0x63f   :  { %2795 = vst [vmem:[#allocation2] sm:$0x3] %v2794_v4  ;;  %v2797_v14 = vrot.slane %v2794_v4, 4 }
 0x641   :  { %2799 = vst [vmem:[#allocation2 + $0x18] sm:$0xc0] %v2797_v14 }
 0x646   :  { %v5447_v8 = vpop.eup %5446 }
 0x647   :  { %v2842_v54 = vmul.f32 %v5447_v8, %v2783_v46  ;;  %v2843_v59 = vsub.f32 1.0, %v5447_v8  ;;  %v5449_v40 = vpop.eup %5448 }
 0x648   :  { %v2839_v16 = vadd.f32 1.0, %v5449_v40 }
 0x649   :  { %v2844_v28 = vmul.f32 %v2843_v59, %v6341_v21 }
 0x64b   :  { %v2845_v5 = vadd.f32 %v2844_v28, %v2842_v54 }
 0x64d   :  { %v2874_v49 = vmul.f32 %v6349_v31, %v2845_v5  ;;  %v2847_v58 = vmul.f32 1.442695, %v2845_v5  ;;  %v2883_v52 = vmul.f32 %v6406_v37, %v2845_v5  ;;  %vm2846_vm4 = vcmp.gt.f32.partialorder %v2845_v5, 0.0 }
 0x64f   :  { %v2875_v50 = vadd.f32 %v2874_v49, %v6389_v2  ;;  %5450 = vpow2.f32 %v2847_v58  ;;  %v2884_v30 = vadd.f32 %v2883_v52, %v6393_v27 }
 0x650   :  { %5452 = vrcp.f32 %v2839_v16 }
 0x651   :  { %v2876_v43 = vadd.f32 %v6384_v38, %v2875_v50  ;;  %v2885_v2 = vadd.f32 %v6415_v19, %v2884_v30  ;;  %v2871_v50 = vrot.slane %v6298_v48, 4 }
 0x653   :  { %v4676_v46 = vmul.f32 -1.442695, %v2876_v43  ;;  %v4677_v0 = vmul.f32 -1.442695, %v2885_v2 }
 0x655   :  { %5454 = vpow2.f32 %v4676_v46 }
 0x659   :  { %v5451_v33 = vpop.eup %5450 }
 0x65a   :  { %v5453_v1 = vpop.eup %5452  ;;  %v4675_v21 = vadd.f32 -1.0, %v5451_v33 }
 0x65b   :  { %v2854_v15 = vsub.f32 1.0, %v5453_v1 }
 0x65c   :  { %v2850_v47 = vmul.f32 1.6732632, %v4675_v21 }
 0x65d   :  { %v2855_v12 = vmul.f32 %v2854_v15, %v2823_v22 }
 0x65e   :  { %v2851_v32 = vsel %vm2846_vm4, %v2845_v5, %v2850_v47 }
 0x65f   :  { %v5455_v13 = vpop.eup %5454  ;;  %v2852_v27 = vmul.f32 1.050701, %v2851_v32 }
 0x660   :  { %v2880_v42 = vadd.f32 1.0, %v5455_v13 }
 0x661   :  { %v2853_v3 = vmul.f32 %v5453_v1, %v2852_v27 }
 0x662   :  { %5456 = vrcp.f32 %v2880_v42 }
 0x663   :  { %v2856_v11 = vadd.f32 %v2855_v12, %v2853_v3  ;;  %5458 = vpow2.f32 %v4677_v0  ;;  %v5132_v3 = vld [vmem:[#allocation9 + $0x4] ss:$24 sps:$4 sm:$0xff]   ;;  %v5130_v0 = vld [vmem:[#allocation9] ss:$24 sps:$4 sm:$0xff]  }
 0x664   :  { %3776 = vmatprep.subr.bf16.mxu0 %v5132_v3 }
 0x665   :  { %v2858_v18 = vrot.slane %v2856_v11, 6  ;;  %v5135_v11 = vld [vmem:[#allocation9 + $0xc] ss:$24 sps:$4 sm:$0xff]   ;;  %3777 = vmatpush1.bf16.msra.mxu0 %v5130_v0  ;;  %v5163_v0 = vld [vmem:[#allocation9 + $0xf8] ss:$24 sps:$4 sm:$0xff]  }
 0x666   :  { %3819 = vmatprep.subr.bf16.mxu1 %v5135_v11 }
 0x667   :  { %2860 = vst [vmem:[#allocation2] ss:$28 sps:$4 sm:$0x3c] %v2858_v18  }
 0x66c   :  { %v5457_v24 = vpop.eup %5456 }
 0x66d   :  { %v2892_v63 = vmul.f32 %v5457_v24, %v2845_v5  ;;  %v2893_v20 = vsub.f32 1.0, %v5457_v24  ;;  %v5459_v35 = vpop.eup %5458  ;;  %v5133_v24 = vld [vmem:[#allocation9 + $0x8] ss:$24 sps:$4 sm:$0xff]  }
 0x66e   :  { %v2889_v8 = vadd.f32 1.0, %v5459_v35  ;;  %3820 = vmatpush1.bf16.msra.mxu1 %v5133_v24 }
 0x66f   :  { %v2894_v4 = vmul.f32 %v2893_v20, %v6335_v53 }
 0x671   :  { %v2895_v14 = vadd.f32 %v2894_v4, %v2892_v63 }
 0x673   :  { %v2932_v54 = vmul.f32 %v6349_v31, %v2895_v14  ;;  %v2897_v59 = vmul.f32 1.442695, %v2895_v14  ;;  %v2941_v40 = vmul.f32 %v6406_v37, %v2895_v14  ;;  %vm2896_vm5 = vcmp.gt.f32.partialorder %v2895_v14, 0.0 }
 0x675   :  { %v2933_v28 = vadd.f32 %v2932_v54, %v6397_v36  ;;  %5460 = vpow2.f32 %v2897_v59  ;;  %v2942_v16 = vadd.f32 %v2941_v40, %v6409_v17  ;;  %v2873_v17 = vsel %vm423_vm1, %v2871_v50, %v6295_v25  ;;  %v5141_v54 = vld [vmem:[#allocation9 + $0x3c] ss:$24 sps:$4 sm:$0xff]   ;;  %v5139_v59 = vld [vmem:[#allocation9 + $0x38] ss:$24 sps:$4 sm:$0xff]  }
 0x676   :  { %5462 = vrcp.f32 %v2889_v8  ;;  %v5136_v8 = vld [vmem:[#allocation9 + $0x30] ss:$24 sps:$4 sm:$0xff]   ;;  %3821 = vmatprep.subr.bf16.mxu1 %v5141_v54  ;;  %v5153_v50 = vld [vmem:[#allocation9 + $0x9c] ss:$24 sps:$4 sm:$0xff]  }
 0x677   :  { %v2934_v49 = vadd.f32 %v6384_v38, %v2933_v28  ;;  %v2943_v46 = vadd.f32 %v6415_v19, %v2942_v16  ;;  %3822 = vmatpush1.bf16.msra.mxu1 %v5139_v59  ;;  %v5144_v16 = vld [vmem:[#allocation9 + $0x64] ss:$24 sps:$4 sm:$0xff]   ;;  %v5174_v54 = vld [vmem:[#allocation9 + $0x154] ss:$24 sps:$4 sm:$0xff]  }
 0x678   :  { %v5177_v59 = vld [vmem:[#allocation9 + $0x15c] ss:$24 sps:$4 sm:$0xff]  }
 0x679   :  { %v4679_v5 = vmul.f32 -1.442695, %v2934_v49  ;;  %v4680_v47 = vmul.f32 -1.442695, %v2943_v46 }
 0x67b   :  { %5464 = vpow2.f32 %v4679_v5 }
 0x67f   :  { %v5461_v58 = vpop.eup %5460 }
 0x680   :  { %v5463_v52 = vpop.eup %5462  ;;  %v4678_v53 = vadd.f32 -1.0, %v5461_v58  ;;  %v5142_v58 = vld [vmem:[#allocation9 + $0x60] ss:$24 sps:$4 sm:$0xff]  }
 0x681   :  { %v2904_v43 = vsub.f32 1.0, %v5463_v52 }
 0x682   :  { %v2900_v30 = vmul.f32 1.6732632, %v4678_v53  ;;  %v5148_v53 = vld [vmem:[#allocation9 + $0x90] ss:$24 sps:$4 sm:$0xff]  }
 0x683   :  { %v2905_v61 = vmul.f32 %v2904_v43, %v2873_v17  ;;  %v5159_v17 = vld [vmem:[#allocation9 + $0xcc] ss:$24 sps:$4 sm:$0xff]  }
 0x684   :  { %v2901_v33 = vsel %vm2896_vm5, %v2895_v14, %v2900_v30  ;;  %v5151_v30 = vld [vmem:[#allocation9 + $0x98] ss:$24 sps:$4 sm:$0xff]  }
 0x685   :  { %v5465_v36 = vpop.eup %5464  ;;  %v2902_v1 = vmul.f32 1.050701, %v2901_v33 }
 0x686   :  { %v2938_v21 = vadd.f32 1.0, %v5465_v36  ;;  %v5156_v36 = vld [vmem:[#allocation9 + $0xc4] ss:$24 sps:$4 sm:$0xff]  }
 0x687   :  { %v2903_v41 = vmul.f32 %v5463_v52, %v2902_v1  ;;  %v5147_v52 = vld [vmem:[#allocation9 + $0x6c] ss:$24 sps:$4 sm:$0xff]   ;;  %v5154_v1 = vld [vmem:[#allocation9 + $0xc0] ss:$24 sps:$4 sm:$0xff]  }
 0x688   :  { %5466 = vrcp.f32 %v2938_v21  ;;  %3823 = vmatprep.subr.bf16.mxu1 %v5147_v52  ;;  %v2929_v21 = vrot.slane %v6295_v25, 6  ;;  %v5189_v52 = vld [vmem:[#allocation9 + $0x1bc] ss:$24 sps:$4 sm:$0xff]  }
 0x689   :  { %v2906_v15 = vadd.f32 %v2905_v61, %v2903_v41  ;;  %5468 = vpow2.f32 %v4680_v47  ;;  %v2927_v41 = vrot.slane %v6298_v48, 6  ;;  %v5157_v47 = vld [vmem:[#allocation9 + $0xc8] ss:$24 sps:$4 sm:$0xff]  }
 0x68b   :  { %v2908_v2 = vrot.slane %v2906_v15, 4  ;;  %2911 = vst [vmem:[#allocation2 + $0x18] sm:$0xc] %v2906_v15  ;;  %v2931_v25 = vsel %vm423_vm1, %v2927_v41, %v2929_v21  ;;  %v5198_v41 = vld [vmem:[#allocation9 + $0x214] ss:$24 sps:$4 sm:$0xff]  }
 0x68d   :  { %2910 = vst [vmem:[#allocation2] sm:$0x30] %v2908_v2 }
 0x692   :  { %v5467_v32 = vpop.eup %5466 }
 0x693   :  { %v2950_v13 = vmul.f32 %v5467_v32, %v2895_v14  ;;  %v2951_v27 = vsub.f32 1.0, %v5467_v32  ;;  %v5469_v22 = vpop.eup %5468  ;;  %v5162_v32 = vld [vmem:[#allocation9 + $0xf4] ss:$24 sps:$4 sm:$0xff]  }
 0x694   :  { %v2947_v18 = vadd.f32 1.0, %v5469_v22  ;;  %v5160_v22 = vld [vmem:[#allocation9 + $0xf0] ss:$24 sps:$4 sm:$0xff]  }
 0x695   :  { %v2952_v42 = vmul.f32 %v2951_v27, %v6344_v57  ;;  %v5138_v57 = vld [vmem:[#allocation9 + $0x34] ss:$24 sps:$4 sm:$0xff]  }
 0x696   :  { %3778 = vmatprep.subr.bf16.mxu0 %v5138_v57  ;;  %v5171_v57 = vld [vmem:[#allocation9 + $0x12c] ss:$24 sps:$4 sm:$0xff]  }
 0x697   :  { %v6447_v12 = vadd.f32 %v2952_v42, %v2950_v13  ;;  %3779 = vmatpush1.bf16.msra.mxu0 %v5136_v8  ;;  %v5165_v42 = vld [vmem:[#allocation9 + $0xfc] ss:$24 sps:$4 sm:$0xff]   ;;  %v5172_v8 = vld [vmem:[#allocation9 + $0x150] ss:$24 sps:$4 sm:$0xff]  }
 0x698   :  { %3780 = vmatprep.subr.bf16.mxu0 %v5144_v16  ;;  %v5183_v16 = vld [vmem:[#allocation9 + $0x18c] ss:$24 sps:$4 sm:$0xff]  }
 0x699   :  { %v2986_v63 = vmul.f32 %v6349_v31, %v6447_v12  ;;  %v2955_v20 = vmul.f32 1.442695, %v6447_v12  ;;  %v2995_v35 = vmul.f32 %v6406_v37, %v6447_v12  ;;  %vm2954_vm6 = vcmp.gt.f32.partialorder %v6447_v12, 0.0 }
 0x69b   :  { %v2987_v4 = vadd.f32 %v2986_v63, %v6364_v45  ;;  %5470 = vpow2.f32 %v2955_v20  ;;  %v2996_v14 = vadd.f32 %v2995_v35, %v6373_v62  ;;  %v5145_v45 = vld [vmem:[#allocation9 + $0x68] ss:$24 sps:$4 sm:$0xff]   ;;  %3781 = vmatpush1.bf16.msra.mxu0 %v5142_v58  ;;  %v5150_v62 = vld [vmem:[#allocation9 + $0x94] ss:$24 sps:$4 sm:$0xff]   ;;  %v5168_v63 = vld [vmem:[#allocation9 + $0x124] ss:$24 sps:$4 sm:$0xff]  }
 0x69c   :  { %5472 = vrcp.f32 %v2947_v18  ;;  %3824 = vmatpush1.bf16.msra.mxu1 %v5145_v45  ;;  %3782 = vmatprep.subr.bf16.mxu0 %v5150_v62  ;;  %v5166_v35 = vld [vmem:[#allocation9 + $0x120] ss:$24 sps:$4 sm:$0xff]  }
 0x69d   :  { %v2988_v40 = vadd.f32 %v6384_v38, %v2987_v4  ;;  %v2997_v28 = vadd.f32 %v6415_v19, %v2996_v14  ;;  %3825 = vmatprep.subr.bf16.mxu1 %v5153_v50  ;;  %v5169_v4 = vld [vmem:[#allocation9 + $0x128] ss:$24 sps:$4 sm:$0xff]  }
 0x69e   :  { %v5181_v58 = vld [vmem:[#allocation9 + $0x188] ss:$24 sps:$4 sm:$0xff]  }
 0x69f   :  { %v4682_v49 = vmul.f32 -1.442695, %v2988_v40  ;;  %v4683_v5 = vmul.f32 -1.442695, %v2997_v28  ;;  %3783 = vmatpush1.bf16.msra.mxu0 %v5148_v53  ;;  %v5175_v40 = vld [vmem:[#allocation9 + $0x158] ss:$24 sps:$4 sm:$0xff]  }
 0x6a0   :  { %3826 = vmatpush1.bf16.msra.mxu1 %v5151_v30  ;;  %3784 = vmatprep.subr.bf16.mxu0 %v5156_v36  ;;  %v5180_v28 = vld [vmem:[#allocation9 + $0x184] ss:$24 sps:$4 sm:$0xff]   ;;  %v5184_v30 = vld [vmem:[#allocation9 + $0x1b0] ss:$24 sps:$4 sm:$0xff]  }
 0x6a1   :  { %5474 = vpow2.f32 %v4682_v49  ;;  %3827 = vmatprep.subr.bf16.mxu1 %v5159_v17  ;;  %v5178_v49 = vld [vmem:[#allocation9 + $0x180] ss:$24 sps:$4 sm:$0xff]  }
 0x6a2   :  { %5476 = vpow2.f32 %v4683_v5  ;;  %v5186_v5 = vld [vmem:[#allocation9 + $0x1b4] ss:$24 sps:$4 sm:$0xff]   ;;  %v5187_v36 = vld [vmem:[#allocation9 + $0x1b8] ss:$24 sps:$4 sm:$0xff]  }
 0x6a3   :  { %3785 = vmatpush1.bf16.msra.mxu0 %v5154_v1  ;;  %v5195_v1 = vld [vmem:[#allocation9 + $0x1ec] ss:$24 sps:$4 sm:$0xff]  }
 0x6a4   :  { %3828 = vmatpush1.bf16.msra.mxu1 %v5157_v47  ;;  %3786 = vmatprep.subr.bf16.mxu0 %v5162_v32 }
 0x6a5   :  { %v5471_v43 = vpop.eup %5470  ;;  %3829 = vmatprep.subr.bf16.mxu1 %v5165_v42 }
 0x6a6   :  { %v5473_v46 = vpop.eup %5472  ;;  %v4681_v33 = vadd.f32 -1.0, %v5471_v43 }
 0x6a7   :  { %v2962_v15 = vsub.f32 1.0, %v5473_v46  ;;  %3787 = vmatpush1.bf16.msra.mxu0 %v5160_v22 }
 0x6a8   :  { %v2958_v61 = vmul.f32 1.6732632, %v4681_v33  ;;  %3830 = vmatpush1.bf16.msra.mxu1 %v5163_v0  ;;  %3788 = vmatprep.subr.bf16.mxu0 %v5168_v63  ;;  %v5216_v63 = vld [vmem:[#allocation9 + $0x2a4] ss:$24 sps:$4 sm:$0xff]  }
 0x6a9   :  { %v2963_v18 = vmul.f32 %v2962_v15, %v2931_v25  ;;  %3831 = vmatprep.subr.bf16.mxu1 %v5171_v57  ;;  %v5207_v25 = vld [vmem:[#allocation9 + $0x24c] ss:$24 sps:$4 sm:$0xff]  }
 0x6aa   :  { %v2959_v2 = vsel %vm2954_vm6, %v6447_v12, %v2958_v61  ;;  %v5219_v57 = vld [vmem:[#allocation9 + $0x2ac] ss:$24 sps:$4 sm:$0xff]  }
 0x6ab   :  { %v5475_v13 = vpop.eup %5474  ;;  %v2960_v27 = vmul.f32 1.050701, %v2959_v2  ;;  %3789 = vmatpush1.bf16.msra.mxu0 %v5166_v35  ;;  %v5201_v2 = vld [vmem:[#allocation9 + $0x21c] ss:$24 sps:$4 sm:$0xff]   ;;  %v5211_v35 = vld [vmem:[#allocation9 + $0x278] ss:$24 sps:$4 sm:$0xff]  }
 0x6ac   :  { %v5477_v3 = vpop.eup %5476  ;;  %v2992_v48 = vadd.f32 1.0, %v5475_v13  ;;  %3832 = vmatpush1.bf16.msra.mxu1 %v5169_v4  ;;  %3790 = vmatprep.subr.bf16.mxu0 %v5174_v54  ;;  %v5196_v13 = vld [vmem:[#allocation9 + $0x210] ss:$24 sps:$4 sm:$0xff]  }
 0x6ad   :  { %v2961_v11 = vmul.f32 %v5473_v46, %v2960_v27  ;;  %v3001_v24 = vadd.f32 1.0, %v5477_v3  ;;  %3833 = vmatprep.subr.bf16.mxu1 %v5177_v59  ;;  %v5192_v46 = vld [vmem:[#allocation9 + $0x1e4] ss:$24 sps:$4 sm:$0xff]   ;;  %v5199_v3 = vld [vmem:[#allocation9 + $0x218] ss:$24 sps:$4 sm:$0xff]  }
 0x6ae   :  { %5478 = vrcp.f32 %v2992_v48  ;;  %v5204_v27 = vld [vmem:[#allocation9 + $0x244] ss:$24 sps:$4 sm:$0xff]   ;;  %v5217_v59 = vld [vmem:[#allocation9 + $0x2a8] ss:$24 sps:$4 sm:$0xff]  }
 0x6af   :  { %v2964_v20 = vadd.f32 %v2963_v18, %v2961_v11  ;;  %5480 = vrcp.f32 %v3001_v24  ;;  %3791 = vmatpush1.bf16.msra.mxu0 %v5172_v8  ;;  %v5202_v11 = vld [vmem:[#allocation9 + $0x240] ss:$24 sps:$4 sm:$0xff]   ;;  %v5213_v18 = vld [vmem:[#allocation9 + $0x27c] ss:$24 sps:$4 sm:$0xff]   ;;  %v5208_v24 = vld [vmem:[#allocation9 + $0x270] ss:$24 sps:$4 sm:$0xff]  }
 0x6b0   :  { %3792 = vmatprep.subr.bf16.mxu0 %v5180_v28  ;;  %3834 = vmatpush1.bf16.msra.mxu1 %v5175_v40  ;;  %v5222_v8 = vld [vmem:[#allocation9 + $0x2d4] ss:$24 sps:$4 sm:$0xff]  }
 0x6b1   :  { %v2966_v14 = vrot.slane %v2964_v20, 2  ;;  %3835 = vmatprep.subr.bf16.mxu1 %v5183_v16  ;;  %v5225_v40 = vld [vmem:[#allocation9 + $0x2dc] ss:$24 sps:$4 sm:$0xff]  }
 0x6b3   :  { %2968 = vst [vmem:[#allocation2 + $0x18] ss:$-20 sps:$4 sm:$0xc3] %v2966_v14   ;;  %3793 = vmatpush1.bf16.msra.mxu0 %v5178_v49  ;;  %v5214_v14 = vld [vmem:[#allocation9 + $0x2a0] ss:$24 sps:$4 sm:$0xff]  }
 0x6b4   :  { %3794 = vmatprep.subr.bf16.mxu0 %v5186_v5  ;;  %3836 = vmatpush1.bf16.msra.mxu1 %v5181_v58  ;;  %v5220_v49 = vld [vmem:[#allocation9 + $0x2d0] ss:$24 sps:$4 sm:$0xff]  }
 0x6b5   :  { %3837 = vmatprep.subr.bf16.mxu1 %v5189_v52 }
 0x6b7   :  { %3795 = vmatpush1.bf16.msra.mxu0 %v5184_v30 }
 0x6b8   :  { %v5479_v45 = vpop.eup %5478  ;;  %3796 = vmatprep.subr.bf16.mxu0 %v5192_v46  ;;  %3838 = vmatpush1.bf16.msra.mxu1 %v5187_v36 }
 0x6b9   :  { %v6463_v62 = vpop.eup %5480  ;;  %v3004_v53 = vmul.f32 %v5479_v45, %v6447_v12  ;;  %v3005_v50 = vsub.f32 1.0, %v5479_v45  ;;  %v5190_v12 = vld [vmem:[#allocation9 + $0x1e0] ss:$24 sps:$4 sm:$0xff]   ;;  %3839 = vmatprep.subr.bf16.mxu1 %v5195_v1 }
 0x6ba   :  { %v3016_v43 = vsub.f32 1.0, %v6463_v62 }
 0x6bb   :  { %v3006_v33 = vmul.f32 %v3005_v50, %v6323_v51  ;;  %v5193_v51 = vld [vmem:[#allocation9 + $0x1e8] ss:$24 sps:$4 sm:$0xff]   ;;  %3797 = vmatpush1.bf16.msra.mxu0 %v5190_v12 }
 0x6bc   :  { %v6469_v17 = vmul.f32 %v3016_v43, %v6304_v10  ;;  %3798 = vmatprep.subr.bf16.mxu0 %v5198_v41  ;;  %3840 = vmatpush1.bf16.msra.mxu1 %v5193_v51  ;;  %v5228_v43 = vld [vmem:[#allocation9 + $0x14] ss:$24 sps:$4 sm:$0xff]  }
 0x6bd   :  { %v6471_v21 = vadd.f32 %v3006_v33, %v3004_v53  ;;  %3841 = vmatprep.subr.bf16.mxu1 %v5201_v2  ;;  %v5223_v53 = vld [vmem:[#allocation9 + $0x2d8] ss:$24 sps:$4 sm:$0xff]  }
 0x6bf   :  { %v3048_v61 = vmul.f32 %v6349_v31, %v6471_v21  ;;  %v3057_v47 = vmul.f32 %v6406_v37, %v6471_v21  ;;  %v3009_v15 = vmul.f32 1.442695, %v6471_v21  ;;  %3799 = vmatpush1.bf16.msra.mxu0 %v5196_v13  ;;  %vm3008_vm7 = vcmp.gt.f32.partialorder %v6471_v21, 0.0 }
 0x6c0   :  { %3800 = vmatprep.subr.bf16.mxu0 %v5204_v27  ;;  %3842 = vmatpush1.bf16.msra.mxu1 %v5199_v3 }
 0x6c1   :  { %v3049_v10 = vadd.f32 %v3048_v61, %v6367_v56  ;;  %v3058_v32 = vadd.f32 %v3057_v47, %v6376_v29  ;;  %5482 = vpow2.f32 %v3009_v15  ;;  %v5210_v56 = vld [vmem:[#allocation9 + $0x274] ss:$24 sps:$4 sm:$0xff]   ;;  %v5205_v29 = vld [vmem:[#allocation9 + $0x248] ss:$24 sps:$4 sm:$0xff]   ;;  %3843 = vmatprep.subr.bf16.mxu1 %v5207_v25 }
 0x6c3   :  { %v3050_v22 = vadd.f32 %v6384_v38, %v3049_v10  ;;  %v3059_v42 = vadd.f32 %v6415_v19, %v3058_v32  ;;  %3801 = vmatpush1.bf16.msra.mxu0 %v5202_v11 }
 0x6c4   :  { %3802 = vmatprep.subr.bf16.mxu0 %v5210_v56  ;;  %3844 = vmatpush1.bf16.msra.mxu1 %v5205_v29 }
 0x6c5   :  { %v4685_v48 = vmul.f32 -1.442695, %v3050_v22  ;;  %v4686_v0 = vmul.f32 -1.442695, %v3059_v42  ;;  %3845 = vmatprep.subr.bf16.mxu1 %v5213_v18 }
 0x6c7   :  { %5484 = vpow2.f32 %v4685_v48  ;;  %3803 = vmatpush1.bf16.msra.mxu0 %v5208_v24 }
 0x6c8   :  { %5486 = vpow2.f32 %v4686_v0  ;;  %3804 = vmatprep.subr.bf16.mxu0 %v5216_v63  ;;  %3846 = vmatpush1.bf16.msra.mxu1 %v5211_v35 }
 0x6c9   :  { %3847 = vmatprep.subr.bf16.mxu1 %v5219_v57 }
 0x6cb   :  { %v5483_v20 = vpop.eup %5482  ;;  %3805 = vmatpush1.bf16.msra.mxu0 %v5214_v14 }
 0x6cc   :  { %v4684_v4 = vadd.f32 -1.0, %v5483_v20  ;;  %3806 = vmatprep.subr.bf16.mxu0 %v5222_v8  ;;  %3848 = vmatpush1.bf16.msra.mxu1 %v5217_v59 }
 0x6cd   :  { %3849 = vmatprep.subr.bf16.mxu1 %v5225_v40 }
 0x6ce   :  { %v3012_v54 = vmul.f32 1.6732632, %v4684_v4 }
 0x6cf   :  { %3807 = vmatpush1.bf16.msra.mxu0 %v5220_v49 }
 0x6d0   :  { %v3013_v28 = vsel %vm3008_vm7, %v6471_v21, %v3012_v54  ;;  %3850 = vmatpush1.bf16.msra.mxu1 %v5223_v53  ;;  %3862 = vmatprep.subr.bf16.mxu0 %v5228_v43 }
 0x6d1   :  { %v5485_v16 = vpop.eup %5484  ;;  %v3014_v5 = vmul.f32 1.050701, %v3013_v28 }
 0x6d2   :  { %v5487_v58 = vpop.eup %5486  ;;  %v3054_v45 = vadd.f32 1.0, %v5485_v16 }
 0x6d3   :  { %v3063_v52 = vadd.f32 1.0, %v5487_v58  ;;  %v3015_v50 = vmul.f32 %v6463_v62, %v3014_v5 }
 0x6d4   :  { %5488 = vrcp.f32 %v3054_v45 }
 0x6d5   :  { %5490 = vrcp.f32 %v3063_v52  ;;  %v3018_v30 = vadd.f32 %v6469_v17, %v3015_v50 }
 0x6d7   :  { %v3021_v46 = vrot.slane %v3018_v30, 4  ;;  %3019 = vst [vmem:[#allocation2 + $0x10] sm:$0x3] %v3018_v30 }
 0x6d9   :  { %3023 = vst [vmem:[#allocation2 + $0x8] sm:$0xc0] %v3021_v46 }
 0x6de   :  { %v5489_v33 = vpop.eup %5488 }
 0x6df   :  { %v5491_v36 = vpop.eup %5490  ;;  %v3066_v1 = vmul.f32 %v5489_v33, %v6471_v21  ;;  %v3067_v12 = vsub.f32 1.0, %v5489_v33 }
 0x6e0   :  { %v3078_v41 = vsub.f32 1.0, %v5491_v36 }
 0x6e1   :  { %v3068_v62 = vmul.f32 %v3067_v12, %v6326_v39 }
 0x6e2   :  { %v3079_v61 = vmul.f32 %v3078_v41, %v6308_v7 }
 0x6e3   :  { %v3069_v47 = vadd.f32 %v3068_v62, %v3066_v1 }
 0x6e5   :  { %v3098_v51 = vmul.f32 %v6349_v31, %v3069_v47  ;;  %v3107_v17 = vmul.f32 %v6406_v37, %v3069_v47  ;;  %v3071_v15 = vmul.f32 1.442695, %v3069_v47  ;;  %vm3070_vm8 = vcmp.gt.f32.partialorder %v3069_v47, 0.0 }
 0x6e7   :  { %v3099_v2 = vadd.f32 %v3098_v51, %v6358_v23  ;;  %v3108_v10 = vadd.f32 %v3107_v17, %v6361_v9  ;;  %5492 = vpow2.f32 %v3071_v15 }
 0x6e9   :  { %v3100_v32 = vadd.f32 %v6384_v38, %v3099_v2  ;;  %v3109_v21 = vadd.f32 %v6415_v19, %v3108_v10 }
 0x6eb   :  { %v4688_v13 = vmul.f32 -1.442695, %v3100_v32  ;;  %v4689_v27 = vmul.f32 -1.442695, %v3109_v21  ;;  %v6505_v32 = vld [vmem:[#allocation2 + $0x18] sm:$0xff] }
 0x6ed   :  { %5494 = vpow2.f32 %v4688_v13  ;;  %v6507_v13 = vld [vmem:[#allocation2] sm:$0xff] }
 0x6ee   :  { %5496 = vpow2.f32 %v4689_v27 }
 0x6f1   :  { %v5493_v7 = vpop.eup %5492 }
 0x6f2   :  { %v4687_v39 = vadd.f32 -1.0, %v5493_v7 }
 0x6f4   :  { %v3074_v22 = vmul.f32 1.6732632, %v4687_v39  ;;  %v5226_v39 = vld [vmem:[#allocation9 + $0x10] ss:$24 sps:$4 sm:$0xff]  }
 0x6f6   :  { %v3075_v42 = vsel %vm3070_vm8, %v3069_v47, %v3074_v22 }
 0x6f7   :  { %v5495_v3 = vpop.eup %5494  ;;  %v3076_v25 = vmul.f32 1.050701, %v3075_v42  ;;  %v5231_v42 = vld [vmem:[#allocation9 + $0x44] ss:$24 sps:$4 sm:$0xff]  }
 0x6f8   :  { %v5497_v48 = vpop.eup %5496  ;;  %v3104_v23 = vadd.f32 1.0, %v5495_v3 }
 0x6f9   :  { %v3113_v0 = vadd.f32 1.0, %v5497_v48  ;;  %v3077_v9 = vmul.f32 %v5491_v36, %v3076_v25 }
 0x6fa   :  { %5498 = vrcp.f32 %v3104_v23 }
 0x6fb   :  { %5500 = vrcp.f32 %v3113_v0  ;;  %v3080_v11 = vadd.f32 %v3079_v61, %v3077_v9 }
 0x6fd   :  { %v3082_v56 = vrot.slane %v3080_v11, 6 }
 0x6ff   :  { %3085 = vst [vmem:[#allocation2 + $0x10] ss:$-4 sps:$4 sm:$0x3c] %v3082_v56  }
 0x704   :  { %v5499_v29 = vpop.eup %5498 }
 0x705   :  { %v5501_v18 = vpop.eup %5500  ;;  %v3116_v24 = vmul.f32 %v5499_v29, %v3069_v47  ;;  %v3117_v63 = vsub.f32 1.0, %v5499_v29  ;;  %v5229_v29 = vld [vmem:[#allocation9 + $0x40] ss:$24 sps:$4 sm:$0xff]  }
 0x706   :  { %v3128_v20 = vsub.f32 1.0, %v5501_v18 }
 0x707   :  { %v3118_v35 = vmul.f32 %v3117_v63, %v6329_v44  ;;  %v5237_v63 = vld [vmem:[#allocation9 + $0xa4] ss:$24 sps:$4 sm:$0xff]  }
 0x708   :  { %v3129_v57 = vmul.f32 %v3128_v20, %v6311_v26  ;;  %v5235_v20 = vld [vmem:[#allocation9 + $0xa0] ss:$24 sps:$4 sm:$0xff]  }
 0x709   :  { %v3119_v4 = vadd.f32 %v3118_v35, %v3116_v24  ;;  %v5232_v24 = vld [vmem:[#allocation9 + $0x70] ss:$24 sps:$4 sm:$0xff]   ;;  %v5240_v35 = vld [vmem:[#allocation9 + $0xd4] ss:$24 sps:$4 sm:$0xff]  }
 0x70b   :  { %v3156_v14 = vmul.f32 %v6349_v31, %v3119_v4  ;;  %v3165_v8 = vmul.f32 %v6406_v37, %v3119_v4  ;;  %v3121_v54 = vmul.f32 1.442695, %v3119_v4  ;;  %vm3120_vm9 = vcmp.gt.f32.partialorder %v3119_v4, 0.0 }
 0x70d   :  { %v3157_v59 = vadd.f32 %v3156_v14, %v6370_v34  ;;  %v3166_v40 = vadd.f32 %v3165_v8, %v6379_v55  ;;  %5502 = vpow2.f32 %v3121_v54  ;;  %v5241_v14 = vld [vmem:[#allocation9 + $0x100] ss:$24 sps:$4 sm:$0xff]   ;;  %v5246_v8 = vld [vmem:[#allocation9 + $0x134] ss:$24 sps:$4 sm:$0xff]   ;;  %v5244_v54 = vld [vmem:[#allocation9 + $0x130] ss:$24 sps:$4 sm:$0xff]  }
 0x70f   :  { %v3158_v28 = vadd.f32 %v6384_v38, %v3157_v59  ;;  %v3167_v16 = vadd.f32 %v6415_v19, %v3166_v40  ;;  %v5249_v59 = vld [vmem:[#allocation9 + $0x164] ss:$24 sps:$4 sm:$0xff]   ;;  %v5247_v40 = vld [vmem:[#allocation9 + $0x160] ss:$24 sps:$4 sm:$0xff]  }
 0x711   :  { %v4691_v49 = vmul.f32 -1.442695, %v3158_v28  ;;  %v4692_v5 = vmul.f32 -1.442695, %v3167_v16  ;;  %v5252_v28 = vld [vmem:[#allocation9 + $0x194] ss:$24 sps:$4 sm:$0xff]  }
 0x712   :  { %v5250_v16 = vld [vmem:[#allocation9 + $0x190] ss:$24 sps:$4 sm:$0xff]  }
 0x713   :  { %5504 = vpow2.f32 %v4691_v49  ;;  %v5255_v49 = vld [vmem:[#allocation9 + $0x1c4] ss:$24 sps:$4 sm:$0xff]  }
 0x714   :  { %5506 = vpow2.f32 %v4692_v5  ;;  %v5253_v5 = vld [vmem:[#allocation9 + $0x1c0] ss:$24 sps:$4 sm:$0xff]  }
 0x717   :  { %v5503_v26 = vpop.eup %5502 }
 0x718   :  { %v4690_v44 = vadd.f32 -1.0, %v5503_v26  ;;  %v5258_v26 = vld [vmem:[#allocation9 + $0x1f4] ss:$24 sps:$4 sm:$0xff]  }
 0x71a   :  { %v3124_v58 = vmul.f32 1.6732632, %v4690_v44  ;;  %v5256_v44 = vld [vmem:[#allocation9 + $0x1f0] ss:$24 sps:$4 sm:$0xff]  }
 0x71c   :  { %v3125_v31 = vsel %vm3120_vm9, %v3119_v4, %v3124_v58  ;;  %v5261_v58 = vld [vmem:[#allocation9 + $0x224] ss:$24 sps:$4 sm:$0xff]  }
 0x71d   :  { %v5505_v37 = vpop.eup %5504  ;;  %v3126_v45 = vmul.f32 1.050701, %v3125_v31  ;;  %v5259_v31 = vld [vmem:[#allocation9 + $0x220] ss:$24 sps:$4 sm:$0xff]  }
 0x71e   :  { %v5507_v52 = vpop.eup %5506  ;;  %v3162_v34 = vadd.f32 1.0, %v5505_v37  ;;  %v5264_v37 = vld [vmem:[#allocation9 + $0x254] ss:$24 sps:$4 sm:$0xff]  }
 0x71f   :  { %v3171_v53 = vadd.f32 1.0, %v5507_v52  ;;  %v3127_v55 = vmul.f32 %v5501_v18, %v3126_v45  ;;  %v5234_v18 = vld [vmem:[#allocation9 + $0x74] ss:$24 sps:$4 sm:$0xff]   ;;  %v5262_v45 = vld [vmem:[#allocation9 + $0x250] ss:$24 sps:$4 sm:$0xff]  }
 0x720   :  { %5508 = vrcp.f32 %v3162_v34  ;;  %v5267_v52 = vld [vmem:[#allocation9 + $0x284] ss:$24 sps:$4 sm:$0xff]   ;;  %v5265_v34 = vld [vmem:[#allocation9 + $0x280] ss:$24 sps:$4 sm:$0xff]  }
 0x721   :  { %5510 = vrcp.f32 %v3171_v53  ;;  %v3130_v38 = vadd.f32 %v3129_v57, %v3127_v55  ;;  %v5238_v57 = vld [vmem:[#allocation9 + $0xd0] ss:$24 sps:$4 sm:$0xff]   ;;  %v5270_v53 = vld [vmem:[#allocation9 + $0x2b4] ss:$24 sps:$4 sm:$0xff]  }
 0x722   :  { %v5268_v55 = vld [vmem:[#allocation9 + $0x2b0] ss:$24 sps:$4 sm:$0xff]  }
 0x723   :  { %v3132_v50 = vrot.slane %v3130_v38, 4  ;;  %3135 = vst [vmem:[#allocation2 + $0x8] sm:$0xc] %v3130_v38  ;;  %v5273_v38 = vld [vmem:[#allocation9 + $0x2e4] ss:$24 sps:$4 sm:$0xff]  }
 0x725   :  { %3134 = vst [vmem:[#allocation2 + $0x10] sm:$0x30] %v3132_v50  ;;  %v5271_v50 = vld [vmem:[#allocation9 + $0x2e0] ss:$24 sps:$4 sm:$0xff]  }
 0x72a   :  { %v5509_v19 = vpop.eup %5508 }
 0x72b   :  { %v5511_v30 = vpop.eup %5510  ;;  %v3174_v43 = vmul.f32 %v5509_v19, %v3119_v4  ;;  %v3175_v46 = vsub.f32 1.0, %v5509_v19  ;;  %v5243_v4 = vld [vmem:[#allocation9 + $0x104] ss:$24 sps:$4 sm:$0xff]  }
 0x72c   :  { %v3186_v33 = vsub.f32 1.0, %v5511_v30 }
 0x72d   :  { %v3176_v36 = vmul.f32 %v3175_v46, %v6332_v60 }
 0x72e   :  { %v3187_v1 = vmul.f32 %v3186_v33, %v6314_v6 }
 0x72f   :  { %v3177_v12 = vadd.f32 %v3176_v36, %v3174_v43 }
 0x731   :  { %v3179_v41 = vmul.f32 1.442695, %v3177_v12  ;;  %vm3178_vm10 = vcmp.gt.f32.partialorder %v3177_v12, 0.0 }
 0x733   :  { %5512 = vpow2.f32 %v3179_v41 }
 0x73d   :  { %v5513_v62 = vpop.eup %5512 }
 0x73e   :  { %v4693_v61 = vadd.f32 -1.0, %v5513_v62 }
 0x740   :  { %v3182_v47 = vmul.f32 1.6732632, %v4693_v61 }
 0x742   :  { %v3183_v51 = vsel %vm3178_vm10, %v3177_v12, %v3182_v47 }
 0x743   :  { %v3184_v17 = vmul.f32 1.050701, %v3183_v51 }
 0x745   :  { %v3185_v15 = vmul.f32 %v5511_v30, %v3184_v17 }
 0x747   :  { %v3188_v2 = vadd.f32 %v3187_v1, %v3185_v15 }
 0x749   :  { %v3190_v10 = vrot.slane %v3188_v2, 2 }
 0x74b   :  { %3193 = vst [vmem:[#allocation2 + $0x8] ss:$12 sps:$4 sm:$0xc3] %v3190_v10  }
 0x752   :  { %v3195_v21 = vld [vmem:[#allocation2 + $0x8] sm:$0xff]  ;;  %v3196_v60 = vld [vmem:[#allocation2 + $0x10] sm:$0xff] }
 0x753   :  { %v3199_v6 = vpack.c.bf16 %v6505_v32, %v3195_v21  ;;  %v4134_v27 = vrot.slane %v3195_v21, 4  ;;  %v4192_v7 = vrot.slane %v3195_v21, 2  ;;  %v6511_v22 = vpack.c.bf16 %v3196_v60, %v6507_v13 }
 0x754   :  { %v4190_v3 = vrot.slane %v3196_v60, 2  ;;  %v4238_v25 = vrot.slane %v3196_v60, 4  ;;  %v4290_v48 = vrot.slane %v3196_v60, 6  ;;  %v4292_v23 = vrot.slane %v3195_v21, 6 }
 0x755   :  { %3808 = vmatprep.mubr.bf16.mxu0 %v3199_v6  ;;  %3851 = vmatprep.mubr.bf16.mxu1 %v3199_v6  ;;  %v6514_v0 = vsel %vm423_vm1, %v3196_v60, %v4134_v27 }
 0x756   :  { %3809 = vmatmul.mubr.bf16.vlgmr.msra.gmra.mrb[12].mxu0 %v6511_v22  ;;  %3852 = vmatmul.mubr.bf16.vlgmr.msra.gmra.mrb[28].mxu1 %v6511_v22  ;;  %v6519_v9 = vsel %vm423_vm1, %v4190_v3, %v4192_v7  ;;  %v6522_v11 = vsel %vm423_vm1, %v4238_v25, %v3195_v21  ;;  %v6525_v56 = vsel %vm423_vm1, %v4290_v48, %v4292_v23  ;;  %v6559_v23 = vld [vmem:[%s6719_s5 + $0x30] sm:$0xf] }
 0x757   :  { %3863 = vmatpush1.bf16.msra.mxu0 %v5226_v39  ;;  %3894 = vmatprep.mubr.bf16.mxu0 %v3199_v6 }
 0x758   :  { %3864 = vmatprep.subr.bf16.mxu0 %v5231_v42 }
 0x75b   :  { %3865 = vmatpush1.bf16.msra.mxu0 %v5229_v29 }
 0x75c   :  { %3866 = vmatprep.subr.bf16.mxu0 %v5234_v18 }
 0x75f   :  { %3867 = vmatpush1.bf16.msra.mxu0 %v5232_v24 }
 0x760   :  { %3868 = vmatprep.subr.bf16.mxu0 %v5237_v63  ;;  %v3929_v63 = vmul.f32 0.0, %v6559_v23 }
 0x763   :  { %3869 = vmatpush1.bf16.msra.mxu0 %v5235_v20 }
 0x764   :  { %3870 = vmatprep.subr.bf16.mxu0 %v5240_v35 }
 0x767   :  { %3871 = vmatpush1.bf16.msra.mxu0 %v5238_v57 }
 0x768   :  { %3872 = vmatprep.subr.bf16.mxu0 %v5243_v4 }
 0x76b   :  { %3873 = vmatpush1.bf16.msra.mxu0 %v5241_v14 }
 0x76c   :  { %3874 = vmatprep.subr.bf16.mxu0 %v5246_v8 }
 0x76f   :  { %3875 = vmatpush1.bf16.msra.mxu0 %v5244_v54 }
 0x770   :  { %3876 = vmatprep.subr.bf16.mxu0 %v5249_v59 }
 0x773   :  { %3877 = vmatpush1.bf16.msra.mxu0 %v5247_v40 }
 0x774   :  { %3878 = vmatprep.subr.bf16.mxu0 %v5252_v28 }
 0x777   :  { %3879 = vmatpush1.bf16.msra.mxu0 %v5250_v16 }
 0x778   :  { %3880 = vmatprep.subr.bf16.mxu0 %v5255_v49 }
 0x77b   :  { %3881 = vmatpush1.bf16.msra.mxu0 %v5253_v5 }
 0x77c   :  { %3882 = vmatprep.subr.bf16.mxu0 %v5258_v26 }
 0x77f   :  { %3883 = vmatpush1.bf16.msra.mxu0 %v5256_v44 }
 0x780   :  { %3884 = vmatprep.subr.bf16.mxu0 %v5261_v58 }
 0x783   :  { %3885 = vmatpush1.bf16.msra.mxu0 %v5259_v31 }
 0x784   :  { %3886 = vmatprep.subr.bf16.mxu0 %v5264_v37 }
 0x787   :  { %3887 = vmatpush1.bf16.msra.mxu0 %v5262_v45 }
 0x788   :  { %3888 = vmatprep.subr.bf16.mxu0 %v5267_v52 }
 0x78b   :  { %3889 = vmatpush1.bf16.msra.mxu0 %v5265_v34 }
 0x78c   :  { %3890 = vmatprep.subr.bf16.mxu0 %v5270_v53 }
 0x78f   :  { %3891 = vmatpush1.bf16.msra.mxu0 %v5268_v55 }
 0x790   :  { %3892 = vmatprep.subr.bf16.mxu0 %v5273_v38 }
 0x793   :  { %3893 = vmatpush1.bf16.msra.mxu0 %v5271_v50 }
 0x796   :  { %3895 = vmatmul.mubr.bf16.vlgmr.msra.gmra.mrb[16].mxu0 %v6511_v22 }
 0x829   :  { %v3810_v19 = vpop.f32.mrb[12].mxu0  ;;  %v6528_v30 = vpop.f32.mrb[28].mxu1 }
 0x82a   :  { %v6530_v43 = vpop.f32.mrb[13].mxu0  ;;  %v3855_v46 = vpop.f32.mrb[29].mxu1  ;;  %v4021_v1 = vrot.slane %v3810_v19, 4  ;;  %v3966_v6 = vrot.slane %v3810_v19, 2  ;;  %v4067_v22 = vrot.slane %v3810_v19, 6  ;;  %v3968_v29 = vrot.slane %v6528_v30, 2 }
 0x82b   :  { %v3814_v33 = vpop.f32.mrb[14].mxu0  ;;  %v3857_v36 = vpop.f32.mrb[30].mxu1  ;;  %v4124_v12 = vrot.slane %v3855_v46, 4  ;;  %v4180_v41 = vrot.slane %v3855_v46, 2  ;;  %v4281_v62 = vrot.slane %v3855_v46, 6  ;;  %v4023_v18 = vrot.slane %v6528_v30, 4 }
 0x82c   :  { %v3816_v61 = vpop.f32.mrb[15].mxu0  ;;  %v3859_v47 = vpop.f32.mrb[31].mxu1  ;;  %v4174_v51 = vrot.slane %v3814_v33, 2  ;;  %v4229_v17 = vrot.slane %v3814_v33, 4  ;;  %v4275_v15 = vrot.slane %v3814_v33, 6  ;;  %v3967_v24 = vrot.slane %v6530_v43, 2 }
 0x82d   :  { %v6533_v2 = vsel %vm423_vm1, %v3814_v33, %v4124_v12  ;;  %v3916_v27 = vrot.slane %v3859_v47, 4  ;;  %v3972_v7 = vrot.slane %v3859_v47, 2  ;;  %v6545_v39 = vsel %vm423_vm1, %v4021_v1, %v3859_v47  ;;  %v6594_v1 = vld [vmem:[%s6719_s5 + $0x38] sm:$0xf] }
 0x82e   :  { %v6536_v10 = vsel %vm423_vm1, %v4174_v51, %v4180_v41  ;;  %v6539_v21 = vsel %vm423_vm1, %v4229_v17, %v3855_v46  ;;  %v6542_v60 = vsel %vm423_vm1, %v4275_v15, %v4281_v62  ;;  %v4073_v42 = vrot.slane %v3859_v47, 6 }
 0x82f   :  { %v6548_v3 = vsel %vm423_vm1, %v3810_v19, %v3916_v27  ;;  %v6551_v25 = vsel %vm423_vm1, %v3966_v6, %v3972_v7  ;;  %v4022_v20 = vrot.slane %v6530_v43, 4  ;;  %v4068_v35 = vrot.slane %v6530_v43, 6 }
 0x830   :  { %v6554_v48 = vsel %vm423_vm1, %v4067_v22, %v4073_v42  ;;  %v4176_v57 = vrot.slane %v3857_v36, 2  ;;  %v4230_v4 = vrot.slane %v3816_v61, 4  ;;  %v4231_v14 = vrot.slane %v3857_v36, 4  ;;  %v6616_v42 = vld [vmem:[%s6719_s5 + $0x34] sm:$0xf] }
 0x831   :  { %v4277_v8 = vrot.slane %v3857_v36, 6  ;;  %v4175_v54 = vrot.slane %v3816_v61, 2  ;;  %v4276_v59 = vrot.slane %v3816_v61, 6  ;;  %v4069_v15 = vrot.slane %v6528_v30, 6 }
 0x869   :  { %v3896_v40 = vpop.f32.mrb[16].mxu0 }
 0x86a   :  { %v4125_v28 = vrot.slane %v3896_v40, 4  ;;  %v4181_v16 = vrot.slane %v3896_v40, 2  ;;  %v6568_v49 = vsel %vm423_vm1, %v4230_v4, %v3896_v40  ;;  %v4282_v5 = vrot.slane %v3896_v40, 6  ;;  %v3898_v26 = vpop.f32.mrb[17].mxu0 }
 0x86b   :  { %v4126_v44 = vrot.slane %v3898_v26, 4  ;;  %v4182_v58 = vrot.slane %v3898_v26, 2  ;;  %v6571_v31 = vsel %vm423_vm1, %v4231_v14, %v3898_v26  ;;  %v4283_v37 = vrot.slane %v3898_v26, 6  ;;  %v3900_v45 = vpop.f32.mrb[18].mxu0 }
 0x86c   :  { %v6574_v52 = vsel %vm423_vm1, %v3816_v61, %v4125_v28  ;;  %v6577_v34 = vsel %vm423_vm1, %v4175_v54, %v4181_v16  ;;  %v6580_v53 = vsel %vm423_vm1, %v4276_v59, %v4282_v5  ;;  %v3917_v55 = vrot.slane %v3900_v45, 4  ;;  %v3902_v38 = vpop.f32.mrb[19].mxu0 }
 0x86d   :  { %v6583_v50 = vsel %vm423_vm1, %v3857_v36, %v4126_v44  ;;  %v6586_v19 = vsel %vm423_vm1, %v4176_v57, %v4182_v58  ;;  %v6589_v46 = vsel %vm423_vm1, %v4277_v8, %v4283_v37  ;;  %v3973_v33 = vrot.slane %v3900_v45, 2 }
 0x86e   :  { %v3923_v12 = vsel %vm423_vm1, %v6530_v43, %v3917_v55  ;;  %v6599_v41 = vsel %vm423_vm1, %v4022_v20, %v3900_v45  ;;  %v4074_v36 = vrot.slane %v3900_v45, 6  ;;  %v3918_v62 = vrot.slane %v3902_v38, 4 }
 0x86f   :  { %v3930_v61 = vadd.f32 %v3929_v63, %v3923_v12  ;;  %v3979_v47 = vsel %vm423_vm1, %v3967_v24, %v3973_v33  ;;  %v3974_v51 = vrot.slane %v3902_v38, 2  ;;  %v6603_v17 = vsel %vm423_vm1, %v4023_v18, %v3902_v38 }
 0x870   :  { %v6607_v6 = vsel %vm423_vm1, %v4068_v35, %v4074_v36  ;;  %v3924_v43 = vsel %vm423_vm1, %v6528_v30, %v3918_v62  ;;  %v4075_v27 = vrot.slane %v3902_v38, 6  ;;  %v3938_v63 = vmul.f32 0.0, %v6616_v42  ;;  %v6625_v30 = vld [vmem:[%s6719_s5 + $0x3c] sm:$0xf] }
 0x871   :  { %v3931_v7 = vadd.f32 %v6594_v1, %v3930_v61  ;;  %v3980_v22 = vsel %vm423_vm1, %v3968_v29, %v3974_v51 }
 0x872   :  { %v6619_v18 = vsel %vm423_vm1, %v4069_v15, %v4075_v27  ;;  %v3939_v20 = vadd.f32 %v3938_v63, %v3924_v43 }
 0x873   :  { %v4794_v24 = vmul.f32 -1.442695, %v3931_v7 }
 0x874   :  { %v3940_v29 = vadd.f32 %v6625_v30, %v3939_v20 }
 0x875   :  { %5514 = vpow2.f32 %v4794_v24 }
 0x876   :  { %v4795_v4 = vmul.f32 -1.442695, %v3940_v29 }
 0x87f   :  { %v5515_v35 = vpop.eup %5514 }
 0x880   :  { %v3935_v57 = vadd.f32 1.0, %v5515_v35 }
 0x882   :  { %5516 = vrcp.f32 %v3935_v57 }
 0x883   :  { %5518 = vpow2.f32 %v4795_v4 }
 0x88c   :  { %v5517_v14 = vpop.eup %5516 }
 0x88d   :  { %v3948_v8 = vsub.f32 1.0, %v5517_v14  ;;  %v5519_v54 = vpop.eup %5518  ;;  %v3947_v59 = vmul.f32 0.0, %v5517_v14 }
 0x88e   :  { %v3944_v16 = vadd.f32 1.0, %v5519_v54 }
 0x88f   :  { %v3949_v40 = vmul.f32 %v3948_v8, %v6548_v3  ;;  %v3926_v3 = vrot.slane %v6505_v32, 4 }
 0x891   :  { %v3950_v28 = vadd.f32 %v3949_v40, %v3947_v59  ;;  %v3928_v43 = vsel %vm423_vm1, %v6507_v13, %v3926_v3 }
 0x893   :  { %v3987_v5 = vmul.f32 %v6559_v23, %v3950_v28  ;;  %v3996_v26 = vmul.f32 %v6616_v42, %v3950_v28  ;;  %v3952_v44 = vmul.f32 1.442695, %v3950_v28  ;;  %vm3951_vm11 = vcmp.gt.f32.partialorder %v3950_v28, 0.0 }
 0x895   :  { %v3988_v58 = vadd.f32 %v3987_v5, %v3979_v47  ;;  %v3997_v37 = vadd.f32 %v3996_v26, %v3980_v22  ;;  %5520 = vpow2.f32 %v3952_v44 }
 0x896   :  { %5522 = vrcp.f32 %v3944_v16 }
 0x897   :  { %v3989_v45 = vadd.f32 %v6594_v1, %v3988_v58  ;;  %v3998_v62 = vadd.f32 %v6625_v30, %v3997_v37  ;;  %v3984_v37 = vrot.slane %v6505_v32, 2 }
 0x899   :  { %v4797_v55 = vmul.f32 -1.442695, %v3989_v45  ;;  %v4798_v7 = vmul.f32 -1.442695, %v3998_v62  ;;  %v3982_v45 = vrot.slane %v6507_v13, 2 }
 0x89b   :  { %5524 = vpow2.f32 %v4797_v55 }
 0x89f   :  { %v5521_v38 = vpop.eup %5520 }
 0x8a0   :  { %v5523_v33 = vpop.eup %5522  ;;  %v4796_v12 = vadd.f32 -1.0, %v5521_v38 }
 0x8a1   :  { %v3959_v61 = vsub.f32 1.0, %v5523_v33 }
 0x8a2   :  { %v3955_v36 = vmul.f32 1.6732632, %v4796_v12 }
 0x8a3   :  { %v3960_v24 = vmul.f32 %v3959_v61, %v3928_v43 }
 0x8a4   :  { %v3956_v51 = vsel %vm3951_vm11, %v3950_v28, %v3955_v36  ;;  %v3986_v36 = vsel %vm423_vm1, %v3982_v45, %v3984_v37 }
 0x8a5   :  { %v5525_v15 = vpop.eup %5524  ;;  %v3957_v47 = vmul.f32 1.050701, %v3956_v51 }
 0x8a6   :  { %v3993_v27 = vadd.f32 1.0, %v5525_v15 }
 0x8a7   :  { %v3958_v22 = vmul.f32 %v5523_v33, %v3957_v47 }
 0x8a8   :  { %5526 = vrcp.f32 %v3993_v27 }
 0x8a9   :  { %v3961_v63 = vadd.f32 %v3960_v24, %v3958_v22  ;;  %5528 = vpow2.f32 %v4798_v7 }
 0x8b2   :  { %v5527_v20 = vpop.eup %5526 }
 0x8b3   :  { %v4005_v29 = vmul.f32 %v5527_v20, %v3950_v28  ;;  %v4006_v35 = vsub.f32 1.0, %v5527_v20  ;;  %v5529_v57 = vpop.eup %5528 }
 0x8b4   :  { %v4002_v8 = vadd.f32 1.0, %v5529_v57 }
 0x8b5   :  { %v4007_v4 = vmul.f32 %v4006_v35, %v6551_v25 }
 0x8b7   :  { %v4008_v14 = vadd.f32 %v4007_v4, %v4005_v29 }
 0x8b9   :  { %v4033_v54 = vmul.f32 %v6559_v23, %v4008_v14  ;;  %v4042_v59 = vmul.f32 %v6616_v42, %v4008_v14  ;;  %v4010_v40 = vmul.f32 1.442695, %v4008_v14  ;;  %vm4009_vm12 = vcmp.gt.f32.partialorder %v4008_v14, 0.0 }
 0x8bb   :  { %v4034_v16 = vadd.f32 %v4033_v54, %v6599_v41  ;;  %v4043_v5 = vadd.f32 %v4042_v59, %v6603_v17  ;;  %5530 = vpow2.f32 %v4010_v40 }
 0x8bc   :  { %5532 = vrcp.f32 %v4002_v8 }
 0x8bd   :  { %v4035_v26 = vadd.f32 %v6594_v1, %v4034_v16  ;;  %v4044_v38 = vadd.f32 %v6625_v30, %v4043_v5  ;;  %v4030_v16 = vrot.slane %v6507_v13, 4 }
 0x8bf   :  { %v4800_v28 = vmul.f32 -1.442695, %v4035_v26  ;;  %v4801_v62 = vmul.f32 -1.442695, %v4044_v38 }
 0x8c1   :  { %5534 = vpow2.f32 %v4800_v28 }
 0x8c5   :  { %v5531_v44 = vpop.eup %5530 }
 0x8c6   :  { %v5533_v58 = vpop.eup %5532  ;;  %v4799_v25 = vadd.f32 -1.0, %v5531_v44 }
 0x8c7   :  { %v4017_v41 = vsub.f32 1.0, %v5533_v58 }
 0x8c8   :  { %v4013_v55 = vmul.f32 1.6732632, %v4799_v25  ;;  %v4032_v25 = vsel %vm423_vm1, %v4030_v16, %v6505_v32 }
 0x8c9   :  { %v4018_v51 = vmul.f32 %v4017_v41, %v3986_v36 }
 0x8ca   :  { %v4014_v33 = vsel %vm4009_vm12, %v4008_v14, %v4013_v55 }
 0x8cb   :  { %v5535_v17 = vpop.eup %5534  ;;  %v4015_v12 = vmul.f32 1.050701, %v4014_v33 }
 0x8cc   :  { %v4039_v3 = vadd.f32 1.0, %v5535_v17 }
 0x8cd   :  { %v4016_v61 = vmul.f32 %v5533_v58, %v4015_v12 }
 0x8ce   :  { %5536 = vrcp.f32 %v4039_v3 }
 0x8cf   :  { %v4019_v15 = vadd.f32 %v4018_v51, %v4016_v61  ;;  %5538 = vpow2.f32 %v4801_v62 }
 0x8d1   :  { %v4020_v47 = vadd.f32 %v4019_v15, %v3961_v63 }
 0x8d8   :  { %v5537_v43 = vpop.eup %5536 }
 0x8d9   :  { %v4051_v27 = vmul.f32 %v5537_v43, %v4008_v14  ;;  %v4052_v7 = vsub.f32 1.0, %v5537_v43  ;;  %v5539_v22 = vpop.eup %5538 }
 0x8da   :  { %v4048_v29 = vadd.f32 1.0, %v5539_v22 }
 0x8db   :  { %v4053_v24 = vmul.f32 %v4052_v7, %v6545_v39 }
 0x8dd   :  { %v4054_v20 = vadd.f32 %v4053_v24, %v4051_v27 }
 0x8df   :  { %v4087_v35 = vmul.f32 %v6559_v23, %v4054_v20  ;;  %v4096_v57 = vmul.f32 %v6616_v42, %v4054_v20  ;;  %v4056_v4 = vmul.f32 1.442695, %v4054_v20  ;;  %vm4055_vm13 = vcmp.gt.f32.partialorder %v4054_v20, 0.0 }
 0x8e1   :  { %v4088_v8 = vadd.f32 %v4087_v35, %v6607_v6  ;;  %v4097_v54 = vadd.f32 %v4096_v57, %v6619_v18  ;;  %5540 = vpow2.f32 %v4056_v4  ;;  %v4084_v57 = vrot.slane %v6505_v32, 6 }
 0x8e2   :  { %5542 = vrcp.f32 %v4048_v29  ;;  %v4082_v4 = vrot.slane %v6507_v13, 6 }
 0x8e3   :  { %v4089_v63 = vadd.f32 %v6594_v1, %v4088_v8  ;;  %v4098_v26 = vadd.f32 %v6625_v30, %v4097_v54 }
 0x8e5   :  { %v4803_v14 = vmul.f32 -1.442695, %v4089_v63  ;;  %v4804_v37 = vmul.f32 -1.442695, %v4098_v26 }
 0x8e7   :  { %5544 = vpow2.f32 %v4803_v14 }
 0x8eb   :  { %v5541_v59 = vpop.eup %5540 }
 0x8ec   :  { %v5543_v40 = vpop.eup %5542  ;;  %v4802_v39 = vadd.f32 -1.0, %v5541_v59 }
 0x8ed   :  { %v4063_v28 = vsub.f32 1.0, %v5543_v40 }
 0x8ee   :  { %v4059_v5 = vmul.f32 1.6732632, %v4802_v39 }
 0x8ef   :  { %v4064_v55 = vmul.f32 %v4063_v28, %v4032_v25 }
 0x8f0   :  { %v4060_v44 = vsel %vm4055_vm13, %v4054_v20, %v4059_v5 }
 0x8f1   :  { %v5545_v6 = vpop.eup %5544  ;;  %v4061_v58 = vmul.f32 1.050701, %v4060_v44 }
 0x8f2   :  { %v4093_v18 = vadd.f32 1.0, %v5545_v6 }
 0x8f3   :  { %v4062_v45 = vmul.f32 %v5543_v40, %v4061_v58  ;;  %v4086_v40 = vsel %vm423_vm1, %v4082_v4, %v4084_v57 }
 0x8f4   :  { %5546 = vrcp.f32 %v4093_v18 }
 0x8f5   :  { %v4065_v38 = vadd.f32 %v4064_v55, %v4062_v45  ;;  %5548 = vpow2.f32 %v4804_v37 }
 0x8f7   :  { %v4066_v41 = vadd.f32 %v4065_v38, %v4020_v47 }
 0x8fe   :  { %v5547_v33 = vpop.eup %5546 }
 0x8ff   :  { %v4105_v17 = vmul.f32 %v5547_v33, %v4054_v20  ;;  %v4106_v12 = vsub.f32 1.0, %v5547_v33  ;;  %v5549_v3 = vpop.eup %5548 }
 0x900   :  { %v4102_v61 = vadd.f32 1.0, %v5549_v3 }
 0x901   :  { %v4107_v36 = vmul.f32 %v4106_v12, %v6554_v48 }
 0x903   :  { %v4108_v62 = vadd.f32 %v4107_v36, %v4105_v17 }
 0x905   :  { %v4137_v51 = vmul.f32 %v6559_v23, %v4108_v62  ;;  %v4110_v15 = vmul.f32 1.442695, %v4108_v62  ;;  %v4146_v43 = vmul.f32 %v6616_v42, %v4108_v62  ;;  %vm4109_vm14 = vcmp.gt.f32.partialorder %v4108_v62, 0.0 }
 0x907   :  { %v4138_v27 = vadd.f32 %v4137_v51, %v6574_v52  ;;  %5550 = vpow2.f32 %v4110_v15  ;;  %v4147_v7 = vadd.f32 %v4146_v43, %v6583_v50 }
 0x908   :  { %5552 = vrcp.f32 %v4102_v61 }
 0x909   :  { %v4139_v47 = vadd.f32 %v6594_v1, %v4138_v27  ;;  %v4148_v22 = vadd.f32 %v6625_v30, %v4147_v7 }
 0x90b   :  { %v4806_v24 = vmul.f32 -1.442695, %v4139_v47  ;;  %v4807_v20 = vmul.f32 -1.442695, %v4148_v22 }
 0x90d   :  { %5554 = vpow2.f32 %v4806_v24 }
 0x90e   :  { %5556 = vpow2.f32 %v4807_v20 }
 0x911   :  { %v5551_v48 = vpop.eup %5550 }
 0x912   :  { %v5553_v29 = vpop.eup %5552  ;;  %v4805_v35 = vadd.f32 -1.0, %v5551_v48 }
 0x913   :  { %v4117_v8 = vsub.f32 1.0, %v5553_v29 }
 0x914   :  { %v4113_v52 = vmul.f32 1.6732632, %v4805_v35 }
 0x915   :  { %v4118_v16 = vmul.f32 %v4117_v8, %v4086_v40 }
 0x916   :  { %v4114_v50 = vsel %vm4109_vm14, %v4108_v62, %v4113_v52 }
 0x917   :  { %v5555_v54 = vpop.eup %5554  ;;  %v4115_v63 = vmul.f32 1.050701, %v4114_v50 }
 0x918   :  { %v5557_v14 = vpop.eup %5556  ;;  %v4143_v59 = vadd.f32 1.0, %v5555_v54 }
 0x919   :  { %v4116_v39 = vmul.f32 %v5553_v29, %v4115_v63  ;;  %v4152_v5 = vadd.f32 1.0, %v5557_v14 }
 0x91a   :  { %5558 = vrcp.f32 %v4143_v59 }
 0x91b   :  { %v4119_v26 = vadd.f32 %v4118_v16, %v4116_v39  ;;  %5560 = vrcp.f32 %v4152_v5 }
 0x91d   :  { %v4120_v28 = vadd.f32 %v4119_v26, %v4066_v41 }
 0x924   :  { %v5559_v32 = vpop.eup %5558 }
 0x925   :  { %v5561_v44 = vpop.eup %5560  ;;  %v4155_v13 = vmul.f32 %v5559_v32, %v4108_v62  ;;  %v4156_v6 = vsub.f32 1.0, %v5559_v32 }
 0x926   :  { %v4167_v58 = vsub.f32 1.0, %v5561_v44 }
 0x927   :  { %v4157_v18 = vmul.f32 %v4156_v6, %v6533_v2 }
 0x928   :  { %v4168_v25 = vmul.f32 %v4167_v58, %v6514_v0 }
 0x929   :  { %v4158_v37 = vadd.f32 %v4157_v18, %v4155_v13 }
 0x92b   :  { %v4160_v45 = vmul.f32 1.442695, %v4158_v37  ;;  %v4195_v55 = vmul.f32 %v6559_v23, %v4158_v37  ;;  %v4204_v38 = vmul.f32 %v6616_v42, %v4158_v37  ;;  %vm4159_vm15 = vcmp.gt.f32.partialorder %v4158_v37, 0.0 }
 0x92d   :  { %5562 = vpow2.f32 %v4160_v45  ;;  %v4196_v33 = vadd.f32 %v4195_v55, %v6577_v34  ;;  %v4205_v41 = vadd.f32 %v4204_v38, %v6586_v19 }
 0x92f   :  { %v4197_v17 = vadd.f32 %v6594_v1, %v4196_v33  ;;  %v4206_v12 = vadd.f32 %v6625_v30, %v4205_v41 }
 0x931   :  { %v4809_v3 = vmul.f32 -1.442695, %v4197_v17  ;;  %v4810_v36 = vmul.f32 -1.442695, %v4206_v12 }
 0x933   :  { %5564 = vpow2.f32 %v4809_v3 }
 0x934   :  { %5566 = vpow2.f32 %v4810_v36 }
 0x937   :  { %v5563_v0 = vpop.eup %5562 }
 0x938   :  { %v4808_v2 = vadd.f32 -1.0, %v5563_v0 }
 0x93a   :  { %v4163_v62 = vmul.f32 1.6732632, %v4808_v2 }
 0x93c   :  { %v4164_v61 = vsel %vm4159_vm15, %v4158_v37, %v4163_v62 }
 0x93d   :  { %v5565_v51 = vpop.eup %5564  ;;  %v4165_v15 = vmul.f32 1.050701, %v4164_v61 }
 0x93e   :  { %v5567_v43 = vpop.eup %5566  ;;  %v4201_v27 = vadd.f32 1.0, %v5565_v51 }
 0x93f   :  { %v4166_v34 = vmul.f32 %v5561_v44, %v4165_v15  ;;  %v4210_v7 = vadd.f32 1.0, %v5567_v43 }
 0x940   :  { %5568 = vrcp.f32 %v4201_v27 }
 0x941   :  { %v4169_v19 = vadd.f32 %v4168_v25, %v4166_v34  ;;  %5570 = vrcp.f32 %v4210_v7 }
 0x943   :  { %v4170_v47 = vadd.f32 %v4169_v19, %v4120_v28 }
 0x94a   :  { %v5569_v22 = vpop.eup %5568 }
 0x94b   :  { %v5571_v24 = vpop.eup %5570  ;;  %v4213_v20 = vmul.f32 %v5569_v22, %v4158_v37  ;;  %v4214_v48 = vsub.f32 1.0, %v5569_v22 }
 0x94c   :  { %v4225_v29 = vsub.f32 1.0, %v5571_v24 }
 0x94d   :  { %v4215_v35 = vmul.f32 %v4214_v48, %v6536_v10 }
 0x94e   :  { %v4226_v57 = vmul.f32 %v4225_v29, %v6519_v9 }
 0x94f   :  { %v4216_v4 = vadd.f32 %v4215_v35, %v4213_v20 }
 0x951   :  { %v4218_v52 = vmul.f32 1.442695, %v4216_v4  ;;  %v4241_v8 = vmul.f32 %v6559_v23, %v4216_v4  ;;  %v4250_v50 = vmul.f32 %v6616_v42, %v4216_v4  ;;  %vm4217_vm0 = vcmp.gt.f32.partialorder %v4216_v4, 0.0 }
 0x953   :  { %5572 = vpow2.f32 %v4218_v52  ;;  %v4242_v54 = vadd.f32 %v4241_v8, %v6568_v49  ;;  %v4251_v63 = vadd.f32 %v4250_v50, %v6571_v31 }
 0x955   :  { %v4243_v14 = vadd.f32 %v6594_v1, %v4242_v54  ;;  %v4252_v59 = vadd.f32 %v6625_v30, %v4251_v63 }
 0x957   :  { %v4812_v40 = vmul.f32 -1.442695, %v4243_v14  ;;  %v4813_v39 = vmul.f32 -1.442695, %v4252_v59 }
 0x959   :  { %5574 = vpow2.f32 %v4812_v40 }
 0x95a   :  { %5576 = vpow2.f32 %v4813_v39 }
 0x95d   :  { %v5573_v9 = vpop.eup %5572 }
 0x95e   :  { %v4811_v10 = vadd.f32 -1.0, %v5573_v9 }
 0x960   :  { %v4221_v16 = vmul.f32 1.6732632, %v4811_v10 }
 0x962   :  { %v4222_v5 = vsel %vm4217_vm0, %v4216_v4, %v4221_v16 }
 0x963   :  { %v5575_v26 = vpop.eup %5574  ;;  %v4223_v28 = vmul.f32 1.050701, %v4222_v5 }
 0x964   :  { %v5577_v32 = vpop.eup %5576  ;;  %v4247_v44 = vadd.f32 1.0, %v5575_v26 }
 0x965   :  { %v4224_v49 = vmul.f32 %v5571_v24, %v4223_v28  ;;  %v4256_v13 = vadd.f32 1.0, %v5577_v32 }
 0x966   :  { %5578 = vrcp.f32 %v4247_v44 }
 0x967   :  { %v4227_v31 = vadd.f32 %v4226_v57, %v4224_v49  ;;  %5580 = vrcp.f32 %v4256_v13 }
 0x969   :  { %v4228_v6 = vadd.f32 %v4227_v31, %v4170_v47 }
 0x970   :  { %v5579_v58 = vpop.eup %5578 }
 0x971   :  { %v5581_v18 = vpop.eup %5580  ;;  %v4259_v25 = vmul.f32 %v5579_v58, %v4216_v4  ;;  %v4260_v37 = vsub.f32 1.0, %v5579_v58 }
 0x972   :  { %v4271_v45 = vsub.f32 1.0, %v5581_v18 }
 0x973   :  { %v4261_v55 = vmul.f32 %v4260_v37, %v6539_v21 }
 0x974   :  { %v4272_v38 = vmul.f32 %v4271_v45, %v6522_v11  ;;  %v4355_v45 = vld [vmem:[%s6720_s6] sm:$0x3]  ;;  %s5664_s6 = scalar_lea.vmem %s4402_s14, 64 }
 0x975   :  { %v4262_v33 = vadd.f32 %v4261_v55, %v4259_v25  ;;  %v4369_v55 = vld [vmem:[%s6721_s7] sm:$0x3]  ;;  %p5665_p10 = scmp.ne.s32.totalorder %s4402_s14, %s5664_s6  ;;  %p5670_p12 = scmp.lt.s32.totalorder %s5664_s6, %s5664_s6 }
 0x977   :  { %v4264_v41 = vmul.f32 1.442695, %v4262_v33  ;;  %v4295_v17 = vmul.f32 %v6559_v23, %v4262_v33  ;;  %v4304_v12 = vmul.f32 %v6616_v42, %v4262_v33  ;;  %vm4263_vm2 = vcmp.gt.f32.partialorder %v4262_v33, 0.0  ;;  %p5671_p13 = por %p5670_p12, %p5669_p11 }
 0x979   :  { %5582 = vpow2.f32 %v4264_v41  ;;  %v4296_v3 = vadd.f32 %v4295_v17, %v6580_v53  ;;  %v4305_v36 = vadd.f32 %v4304_v12, %v6589_v46  ;;  %p5672_p0 = pnand %p5671_p13, %p5665_p10 }
 0x97b   :  { %v4297_v0 = vadd.f32 %v6594_v1, %v4296_v3  ;;  %v4306_v2 = vadd.f32 %v6625_v30, %v4305_v36 }
 0x97d   :  { %v4815_v62 = vmul.f32 -1.442695, %v4297_v0  ;;  %v4816_v61 = vmul.f32 -1.442695, %v4306_v2 }
 0x97f   :  { %5584 = vpow2.f32 %v4815_v62 }
 0x980   :  { %5586 = vpow2.f32 %v4816_v61 }
 0x983   :  { %v5583_v11 = vpop.eup %5582 }
 0x984   :  { %v4814_v21 = vadd.f32 -1.0, %v5583_v11 }
 0x986   :  { %v4267_v51 = vmul.f32 1.6732632, %v4814_v21 }
 0x988   :  { %v4268_v23 = vsel %vm4263_vm2, %v4262_v33, %v4267_v51 }
 0x989   :  { %v5585_v15 = vpop.eup %5584  ;;  %v4269_v42 = vmul.f32 1.050701, %v4268_v23 }
 0x98a   :  { %v5587_v43 = vpop.eup %5586  ;;  %v4301_v27 = vadd.f32 1.0, %v5585_v15 }
 0x98b   :  { %v4270_v53 = vmul.f32 %v5581_v18, %v4269_v42  ;;  %v4310_v34 = vadd.f32 1.0, %v5587_v43 }
 0x98c   :  { %5588 = vrcp.f32 %v4301_v27 }
 0x98d   :  { %v4273_v46 = vadd.f32 %v4272_v38, %v4270_v53  ;;  %5590 = vrcp.f32 %v4310_v34 }
 0x98f   :  { %v4274_v1 = vadd.f32 %v4273_v46, %v4228_v6  ;;  %v4357_v6 = vlaneseq }
 0x991   :  { %v4358_v18 = vshrl.u32 %v4357_v6, 7 }
 0x993   :  { %v4359_v25 = vsub.s32 0, %v4358_v18  ;;  %v4363_v37 = vsub.s32 1, %v4358_v18 }
 0x995   :  { %v4360_v38 = vrot.slane %v4355_v45, %v4359_v25  ;;  %v4374_v3 = vrot.slane %v4369_v55, %v4359_v25  ;;  %v4378_v36 = vrot.slane %v4369_v55, %v4363_v37 }
 0x996   :  { %v5589_v30 = vpop.eup %5588 }
 0x997   :  { %v5591_v7 = vpop.eup %5590  ;;  %v4313_v19 = vmul.f32 %v5589_v30, %v4262_v33  ;;  %v4314_v47 = vsub.f32 1.0, %v5589_v30  ;;  %v4364_v33 = vrot.slane %v4355_v45, %v4363_v37 }
 0x998   :  { %v4325_v22 = vsub.f32 1.0, %v5591_v7 }
 0x999   :  { %v4315_v24 = vmul.f32 %v4314_v47, %v6542_v60 }
 0x99a   :  { %v4326_v20 = vmul.f32 %v4325_v22, %v6525_v56 }
 0x99b   :  { %v4316_v48 = vadd.f32 %v4315_v24, %v4313_v19 }
 0x99d   :  { %v4318_v29 = vmul.f32 1.442695, %v4316_v48  ;;  %vm4317_vm3 = vcmp.gt.f32.partialorder %v4316_v48, 0.0 }
 0x99f   :  { %5592 = vpow2.f32 %v4318_v29 }
 0x9a9   :  { %v5593_v35 = vpop.eup %5592 }
 0x9aa   :  { %v4817_v57 = vadd.f32 -1.0, %v5593_v35 }
 0x9ac   :  { %v4321_v4 = vmul.f32 1.6732632, %v4817_v57 }
 0x9ae   :  { %v4322_v52 = vsel %vm4317_vm3, %v4316_v48, %v4321_v4 }
 0x9af   :  { %v4323_v8 = vmul.f32 1.050701, %v4322_v52 }
 0x9b1   :  { %v4324_v50 = vmul.f32 %v5591_v7, %v4323_v8 }
 0x9b3   :  { %v4327_v54 = vadd.f32 %v4326_v20, %v4324_v50 }
 0x9b5   :  { %v4328_v63 = vadd.f32 %v4327_v54, %v4274_v1 }
 0x9b7   :  { %v4330_v14 = vrot.slane %v4328_v63, 2  ;;  %v4332_v59 = vmul.f32 0.125, %v4328_v63 }
 0x9b9   :  { %v4333_v40 = vmul.f32 0.125, %v4330_v14  ;;  %v4334_v39 = vsel %vm423_vm1, %v4332_v59, 0.0 }
 0x9bb   :  { %v4335_v60 = vsel %vm423_vm1, %v4333_v40, 0.0 }
 0x9bc   :  { %v4336_v56 = vadd.f32 %v4335_v60, %v4334_v39 }
 0x9be   :  { %4337 = vadd.xlane.f32.xlu0 %v4336_v56 }
 0xa4b   :  { %v4338_v9 = vpop.xlane.xlu0 %4337 }
 0xa4c   :  { %v4340_v10 = vmul.f32 0.00390625, %v4338_v9 }
 0xa4e   :  { %v4341_v16 = vsub.f32 %v4332_v59, %v4340_v10  ;;  %v4342_v5 = vsub.f32 %v4333_v40, %v4340_v10 }
 0xa50   :  { %v4343_v26 = vmul.f32 %v4341_v16, %v4341_v16  ;;  %v4344_v28 = vmul.f32 %v4342_v5, %v4342_v5 }
 0xa52   :  { %v4345_v32 = vsel %vm423_vm1, %v4343_v26, 0.0  ;;  %v4346_v44 = vsel %vm423_vm1, %v4344_v28, 0.0 }
 0xa53   :  { %v4347_v49 = vadd.f32 %v4346_v44, %v4345_v32 }
 0xa55   :  { %4348 = vadd.xlane.f32.xlu0 %v4347_v49 }
 0xae2   :  { %v4349_v13 = vpop.xlane.xlu0 %4348 }
 0xae3   :  { %v4350_v31 = vmul.f32 0.00390625, %v4349_v13 }
 0xae5   :  { %v4351_v58 = vadd.f32 1e-05, %v4350_v31 }
 0xae7   :  { %5594 = vrsqrt.f32 %v4351_v58 }
 0xaf1   :  { %v5595_v41 = vpop.eup %5594 }
 0xaf2   :  { %v4353_v17 = vmul.f32 %v5595_v41, %v4341_v16  ;;  %v4354_v12 = vmul.f32 %v5595_v41, %v4342_v5 }
 0xaf4   :  { %v4367_v0 = vmul.f32 %v4360_v38, %v4353_v17  ;;  %v4368_v2 = vmul.f32 %v4364_v33, %v4354_v12 }
 0xaf6   :  { %v4381_v62 = vadd.f32 %v4374_v3, %v4367_v0  ;;  %v4382_v61 = vadd.f32 %v4378_v36, %v4368_v2 }
 0xaf8   :  { %v4385_v11 = vcombine.low %v4381_v62, %v4382_v61 }
 0xafa   :  { %4818 = vst.sshfl [vmem:[#allocation10] sm:$0x33 pattern:$0x76325410] %v4385_v11 }
 0xafb   :  { %5675 = shalt.err (!%p5672_p0)
}
 0xafc   :  { %s5676_s16 = scalar_lea.hbm %s6722_s8, 64 }
 0xafd   :  { %p5677_p1 = scmp.ne.s32.totalorder %s6722_s8, %s5676_s16  ;;  %p5680_p2 = scmp.lt.u32.totalorder %s5676_s16, %s6722_s8 }
 0xaff   :  { %p5682_p3 = pnand %p5680_p2, %p5677_p1 }
 0xb01   :  { %5685 = shalt.err (!%p5682_p3)
}
 0xb02   :  { %4404 = dma.vmem_to_hbm [thread:$0]  %s4402_s14, 64, %s6722_s8, [#allocation6]  }
 0xb03   :  { %5690 = dma.done.wait [#allocation6], 64  }
 0xb04   :  { %5691 = vsyncadd [#allocation6], 4294967232 }
 0xb05   :  { %4408 = vsyncpa [#allocation5], 1 }
 0xb06   :  { %4409 = vsyncpa [#allocation8], 1 }
 0xb07   :  { %4410 = vsyncpa [#allocation6], 1 }

</bundles_post_ra>
